<compile_context>
chip_gen: v7x
topology: tpu7x:2x2x1
jax: 0.10.0
libtpu: 0.0.40
codegen_flags: <defaults>
</compile_context>

<pallas_src>
import functools

import jax
import jax.numpy as jnp
import numpy as np
from jax import lax
from jax.experimental import pallas as pl
from jax.experimental.pallas import tpu as pltpu

NEG_SLOPE = 0.01          # PyTorch nn.LeakyReLU default
_SUB = 8                  # f32 sublane tile
_CONCAT_K_MAX = 256       # use one im2col matmul while 9*C_pad <= one MXU K pass


def _rup(x, m):
    return (x + m - 1) // m * m


def _lrelu(x):
    return jnp.where(x > 0, x, NEG_SLOPE * x)


# ---------------------------------------------------------------------------
# in-kernel helpers
# ---------------------------------------------------------------------------
def _zero_halo(buf, rows_used, f_off, s_img):
    """Zero only the lane halos and the padded channel rows of a flat buffer
    (the interior rows [0:rows_used, f_off:f_off+s_img] are overwritten by the
    caller, so a full memset would just waste vector-store slots)."""
    c_pad, spad = buf.shape
    buf[:, 0:f_off] = jnp.zeros((c_pad, f_off), buf.dtype)
    buf[:, f_off + s_img:spad] = jnp.zeros((c_pad, spad - f_off - s_img),
                                           buf.dtype)
    if rows_used < c_pad:
        buf[rows_used:c_pad, f_off:f_off + s_img] = jnp.zeros(
            (c_pad - rows_used, s_img), buf.dtype)


def _conv_taps(w_ref, src_buf, mask_ref, w_img, s_img, f_off, c_pad):
    """3x3 conv over a flat, zero-haloed buffer -> pre-bias (Cout, s_img) f32.

    src_buf: (c_pad, f_off + s_img + w_img + 1) f32, image rows contiguous at
    lane f_off, zeros elsewhere.  w_ref: (Cout, 9*c_pad) bf16, tap-major /
    channel-minor.  Uses one concatenated im2col matmul when 9*c_pad fits one
    MXU K pass, otherwise 9 per-tap matmuls accumulated in f32 (no (9*C, S)
    patch matrix is ever materialized)."""
    not_left = mask_ref[0:1, :]       # 0.0 where x == 0
    not_right = mask_ref[1:2, :]      # 0.0 where x == w_img - 1
    taps = []
    for dy in range(3):
        for dx in range(3):
            start = f_off - w_img - 1 + dy * w_img + dx
            t = src_buf[:, start:start + s_img]        # shifted lane window
            if dx == 0:                                 # left neighbour tap
                t = t * not_left
            elif dx == 2:                               # right neighbour tap
                t = t * not_right
            taps.append(t)
    if 9 * c_pad <= _CONCAT_K_MAX:
        patches = jnp.concatenate(taps, axis=0).astype(jnp.bfloat16)
        return jnp.dot(w_ref[...], patches, preferred_element_type=jnp.float32)
    acc = None
    for t_i, t in enumerate(taps):
        w_t = w_ref[:, t_i * c_pad:(t_i + 1) * c_pad]
        part = jnp.dot(w_t, t.astype(jnp.bfloat16),
                       preferred_element_type=jnp.float32)
        acc = part if acc is None else acc + part
    return acc


def _up_fused_kernel(*refs, cfg):
    has_skip = cfg["has_skip"]
    if has_skip:
        (x1_ref, x2_ref, uwT_ref, mu_ref, m2_ref,
         w1_ref, b1_ref, w2_ref, b2_ref, wfx_ref, wfy_ref, bf_ref,
         out_ref, wbuf, up_buf, y1_buf, y2_buf, x2_buf) = refs
    else:
        (x1_ref, uwT_ref, mu_ref, m2_ref,
         w1_ref, b1_ref, w2_ref, b2_ref, wfy_ref, bf_ref,
         out_ref, wbuf, up_buf, y1_buf, y2_buf) = refs
        x2_ref = wfx_ref = x2_buf = None

    H, W = cfg["H"], cfg["W"]
    Ho, Wo, H2, W2 = cfg["Ho"], cfg["Wo"], cfg["H2"], cfg["W2"]
    S, S2 = Ho * Wo, H2 * W2
    FU, F2 = cfg["FU"], cfg["F2"]
    cin, c1, cf = cfg["cin"], cfg["c1"], cfg["cf"]
    cin_p, c1_p, cf_p = cfg["cin_p"], cfg["c1_p"], cfg["cf_p"]
    py0, px0 = cfg["py0"], cfg["px0"]
    i0, i1, fh = cfg["i0"], cfg["i1"], cfg["fh"]     # static height-tap tables

    # ---- halo-only zeroing of the flat staging buffers ----------------------
    _zero_halo(up_buf, cin, FU, S)
    _zero_halo(y1_buf, c1, FU, S)
    trivial_place = (py0, px0, H2, W2) == (0, 0, Ho, Wo)
    if trivial_place:
        _zero_halo(y2_buf, c1, F2, S2)
    else:
        # the F.pad border inside the interior must also be zero
        y2_buf[...] = jnp.zeros(y2_buf.shape, y2_buf.dtype)

    # ---- separable bilinear x2 upsample (align_corners=True) ----------------
    # width pass: per input row, one small f32 matmul vs UwT (W, Wo)
    uwT = uwT_ref[...]
    for h in range(H):
        wbuf[:, h * Wo:(h + 1) * Wo] = jnp.dot(
            x1_ref[:, h * W:(h + 1) * W], uwT,
            preferred_element_type=jnp.float32)
    # height pass: two-tap interpolation with static weights, straight into the
    # zero-haloed conv1 input buffer (no big kron matrix, no reshapes).
    for o in range(Ho):
        r0 = wbuf[:, i0[o] * Wo:(i0[o] + 1) * Wo]
        if i1[o] == i0[o] or fh[o] == 0.0:
            row = r0
        else:
            r1 = wbuf[:, i1[o] * Wo:(i1[o] + 1) * Wo]
            row = (1.0 - fh[o]) * r0 + fh[o] * r1
        up_buf[0:cin, FU + o * Wo:FU + (o + 1) * Wo] = row

    # ---- conv1 + LeakyReLU ---------------------------------------------------
    y1 = _lrelu(_conv_taps(w1_ref, up_buf, mu_ref, Wo, S, FU, cin_p)
                + b1_ref[...])
    y1_buf[0:c1, FU:FU + S] = y1

    # ---- conv2 + LeakyReLU ---------------------------------------------------
    y2 = _lrelu(_conv_taps(w2_ref, y1_buf, mu_ref, Wo, S, FU, c1_p)
                + b2_ref[...])

    # ---- place y2 on the (H2, W2) canvas (diffY/diffX zero pad) -------------
    if trivial_place:
        y2_buf[0:c1, F2:F2 + S2] = y2
    else:
        # TODO(synk): stage contiguously + strided VMEM->VMEM DMA on v5e.
        for h in range(Ho):
            dst = F2 + (py0 + h) * W2 + px0
            y2_buf[0:c1, dst:dst + Wo] = y2[:, h * Wo:(h + 1) * Wo]

    # ---- feat conv on concat([x2, y2], channels) + LeakyReLU -----------------
    # split-weight form: no (9*(cf_p+c1_p), S2) patch concatenate is built.
    acc = _conv_taps(wfy_ref, y2_buf, m2_ref, W2, S2, F2, c1_p)
    if has_skip:
        # stage the UNPADDED skip features into a zero-haloed flat buffer
        _zero_halo(x2_buf, cf, F2, S2)
        x2_buf[0:cf, F2:F2 + S2] = x2_ref[...]
        acc = acc + _conv_taps(wfx_ref, x2_buf, m2_ref, W2, S2, F2, cf_p)
    out_ref[...] = _lrelu(acc + bf_ref[...])       # lane-dense, already NCHW


# ---------------------------------------------------------------------------
# wrapper-side constant builders (numpy / tiny XLA ops)
# ---------------------------------------------------------------------------
def _bilinear_axis_matrix(n_in):
    n_out = 2 * n_in
    m = np.zeros((n_out, n_in), np.float32)
    if n_in == 1:
        m[:, 0] = 1.0
        return m
    src = np.arange(n_out, dtype=np.float32) * (n_in - 1) / (n_out - 1)
    i0 = np.clip(np.floor(src).astype(np.int64), 0, n_in - 1)
    i1 = np.minimum(i0 + 1, n_in - 1)
    f = src - i0
    for o in range(n_out):
        m[o, i0[o]] += 1.0 - f[o]
        m[o, i1[o]] += f[o]
    return m


def _height_taps(n_in):
    """Static two-tap tables (i0, i1, frac) for the align_corners=True x2
    upsample along the row axis."""
    n_out = 2 * n_in
    if n_in == 1:
        return [0] * n_out, [0] * n_out, [0.0] * n_out
    src = np.arange(n_out, dtype=np.float32) * (n_in - 1) / (n_out - 1)
    i0 = np.clip(np.floor(src).astype(np.int64), 0, n_in - 1)
    i1 = np.minimum(i0 + 1, n_in - 1)
    f = src - i0
    return ([int(v) for v in i0], [int(v) for v in i1], [float(v) for v in f])


def _edge_mask(h, w):
    """(2, h*w) f32: row 0 zeroes column w==0, row 1 zeroes column w==w-1."""
    col = np.tile(np.arange(w), h)
    return jnp.asarray(np.stack([(col != 0), (col != w - 1)]).astype(np.float32))


def _weight_to_kmat(w_oihw, cin_pad):
    """OIHW (Co, Ci, 3, 3) -> (Co, 9*cin_pad) bf16, tap-major / channel-minor,
    input channels zero-padded to cin_pad (matches the im2col row order)."""
    co, ci, kh, kw = w_oihw.shape
    w = jnp.transpose(w_oihw.astype(jnp.float32), (0, 2, 3, 1))
    w = jnp.pad(w, ((0, 0), (0, 0), (0, 0), (0, cin_pad - ci)))
    return w.reshape(co, kh * kw * cin_pad).astype(jnp.bfloat16)


def _const_spec(shape):
    """BlockSpec for grid-invariant inputs: single-buffered (no double
    buffering) when the running jax supports pipeline_mode."""
    idx = lambda n: (0, 0)
    try:
        return pl.BlockSpec(shape, idx, pipeline_mode=pl.Buffered(1))
    except Exception:                                   # pragma: no cover
        return pl.BlockSpec(shape, idx)


# ---------------------------------------------------------------------------
# Fused Up.forward (inputs / outputs in NCHW like PyTorch)
# ---------------------------------------------------------------------------
def up_forward(params, x1_nchw, x2_nchw=None):
    N, cin, H, W = x1_nchw.shape
    Ho, Wo = 2 * H, 2 * W
    c1 = params["w1"].shape[0]
    has_skip = x2_nchw is not None
    if has_skip:
        _, cf, H2, W2 = x2_nchw.shape
    else:
        cf, H2, W2 = 0, Ho, Wo
    assert H2 >= Ho and W2 >= Wo, (
        "skip features must be at least as large as the upsampled tensor")
    S1, S, S2 = H * W, Ho * Wo, H2 * W2
    py0, px0 = (H2 - Ho) // 2, (W2 - Wo) // 2

    cin_p, c1_p = _rup(cin, _SUB), _rup(c1, _SUB)
    cf_p = _rup(cf, _SUB) if has_skip else 0
    FU, F2 = _rup(Wo + 1, 128), _rup(W2 + 1, 128)
    spad_u, spad_2 = FU + S + Wo + 1, F2 + S2 + W2 + 1

    # free reshapes of the NCHW inputs (no host-side padding copies)
    x1f = x1_nchw.astype(jnp.float32).reshape(N, cin, S1)

    # packed weights / biases / tiny constants
    w1k = _weight_to_kmat(params["w1"], cin_p)
    w2k = _weight_to_kmat(params["w2"], c1_p)
    if has_skip:
        wf = params["wf"]
        wfx = _weight_to_kmat(wf[:, :cf], cf_p)         # skip-feature columns
        wfy = _weight_to_kmat(wf[:, cf:], c1_p)         # upsampled-branch cols
    else:
        wfx = None
        wfy = _weight_to_kmat(params["wf"], c1_p)
    b1 = params["b1"].reshape(c1, 1).astype(jnp.float32)
    b2 = params["b2"].reshape(c1, 1).astype(jnp.float32)
    bf = params["bf"].reshape(c1, 1).astype(jnp.float32)
    uwT = jnp.asarray(_bilinear_axis_matrix(W).T, dtype=jnp.float32)  # (W, Wo)
    i0, i1, fh = _height_taps(H)
    mask_u = _edge_mask(Ho, Wo)                         # (2, S)
    mask_2 = _edge_mask(H2, W2)                         # (2, S2)

    inputs = [x1f]
    in_specs = [pl.BlockSpec((None, cin, S1), lambda n: (n, 0, 0))]
    if has_skip:
        x2f = x2_nchw.astype(jnp.float32).reshape(N, cf, S2)   # unpadded
        inputs.append(x2f)
        in_specs.append(pl.BlockSpec((None, cf, S2), lambda n: (n, 0, 0)))
    inputs += [uwT, mask_u, mask_2, w1k, b1, w2k, b2]
    in_specs += [_const_spec((W, Wo)), _const_spec((2, S)), _const_spec((2, S2)),
                 _const_spec(tuple(w1k.shape)), _const_spec((c1, 1)),
                 _const_spec(tuple(w2k.shape)), _const_spec((c1, 1))]
    if has_skip:
        inputs.append(wfx)
        in_specs.append(_const_spec(tuple(wfx.shape)))
    inputs += [wfy, bf]
    in_specs += [_const_spec(tuple(wfy.shape)), _const_spec((c1, 1))]

    cfg = dict(has_skip=has_skip, H=H, W=W, Ho=Ho, Wo=Wo, H2=H2, W2=W2,
               FU=FU, F2=F2, cin=cin, c1=c1, cf=cf,
               cin_p=cin_p, c1_p=c1_p, cf_p=cf_p,
               py0=py0, px0=px0, i0=i0, i1=i1, fh=fh)

    scratch_shapes = [
        pltpu.VMEM((cin, H * Wo), jnp.float32),     # width-pass rows
        pltpu.VMEM((cin_p, spad_u), jnp.float32),   # zero-haloed upsample
        pltpu.VMEM((c1_p, spad_u), jnp.float32),    # zero-haloed conv1 out
        pltpu.VMEM((c1_p, spad_2), jnp.float32),    # zero-haloed conv2 canvas
    ]
    if has_skip:
        scratch_shapes.append(pltpu.VMEM((cf_p, spad_2), jnp.float32))  # skip

    flops = 2 * N * (cin * S1 * Wo + 2 * cin * S
                     + 9 * cin_p * S * c1 + 9 * c1_p * S * c1
                     + 9 * (cf_p + c1_p) * S2 * c1)
    bytes_accessed = 4 * N * (cin * S1 + c1 * S2) + 2 * (
        int(w1k.size) + int(w2k.size) + int(wfy.size)
        + (int(wfx.size) if has_skip else 0))
    if has_skip:
        bytes_accessed += 4 * N * cf * S2

    out = pl.pallas_call(
        functools.partial(_up_fused_kernel, cfg=cfg),
        out_shape=jax.ShapeDtypeStruct((N, c1, S2), jnp.float32),
        grid_spec=pltpu.PrefetchScalarGridSpec(
            num_scalar_prefetch=0,
            grid=(N,),
            in_specs=in_specs,
            out_specs=pl.BlockSpec((None, c1, S2), lambda n: (n, 0, 0)),
            scratch_shapes=scratch_shapes),
        compiler_params=pltpu.CompilerParams(
            dimension_semantics=("parallel",)),
        cost_estimate=pl.CostEstimate(flops=flops, transcendentals=0,
                                      bytes_accessed=bytes_accessed),
    )(*inputs)
    return out.reshape(N, c1, H2, W2)          # free reshape, already NCHW


# ---------------------------------------------------------------------------
# pure-JAX reference (lax.conv, same bf16-operand / f32-accumulate numerics)
# ---------------------------------------------------------------------------
def _upsample2x_ref(x):                    # NCHW, bilinear, align_corners=True
    n, c, h, w = x.shape

    def coords(n_in):
        n_out = 2 * n_in
        if n_in == 1:
            z = jnp.zeros((n_out,), jnp.float32)
            zi = jnp.zeros((n_out,), jnp.int32)
            return z, zi, zi
        src = jnp.arange(n_out, dtype=jnp.float32) * (n_in - 1) / (n_out - 1)
        i0 = jnp.clip(jnp.floor(src).astype(jnp.int32), 0, n_in - 1)
        i1 = jnp.minimum(i0 + 1, n_in - 1)
        return src - i0.astype(jnp.float32), i0, i1

    fy, y0, y1 = coords(h)
    fx, x0, x1 = coords(w)
    rows = (x[:, :, y0, :] * (1.0 - fy)[None, None, :, None]
            + x[:, :, y1, :] * fy[None, None, :, None])
    return (rows[:, :, :, x0] * (1.0 - fx)[None, None, None, :]
            + rows[:, :, :, x1] * fx[None, None, None, :])


def _ref_conv(x, w_oihw, b):
    y = lax.conv_general_dilated(
        x.astype(jnp.bfloat16), w_oihw.astype(jnp.bfloat16),
        window_strides=(1, 1), padding="SAME",
        dimension_numbers=("NCHW", "OIHW", "NCHW"),
        preferred_element_type=jnp.float32)
    y = y + b.reshape(1, -1, 1, 1).astype(jnp.float32)
    return jnp.where(y > 0, y, NEG_SLOPE * y)


def up_forward_ref(params, x1, x2=None):
    x1 = _upsample2x_ref(x1.astype(jnp.float32))
    x1 = _ref_conv(x1, params["w1"], params["b1"])
    x1 = _ref_conv(x1, params["w2"], params["b2"])
    if x2 is not None:
        dy = x2.shape[2] - x1.shape[2]
        dx = x2.shape[3] - x1.shape[3]
        x1 = jnp.pad(x1, ((0, 0), (0, 0),
                          (dy // 2, dy - dy // 2), (dx // 2, dx - dx // 2)))
        x = jnp.concatenate([x2.astype(jnp.float32), x1], axis=1)
    else:
        x = x1
    return _ref_conv(x, params["wf"], params["bf"])


# ---------------------------------------------------------------------------
# deterministic PyTorch-layout (OIHW) parameter init
# ---------------------------------------------------------------------------
def init_params(key, in_channels, feat_channels, out_channels):
    ks = jax.random.split(key, 6)

    def conv_init(kw, kb, cin, cout):
        scale = 1.0 / np.sqrt(cin * 9)
        w = jax.random.uniform(kw, (cout, cin, 3, 3), jnp.float32, -scale, scale)
        b = jax.random.uniform(kb, (cout,), jnp.float32, -scale, scale)
        return w, b

    w1, b1 = conv_init(ks[0], ks[1], in_channels, out_channels)
    w2, b2 = conv_init(ks[2], ks[3], out_channels, out_channels)
    wf, bf = conv_init(ks[4], ks[5], feat_channels + out_channels, out_channels)
    return {"w1": w1, "b1": b1, "w2": w2, "b2": b2, "wf": wf, "bf": bf}


if __name__ == "__main__":
    in_channels, feat_channels, out_channels = 4, 4, 8
    N, H, W = 2, 16, 16

    key = jax.random.PRNGKey(0)
    kp, kx1, kx2 = jax.random.split(key, 3)
    params = init_params(kp, in_channels, feat_channels, out_channels)

    x1 = jax.random.normal(kx1, (N, in_channels, H, W), jnp.float32)        # NCHW
    x2 = jax.random.normal(kx2, (N, feat_channels, 2 * H, 2 * W), jnp.float32)

    out = jax.block_until_ready(jax.jit(up_forward)(params, x1, x2))
    ref = jax.block_until_ready(up_forward_ref(params, x1, x2))

    assert out.shape == (N, out_channels, 2 * H, 2 * W), out.shape
    # tolerance covers bf16 MXU operands (f32 accumulation) in both paths
    np.testing.assert_allclose(np.asarray(out), np.asarray(ref),
                               rtol=1e-2, atol=1e-2)
    print("KERNEL_OK")
</pallas_src>

<mosaic_0001>
module attributes {stable_mosaic.version = 11 : i64} {
  func.func @_up_fused_kernel(%arg0: i32, %arg1: memref<1x4x256xf32, #tpu.memory_space<vmem>>, %arg2: memref<1x4x1024xf32, #tpu.memory_space<vmem>>, %arg3: memref<16x32xf32, #tpu.memory_space<vmem>>, %arg4: memref<2x1024xf32, #tpu.memory_space<vmem>>, %arg5: memref<2x1024xf32, #tpu.memory_space<vmem>>, %arg6: memref<8x72xbf16, #tpu.memory_space<vmem>>, %arg7: memref<8x1xf32, #tpu.memory_space<vmem>>, %arg8: memref<8x72xbf16, #tpu.memory_space<vmem>>, %arg9: memref<8x1xf32, #tpu.memory_space<vmem>>, %arg10: memref<8x72xbf16, #tpu.memory_space<vmem>>, %arg11: memref<8x72xbf16, #tpu.memory_space<vmem>>, %arg12: memref<8x1xf32, #tpu.memory_space<vmem>>, %arg13: memref<1x8x1024xf32, #tpu.memory_space<vmem>>, %arg14: memref<4x512xf32, #tpu.memory_space<vmem>>, %arg15: memref<8x1185xf32, #tpu.memory_space<vmem>>, %arg16: memref<8x1185xf32, #tpu.memory_space<vmem>>, %arg17: memref<8x1185xf32, #tpu.memory_space<vmem>>, %arg18: memref<8x1185xf32, #tpu.memory_space<vmem>>) attributes {dimension_semantics = [#tpu.dimension_semantics<parallel>], iteration_bounds = array<i64: 2>, scalar_prefetch = 0 : i64, scratch_operands = 5 : i64, tpu.core_type = #tpu.core_type<tc>, window_params = [{transform_indices = @transform_0, window_bounds = array<i64: 1, 4, 256>}, {transform_indices = @transform_1, window_bounds = array<i64: 1, 4, 1024>}, {pipeline_mode = #tpu.pipeline_mode<synchronous>, transform_indices = @transform_2, window_bounds = array<i64: 16, 32>}, {pipeline_mode = #tpu.pipeline_mode<synchronous>, transform_indices = @transform_3, window_bounds = array<i64: 2, 1024>}, {pipeline_mode = #tpu.pipeline_mode<synchronous>, transform_indices = @transform_4, window_bounds = array<i64: 2, 1024>}, {pipeline_mode = #tpu.pipeline_mode<synchronous>, transform_indices = @transform_5, window_bounds = array<i64: 8, 72>}, {pipeline_mode = #tpu.pipeline_mode<synchronous>, transform_indices = @transform_6, window_bounds = array<i64: 8, 1>}, {pipeline_mode = #tpu.pipeline_mode<synchronous>, transform_indices = @transform_7, window_bounds = array<i64: 8, 72>}, {pipeline_mode = #tpu.pipeline_mode<synchronous>, transform_indices = @transform_8, window_bounds = array<i64: 8, 1>}, {pipeline_mode = #tpu.pipeline_mode<synchronous>, transform_indices = @transform_9, window_bounds = array<i64: 8, 72>}, {pipeline_mode = #tpu.pipeline_mode<synchronous>, transform_indices = @transform_10, window_bounds = array<i64: 8, 72>}, {pipeline_mode = #tpu.pipeline_mode<synchronous>, transform_indices = @transform_11, window_bounds = array<i64: 8, 1>}, {transform_indices = @transform_12, window_bounds = array<i64: 1, 8, 1024>}]} {
    %cst = arith.constant 0.000000e+00 : f32
    %0 = vector.broadcast %cst : f32 to vector<8x128xf32>
    %c0 = arith.constant 0 : index
    %c0_0 = arith.constant 0 : index
    %1 = vector.load %arg15[%c0, %c0_0] : memref<8x1185xf32, #tpu.memory_space<vmem>>, vector<8x128xf32>
    tpu.vector_store %arg15[%c0, %c0_0], %0 {strides = array<i32>} : memref<8x1185xf32, #tpu.memory_space<vmem>>, vector<8x128xf32>,
    %cst_1 = arith.constant 0.000000e+00 : f32
    %2 = vector.broadcast %cst_1 : f32 to vector<8x33xf32>
    %c0_2 = arith.constant 0 : index
    %c1152 = arith.constant 1152 : index
    %3 = vector.load %arg15[%c0_2, %c1152] : memref<8x1185xf32, #tpu.memory_space<vmem>>, vector<8x33xf32>
    tpu.vector_store %arg15[%c0_2, %c1152], %2 {strides = array<i32>} : memref<8x1185xf32, #tpu.memory_space<vmem>>, vector<8x33xf32>,
    %cst_3 = arith.constant 0.000000e+00 : f32
    %4 = vector.broadcast %cst_3 : f32 to vector<4x1024xf32>
    %c4 = arith.constant 4 : index
    %c128 = arith.constant 128 : index
    %5 = vector.load %arg15[%c4, %c128] : memref<8x1185xf32, #tpu.memory_space<vmem>>, vector<4x1024xf32>
    tpu.vector_store %arg15[%c4, %c128], %4 {strides = array<i32>} : memref<8x1185xf32, #tpu.memory_space<vmem>>, vector<4x1024xf32>,
    %cst_4 = arith.constant 0.000000e+00 : f32
    %6 = vector.broadcast %cst_4 : f32 to vector<8x128xf32>
    %c0_5 = arith.constant 0 : index
    %c0_6 = arith.constant 0 : index
    %7 = vector.load %arg16[%c0_5, %c0_6] : memref<8x1185xf32, #tpu.memory_space<vmem>>, vector<8x128xf32>
    tpu.vector_store %arg16[%c0_5, %c0_6], %6 {strides = array<i32>} : memref<8x1185xf32, #tpu.memory_space<vmem>>, vector<8x128xf32>,
    %cst_7 = arith.constant 0.000000e+00 : f32
    %8 = vector.broadcast %cst_7 : f32 to vector<8x33xf32>
    %c0_8 = arith.constant 0 : index
    %c1152_9 = arith.constant 1152 : index
    %9 = vector.load %arg16[%c0_8, %c1152_9] : memref<8x1185xf32, #tpu.memory_space<vmem>>, vector<8x33xf32>
    tpu.vector_store %arg16[%c0_8, %c1152_9], %8 {strides = array<i32>} : memref<8x1185xf32, #tpu.memory_space<vmem>>, vector<8x33xf32>,
    %cst_10 = arith.constant 0.000000e+00 : f32
    %10 = vector.broadcast %cst_10 : f32 to vector<8x128xf32>
    %c0_11 = arith.constant 0 : index
    %c0_12 = arith.constant 0 : index
    %11 = vector.load %arg17[%c0_11, %c0_12] : memref<8x1185xf32, #tpu.memory_space<vmem>>, vector<8x128xf32>
    tpu.vector_store %arg17[%c0_11, %c0_12], %10 {strides = array<i32>} : memref<8x1185xf32, #tpu.memory_space<vmem>>, vector<8x128xf32>,
    %cst_13 = arith.constant 0.000000e+00 : f32
    %12 = vector.broadcast %cst_13 : f32 to vector<8x33xf32>
    %c0_14 = arith.constant 0 : index
    %c1152_15 = arith.constant 1152 : index
    %13 = vector.load %arg17[%c0_14, %c1152_15] : memref<8x1185xf32, #tpu.memory_space<vmem>>, vector<8x33xf32>
    tpu.vector_store %arg17[%c0_14, %c1152_15], %12 {strides = array<i32>} : memref<8x1185xf32, #tpu.memory_space<vmem>>, vector<8x33xf32>,
    %c0_16 = arith.constant 0 : index
    %c0_17 = arith.constant 0 : index
    %14 = vector.load %arg3[%c0_16, %c0_17] : memref<16x32xf32, #tpu.memory_space<vmem>>, vector<16x32xf32>
    %c0_18 = arith.constant 0 : index
    %c0_19 = arith.constant 0 : index
    %c0_20 = arith.constant 0 : index
    %15 = vector.load %arg1[%c0_18, %c0_19, %c0_20] : memref<1x4x256xf32, #tpu.memory_space<vmem>>, vector<1x4x16xf32>
    %16 = vector.shape_cast %15 : vector<1x4x16xf32> to vector<4x16xf32>
    %cst_21 = arith.constant dense<0.000000e+00> : vector<4x32xf32>
    %17 = tpu.matmul %16, %14, %cst_21 {dimension_numbers = #tpu.dot_dimension_numbers<[1], [0], [0], [1], [0, 0, 1, 1], [], []>} : vector<4x16xf32>, vector<16x32xf32>, vector<4x32xf32> -> vector<4x32xf32>
    %c0_22 = arith.constant 0 : index
    %c0_23 = arith.constant 0 : index
    %18 = vector.load %arg14[%c0_22, %c0_23] : memref<4x512xf32, #tpu.memory_space<vmem>>, vector<4x32xf32>
    tpu.vector_store %arg14[%c0_22, %c0_23], %17 {strides = array<i32>} : memref<4x512xf32, #tpu.memory_space<vmem>>, vector<4x32xf32>,
    %c0_24 = arith.constant 0 : index
    %c0_25 = arith.constant 0 : index
    %c16 = arith.constant 16 : index
    %19 = vector.load %arg1[%c0_24, %c0_25, %c16] : memref<1x4x256xf32, #tpu.memory_space<vmem>>, vector<1x4x16xf32>
    %20 = vector.shape_cast %19 : vector<1x4x16xf32> to vector<4x16xf32>
    %cst_26 = arith.constant dense<0.000000e+00> : vector<4x32xf32>
    %21 = tpu.matmul %20, %14, %cst_26 {dimension_numbers = #tpu.dot_dimension_numbers<[1], [0], [0], [1], [0, 0, 1, 1], [], []>} : vector<4x16xf32>, vector<16x32xf32>, vector<4x32xf32> -> vector<4x32xf32>
    %c0_27 = arith.constant 0 : index
    %c32 = arith.constant 32 : index
    %22 = vector.load %arg14[%c0_27, %c32] : memref<4x512xf32, #tpu.memory_space<vmem>>, vector<4x32xf32>
    tpu.vector_store %arg14[%c0_27, %c32], %21 {strides = array<i32>} : memref<4x512xf32, #tpu.memory_space<vmem>>, vector<4x32xf32>,
    %c0_28 = arith.constant 0 : index
    %c0_29 = arith.constant 0 : index
    %c32_30 = arith.constant 32 : index
    %23 = vector.load %arg1[%c0_28, %c0_29, %c32_30] : memref<1x4x256xf32, #tpu.memory_space<vmem>>, vector<1x4x16xf32>
    %24 = vector.shape_cast %23 : vector<1x4x16xf32> to vector<4x16xf32>
    %cst_31 = arith.constant dense<0.000000e+00> : vector<4x32xf32>
    %25 = tpu.matmul %24, %14, %cst_31 {dimension_numbers = #tpu.dot_dimension_numbers<[1], [0], [0], [1], [0, 0, 1, 1], [], []>} : vector<4x16xf32>, vector<16x32xf32>, vector<4x32xf32> -> vector<4x32xf32>
    %c0_32 = arith.constant 0 : index
    %c64 = arith.constant 64 : index
    %26 = vector.load %arg14[%c0_32, %c64] : memref<4x512xf32, #tpu.memory_space<vmem>>, vector<4x32xf32>
    tpu.vector_store %arg14[%c0_32, %c64], %25 {strides = array<i32>} : memref<4x512xf32, #tpu.memory_space<vmem>>, vector<4x32xf32>,
    %c0_33 = arith.constant 0 : index
    %c0_34 = arith.constant 0 : index
    %c48 = arith.constant 48 : index
    %27 = vector.load %arg1[%c0_33, %c0_34, %c48] : memref<1x4x256xf32, #tpu.memory_space<vmem>>, vector<1x4x16xf32>
    %28 = vector.shape_cast %27 : vector<1x4x16xf32> to vector<4x16xf32>
    %cst_35 = arith.constant dense<0.000000e+00> : vector<4x32xf32>
    %29 = tpu.matmul %28, %14, %cst_35 {dimension_numbers = #tpu.dot_dimension_numbers<[1], [0], [0], [1], [0, 0, 1, 1], [], []>} : vector<4x16xf32>, vector<16x32xf32>, vector<4x32xf32> -> vector<4x32xf32>
    %c0_36 = arith.constant 0 : index
    %c96 = arith.constant 96 : index
    %30 = vector.load %arg14[%c0_36, %c96] : memref<4x512xf32, #tpu.memory_space<vmem>>, vector<4x32xf32>
    tpu.vector_store %arg14[%c0_36, %c96], %29 {strides = array<i32>} : memref<4x512xf32, #tpu.memory_space<vmem>>, vector<4x32xf32>,
    %c0_37 = arith.constant 0 : index
    %c0_38 = arith.constant 0 : index
    %c64_39 = arith.constant 64 : index
    %31 = vector.load %arg1[%c0_37, %c0_38, %c64_39] : memref<1x4x256xf32, #tpu.memory_space<vmem>>, vector<1x4x16xf32>
    %32 = vector.shape_cast %31 : vector<1x4x16xf32> to vector<4x16xf32>
    %cst_40 = arith.constant dense<0.000000e+00> : vector<4x32xf32>
    %33 = tpu.matmul %32, %14, %cst_40 {dimension_numbers = #tpu.dot_dimension_numbers<[1], [0], [0], [1], [0, 0, 1, 1], [], []>} : vector<4x16xf32>, vector<16x32xf32>, vector<4x32xf32> -> vector<4x32xf32>
    %c0_41 = arith.constant 0 : index
    %c128_42 = arith.constant 128 : index
    %34 = vector.load %arg14[%c0_41, %c128_42] : memref<4x512xf32, #tpu.memory_space<vmem>>, vector<4x32xf32>
    tpu.vector_store %arg14[%c0_41, %c128_42], %33 {strides = array<i32>} : memref<4x512xf32, #tpu.memory_space<vmem>>, vector<4x32xf32>,
    %c0_43 = arith.constant 0 : index
    %c0_44 = arith.constant 0 : index
    %c80 = arith.constant 80 : index
    %35 = vector.load %arg1[%c0_43, %c0_44, %c80] : memref<1x4x256xf32, #tpu.memory_space<vmem>>, vector<1x4x16xf32>
    %36 = vector.shape_cast %35 : vector<1x4x16xf32> to vector<4x16xf32>
    %cst_45 = arith.constant dense<0.000000e+00> : vector<4x32xf32>
    %37 = tpu.matmul %36, %14, %cst_45 {dimension_numbers = #tpu.dot_dimension_numbers<[1], [0], [0], [1], [0, 0, 1, 1], [], []>} : vector<4x16xf32>, vector<16x32xf32>, vector<4x32xf32> -> vector<4x32xf32>
    %c0_46 = arith.constant 0 : index
    %c160 = arith.constant 160 : index
    %38 = vector.load %arg14[%c0_46, %c160] : memref<4x512xf32, #tpu.memory_space<vmem>>, vector<4x32xf32>
    tpu.vector_store %arg14[%c0_46, %c160], %37 {strides = array<i32>} : memref<4x512xf32, #tpu.memory_space<vmem>>, vector<4x32xf32>,
    %c0_47 = arith.constant 0 : index
    %c0_48 = arith.constant 0 : index
    %c96_49 = arith.constant 96 : index
    %39 = vector.load %arg1[%c0_47, %c0_48, %c96_49] : memref<1x4x256xf32, #tpu.memory_space<vmem>>, vector<1x4x16xf32>
    %40 = vector.shape_cast %39 : vector<1x4x16xf32> to vector<4x16xf32>
    %cst_50 = arith.constant dense<0.000000e+00> : vector<4x32xf32>
    %41 = tpu.matmul %40, %14, %cst_50 {dimension_numbers = #tpu.dot_dimension_numbers<[1], [0], [0], [1], [0, 0, 1, 1], [], []>} : vector<4x16xf32>, vector<16x32xf32>, vector<4x32xf32> -> vector<4x32xf32>
    %c0_51 = arith.constant 0 : index
    %c192 = arith.constant 192 : index
    %42 = vector.load %arg14[%c0_51, %c192] : memref<4x512xf32, #tpu.memory_space<vmem>>, vector<4x32xf32>
    tpu.vector_store %arg14[%c0_51, %c192], %41 {strides = array<i32>} : memref<4x512xf32, #tpu.memory_space<vmem>>, vector<4x32xf32>,
    %c0_52 = arith.constant 0 : index
    %c0_53 = arith.constant 0 : index
    %c112 = arith.constant 112 : index
    %43 = vector.load %arg1[%c0_52, %c0_53, %c112] : memref<1x4x256xf32, #tpu.memory_space<vmem>>, vector<1x4x16xf32>
    %44 = vector.shape_cast %43 : vector<1x4x16xf32> to vector<4x16xf32>
    %cst_54 = arith.constant dense<0.000000e+00> : vector<4x32xf32>
    %45 = tpu.matmul %44, %14, %cst_54 {dimension_numbers = #tpu.dot_dimension_numbers<[1], [0], [0], [1], [0, 0, 1, 1], [], []>} : vector<4x16xf32>, vector<16x32xf32>, vector<4x32xf32> -> vector<4x32xf32>
    %c0_55 = arith.constant 0 : index
    %c224 = arith.constant 224 : index
    %46 = vector.load %arg14[%c0_55, %c224] : memref<4x512xf32, #tpu.memory_space<vmem>>, vector<4x32xf32>
    tpu.vector_store %arg14[%c0_55, %c224], %45 {strides = array<i32>} : memref<4x512xf32, #tpu.memory_space<vmem>>, vector<4x32xf32>,
    %c0_56 = arith.constant 0 : index
    %c0_57 = arith.constant 0 : index
    %c128_58 = arith.constant 128 : index
    %47 = vector.load %arg1[%c0_56, %c0_57, %c128_58] : memref<1x4x256xf32, #tpu.memory_space<vmem>>, vector<1x4x16xf32>
    %48 = vector.shape_cast %47 : vector<1x4x16xf32> to vector<4x16xf32>
    %cst_59 = arith.constant dense<0.000000e+00> : vector<4x32xf32>
    %49 = tpu.matmul %48, %14, %cst_59 {dimension_numbers = #tpu.dot_dimension_numbers<[1], [0], [0], [1], [0, 0, 1, 1], [], []>} : vector<4x16xf32>, vector<16x32xf32>, vector<4x32xf32> -> vector<4x32xf32>
    %c0_60 = arith.constant 0 : index
    %c256 = arith.constant 256 : index
    %50 = vector.load %arg14[%c0_60, %c256] : memref<4x512xf32, #tpu.memory_space<vmem>>, vector<4x32xf32>
    tpu.vector_store %arg14[%c0_60, %c256], %49 {strides = array<i32>} : memref<4x512xf32, #tpu.memory_space<vmem>>, vector<4x32xf32>,
    %c0_61 = arith.constant 0 : index
    %c0_62 = arith.constant 0 : index
    %c144 = arith.constant 144 : index
    %51 = vector.load %arg1[%c0_61, %c0_62, %c144] : memref<1x4x256xf32, #tpu.memory_space<vmem>>, vector<1x4x16xf32>
    %52 = vector.shape_cast %51 : vector<1x4x16xf32> to vector<4x16xf32>
    %cst_63 = arith.constant dense<0.000000e+00> : vector<4x32xf32>
    %53 = tpu.matmul %52, %14, %cst_63 {dimension_numbers = #tpu.dot_dimension_numbers<[1], [0], [0], [1], [0, 0, 1, 1], [], []>} : vector<4x16xf32>, vector<16x32xf32>, vector<4x32xf32> -> vector<4x32xf32>
    %c0_64 = arith.constant 0 : index
    %c288 = arith.constant 288 : index
    %54 = vector.load %arg14[%c0_64, %c288] : memref<4x512xf32, #tpu.memory_space<vmem>>, vector<4x32xf32>
    tpu.vector_store %arg14[%c0_64, %c288], %53 {strides = array<i32>} : memref<4x512xf32, #tpu.memory_space<vmem>>, vector<4x32xf32>,
    %c0_65 = arith.constant 0 : index
    %c0_66 = arith.constant 0 : index
    %c160_67 = arith.constant 160 : index
    %55 = vector.load %arg1[%c0_65, %c0_66, %c160_67] : memref<1x4x256xf32, #tpu.memory_space<vmem>>, vector<1x4x16xf32>
    %56 = vector.shape_cast %55 : vector<1x4x16xf32> to vector<4x16xf32>
    %cst_68 = arith.constant dense<0.000000e+00> : vector<4x32xf32>
    %57 = tpu.matmul %56, %14, %cst_68 {dimension_numbers = #tpu.dot_dimension_numbers<[1], [0], [0], [1], [0, 0, 1, 1], [], []>} : vector<4x16xf32>, vector<16x32xf32>, vector<4x32xf32> -> vector<4x32xf32>
    %c0_69 = arith.constant 0 : index
    %c320 = arith.constant 320 : index
    %58 = vector.load %arg14[%c0_69, %c320] : memref<4x512xf32, #tpu.memory_space<vmem>>, vector<4x32xf32>
    tpu.vector_store %arg14[%c0_69, %c320], %57 {strides = array<i32>} : memref<4x512xf32, #tpu.memory_space<vmem>>, vector<4x32xf32>,
    %c0_70 = arith.constant 0 : index
    %c0_71 = arith.constant 0 : index
    %c176 = arith.constant 176 : index
    %59 = vector.load %arg1[%c0_70, %c0_71, %c176] : memref<1x4x256xf32, #tpu.memory_space<vmem>>, vector<1x4x16xf32>
    %60 = vector.shape_cast %59 : vector<1x4x16xf32> to vector<4x16xf32>
    %cst_72 = arith.constant dense<0.000000e+00> : vector<4x32xf32>
    %61 = tpu.matmul %60, %14, %cst_72 {dimension_numbers = #tpu.dot_dimension_numbers<[1], [0], [0], [1], [0, 0, 1, 1], [], []>} : vector<4x16xf32>, vector<16x32xf32>, vector<4x32xf32> -> vector<4x32xf32>
    %c0_73 = arith.constant 0 : index
    %c352 = arith.constant 352 : index
    %62 = vector.load %arg14[%c0_73, %c352] : memref<4x512xf32, #tpu.memory_space<vmem>>, vector<4x32xf32>
    tpu.vector_store %arg14[%c0_73, %c352], %61 {strides = array<i32>} : memref<4x512xf32, #tpu.memory_space<vmem>>, vector<4x32xf32>,
    %c0_74 = arith.constant 0 : index
    %c0_75 = arith.constant 0 : index
    %c192_76 = arith.constant 192 : index
    %63 = vector.load %arg1[%c0_74, %c0_75, %c192_76] : memref<1x4x256xf32, #tpu.memory_space<vmem>>, vector<1x4x16xf32>
    %64 = vector.shape_cast %63 : vector<1x4x16xf32> to vector<4x16xf32>
    %cst_77 = arith.constant dense<0.000000e+00> : vector<4x32xf32>
    %65 = tpu.matmul %64, %14, %cst_77 {dimension_numbers = #tpu.dot_dimension_numbers<[1], [0], [0], [1], [0, 0, 1, 1], [], []>} : vector<4x16xf32>, vector<16x32xf32>, vector<4x32xf32> -> vector<4x32xf32>
    %c0_78 = arith.constant 0 : index
    %c384 = arith.constant 384 : index
    %66 = vector.load %arg14[%c0_78, %c384] : memref<4x512xf32, #tpu.memory_space<vmem>>, vector<4x32xf32>
    tpu.vector_store %arg14[%c0_78, %c384], %65 {strides = array<i32>} : memref<4x512xf32, #tpu.memory_space<vmem>>, vector<4x32xf32>,
    %c0_79 = arith.constant 0 : index
    %c0_80 = arith.constant 0 : index
    %c208 = arith.constant 208 : index
    %67 = vector.load %arg1[%c0_79, %c0_80, %c208] : memref<1x4x256xf32, #tpu.memory_space<vmem>>, vector<1x4x16xf32>
    %68 = vector.shape_cast %67 : vector<1x4x16xf32> to vector<4x16xf32>
    %cst_81 = arith.constant dense<0.000000e+00> : vector<4x32xf32>
    %69 = tpu.matmul %68, %14, %cst_81 {dimension_numbers = #tpu.dot_dimension_numbers<[1], [0], [0], [1], [0, 0, 1, 1], [], []>} : vector<4x16xf32>, vector<16x32xf32>, vector<4x32xf32> -> vector<4x32xf32>
    %c0_82 = arith.constant 0 : index
    %c416 = arith.constant 416 : index
    %70 = vector.load %arg14[%c0_82, %c416] : memref<4x512xf32, #tpu.memory_space<vmem>>, vector<4x32xf32>
    tpu.vector_store %arg14[%c0_82, %c416], %69 {strides = array<i32>} : memref<4x512xf32, #tpu.memory_space<vmem>>, vector<4x32xf32>,
    %c0_83 = arith.constant 0 : index
    %c0_84 = arith.constant 0 : index
    %c224_85 = arith.constant 224 : index
    %71 = vector.load %arg1[%c0_83, %c0_84, %c224_85] : memref<1x4x256xf32, #tpu.memory_space<vmem>>, vector<1x4x16xf32>
    %72 = vector.shape_cast %71 : vector<1x4x16xf32> to vector<4x16xf32>
    %cst_86 = arith.constant dense<0.000000e+00> : vector<4x32xf32>
    %73 = tpu.matmul %72, %14, %cst_86 {dimension_numbers = #tpu.dot_dimension_numbers<[1], [0], [0], [1], [0, 0, 1, 1], [], []>} : vector<4x16xf32>, vector<16x32xf32>, vector<4x32xf32> -> vector<4x32xf32>
    %c0_87 = arith.constant 0 : index
    %c448 = arith.constant 448 : index
    %74 = vector.load %arg14[%c0_87, %c448] : memref<4x512xf32, #tpu.memory_space<vmem>>, vector<4x32xf32>
    tpu.vector_store %arg14[%c0_87, %c448], %73 {strides = array<i32>} : memref<4x512xf32, #tpu.memory_space<vmem>>, vector<4x32xf32>,
    %c0_88 = arith.constant 0 : index
    %c0_89 = arith.constant 0 : index
    %c240 = arith.constant 240 : index
    %75 = vector.load %arg1[%c0_88, %c0_89, %c240] : memref<1x4x256xf32, #tpu.memory_space<vmem>>, vector<1x4x16xf32>
    %76 = vector.shape_cast %75 : vector<1x4x16xf32> to vector<4x16xf32>
    %cst_90 = arith.constant dense<0.000000e+00> : vector<4x32xf32>
    %77 = tpu.matmul %76, %14, %cst_90 {dimension_numbers = #tpu.dot_dimension_numbers<[1], [0], [0], [1], [0, 0, 1, 1], [], []>} : vector<4x16xf32>, vector<16x32xf32>, vector<4x32xf32> -> vector<4x32xf32>
    %c0_91 = arith.constant 0 : index
    %c480 = arith.constant 480 : index
    %78 = vector.load %arg14[%c0_91, %c480] : memref<4x512xf32, #tpu.memory_space<vmem>>, vector<4x32xf32>
    tpu.vector_store %arg14[%c0_91, %c480], %77 {strides = array<i32>} : memref<4x512xf32, #tpu.memory_space<vmem>>, vector<4x32xf32>,
    %c0_92 = arith.constant 0 : index
    %c0_93 = arith.constant 0 : index
    %79 = vector.load %arg14[%c0_92, %c0_93] : memref<4x512xf32, #tpu.memory_space<vmem>>, vector<4x32xf32>
    %c0_94 = arith.constant 0 : index
    %c128_95 = arith.constant 128 : index
    %80 = vector.load %arg15[%c0_94, %c128_95] : memref<8x1185xf32, #tpu.memory_space<vmem>>, vector<4x32xf32>
    tpu.vector_store %arg15[%c0_94, %c128_95], %79 {strides = array<i32>} : memref<8x1185xf32, #tpu.memory_space<vmem>>, vector<4x32xf32>,
    %c0_96 = arith.constant 0 : index
    %c0_97 = arith.constant 0 : index
    %81 = vector.load %arg14[%c0_96, %c0_97] : memref<4x512xf32, #tpu.memory_space<vmem>>, vector<4x32xf32>
    %c0_98 = arith.constant 0 : index
    %c32_99 = arith.constant 32 : index
    %82 = vector.load %arg14[%c0_98, %c32_99] : memref<4x512xf32, #tpu.memory_space<vmem>>, vector<4x32xf32>
    %cst_100 = arith.constant 5.161290e-01 : f32
    %83 = vector.broadcast %cst_100 : f32 to vector<4x32xf32>
    %84 = arith.mulf %83, %81 : vector<4x32xf32>
    %cst_101 = arith.constant 0.483870953 : f32
    %85 = vector.broadcast %cst_101 : f32 to vector<4x32xf32>
    %86 = arith.mulf %85, %82 : vector<4x32xf32>
    %87 = arith.addf %84, %86 : vector<4x32xf32>
    %c0_102 = arith.constant 0 : index
    %c160_103 = arith.constant 160 : index
    %88 = vector.load %arg15[%c0_102, %c160_103] : memref<8x1185xf32, #tpu.memory_space<vmem>>, vector<4x32xf32>
    tpu.vector_store %arg15[%c0_102, %c160_103], %87 {strides = array<i32>} : memref<8x1185xf32, #tpu.memory_space<vmem>>, vector<4x32xf32>,
    %c0_104 = arith.constant 0 : index
    %c0_105 = arith.constant 0 : index
    %89 = vector.load %arg14[%c0_104, %c0_105] : memref<4x512xf32, #tpu.memory_space<vmem>>, vector<4x32xf32>
    %c0_106 = arith.constant 0 : index
    %c32_107 = arith.constant 32 : index
    %90 = vector.load %arg14[%c0_106, %c32_107] : memref<4x512xf32, #tpu.memory_space<vmem>>, vector<4x32xf32>
    %cst_108 = arith.constant 0.0322580934 : f32
    %91 = vector.broadcast %cst_108 : f32 to vector<4x32xf32>
    %92 = arith.mulf %91, %89 : vector<4x32xf32>
    %cst_109 = arith.constant 0.967741906 : f32
    %93 = vector.broadcast %cst_109 : f32 to vector<4x32xf32>
    %94 = arith.mulf %93, %90 : vector<4x32xf32>
    %95 = arith.addf %92, %94 : vector<4x32xf32>
    %c0_110 = arith.constant 0 : index
    %c192_111 = arith.constant 192 : index
    %96 = vector.load %arg15[%c0_110, %c192_111] : memref<8x1185xf32, #tpu.memory_space<vmem>>, vector<4x32xf32>
    tpu.vector_store %arg15[%c0_110, %c192_111], %95 {strides = array<i32>} : memref<8x1185xf32, #tpu.memory_space<vmem>>, vector<4x32xf32>,
    %c0_112 = arith.constant 0 : index
    %c32_113 = arith.constant 32 : index
    %97 = vector.load %arg14[%c0_112, %c32_113] : memref<4x512xf32, #tpu.memory_space<vmem>>, vector<4x32xf32>
    %c0_114 = arith.constant 0 : index
    %c64_115 = arith.constant 64 : index
    %98 = vector.load %arg14[%c0_114, %c64_115] : memref<4x512xf32, #tpu.memory_space<vmem>>, vector<4x32xf32>
    %cst_116 = arith.constant 0.548387051 : f32
    %99 = vector.broadcast %cst_116 : f32 to vector<4x32xf32>
    %100 = arith.mulf %99, %97 : vector<4x32xf32>
    %cst_117 = arith.constant 0.451612949 : f32
    %101 = vector.broadcast %cst_117 : f32 to vector<4x32xf32>
    %102 = arith.mulf %101, %98 : vector<4x32xf32>
    %103 = arith.addf %100, %102 : vector<4x32xf32>
    %c0_118 = arith.constant 0 : index
    %c224_119 = arith.constant 224 : index
    %104 = vector.load %arg15[%c0_118, %c224_119] : memref<8x1185xf32, #tpu.memory_space<vmem>>, vector<4x32xf32>
    tpu.vector_store %arg15[%c0_118, %c224_119], %103 {strides = array<i32>} : memref<8x1185xf32, #tpu.memory_space<vmem>>, vector<4x32xf32>,
    %c0_120 = arith.constant 0 : index
    %c32_121 = arith.constant 32 : index
    %105 = vector.load %arg14[%c0_120, %c32_121] : memref<4x512xf32, #tpu.memory_space<vmem>>, vector<4x32xf32>
    %c0_122 = arith.constant 0 : index
    %c64_123 = arith.constant 64 : index
    %106 = vector.load %arg14[%c0_122, %c64_123] : memref<4x512xf32, #tpu.memory_space<vmem>>, vector<4x32xf32>
    %cst_124 = arith.constant 0.0645161867 : f32
    %107 = vector.broadcast %cst_124 : f32 to vector<4x32xf32>
    %108 = arith.mulf %107, %105 : vector<4x32xf32>
    %cst_125 = arith.constant 0.935483813 : f32
    %109 = vector.broadcast %cst_125 : f32 to vector<4x32xf32>
    %110 = arith.mulf %109, %106 : vector<4x32xf32>
    %111 = arith.addf %108, %110 : vector<4x32xf32>
    %c0_126 = arith.constant 0 : index
    %c256_127 = arith.constant 256 : index
    %112 = vector.load %arg15[%c0_126, %c256_127] : memref<8x1185xf32, #tpu.memory_space<vmem>>, vector<4x32xf32>
    tpu.vector_store %arg15[%c0_126, %c256_127], %111 {strides = array<i32>} : memref<8x1185xf32, #tpu.memory_space<vmem>>, vector<4x32xf32>,
    %c0_128 = arith.constant 0 : index
    %c64_129 = arith.constant 64 : index
    %113 = vector.load %arg14[%c0_128, %c64_129] : memref<4x512xf32, #tpu.memory_space<vmem>>, vector<4x32xf32>
    %c0_130 = arith.constant 0 : index
    %c96_131 = arith.constant 96 : index
    %114 = vector.load %arg14[%c0_130, %c96_131] : memref<4x512xf32, #tpu.memory_space<vmem>>, vector<4x32xf32>
    %cst_132 = arith.constant 0.580645084 : f32
    %115 = vector.broadcast %cst_132 : f32 to vector<4x32xf32>
    %116 = arith.mulf %115, %113 : vector<4x32xf32>
    %cst_133 = arith.constant 0.419354916 : f32
    %117 = vector.broadcast %cst_133 : f32 to vector<4x32xf32>
    %118 = arith.mulf %117, %114 : vector<4x32xf32>
    %119 = arith.addf %116, %118 : vector<4x32xf32>
    %c0_134 = arith.constant 0 : index
    %c288_135 = arith.constant 288 : index
    %120 = vector.load %arg15[%c0_134, %c288_135] : memref<8x1185xf32, #tpu.memory_space<vmem>>, vector<4x32xf32>
    tpu.vector_store %arg15[%c0_134, %c288_135], %119 {strides = array<i32>} : memref<8x1185xf32, #tpu.memory_space<vmem>>, vector<4x32xf32>,
    %c0_136 = arith.constant 0 : index
    %c64_137 = arith.constant 64 : index
    %121 = vector.load %arg14[%c0_136, %c64_137] : memref<4x512xf32, #tpu.memory_space<vmem>>, vector<4x32xf32>
    %c0_138 = arith.constant 0 : index
    %c96_139 = arith.constant 96 : index
    %122 = vector.load %arg14[%c0_138, %c96_139] : memref<4x512xf32, #tpu.memory_space<vmem>>, vector<4x32xf32>
    %cst_140 = arith.constant 9.677410e-02 : f32
    %123 = vector.broadcast %cst_140 : f32 to vector<4x32xf32>
    %124 = arith.mulf %123, %121 : vector<4x32xf32>
    %cst_141 = arith.constant 0.903225898 : f32
    %125 = vector.broadcast %cst_141 : f32 to vector<4x32xf32>
    %126 = arith.mulf %125, %122 : vector<4x32xf32>
    %127 = arith.addf %124, %126 : vector<4x32xf32>
    %c0_142 = arith.constant 0 : index
    %c320_143 = arith.constant 320 : index
    %128 = vector.load %arg15[%c0_142, %c320_143] : memref<8x1185xf32, #tpu.memory_space<vmem>>, vector<4x32xf32>
    tpu.vector_store %arg15[%c0_142, %c320_143], %127 {strides = array<i32>} : memref<8x1185xf32, #tpu.memory_space<vmem>>, vector<4x32xf32>,
    %c0_144 = arith.constant 0 : index
    %c96_145 = arith.constant 96 : index
    %129 = vector.load %arg14[%c0_144, %c96_145] : memref<4x512xf32, #tpu.memory_space<vmem>>, vector<4x32xf32>
    %c0_146 = arith.constant 0 : index
    %c128_147 = arith.constant 128 : index
    %130 = vector.load %arg14[%c0_146, %c128_147] : memref<4x512xf32, #tpu.memory_space<vmem>>, vector<4x32xf32>
    %cst_148 = arith.constant 0.612903118 : f32
    %131 = vector.broadcast %cst_148 : f32 to vector<4x32xf32>
    %132 = arith.mulf %131, %129 : vector<4x32xf32>
    %cst_149 = arith.constant 0.387096882 : f32
    %133 = vector.broadcast %cst_149 : f32 to vector<4x32xf32>
    %134 = arith.mulf %133, %130 : vector<4x32xf32>
    %135 = arith.addf %132, %134 : vector<4x32xf32>
    %c0_150 = arith.constant 0 : index
    %c352_151 = arith.constant 352 : index
    %136 = vector.load %arg15[%c0_150, %c352_151] : memref<8x1185xf32, #tpu.memory_space<vmem>>, vector<4x32xf32>
    tpu.vector_store %arg15[%c0_150, %c352_151], %135 {strides = array<i32>} : memref<8x1185xf32, #tpu.memory_space<vmem>>, vector<4x32xf32>,
    %c0_152 = arith.constant 0 : index
    %c96_153 = arith.constant 96 : index
    %137 = vector.load %arg14[%c0_152, %c96_153] : memref<4x512xf32, #tpu.memory_space<vmem>>, vector<4x32xf32>
    %c0_154 = arith.constant 0 : index
    %c128_155 = arith.constant 128 : index
    %138 = vector.load %arg14[%c0_154, %c128_155] : memref<4x512xf32, #tpu.memory_space<vmem>>, vector<4x32xf32>
    %cst_156 = arith.constant 0.129032373 : f32
    %139 = vector.broadcast %cst_156 : f32 to vector<4x32xf32>
    %140 = arith.mulf %139, %137 : vector<4x32xf32>
    %cst_157 = arith.constant 0.870967627 : f32
    %141 = vector.broadcast %cst_157 : f32 to vector<4x32xf32>
    %142 = arith.mulf %141, %138 : vector<4x32xf32>
    %143 = arith.addf %140, %142 : vector<4x32xf32>
    %c0_158 = arith.constant 0 : index
    %c384_159 = arith.constant 384 : index
    %144 = vector.load %arg15[%c0_158, %c384_159] : memref<8x1185xf32, #tpu.memory_space<vmem>>, vector<4x32xf32>
    tpu.vector_store %arg15[%c0_158, %c384_159], %143 {strides = array<i32>} : memref<8x1185xf32, #tpu.memory_space<vmem>>, vector<4x32xf32>,
    %c0_160 = arith.constant 0 : index
    %c128_161 = arith.constant 128 : index
    %145 = vector.load %arg14[%c0_160, %c128_161] : memref<4x512xf32, #tpu.memory_space<vmem>>, vector<4x32xf32>
    %c0_162 = arith.constant 0 : index
    %c160_163 = arith.constant 160 : index
    %146 = vector.load %arg14[%c0_162, %c160_163] : memref<4x512xf32, #tpu.memory_space<vmem>>, vector<4x32xf32>
    %cst_164 = arith.constant 0.645161151 : f32
    %147 = vector.broadcast %cst_164 : f32 to vector<4x32xf32>
    %148 = arith.mulf %147, %145 : vector<4x32xf32>
    %cst_165 = arith.constant 0.354838848 : f32
    %149 = vector.broadcast %cst_165 : f32 to vector<4x32xf32>
    %150 = arith.mulf %149, %146 : vector<4x32xf32>
    %151 = arith.addf %148, %150 : vector<4x32xf32>
    %c0_166 = arith.constant 0 : index
    %c416_167 = arith.constant 416 : index
    %152 = vector.load %arg15[%c0_166, %c416_167] : memref<8x1185xf32, #tpu.memory_space<vmem>>, vector<4x32xf32>
    tpu.vector_store %arg15[%c0_166, %c416_167], %151 {strides = array<i32>} : memref<8x1185xf32, #tpu.memory_space<vmem>>, vector<4x32xf32>,
    %c0_168 = arith.constant 0 : index
    %c128_169 = arith.constant 128 : index
    %153 = vector.load %arg14[%c0_168, %c128_169] : memref<4x512xf32, #tpu.memory_space<vmem>>, vector<4x32xf32>
    %c0_170 = arith.constant 0 : index
    %c160_171 = arith.constant 160 : index
    %154 = vector.load %arg14[%c0_170, %c160_171] : memref<4x512xf32, #tpu.memory_space<vmem>>, vector<4x32xf32>
    %cst_172 = arith.constant 0.161290169 : f32
    %155 = vector.broadcast %cst_172 : f32 to vector<4x32xf32>
    %156 = arith.mulf %155, %153 : vector<4x32xf32>
    %cst_173 = arith.constant 0.838709831 : f32
    %157 = vector.broadcast %cst_173 : f32 to vector<4x32xf32>
    %158 = arith.mulf %157, %154 : vector<4x32xf32>
    %159 = arith.addf %156, %158 : vector<4x32xf32>
    %c0_174 = arith.constant 0 : index
    %c448_175 = arith.constant 448 : index
    %160 = vector.load %arg15[%c0_174, %c448_175] : memref<8x1185xf32, #tpu.memory_space<vmem>>, vector<4x32xf32>
    tpu.vector_store %arg15[%c0_174, %c448_175], %159 {strides = array<i32>} : memref<8x1185xf32, #tpu.memory_space<vmem>>, vector<4x32xf32>,
    %c0_176 = arith.constant 0 : index
    %c160_177 = arith.constant 160 : index
    %161 = vector.load %arg14[%c0_176, %c160_177] : memref<4x512xf32, #tpu.memory_space<vmem>>, vector<4x32xf32>
    %c0_178 = arith.constant 0 : index
    %c192_179 = arith.constant 192 : index
    %162 = vector.load %arg14[%c0_178, %c192_179] : memref<4x512xf32, #tpu.memory_space<vmem>>, vector<4x32xf32>
    %cst_180 = arith.constant 0.677419185 : f32
    %163 = vector.broadcast %cst_180 : f32 to vector<4x32xf32>
    %164 = arith.mulf %163, %161 : vector<4x32xf32>
    %cst_181 = arith.constant 0.322580814 : f32
    %165 = vector.broadcast %cst_181 : f32 to vector<4x32xf32>
    %166 = arith.mulf %165, %162 : vector<4x32xf32>
    %167 = arith.addf %164, %166 : vector<4x32xf32>
    %c0_182 = arith.constant 0 : index
    %c480_183 = arith.constant 480 : index
    %168 = vector.load %arg15[%c0_182, %c480_183] : memref<8x1185xf32, #tpu.memory_space<vmem>>, vector<4x32xf32>
    tpu.vector_store %arg15[%c0_182, %c480_183], %167 {strides = array<i32>} : memref<8x1185xf32, #tpu.memory_space<vmem>>, vector<4x32xf32>,
    %c0_184 = arith.constant 0 : index
    %c160_185 = arith.constant 160 : index
    %169 = vector.load %arg14[%c0_184, %c160_185] : memref<4x512xf32, #tpu.memory_space<vmem>>, vector<4x32xf32>
    %c0_186 = arith.constant 0 : index
    %c192_187 = arith.constant 192 : index
    %170 = vector.load %arg14[%c0_186, %c192_187] : memref<4x512xf32, #tpu.memory_space<vmem>>, vector<4x32xf32>
    %cst_188 = arith.constant 0.193548203 : f32
    %171 = vector.broadcast %cst_188 : f32 to vector<4x32xf32>
    %172 = arith.mulf %171, %169 : vector<4x32xf32>
    %cst_189 = arith.constant 0.806451797 : f32
    %173 = vector.broadcast %cst_189 : f32 to vector<4x32xf32>
    %174 = arith.mulf %173, %170 : vector<4x32xf32>
    %175 = arith.addf %172, %174 : vector<4x32xf32>
    %c0_190 = arith.constant 0 : index
    %c512 = arith.constant 512 : index
    %176 = vector.load %arg15[%c0_190, %c512] : memref<8x1185xf32, #tpu.memory_space<vmem>>, vector<4x32xf32>
    tpu.vector_store %arg15[%c0_190, %c512], %175 {strides = array<i32>} : memref<8x1185xf32, #tpu.memory_space<vmem>>, vector<4x32xf32>,
    %c0_191 = arith.constant 0 : index
    %c192_192 = arith.constant 192 : index
    %177 = vector.load %arg14[%c0_191, %c192_192] : memref<4x512xf32, #tpu.memory_space<vmem>>, vector<4x32xf32>
    %c0_193 = arith.constant 0 : index
    %c224_194 = arith.constant 224 : index
    %178 = vector.load %arg14[%c0_193, %c224_194] : memref<4x512xf32, #tpu.memory_space<vmem>>, vector<4x32xf32>
    %cst_195 = arith.constant 0.709677219 : f32
    %179 = vector.broadcast %cst_195 : f32 to vector<4x32xf32>
    %180 = arith.mulf %179, %177 : vector<4x32xf32>
    %cst_196 = arith.constant 0.290322781 : f32
    %181 = vector.broadcast %cst_196 : f32 to vector<4x32xf32>
    %182 = arith.mulf %181, %178 : vector<4x32xf32>
    %183 = arith.addf %180, %182 : vector<4x32xf32>
    %c0_197 = arith.constant 0 : index
    %c544 = arith.constant 544 : index
    %184 = vector.load %arg15[%c0_197, %c544] : memref<8x1185xf32, #tpu.memory_space<vmem>>, vector<4x32xf32>
    tpu.vector_store %arg15[%c0_197, %c544], %183 {strides = array<i32>} : memref<8x1185xf32, #tpu.memory_space<vmem>>, vector<4x32xf32>,
    %c0_198 = arith.constant 0 : index
    %c192_199 = arith.constant 192 : index
    %185 = vector.load %arg14[%c0_198, %c192_199] : memref<4x512xf32, #tpu.memory_space<vmem>>, vector<4x32xf32>
    %c0_200 = arith.constant 0 : index
    %c224_201 = arith.constant 224 : index
    %186 = vector.load %arg14[%c0_200, %c224_201] : memref<4x512xf32, #tpu.memory_space<vmem>>, vector<4x32xf32>
    %cst_202 = arith.constant 0.225806236 : f32
    %187 = vector.broadcast %cst_202 : f32 to vector<4x32xf32>
    %188 = arith.mulf %187, %185 : vector<4x32xf32>
    %cst_203 = arith.constant 0.774193763 : f32
    %189 = vector.broadcast %cst_203 : f32 to vector<4x32xf32>
    %190 = arith.mulf %189, %186 : vector<4x32xf32>
    %191 = arith.addf %188, %190 : vector<4x32xf32>
    %c0_204 = arith.constant 0 : index
    %c576 = arith.constant 576 : index
    %192 = vector.load %arg15[%c0_204, %c576] : memref<8x1185xf32, #tpu.memory_space<vmem>>, vector<4x32xf32>
    tpu.vector_store %arg15[%c0_204, %c576], %191 {strides = array<i32>} : memref<8x1185xf32, #tpu.memory_space<vmem>>, vector<4x32xf32>,
    %c0_205 = arith.constant 0 : index
    %c224_206 = arith.constant 224 : index
    %193 = vector.load %arg14[%c0_205, %c224_206] : memref<4x512xf32, #tpu.memory_space<vmem>>, vector<4x32xf32>
    %c0_207 = arith.constant 0 : index
    %c256_208 = arith.constant 256 : index
    %194 = vector.load %arg14[%c0_207, %c256_208] : memref<4x512xf32, #tpu.memory_space<vmem>>, vector<4x32xf32>
    %cst_209 = arith.constant 0.741935253 : f32
    %195 = vector.broadcast %cst_209 : f32 to vector<4x32xf32>
    %196 = arith.mulf %195, %193 : vector<4x32xf32>
    %cst_210 = arith.constant 0.258064747 : f32
    %197 = vector.broadcast %cst_210 : f32 to vector<4x32xf32>
    %198 = arith.mulf %197, %194 : vector<4x32xf32>
    %199 = arith.addf %196, %198 : vector<4x32xf32>
    %c0_211 = arith.constant 0 : index
    %c608 = arith.constant 608 : index
    %200 = vector.load %arg15[%c0_211, %c608] : memref<8x1185xf32, #tpu.memory_space<vmem>>, vector<4x32xf32>
    tpu.vector_store %arg15[%c0_211, %c608], %199 {strides = array<i32>} : memref<8x1185xf32, #tpu.memory_space<vmem>>, vector<4x32xf32>,
    %c0_212 = arith.constant 0 : index
    %c224_213 = arith.constant 224 : index
    %201 = vector.load %arg14[%c0_212, %c224_213] : memref<4x512xf32, #tpu.memory_space<vmem>>, vector<4x32xf32>
    %c0_214 = arith.constant 0 : index
    %c256_215 = arith.constant 256 : index
    %202 = vector.load %arg14[%c0_214, %c256_215] : memref<4x512xf32, #tpu.memory_space<vmem>>, vector<4x32xf32>
    %cst_216 = arith.constant 0.258064747 : f32
    %203 = vector.broadcast %cst_216 : f32 to vector<4x32xf32>
    %204 = arith.mulf %203, %201 : vector<4x32xf32>
    %cst_217 = arith.constant 0.741935253 : f32
    %205 = vector.broadcast %cst_217 : f32 to vector<4x32xf32>
    %206 = arith.mulf %205, %202 : vector<4x32xf32>
    %207 = arith.addf %204, %206 : vector<4x32xf32>
    %c0_218 = arith.constant 0 : index
    %c640 = arith.constant 640 : index
    %208 = vector.load %arg15[%c0_218, %c640] : memref<8x1185xf32, #tpu.memory_space<vmem>>, vector<4x32xf32>
    tpu.vector_store %arg15[%c0_218, %c640], %207 {strides = array<i32>} : memref<8x1185xf32, #tpu.memory_space<vmem>>, vector<4x32xf32>,
    %c0_219 = arith.constant 0 : index
    %c256_220 = arith.constant 256 : index
    %209 = vector.load %arg14[%c0_219, %c256_220] : memref<4x512xf32, #tpu.memory_space<vmem>>, vector<4x32xf32>
    %c0_221 = arith.constant 0 : index
    %c288_222 = arith.constant 288 : index
    %210 = vector.load %arg14[%c0_221, %c288_222] : memref<4x512xf32, #tpu.memory_space<vmem>>, vector<4x32xf32>
    %cst_223 = arith.constant 0.774193763 : f32
    %211 = vector.broadcast %cst_223 : f32 to vector<4x32xf32>
    %212 = arith.mulf %211, %209 : vector<4x32xf32>
    %cst_224 = arith.constant 0.225806236 : f32
    %213 = vector.broadcast %cst_224 : f32 to vector<4x32xf32>
    %214 = arith.mulf %213, %210 : vector<4x32xf32>
    %215 = arith.addf %212, %214 : vector<4x32xf32>
    %c0_225 = arith.constant 0 : index
    %c672 = arith.constant 672 : index
    %216 = vector.load %arg15[%c0_225, %c672] : memref<8x1185xf32, #tpu.memory_space<vmem>>, vector<4x32xf32>
    tpu.vector_store %arg15[%c0_225, %c672], %215 {strides = array<i32>} : memref<8x1185xf32, #tpu.memory_space<vmem>>, vector<4x32xf32>,
    %c0_226 = arith.constant 0 : index
    %c256_227 = arith.constant 256 : index
    %217 = vector.load %arg14[%c0_226, %c256_227] : memref<4x512xf32, #tpu.memory_space<vmem>>, vector<4x32xf32>
    %c0_228 = arith.constant 0 : index
    %c288_229 = arith.constant 288 : index
    %218 = vector.load %arg14[%c0_228, %c288_229] : memref<4x512xf32, #tpu.memory_space<vmem>>, vector<4x32xf32>
    %cst_230 = arith.constant 0.290322304 : f32
    %219 = vector.broadcast %cst_230 : f32 to vector<4x32xf32>
    %220 = arith.mulf %219, %217 : vector<4x32xf32>
    %cst_231 = arith.constant 0.709677696 : f32
    %221 = vector.broadcast %cst_231 : f32 to vector<4x32xf32>
    %222 = arith.mulf %221, %218 : vector<4x32xf32>
    %223 = arith.addf %220, %222 : vector<4x32xf32>
    %c0_232 = arith.constant 0 : index
    %c704 = arith.constant 704 : index
    %224 = vector.load %arg15[%c0_232, %c704] : memref<8x1185xf32, #tpu.memory_space<vmem>>, vector<4x32xf32>
    tpu.vector_store %arg15[%c0_232, %c704], %223 {strides = array<i32>} : memref<8x1185xf32, #tpu.memory_space<vmem>>, vector<4x32xf32>,
    %c0_233 = arith.constant 0 : index
    %c288_234 = arith.constant 288 : index
    %225 = vector.load %arg14[%c0_233, %c288_234] : memref<4x512xf32, #tpu.memory_space<vmem>>, vector<4x32xf32>
    %c0_235 = arith.constant 0 : index
    %c320_236 = arith.constant 320 : index
    %226 = vector.load %arg14[%c0_235, %c320_236] : memref<4x512xf32, #tpu.memory_space<vmem>>, vector<4x32xf32>
    %cst_237 = arith.constant 0.806451797 : f32
    %227 = vector.broadcast %cst_237 : f32 to vector<4x32xf32>
    %228 = arith.mulf %227, %225 : vector<4x32xf32>
    %cst_238 = arith.constant 0.193548203 : f32
    %229 = vector.broadcast %cst_238 : f32 to vector<4x32xf32>
    %230 = arith.mulf %229, %226 : vector<4x32xf32>
    %231 = arith.addf %228, %230 : vector<4x32xf32>
    %c0_239 = arith.constant 0 : index
    %c736 = arith.constant 736 : index
    %232 = vector.load %arg15[%c0_239, %c736] : memref<8x1185xf32, #tpu.memory_space<vmem>>, vector<4x32xf32>
    tpu.vector_store %arg15[%c0_239, %c736], %231 {strides = array<i32>} : memref<8x1185xf32, #tpu.memory_space<vmem>>, vector<4x32xf32>,
    %c0_240 = arith.constant 0 : index
    %c288_241 = arith.constant 288 : index
    %233 = vector.load %arg14[%c0_240, %c288_241] : memref<4x512xf32, #tpu.memory_space<vmem>>, vector<4x32xf32>
    %c0_242 = arith.constant 0 : index
    %c320_243 = arith.constant 320 : index
    %234 = vector.load %arg14[%c0_242, %c320_243] : memref<4x512xf32, #tpu.memory_space<vmem>>, vector<4x32xf32>
    %cst_244 = arith.constant 0.322580338 : f32
    %235 = vector.broadcast %cst_244 : f32 to vector<4x32xf32>
    %236 = arith.mulf %235, %233 : vector<4x32xf32>
    %cst_245 = arith.constant 0.677419662 : f32
    %237 = vector.broadcast %cst_245 : f32 to vector<4x32xf32>
    %238 = arith.mulf %237, %234 : vector<4x32xf32>
    %239 = arith.addf %236, %238 : vector<4x32xf32>
    %c0_246 = arith.constant 0 : index
    %c768 = arith.constant 768 : index
    %240 = vector.load %arg15[%c0_246, %c768] : memref<8x1185xf32, #tpu.memory_space<vmem>>, vector<4x32xf32>
    tpu.vector_store %arg15[%c0_246, %c768], %239 {strides = array<i32>} : memref<8x1185xf32, #tpu.memory_space<vmem>>, vector<4x32xf32>,
    %c0_247 = arith.constant 0 : index
    %c320_248 = arith.constant 320 : index
    %241 = vector.load %arg14[%c0_247, %c320_248] : memref<4x512xf32, #tpu.memory_space<vmem>>, vector<4x32xf32>
    %c0_249 = arith.constant 0 : index
    %c352_250 = arith.constant 352 : index
    %242 = vector.load %arg14[%c0_249, %c352_250] : memref<4x512xf32, #tpu.memory_space<vmem>>, vector<4x32xf32>
    %cst_251 = arith.constant 0.838709831 : f32
    %243 = vector.broadcast %cst_251 : f32 to vector<4x32xf32>
    %244 = arith.mulf %243, %241 : vector<4x32xf32>
    %cst_252 = arith.constant 0.161290169 : f32
    %245 = vector.broadcast %cst_252 : f32 to vector<4x32xf32>
    %246 = arith.mulf %245, %242 : vector<4x32xf32>
    %247 = arith.addf %244, %246 : vector<4x32xf32>
    %c0_253 = arith.constant 0 : index
    %c800 = arith.constant 800 : index
    %248 = vector.load %arg15[%c0_253, %c800] : memref<8x1185xf32, #tpu.memory_space<vmem>>, vector<4x32xf32>
    tpu.vector_store %arg15[%c0_253, %c800], %247 {strides = array<i32>} : memref<8x1185xf32, #tpu.memory_space<vmem>>, vector<4x32xf32>,
    %c0_254 = arith.constant 0 : index
    %c320_255 = arith.constant 320 : index
    %249 = vector.load %arg14[%c0_254, %c320_255] : memref<4x512xf32, #tpu.memory_space<vmem>>, vector<4x32xf32>
    %c0_256 = arith.constant 0 : index
    %c352_257 = arith.constant 352 : index
    %250 = vector.load %arg14[%c0_256, %c352_257] : memref<4x512xf32, #tpu.memory_space<vmem>>, vector<4x32xf32>
    %cst_258 = arith.constant 0.354838371 : f32
    %251 = vector.broadcast %cst_258 : f32 to vector<4x32xf32>
    %252 = arith.mulf %251, %249 : vector<4x32xf32>
    %cst_259 = arith.constant 0.645161629 : f32
    %253 = vector.broadcast %cst_259 : f32 to vector<4x32xf32>
    %254 = arith.mulf %253, %250 : vector<4x32xf32>
    %255 = arith.addf %252, %254 : vector<4x32xf32>
    %c0_260 = arith.constant 0 : index
    %c832 = arith.constant 832 : index
    %256 = vector.load %arg15[%c0_260, %c832] : memref<8x1185xf32, #tpu.memory_space<vmem>>, vector<4x32xf32>
    tpu.vector_store %arg15[%c0_260, %c832], %255 {strides = array<i32>} : memref<8x1185xf32, #tpu.memory_space<vmem>>, vector<4x32xf32>,
    %c0_261 = arith.constant 0 : index
    %c352_262 = arith.constant 352 : index
    %257 = vector.load %arg14[%c0_261, %c352_262] : memref<4x512xf32, #tpu.memory_space<vmem>>, vector<4x32xf32>
    %c0_263 = arith.constant 0 : index
    %c384_264 = arith.constant 384 : index
    %258 = vector.load %arg14[%c0_263, %c384_264] : memref<4x512xf32, #tpu.memory_space<vmem>>, vector<4x32xf32>
    %cst_265 = arith.constant 0.870967864 : f32
    %259 = vector.broadcast %cst_265 : f32 to vector<4x32xf32>
    %260 = arith.mulf %259, %257 : vector<4x32xf32>
    %cst_266 = arith.constant 0.129032135 : f32
    %261 = vector.broadcast %cst_266 : f32 to vector<4x32xf32>
    %262 = arith.mulf %261, %258 : vector<4x32xf32>
    %263 = arith.addf %260, %262 : vector<4x32xf32>
    %c0_267 = arith.constant 0 : index
    %c864 = arith.constant 864 : index
    %264 = vector.load %arg15[%c0_267, %c864] : memref<8x1185xf32, #tpu.memory_space<vmem>>, vector<4x32xf32>
    tpu.vector_store %arg15[%c0_267, %c864], %263 {strides = array<i32>} : memref<8x1185xf32, #tpu.memory_space<vmem>>, vector<4x32xf32>,
    %c0_268 = arith.constant 0 : index
    %c352_269 = arith.constant 352 : index
    %265 = vector.load %arg14[%c0_268, %c352_269] : memref<4x512xf32, #tpu.memory_space<vmem>>, vector<4x32xf32>
    %c0_270 = arith.constant 0 : index
    %c384_271 = arith.constant 384 : index
    %266 = vector.load %arg14[%c0_270, %c384_271] : memref<4x512xf32, #tpu.memory_space<vmem>>, vector<4x32xf32>
    %cst_272 = arith.constant 0.387096405 : f32
    %267 = vector.broadcast %cst_272 : f32 to vector<4x32xf32>
    %268 = arith.mulf %267, %265 : vector<4x32xf32>
    %cst_273 = arith.constant 0.612903594 : f32
    %269 = vector.broadcast %cst_273 : f32 to vector<4x32xf32>
    %270 = arith.mulf %269, %266 : vector<4x32xf32>
    %271 = arith.addf %268, %270 : vector<4x32xf32>
    %c0_274 = arith.constant 0 : index
    %c896 = arith.constant 896 : index
    %272 = vector.load %arg15[%c0_274, %c896] : memref<8x1185xf32, #tpu.memory_space<vmem>>, vector<4x32xf32>
    tpu.vector_store %arg15[%c0_274, %c896], %271 {strides = array<i32>} : memref<8x1185xf32, #tpu.memory_space<vmem>>, vector<4x32xf32>,
    %c0_275 = arith.constant 0 : index
    %c384_276 = arith.constant 384 : index
    %273 = vector.load %arg14[%c0_275, %c384_276] : memref<4x512xf32, #tpu.memory_space<vmem>>, vector<4x32xf32>
    %c0_277 = arith.constant 0 : index
    %c416_278 = arith.constant 416 : index
    %274 = vector.load %arg14[%c0_277, %c416_278] : memref<4x512xf32, #tpu.memory_space<vmem>>, vector<4x32xf32>
    %cst_279 = arith.constant 0.903225898 : f32
    %275 = vector.broadcast %cst_279 : f32 to vector<4x32xf32>
    %276 = arith.mulf %275, %273 : vector<4x32xf32>
    %cst_280 = arith.constant 9.677410e-02 : f32
    %277 = vector.broadcast %cst_280 : f32 to vector<4x32xf32>
    %278 = arith.mulf %277, %274 : vector<4x32xf32>
    %279 = arith.addf %276, %278 : vector<4x32xf32>
    %c0_281 = arith.constant 0 : index
    %c928 = arith.constant 928 : index
    %280 = vector.load %arg15[%c0_281, %c928] : memref<8x1185xf32, #tpu.memory_space<vmem>>, vector<4x32xf32>
    tpu.vector_store %arg15[%c0_281, %c928], %279 {strides = array<i32>} : memref<8x1185xf32, #tpu.memory_space<vmem>>, vector<4x32xf32>,
    %c0_282 = arith.constant 0 : index
    %c384_283 = arith.constant 384 : index
    %281 = vector.load %arg14[%c0_282, %c384_283] : memref<4x512xf32, #tpu.memory_space<vmem>>, vector<4x32xf32>
    %c0_284 = arith.constant 0 : index
    %c416_285 = arith.constant 416 : index
    %282 = vector.load %arg14[%c0_284, %c416_285] : memref<4x512xf32, #tpu.memory_space<vmem>>, vector<4x32xf32>
    %cst_286 = arith.constant 0.419354439 : f32
    %283 = vector.broadcast %cst_286 : f32 to vector<4x32xf32>
    %284 = arith.mulf %283, %281 : vector<4x32xf32>
    %cst_287 = arith.constant 0.580645561 : f32
    %285 = vector.broadcast %cst_287 : f32 to vector<4x32xf32>
    %286 = arith.mulf %285, %282 : vector<4x32xf32>
    %287 = arith.addf %284, %286 : vector<4x32xf32>
    %c0_288 = arith.constant 0 : index
    %c960 = arith.constant 960 : index
    %288 = vector.load %arg15[%c0_288, %c960] : memref<8x1185xf32, #tpu.memory_space<vmem>>, vector<4x32xf32>
    tpu.vector_store %arg15[%c0_288, %c960], %287 {strides = array<i32>} : memref<8x1185xf32, #tpu.memory_space<vmem>>, vector<4x32xf32>,
    %c0_289 = arith.constant 0 : index
    %c416_290 = arith.constant 416 : index
    %289 = vector.load %arg14[%c0_289, %c416_290] : memref<4x512xf32, #tpu.memory_space<vmem>>, vector<4x32xf32>
    %c0_291 = arith.constant 0 : index
    %c448_292 = arith.constant 448 : index
    %290 = vector.load %arg14[%c0_291, %c448_292] : memref<4x512xf32, #tpu.memory_space<vmem>>, vector<4x32xf32>
    %cst_293 = arith.constant 0.935483932 : f32
    %291 = vector.broadcast %cst_293 : f32 to vector<4x32xf32>
    %292 = arith.mulf %291, %289 : vector<4x32xf32>
    %cst_294 = arith.constant 0.0645160675 : f32
    %293 = vector.broadcast %cst_294 : f32 to vector<4x32xf32>
    %294 = arith.mulf %293, %290 : vector<4x32xf32>
    %295 = arith.addf %292, %294 : vector<4x32xf32>
    %c0_295 = arith.constant 0 : index
    %c992 = arith.constant 992 : index
    %296 = vector.load %arg15[%c0_295, %c992] : memref<8x1185xf32, #tpu.memory_space<vmem>>, vector<4x32xf32>
    tpu.vector_store %arg15[%c0_295, %c992], %295 {strides = array<i32>} : memref<8x1185xf32, #tpu.memory_space<vmem>>, vector<4x32xf32>,
    %c0_296 = arith.constant 0 : index
    %c416_297 = arith.constant 416 : index
    %297 = vector.load %arg14[%c0_296, %c416_297] : memref<4x512xf32, #tpu.memory_space<vmem>>, vector<4x32xf32>
    %c0_298 = arith.constant 0 : index
    %c448_299 = arith.constant 448 : index
    %298 = vector.load %arg14[%c0_298, %c448_299] : memref<4x512xf32, #tpu.memory_space<vmem>>, vector<4x32xf32>
    %cst_300 = arith.constant 0.451612473 : f32
    %299 = vector.broadcast %cst_300 : f32 to vector<4x32xf32>
    %300 = arith.mulf %299, %297 : vector<4x32xf32>
    %cst_301 = arith.constant 0.548387527 : f32
    %301 = vector.broadcast %cst_301 : f32 to vector<4x32xf32>
    %302 = arith.mulf %301, %298 : vector<4x32xf32>
    %303 = arith.addf %300, %302 : vector<4x32xf32>
    %c0_302 = arith.constant 0 : index
    %c1024 = arith.constant 1024 : index
    %304 = vector.load %arg15[%c0_302, %c1024] : memref<8x1185xf32, #tpu.memory_space<vmem>>, vector<4x32xf32>
    tpu.vector_store %arg15[%c0_302, %c1024], %303 {strides = array<i32>} : memref<8x1185xf32, #tpu.memory_space<vmem>>, vector<4x32xf32>,
    %c0_303 = arith.constant 0 : index
    %c448_304 = arith.constant 448 : index
    %305 = vector.load %arg14[%c0_303, %c448_304] : memref<4x512xf32, #tpu.memory_space<vmem>>, vector<4x32xf32>
    %c0_305 = arith.constant 0 : index
    %c480_306 = arith.constant 480 : index
    %306 = vector.load %arg14[%c0_305, %c480_306] : memref<4x512xf32, #tpu.memory_space<vmem>>, vector<4x32xf32>
    %cst_307 = arith.constant 0.967741966 : f32
    %307 = vector.broadcast %cst_307 : f32 to vector<4x32xf32>
    %308 = arith.mulf %307, %305 : vector<4x32xf32>
    %cst_308 = arith.constant 0.0322580338 : f32
    %309 = vector.broadcast %cst_308 : f32 to vector<4x32xf32>
    %310 = arith.mulf %309, %306 : vector<4x32xf32>
    %311 = arith.addf %308, %310 : vector<4x32xf32>
    %c0_309 = arith.constant 0 : index
    %c1056 = arith.constant 1056 : index
    %312 = vector.load %arg15[%c0_309, %c1056] : memref<8x1185xf32, #tpu.memory_space<vmem>>, vector<4x32xf32>
    tpu.vector_store %arg15[%c0_309, %c1056], %311 {strides = array<i32>} : memref<8x1185xf32, #tpu.memory_space<vmem>>, vector<4x32xf32>,
    %c0_310 = arith.constant 0 : index
    %c448_311 = arith.constant 448 : index
    %313 = vector.load %arg14[%c0_310, %c448_311] : memref<4x512xf32, #tpu.memory_space<vmem>>, vector<4x32xf32>
    %c0_312 = arith.constant 0 : index
    %c480_313 = arith.constant 480 : index
    %314 = vector.load %arg14[%c0_312, %c480_313] : memref<4x512xf32, #tpu.memory_space<vmem>>, vector<4x32xf32>
    %cst_314 = arith.constant 0.483870506 : f32
    %315 = vector.broadcast %cst_314 : f32 to vector<4x32xf32>
    %316 = arith.mulf %315, %313 : vector<4x32xf32>
    %cst_315 = arith.constant 0.516129494 : f32
    %317 = vector.broadcast %cst_315 : f32 to vector<4x32xf32>
    %318 = arith.mulf %317, %314 : vector<4x32xf32>
    %319 = arith.addf %316, %318 : vector<4x32xf32>
    %c0_316 = arith.constant 0 : index
    %c1088 = arith.constant 1088 : index
    %320 = vector.load %arg15[%c0_316, %c1088] : memref<8x1185xf32, #tpu.memory_space<vmem>>, vector<4x32xf32>
    tpu.vector_store %arg15[%c0_316, %c1088], %319 {strides = array<i32>} : memref<8x1185xf32, #tpu.memory_space<vmem>>, vector<4x32xf32>,
    %c0_317 = arith.constant 0 : index
    %c480_318 = arith.constant 480 : index
    %321 = vector.load %arg14[%c0_317, %c480_318] : memref<4x512xf32, #tpu.memory_space<vmem>>, vector<4x32xf32>
    %c0_319 = arith.constant 0 : index
    %c1120 = arith.constant 1120 : index
    %322 = vector.load %arg15[%c0_319, %c1120] : memref<8x1185xf32, #tpu.memory_space<vmem>>, vector<4x32xf32>
    tpu.vector_store %arg15[%c0_319, %c1120], %321 {strides = array<i32>} : memref<8x1185xf32, #tpu.memory_space<vmem>>, vector<4x32xf32>,
    %c0_320 = arith.constant 0 : index
    %c0_321 = arith.constant 0 : index
    %323 = vector.load %arg4[%c0_320, %c0_321] : memref<2x1024xf32, #tpu.memory_space<vmem>>, vector<1x1024xf32>
    %c1 = arith.constant 1 : index
    %c0_322 = arith.constant 0 : index
    %324 = vector.load %arg4[%c1, %c0_322] : memref<2x1024xf32, #tpu.memory_space<vmem>>, vector<1x1024xf32>
    %c0_323 = arith.constant 0 : index
    %c95 = arith.constant 95 : index
    %325 = vector.load %arg15[%c0_323, %c95] : memref<8x1185xf32, #tpu.memory_space<vmem>>, vector<8x1024xf32>
    %326 = vector.broadcast %323 : vector<1x1024xf32> to vector<8x1024xf32>
    %327 = arith.mulf %325, %326 : vector<8x1024xf32>
    %c0_324 = arith.constant 0 : index
    %c96_325 = arith.constant 96 : index
    %328 = vector.load %arg15[%c0_324, %c96_325] : memref<8x1185xf32, #tpu.memory_space<vmem>>, vector<8x1024xf32>
    %c0_326 = arith.constant 0 : index
    %c97 = arith.constant 97 : index
    %329 = vector.load %arg15[%c0_326, %c97] : memref<8x1185xf32, #tpu.memory_space<vmem>>, vector<8x1024xf32>
    %330 = vector.broadcast %324 : vector<1x1024xf32> to vector<8x1024xf32>
    %331 = arith.mulf %329, %330 : vector<8x1024xf32>
    %c0_327 = arith.constant 0 : index
    %c127 = arith.constant 127 : index
    %332 = vector.load %arg15[%c0_327, %c127] : memref<8x1185xf32, #tpu.memory_space<vmem>>, vector<8x1024xf32>
    %333 = vector.broadcast %323 : vector<1x1024xf32> to vector<8x1024xf32>
    %334 = arith.mulf %332, %333 : vector<8x1024xf32>
    %c0_328 = arith.constant 0 : index
    %c128_329 = arith.constant 128 : index
    %335 = vector.load %arg15[%c0_328, %c128_329] : memref<8x1185xf32, #tpu.memory_space<vmem>>, vector<8x1024xf32>
    %c0_330 = arith.constant 0 : index
    %c129 = arith.constant 129 : index
    %336 = vector.load %arg15[%c0_330, %c129] : memref<8x1185xf32, #tpu.memory_space<vmem>>, vector<8x1024xf32>
    %337 = vector.broadcast %324 : vector<1x1024xf32> to vector<8x1024xf32>
    %338 = arith.mulf %336, %337 : vector<8x1024xf32>
    %c0_331 = arith.constant 0 : index
    %c159 = arith.constant 159 : index
    %339 = vector.load %arg15[%c0_331, %c159] : memref<8x1185xf32, #tpu.memory_space<vmem>>, vector<8x1024xf32>
    %340 = vector.broadcast %323 : vector<1x1024xf32> to vector<8x1024xf32>
    %341 = arith.mulf %339, %340 : vector<8x1024xf32>
    %c0_332 = arith.constant 0 : index
    %c160_333 = arith.constant 160 : index
    %342 = vector.load %arg15[%c0_332, %c160_333] : memref<8x1185xf32, #tpu.memory_space<vmem>>, vector<8x1024xf32>
    %c0_334 = arith.constant 0 : index
    %c161 = arith.constant 161 : index
    %343 = vector.load %arg15[%c0_334, %c161] : memref<8x1185xf32, #tpu.memory_space<vmem>>, vector<8x1024xf32>
    %344 = vector.broadcast %324 : vector<1x1024xf32> to vector<8x1024xf32>
    %345 = arith.mulf %343, %344 : vector<8x1024xf32>
    %346 = tpu.concatenate %327, %328, %331, %334, %335, %338, %341, %342, %345 in 0 : vector<8x1024xf32>, vector<8x1024xf32>, vector<8x1024xf32>, vector<8x1024xf32>, vector<8x1024xf32>, vector<8x1024xf32>, vector<8x1024xf32>, vector<8x1024xf32>, vector<8x1024xf32> -> vector<72x1024xf32>
    %347 = arith.truncf %346 : vector<72x1024xf32> to vector<72x1024xbf16>
    %c0_335 = arith.constant 0 : index
    %c0_336 = arith.constant 0 : index
    %348 = vector.load %arg6[%c0_335, %c0_336] : memref<8x72xbf16, #tpu.memory_space<vmem>>, vector<8x72xbf16>
    %cst_337 = arith.constant dense<0.000000e+00> : vector<8x1024xf32>
    %349 = tpu.matmul %348, %347, %cst_337 {dimension_numbers = #tpu.dot_dimension_numbers<[1], [0], [0], [1], [0, 0, 1, 1], [], []>} : vector<8x72xbf16>, vector<72x1024xbf16>, vector<8x1024xf32> -> vector<8x1024xf32>
    %c0_338 = arith.constant 0 : index
    %c0_339 = arith.constant 0 : index
    %350 = vector.load %arg7[%c0_338, %c0_339] : memref<8x1xf32, #tpu.memory_space<vmem>>, vector<8x1xf32>
    %351 = vector.broadcast %350 : vector<8x1xf32> to vector<8x1024xf32>
    %352 = arith.addf %349, %351 : vector<8x1024xf32>
    %cst_340 = arith.constant 0.000000e+00 : f32
    %353 = vector.broadcast %cst_340 : f32 to vector<8x1024xf32>
    %354 = arith.cmpf ogt, %352, %353 : vector<8x1024xf32>
    %cst_341 = arith.constant 0.00999999977 : f32
    %355 = vector.broadcast %cst_341 : f32 to vector<8x1024xf32>
    %356 = arith.mulf %355, %352 : vector<8x1024xf32>
    %357 = arith.select %354, %352, %356 : vector<8x1024xi1>, vector<8x1024xf32>
    %c0_342 = arith.constant 0 : index
    %c128_343 = arith.constant 128 : index
    %358 = vector.load %arg16[%c0_342, %c128_343] : memref<8x1185xf32, #tpu.memory_space<vmem>>, vector<8x1024xf32>
    tpu.vector_store %arg16[%c0_342, %c128_343], %357 {strides = array<i32>} : memref<8x1185xf32, #tpu.memory_space<vmem>>, vector<8x1024xf32>,
    %c0_344 = arith.constant 0 : index
    %c0_345 = arith.constant 0 : index
    %359 = vector.load %arg4[%c0_344, %c0_345] : memref<2x1024xf32, #tpu.memory_space<vmem>>, vector<1x1024xf32>
    %c1_346 = arith.constant 1 : index
    %c0_347 = arith.constant 0 : index
    %360 = vector.load %arg4[%c1_346, %c0_347] : memref<2x1024xf32, #tpu.memory_space<vmem>>, vector<1x1024xf32>
    %c0_348 = arith.constant 0 : index
    %c95_349 = arith.constant 95 : index
    %361 = vector.load %arg16[%c0_348, %c95_349] : memref<8x1185xf32, #tpu.memory_space<vmem>>, vector<8x1024xf32>
    %362 = vector.broadcast %359 : vector<1x1024xf32> to vector<8x1024xf32>
    %363 = arith.mulf %361, %362 : vector<8x1024xf32>
    %c0_350 = arith.constant 0 : index
    %c96_351 = arith.constant 96 : index
    %364 = vector.load %arg16[%c0_350, %c96_351] : memref<8x1185xf32, #tpu.memory_space<vmem>>, vector<8x1024xf32>
    %c0_352 = arith.constant 0 : index
    %c97_353 = arith.constant 97 : index
    %365 = vector.load %arg16[%c0_352, %c97_353] : memref<8x1185xf32, #tpu.memory_space<vmem>>, vector<8x1024xf32>
    %366 = vector.broadcast %360 : vector<1x1024xf32> to vector<8x1024xf32>
    %367 = arith.mulf %365, %366 : vector<8x1024xf32>
    %c0_354 = arith.constant 0 : index
    %c127_355 = arith.constant 127 : index
    %368 = vector.load %arg16[%c0_354, %c127_355] : memref<8x1185xf32, #tpu.memory_space<vmem>>, vector<8x1024xf32>
    %369 = vector.broadcast %359 : vector<1x1024xf32> to vector<8x1024xf32>
    %370 = arith.mulf %368, %369 : vector<8x1024xf32>
    %c0_356 = arith.constant 0 : index
    %c128_357 = arith.constant 128 : index
    %371 = vector.load %arg16[%c0_356, %c128_357] : memref<8x1185xf32, #tpu.memory_space<vmem>>, vector<8x1024xf32>
    %c0_358 = arith.constant 0 : index
    %c129_359 = arith.constant 129 : index
    %372 = vector.load %arg16[%c0_358, %c129_359] : memref<8x1185xf32, #tpu.memory_space<vmem>>, vector<8x1024xf32>
    %373 = vector.broadcast %360 : vector<1x1024xf32> to vector<8x1024xf32>
    %374 = arith.mulf %372, %373 : vector<8x1024xf32>
    %c0_360 = arith.constant 0 : index
    %c159_361 = arith.constant 159 : index
    %375 = vector.load %arg16[%c0_360, %c159_361] : memref<8x1185xf32, #tpu.memory_space<vmem>>, vector<8x1024xf32>
    %376 = vector.broadcast %359 : vector<1x1024xf32> to vector<8x1024xf32>
    %377 = arith.mulf %375, %376 : vector<8x1024xf32>
    %c0_362 = arith.constant 0 : index
    %c160_363 = arith.constant 160 : index
    %378 = vector.load %arg16[%c0_362, %c160_363] : memref<8x1185xf32, #tpu.memory_space<vmem>>, vector<8x1024xf32>
    %c0_364 = arith.constant 0 : index
    %c161_365 = arith.constant 161 : index
    %379 = vector.load %arg16[%c0_364, %c161_365] : memref<8x1185xf32, #tpu.memory_space<vmem>>, vector<8x1024xf32>
    %380 = vector.broadcast %360 : vector<1x1024xf32> to vector<8x1024xf32>
    %381 = arith.mulf %379, %380 : vector<8x1024xf32>
    %382 = tpu.concatenate %363, %364, %367, %370, %371, %374, %377, %378, %381 in 0 : vector<8x1024xf32>, vector<8x1024xf32>, vector<8x1024xf32>, vector<8x1024xf32>, vector<8x1024xf32>, vector<8x1024xf32>, vector<8x1024xf32>, vector<8x1024xf32>, vector<8x1024xf32> -> vector<72x1024xf32>
    %383 = arith.truncf %382 : vector<72x1024xf32> to vector<72x1024xbf16>
    %c0_366 = arith.constant 0 : index
    %c0_367 = arith.constant 0 : index
    %384 = vector.load %arg8[%c0_366, %c0_367] : memref<8x72xbf16, #tpu.memory_space<vmem>>, vector<8x72xbf16>
    %cst_368 = arith.constant dense<0.000000e+00> : vector<8x1024xf32>
    %385 = tpu.matmul %384, %383, %cst_368 {dimension_numbers = #tpu.dot_dimension_numbers<[1], [0], [0], [1], [0, 0, 1, 1], [], []>} : vector<8x72xbf16>, vector<72x1024xbf16>, vector<8x1024xf32> -> vector<8x1024xf32>
    %c0_369 = arith.constant 0 : index
    %c0_370 = arith.constant 0 : index
    %386 = vector.load %arg9[%c0_369, %c0_370] : memref<8x1xf32, #tpu.memory_space<vmem>>, vector<8x1xf32>
    %387 = vector.broadcast %386 : vector<8x1xf32> to vector<8x1024xf32>
    %388 = arith.addf %385, %387 : vector<8x1024xf32>
    %cst_371 = arith.constant 0.000000e+00 : f32
    %389 = vector.broadcast %cst_371 : f32 to vector<8x1024xf32>
    %390 = arith.cmpf ogt, %388, %389 : vector<8x1024xf32>
    %cst_372 = arith.constant 0.00999999977 : f32
    %391 = vector.broadcast %cst_372 : f32 to vector<8x1024xf32>
    %392 = arith.mulf %391, %388 : vector<8x1024xf32>
    %393 = arith.select %390, %388, %392 : vector<8x1024xi1>, vector<8x1024xf32>
    %c0_373 = arith.constant 0 : index
    %c128_374 = arith.constant 128 : index
    %394 = vector.load %arg17[%c0_373, %c128_374] : memref<8x1185xf32, #tpu.memory_space<vmem>>, vector<8x1024xf32>
    tpu.vector_store %arg17[%c0_373, %c128_374], %393 {strides = array<i32>} : memref<8x1185xf32, #tpu.memory_space<vmem>>, vector<8x1024xf32>,
    %c0_375 = arith.constant 0 : index
    %c0_376 = arith.constant 0 : index
    %395 = vector.load %arg5[%c0_375, %c0_376] : memref<2x1024xf32, #tpu.memory_space<vmem>>, vector<1x1024xf32>
    %c1_377 = arith.constant 1 : index
    %c0_378 = arith.constant 0 : index
    %396 = vector.load %arg5[%c1_377, %c0_378] : memref<2x1024xf32, #tpu.memory_space<vmem>>, vector<1x1024xf32>
    %c0_379 = arith.constant 0 : index
    %c95_380 = arith.constant 95 : index
    %397 = vector.load %arg17[%c0_379, %c95_380] : memref<8x1185xf32, #tpu.memory_space<vmem>>, vector<8x1024xf32>
    %398 = vector.broadcast %395 : vector<1x1024xf32> to vector<8x1024xf32>
    %399 = arith.mulf %397, %398 : vector<8x1024xf32>
    %c0_381 = arith.constant 0 : index
    %c96_382 = arith.constant 96 : index
    %400 = vector.load %arg17[%c0_381, %c96_382] : memref<8x1185xf32, #tpu.memory_space<vmem>>, vector<8x1024xf32>
    %c0_383 = arith.constant 0 : index
    %c97_384 = arith.constant 97 : index
    %401 = vector.load %arg17[%c0_383, %c97_384] : memref<8x1185xf32, #tpu.memory_space<vmem>>, vector<8x1024xf32>
    %402 = vector.broadcast %396 : vector<1x1024xf32> to vector<8x1024xf32>
    %403 = arith.mulf %401, %402 : vector<8x1024xf32>
    %c0_385 = arith.constant 0 : index
    %c127_386 = arith.constant 127 : index
    %404 = vector.load %arg17[%c0_385, %c127_386] : memref<8x1185xf32, #tpu.memory_space<vmem>>, vector<8x1024xf32>
    %405 = vector.broadcast %395 : vector<1x1024xf32> to vector<8x1024xf32>
    %406 = arith.mulf %404, %405 : vector<8x1024xf32>
    %c0_387 = arith.constant 0 : index
    %c128_388 = arith.constant 128 : index
    %407 = vector.load %arg17[%c0_387, %c128_388] : memref<8x1185xf32, #tpu.memory_space<vmem>>, vector<8x1024xf32>
    %c0_389 = arith.constant 0 : index
    %c129_390 = arith.constant 129 : index
    %408 = vector.load %arg17[%c0_389, %c129_390] : memref<8x1185xf32, #tpu.memory_space<vmem>>, vector<8x1024xf32>
    %409 = vector.broadcast %396 : vector<1x1024xf32> to vector<8x1024xf32>
    %410 = arith.mulf %408, %409 : vector<8x1024xf32>
    %c0_391 = arith.constant 0 : index
    %c159_392 = arith.constant 159 : index
    %411 = vector.load %arg17[%c0_391, %c159_392] : memref<8x1185xf32, #tpu.memory_space<vmem>>, vector<8x1024xf32>
    %412 = vector.broadcast %395 : vector<1x1024xf32> to vector<8x1024xf32>
    %413 = arith.mulf %411, %412 : vector<8x1024xf32>
    %c0_393 = arith.constant 0 : index
    %c160_394 = arith.constant 160 : index
    %414 = vector.load %arg17[%c0_393, %c160_394] : memref<8x1185xf32, #tpu.memory_space<vmem>>, vector<8x1024xf32>
    %c0_395 = arith.constant 0 : index
    %c161_396 = arith.constant 161 : index
    %415 = vector.load %arg17[%c0_395, %c161_396] : memref<8x1185xf32, #tpu.memory_space<vmem>>, vector<8x1024xf32>
    %416 = vector.broadcast %396 : vector<1x1024xf32> to vector<8x1024xf32>
    %417 = arith.mulf %415, %416 : vector<8x1024xf32>
    %418 = tpu.concatenate %399, %400, %403, %406, %407, %410, %413, %414, %417 in 0 : vector<8x1024xf32>, vector<8x1024xf32>, vector<8x1024xf32>, vector<8x1024xf32>, vector<8x1024xf32>, vector<8x1024xf32>, vector<8x1024xf32>, vector<8x1024xf32>, vector<8x1024xf32> -> vector<72x1024xf32>
    %419 = arith.truncf %418 : vector<72x1024xf32> to vector<72x1024xbf16>
    %c0_397 = arith.constant 0 : index
    %c0_398 = arith.constant 0 : index
    %420 = vector.load %arg11[%c0_397, %c0_398] : memref<8x72xbf16, #tpu.memory_space<vmem>>, vector<8x72xbf16>
    %cst_399 = arith.constant dense<0.000000e+00> : vector<8x1024xf32>
    %421 = tpu.matmul %420, %419, %cst_399 {dimension_numbers = #tpu.dot_dimension_numbers<[1], [0], [0], [1], [0, 0, 1, 1], [], []>} : vector<8x72xbf16>, vector<72x1024xbf16>, vector<8x1024xf32> -> vector<8x1024xf32>
    %cst_400 = arith.constant 0.000000e+00 : f32
    %422 = vector.broadcast %cst_400 : f32 to vector<8x128xf32>
    %c0_401 = arith.constant 0 : index
    %c0_402 = arith.constant 0 : index
    %423 = vector.load %arg18[%c0_401, %c0_402] : memref<8x1185xf32, #tpu.memory_space<vmem>>, vector<8x128xf32>
    tpu.vector_store %arg18[%c0_401, %c0_402], %422 {strides = array<i32>} : memref<8x1185xf32, #tpu.memory_space<vmem>>, vector<8x128xf32>,
    %cst_403 = arith.constant 0.000000e+00 : f32
    %424 = vector.broadcast %cst_403 : f32 to vector<8x33xf32>
    %c0_404 = arith.constant 0 : index
    %c1152_405 = arith.constant 1152 : index
    %425 = vector.load %arg18[%c0_404, %c1152_405] : memref<8x1185xf32, #tpu.memory_space<vmem>>, vector<8x33xf32>
    tpu.vector_store %arg18[%c0_404, %c1152_405], %424 {strides = array<i32>} : memref<8x1185xf32, #tpu.memory_space<vmem>>, vector<8x33xf32>,
    %cst_406 = arith.constant 0.000000e+00 : f32
    %426 = vector.broadcast %cst_406 : f32 to vector<4x1024xf32>
    %c4_407 = arith.constant 4 : index
    %c128_408 = arith.constant 128 : index
    %427 = vector.load %arg18[%c4_407, %c128_408] : memref<8x1185xf32, #tpu.memory_space<vmem>>, vector<4x1024xf32>
    tpu.vector_store %arg18[%c4_407, %c128_408], %426 {strides = array<i32>} : memref<8x1185xf32, #tpu.memory_space<vmem>>, vector<4x1024xf32>,
    %c0_409 = arith.constant 0 : index
    %c0_410 = arith.constant 0 : index
    %c0_411 = arith.constant 0 : index
    %428 = vector.load %arg2[%c0_409, %c0_410, %c0_411] : memref<1x4x1024xf32, #tpu.memory_space<vmem>>, vector<1x4x1024xf32>
    %429 = vector.shape_cast %428 : vector<1x4x1024xf32> to vector<4x1024xf32>
    %c0_412 = arith.constant 0 : index
    %c128_413 = arith.constant 128 : index
    %430 = vector.load %arg18[%c0_412, %c128_413] : memref<8x1185xf32, #tpu.memory_space<vmem>>, vector<4x1024xf32>
    tpu.vector_store %arg18[%c0_412, %c128_413], %429 {strides = array<i32>} : memref<8x1185xf32, #tpu.memory_space<vmem>>, vector<4x1024xf32>,
    %c0_414 = arith.constant 0 : index
    %c0_415 = arith.constant 0 : index
    %431 = vector.load %arg5[%c0_414, %c0_415] : memref<2x1024xf32, #tpu.memory_space<vmem>>, vector<1x1024xf32>
    %c1_416 = arith.constant 1 : index
    %c0_417 = arith.constant 0 : index
    %432 = vector.load %arg5[%c1_416, %c0_417] : memref<2x1024xf32, #tpu.memory_space<vmem>>, vector<1x1024xf32>
    %c0_418 = arith.constant 0 : index
    %c95_419 = arith.constant 95 : index
    %433 = vector.load %arg18[%c0_418, %c95_419] : memref<8x1185xf32, #tpu.memory_space<vmem>>, vector<8x1024xf32>
    %434 = vector.broadcast %431 : vector<1x1024xf32> to vector<8x1024xf32>
    %435 = arith.mulf %433, %434 : vector<8x1024xf32>
    %c0_420 = arith.constant 0 : index
    %c96_421 = arith.constant 96 : index
    %436 = vector.load %arg18[%c0_420, %c96_421] : memref<8x1185xf32, #tpu.memory_space<vmem>>, vector<8x1024xf32>
    %c0_422 = arith.constant 0 : index
    %c97_423 = arith.constant 97 : index
    %437 = vector.load %arg18[%c0_422, %c97_423] : memref<8x1185xf32, #tpu.memory_space<vmem>>, vector<8x1024xf32>
    %438 = vector.broadcast %432 : vector<1x1024xf32> to vector<8x1024xf32>
    %439 = arith.mulf %437, %438 : vector<8x1024xf32>
    %c0_424 = arith.constant 0 : index
    %c127_425 = arith.constant 127 : index
    %440 = vector.load %arg18[%c0_424, %c127_425] : memref<8x1185xf32, #tpu.memory_space<vmem>>, vector<8x1024xf32>
    %441 = vector.broadcast %431 : vector<1x1024xf32> to vector<8x1024xf32>
    %442 = arith.mulf %440, %441 : vector<8x1024xf32>
    %c0_426 = arith.constant 0 : index
    %c128_427 = arith.constant 128 : index
    %443 = vector.load %arg18[%c0_426, %c128_427] : memref<8x1185xf32, #tpu.memory_space<vmem>>, vector<8x1024xf32>
    %c0_428 = arith.constant 0 : index
    %c129_429 = arith.constant 129 : index
    %444 = vector.load %arg18[%c0_428, %c129_429] : memref<8x1185xf32, #tpu.memory_space<vmem>>, vector<8x1024xf32>
    %445 = vector.broadcast %432 : vector<1x1024xf32> to vector<8x1024xf32>
    %446 = arith.mulf %444, %445 : vector<8x1024xf32>
    %c0_430 = arith.constant 0 : index
    %c159_431 = arith.constant 159 : index
    %447 = vector.load %arg18[%c0_430, %c159_431] : memref<8x1185xf32, #tpu.memory_space<vmem>>, vector<8x1024xf32>
    %448 = vector.broadcast %431 : vector<1x1024xf32> to vector<8x1024xf32>
    %449 = arith.mulf %447, %448 : vector<8x1024xf32>
    %c0_432 = arith.constant 0 : index
    %c160_433 = arith.constant 160 : index
    %450 = vector.load %arg18[%c0_432, %c160_433] : memref<8x1185xf32, #tpu.memory_space<vmem>>, vector<8x1024xf32>
    %c0_434 = arith.constant 0 : index
    %c161_435 = arith.constant 161 : index
    %451 = vector.load %arg18[%c0_434, %c161_435] : memref<8x1185xf32, #tpu.memory_space<vmem>>, vector<8x1024xf32>
    %452 = vector.broadcast %432 : vector<1x1024xf32> to vector<8x1024xf32>
    %453 = arith.mulf %451, %452 : vector<8x1024xf32>
    %454 = tpu.concatenate %435, %436, %439, %442, %443, %446, %449, %450, %453 in 0 : vector<8x1024xf32>, vector<8x1024xf32>, vector<8x1024xf32>, vector<8x1024xf32>, vector<8x1024xf32>, vector<8x1024xf32>, vector<8x1024xf32>, vector<8x1024xf32>, vector<8x1024xf32> -> vector<72x1024xf32>
    %455 = arith.truncf %454 : vector<72x1024xf32> to vector<72x1024xbf16>
    %c0_436 = arith.constant 0 : index
    %c0_437 = arith.constant 0 : index
    %456 = vector.load %arg10[%c0_436, %c0_437] : memref<8x72xbf16, #tpu.memory_space<vmem>>, vector<8x72xbf16>
    %cst_438 = arith.constant dense<0.000000e+00> : vector<8x1024xf32>
    %457 = tpu.matmul %456, %455, %cst_438 {dimension_numbers = #tpu.dot_dimension_numbers<[1], [0], [0], [1], [0, 0, 1, 1], [], []>} : vector<8x72xbf16>, vector<72x1024xbf16>, vector<8x1024xf32> -> vector<8x1024xf32>
    %458 = arith.addf %421, %457 : vector<8x1024xf32>
    %c0_439 = arith.constant 0 : index
    %c0_440 = arith.constant 0 : index
    %459 = vector.load %arg12[%c0_439, %c0_440] : memref<8x1xf32, #tpu.memory_space<vmem>>, vector<8x1xf32>
    %460 = vector.broadcast %459 : vector<8x1xf32> to vector<8x1024xf32>
    %461 = arith.addf %458, %460 : vector<8x1024xf32>
    %cst_441 = arith.constant 0.000000e+00 : f32
    %462 = vector.broadcast %cst_441 : f32 to vector<8x1024xf32>
    %463 = arith.cmpf ogt, %461, %462 : vector<8x1024xf32>
    %cst_442 = arith.constant 0.00999999977 : f32
    %464 = vector.broadcast %cst_442 : f32 to vector<8x1024xf32>
    %465 = arith.mulf %464, %461 : vector<8x1024xf32>
    %466 = arith.select %463, %461, %465 : vector<8x1024xi1>, vector<8x1024xf32>
    %c0_443 = arith.constant 0 : index
    %c0_444 = arith.constant 0 : index
    %c0_445 = arith.constant 0 : index
    %467 = vector.load %arg13[%c0_443, %c0_444, %c0_445] : memref<1x8x1024xf32, #tpu.memory_space<vmem>>, vector<1x8x1024xf32>
    %468 = vector.shape_cast %467 : vector<1x8x1024xf32> to vector<8x1024xf32>
    %469 = vector.shape_cast %466 : vector<8x1024xf32> to vector<1x8x1024xf32>
    tpu.vector_store %arg13[%c0_443, %c0_444, %c0_445], %469 {strides = array<i32>} : memref<1x8x1024xf32, #tpu.memory_space<vmem>>, vector<1x8x1024xf32>,
    return
  }
  func.func @transform_0(%arg0: i32) -> (i32, i32, i32) {
    %c0_i32 = arith.constant 0 : i32
    %c0_i32_0 = arith.constant 0 : i32
    %c0_i32_1 = arith.constant 0 : i32
    return %arg0, %c0_i32, %c0_i32_0 : i32, i32, i32
  }
  func.func @transform_1(%arg0: i32) -> (i32, i32, i32) {
    %c0_i32 = arith.constant 0 : i32
    %c0_i32_0 = arith.constant 0 : i32
    %c0_i32_1 = arith.constant 0 : i32
    return %arg0, %c0_i32, %c0_i32_0 : i32, i32, i32
  }
  func.func @transform_2(%arg0: i32) -> (i32, i32) {
    %c0_i32 = arith.constant 0 : i32
    %c0_i32_0 = arith.constant 0 : i32
    %c0_i32_1 = arith.constant 0 : i32
    return %c0_i32, %c0_i32_0 : i32, i32
  }
  func.func @transform_3(%arg0: i32) -> (i32, i32) {
    %c0_i32 = arith.constant 0 : i32
    %c0_i32_0 = arith.constant 0 : i32
    %c0_i32_1 = arith.constant 0 : i32
    return %c0_i32, %c0_i32_0 : i32, i32
  }
  func.func @transform_4(%arg0: i32) -> (i32, i32) {
    %c0_i32 = arith.constant 0 : i32
    %c0_i32_0 = arith.constant 0 : i32
    %c0_i32_1 = arith.constant 0 : i32
    return %c0_i32, %c0_i32_0 : i32, i32
  }
  func.func @transform_5(%arg0: i32) -> (i32, i32) {
    %c0_i32 = arith.constant 0 : i32
    %c0_i32_0 = arith.constant 0 : i32
    %c0_i32_1 = arith.constant 0 : i32
    return %c0_i32, %c0_i32_0 : i32, i32
  }
  func.func @transform_6(%arg0: i32) -> (i32, i32) {
    %c0_i32 = arith.constant 0 : i32
    %c0_i32_0 = arith.constant 0 : i32
    %c0_i32_1 = arith.constant 0 : i32
    return %c0_i32, %c0_i32_0 : i32, i32
  }
  func.func @transform_7(%arg0: i32) -> (i32, i32) {
    %c0_i32 = arith.constant 0 : i32
    %c0_i32_0 = arith.constant 0 : i32
    %c0_i32_1 = arith.constant 0 : i32
    return %c0_i32, %c0_i32_0 : i32, i32
  }
  func.func @transform_8(%arg0: i32) -> (i32, i32) {
    %c0_i32 = arith.constant 0 : i32
    %c0_i32_0 = arith.constant 0 : i32
    %c0_i32_1 = arith.constant 0 : i32
    return %c0_i32, %c0_i32_0 : i32, i32
  }
  func.func @transform_9(%arg0: i32) -> (i32, i32) {
    %c0_i32 = arith.constant 0 : i32
    %c0_i32_0 = arith.constant 0 : i32
    %c0_i32_1 = arith.constant 0 : i32
    return %c0_i32, %c0_i32_0 : i32, i32
  }
  func.func @transform_10(%arg0: i32) -> (i32, i32) {
    %c0_i32 = arith.constant 0 : i32
    %c0_i32_0 = arith.constant 0 : i32
    %c0_i32_1 = arith.constant 0 : i32
    return %c0_i32, %c0_i32_0 : i32, i32
  }
  func.func @transform_11(%arg0: i32) -> (i32, i32) {
    %c0_i32 = arith.constant 0 : i32
    %c0_i32_0 = arith.constant 0 : i32
    %c0_i32_1 = arith.constant 0 : i32
    return %c0_i32, %c0_i32_0 : i32, i32
  }
  func.func @transform_12(%arg0: i32) -> (i32, i32, i32) {
    %c0_i32 = arith.constant 0 : i32
    %c0_i32_0 = arith.constant 0 : i32
    %c0_i32_1 = arith.constant 0 : i32
    return %arg0, %c0_i32, %c0_i32_0 : i32, i32, i32
  }
}

</mosaic_0001>

<bundles_post_ra>
// kernel: up_forward.1
= control target key start
LH: loop header
LB: loop body
LE: loop exit
PB: predicated region body
PF: predicated region fallthrough
CT: control target
= control target key end

     0   :  { %s7828_s21 = smov 0   ;;  %s12506_s0 = inlined_call_operand.vmem [shape: f32[2,4,256], index: 0, kind: input, shape index: {}]   ;;  %s12507_s1 = inlined_call_operand.vmem [shape: f32[2,4,1024], index: 1, kind: input, shape index: {}]   ;;  %s12508_s2 = inlined_call_operand.vmem [shape: f32[16,32], index: 2, kind: input, shape index: {}]   ;;  %s12509_s3 = inlined_call_operand.vmem [shape: f32[2,1024], index: 3, kind: input, shape index: {}, may-alias: {3,4}]   ;;  %s12510_s4 = inlined_call_operand.vmem [shape: f32[2,1024], index: 4, kind: input, shape index: {}, may-alias: {3,4}]   ;;  %s12511_s5 = inlined_call_operand.vmem [shape: bf16[8,72], index: 5, kind: input, shape index: {}]   ;;  %s12512_s6 = inlined_call_operand.vmem [shape: f32[8,1], index: 6, kind: input, shape index: {}]   ;;  %s12513_s7 = inlined_call_operand.vmem [shape: bf16[8,72], index: 7, kind: input, shape index: {}]   ;;  %s12514_s8 = inlined_call_operand.vmem [shape: f32[8,1], index: 8, kind: input, shape index: {}]   ;;  %s12515_s9 = inlined_call_operand.vmem [shape: bf16[8,72], index: 9, kind: input, shape index: {}]   ;;  %s12516_s10 = inlined_call_operand.vmem [shape: bf16[8,72], index: 10, kind: input, shape index: {}]   ;;  %s12517_s11 = inlined_call_operand.vmem [shape: f32[8,1], index: 11, kind: input, shape index: {}]   ;;  %s12518_s12 = inlined_call_operand.vmem [shape: f32[2,8,1024], index: 12, kind: output, shape index: {}]  }
   0x1 LB: > { %s6744_s22 = sadd.s32 4294967295, %s7740_s21   ;;  %p6748_p0 = scmp.ge.s32.totalorder %s7740_s21, 1  ;;  %s7740_s21 = sphi %s7828_s21, %s22_s21  }
   0x2   : > { %p372_p1 = scmp.lt.s32.totalorder %s7740_s21, 3 }
   0x4   : > { %p373_p2 = pnand %p6748_p0, %p372_p1 }
   0x6   : > { %376 = sbr.rel (%p373_p2) target bundleno = 2672 (0xa70), region = 68 }
   0xd   : > { %p7838_p3 = scmp.lt.s32.totalorder %s6744_s22, 1  ;;  %v450_v0 = vld [vmem:[%s12508_s2] sm:$0xff]  ;;  %v451_v1 = vld [vmem:[%s12508_s2 + $0x8] sm:$0xff]  ;;  %v7742_v2 = vmov 0.0|0.0   ;;  %v7743_v4 = vmov 0.0   ;;  %vm7744_vm0 = vmmov 0   ;;  %v2118_v14 = vlaneseq }
   0xe   : > { %6972 = vmatprep.subr.bf16.mxu0 %v7742_v2  ;;  %v7849_v3 = vpack.c.bf16 %v451_v1, %v450_v0  ;;  %6975 = vmatprep.subr.bf16.mxu1 %v7742_v2  ;;  %435 = vst [vmem:[#allocation3] sm:$0xff] %v7743_v4  ;;  %438 = vst [vmem:[#allocation3 + $0x8] sm:$0xf0] %v7743_v4  ;;  %s7745_s14 = smov 112   ;;  %s7746_s15 = smov 80   ;;  %vm453_vm1 = vcmask 130048  }
   0xf   : > { %439 = vst [vmem:[#allocation3 + $0x10] sm:$0xf0] %v7743_v4  ;;  %440 = vst [vmem:[#allocation3 + $0x18] sm:$0xf0] %v7743_v4  ;;  %s13381_s22 = smov (!%p7838_p3, %s6744_s22), 1  ;;  %6864 = vmatprep.mubr.msk.f32.mxu0 %vm7744_vm0, %v7743_v4  ;;  %6871 = vmatprep.mubr.msk.f32.mxu1 %vm7744_vm0, %v7743_v4  ;;  %s7747_s16 = smov 96  }
  0x10   : > { %441 = vst [vmem:[#allocation3 + $0x20] sm:$0xf0] %v7743_v4  ;;  %442 = vst [vmem:[#allocation3 + $0x28] sm:$0xf0] %v7743_v4  ;;  %6974 = vmatpush3.bf16.msra.mxu0 %v7849_v3  ;;  %6977 = vmatpush3.bf16.msra.mxu1 %v7849_v3  ;;  %s6809_s28 = sshll.u32 %s13381_s22, 3  ;;  %s7748_s17 = smov 64  }
  0x11   : > { %443 = vst [vmem:[#allocation3 + $0x30] sm:$0xf0] %v7743_v4  ;;  %444 = vst [vmem:[#allocation3 + $0x38] sm:$0xf0] %v7743_v4  ;;  %6978 = vmatprep.subr.bf16.mxu0 %v7742_v2  ;;  %6981 = vmatprep.subr.bf16.mxu1 %v7742_v2  ;;  %s7887_s13 = scalar_lea.vmem %s12506_s0, %s6809_s28  ;;  %s7749_s18 = smov 48   ;;  %v2119_v17 = vshrl.u32 %v2118_v14, 7 }
  0x12   : > { %445 = vst [vmem:[#allocation3 + $0x40] sm:$0xf0] %v7743_v4  ;;  %5101 = vst [vmem:[#allocation6 + $0x8] sm:$0xf0] %v7743_v4  ;;  %v529_v5 = vld [vmem:[%s7887_s13] sm:$0xf] }
  0x13   : > { %5102 = vst [vmem:[#allocation6 + $0x10] sm:$0xf0] %v7743_v4  ;;  %5103 = vst [vmem:[#allocation6 + $0x18] sm:$0xf0] %v7743_v4  ;;  %v693_v6 = vld [vmem:[%s7887_s13] sm:$0xf]  ;;  %531 = vrot.lane.b32.xlu0 %v529_v5, %s7745_s14 }
  0x14   : > { %5104 = vst [vmem:[#allocation6 + $0x20] sm:$0xf0] %v7743_v4  ;;  %5105 = vst [vmem:[#allocation6 + $0x28] sm:$0xf0] %v7743_v4  ;;  %695 = vrot.lane.b32.xlu1 %v693_v6, %s7746_s15  ;;  %v611_v7 = vld [vmem:[%s7887_s13] sm:$0xf] }
  0x15   : > { %5106 = vst [vmem:[#allocation6 + $0x30] sm:$0xf0] %v7743_v4  ;;  %5107 = vst [vmem:[#allocation6 + $0x38] sm:$0xf0] %v7743_v4  ;;  %v775_v8 = vld [vmem:[%s7887_s13] sm:$0xf] }
  0x16   : > { %5108 = vst [vmem:[#allocation6 + $0x40] sm:$0xf0] %v7743_v4  ;;  %v452_v9 = vld [vmem:[%s7887_s13] sm:$0xf]  ;;  %s7750_s19 = smov 32   ;;  %s7751_s20 = smov 16  }
  0x17   : > { %613 = vrot.lane.b32.xlu0 %v611_v7, %s7747_s16  ;;  %v852_v10 = vld [vmem:[%s7887_s13] sm:$0xf]  ;;  %6865 = vmatmul.mubr.msk.f32.vlgmr.msra.gmra.mrb[0].mxu0 %vm453_vm1, %v452_v9  ;;  %v1170_v13 = vld [vmem:[%s7887_s13 + $0x4] sm:$0xf]  ;;  %v7912_v20 = vsub.s32 0, %v2119_v17  ;;  %v7914_v21 = vsub.s32 1, %v2119_v17 }
  0x18   : > { %777 = vrot.lane.b32.xlu1 %v775_v8, %s7748_s17  ;;  %v933_v11 = vld [vmem:[%s7887_s13] sm:$0xf]  ;;  %6980 = vmatpush3.bf16.msra.mxu0 %v7849_v3  ;;  %v1251_v15 = vld [vmem:[%s7887_s13 + $0x4] sm:$0xf]  ;;  %v7925_v26 = vsub.s32 2, %v2119_v17  ;;  %v7930_v28 = vsub.s32 3, %v2119_v17 }
  0x19   : > { %6878 = vmatprep.mubr.msk.f32.mxu0 %vm7744_vm0, %v7743_v4  ;;  %6984 = vmatprep.subr.bf16.mxu0 %v7742_v2  ;;  %v1014_v12 = vld [vmem:[%s7887_s13] sm:$0xf]  ;;  %v1332_v16 = vld [vmem:[%s7887_s13 + $0x4] sm:$0xf]  ;;  %12818 = vst [vmem:[#allocation7_spill] sm:$0xff] %v7912_v20  ;;  %12819 = vst [vmem:[#allocation8_spill] sm:$0xff] %v7914_v21 }
  0x1a   : > { %v1413_v18 = vld [vmem:[%s7887_s13 + $0x4] sm:$0xf]  ;;  %12820 = vst [vmem:[#allocation9_spill] sm:$0xff] %v7925_v26  ;;  %12821 = vst [vmem:[#allocation10_spill] sm:$0xff] %v7930_v28  ;;  %s7752_s25 = smov 95   ;;  %v7937_v30 = vsub.s32 4, %v2119_v17 }
  0x1b   : > { %854 = vrot.lane.b32.xlu0 %v852_v10, %s7749_s18  ;;  %v1490_v19 = vld [vmem:[%s7887_s13 + $0x4] sm:$0xf]  ;;  %v7940_v32 = vsub.s32 5, %v2119_v17  ;;  %v7945_v34 = vsub.s32 6, %v2119_v17  ;;  %v7948_v36 = vsub.s32 7, %v2119_v17  ;;  %s7753_s28 = smov 97  }
  0x1c   : > { %935 = vrot.lane.b32.xlu1 %v933_v11, %s7750_s19  ;;  %v1571_v22 = vld [vmem:[%s7887_s13 + $0x4] sm:$0xf]  ;;  %12822 = vst [vmem:[#allocation11_spill] sm:$0xff] %v7937_v30  ;;  %s7754_s29 = smov 127   ;;  %s7755_s30 = smov 1   ;;  %vm436_vm2 = vcmask 269312  }
  0x1d   : > { %v1652_v23 = vld [vmem:[%s7887_s13 + $0x4] sm:$0xf]  ;;  %12823 = vst [vmem:[#allocation12_spill] sm:$0xff] %v7940_v32  ;;  %12824 = vst [vmem:[#allocation13_spill] sm:$0xff] %v7945_v34  ;;  %vm527_vm3 = vcmask 257024   ;;  %vm609_vm4 = vcmask 519424  }
  0x1e   : > { %v2105_v24 = vld [vmem:[%s12509_s3] ss:$2 sm:$0xff]  ;;  %12825 = vst [vmem:[#allocation14_spill] sm:$0xff] %v7948_v36  ;;  %v6771_v39 = vld [vmem:[%s12509_s3 + $0x1] ss:$2 sm:$0xff]  ;;  %437 = vst.msk [vmem:[#allocation3 + $0x48] sm:$0xff] %vm436_vm2, %v7743_v4 }
  0x1f   : > { %1016 = vrot.lane.b32.xlu0 %v1014_v12, %s7751_s20  ;;  %v7923_v25 = vrot.slane %v2105_v24, %v7912_v20  ;;  %v7928_v27 = vrot.slane %v2105_v24, %v7914_v21  ;;  %v2129_v29 = vrot.slane %v2105_v24, %v7925_v26  ;;  %v2133_v31 = vrot.slane %v2105_v24, %v7930_v28  ;;  %v1095_v56 = vld [vmem:[%s7887_s13 + $0x4] sm:$0xf]  ;;  %s7758_s13 = smov 94   ;;  %s6810_s26 = sshll.u32 %s13381_s22, 5 }
  0x20   : > { %1172 = vrot.lane.b32.xlu1 %v1170_v13, %s7745_s14  ;;  %v2137_v33 = vrot.slane %v2105_v24, %v7937_v30  ;;  %v2141_v35 = vrot.slane %v2105_v24, %v7940_v32  ;;  %v2145_v37 = vrot.slane %v2105_v24, %v7945_v34  ;;  %v2149_v38 = vrot.slane %v2105_v24, %v7948_v36  ;;  %s7756_s14 = smov 31   ;;  %s9428_s24 = scalar_lea.vmem %s12507_s1, %s6810_s26 }
  0x21   : > { %v2196_v40 = vrot.slane %v6771_v39, %v7912_v20  ;;  %v2200_v41 = vrot.slane %v6771_v39, %v7914_v21  ;;  %v2204_v42 = vrot.slane %v6771_v39, %v7925_v26  ;;  %v2208_v43 = vrot.slane %v6771_v39, %v7930_v28  ;;  %447 = vst.msk [vmem:[#allocation4 + $0x48] sm:$0xff] %vm436_vm2, %v7743_v4 }
  0x22   : > { %v2212_v44 = vrot.slane %v6771_v39, %v7937_v30  ;;  %v2216_v45 = vrot.slane %v6771_v39, %v7940_v32  ;;  %v7971_v46 = vrot.slane %v6771_v39, %v7945_v34  ;;  %v7975_v47 = vrot.slane %v6771_v39, %v7948_v36  ;;  %449 = vst.msk [vmem:[#allocation5 + $0x48] sm:$0xff] %vm436_vm2, %v7743_v4 }
  0x23   : > { %1253 = vrot.lane.b32.xlu0 %v1251_v15, %s7747_s16  ;;  %5100 = vst.msk [vmem:[#allocation6 + $0x48] sm:$0xff] %vm436_vm2, %v7743_v4  ;;  %vm691_vm5 = vcmask 781824   ;;  %vm773_vm6 = vcmask 1044224   ;;  %vm2283_vm7 = vcmask 1039360   ;;  %vm2368_vm8 = vcmask 252928  }
  0x24   : > { %1334 = vrot.lane.b32.xlu1 %v1332_v16, %s7746_s15  ;;  %s7757_s15 = smov 33   ;;  %vm2241_vm9 = vcmask 793600   ;;  %vm2326_vm10 = vcmask 7168   ;;  %vm2551_vm11 = vcmask 785408   ;;  %vm2506_vm12 = vcmask 1031168  }
  0x25   : > { %v2309_v14 = vld [vmem:[#allocation3 + $0x48] sm:$0xff]  ;;  %vm2166_vm13 = vcmask 777216   ;;  %vm2628_vm14 = vcmask 769024   ;;  %vm2710_vm15 = vcmask 515072  }
  0x27   : > { %1415 = vrot.lane.b32.xlu0 %v1413_v18, %s7748_s17 }
  0x28   : > { %1492 = vrot.lane.b32.xlu1 %v1490_v19, %s7749_s18  ;;  %s7759_s18 = smov 63  }
  0x2b   : > { %1573 = vrot.lane.b32.xlu0 %v1571_v22, %s7750_s19 }
  0x2c   : > { %1654 = vrot.lane.b32.xlu1 %v1652_v23, %s7751_s20  ;;  %s7760_s20 = smov 62  }
  0x2f   : > { %2152 = vrot.lane.b32.xlu0 %v7928_v27, %s7752_s25 }
  0x30   : > { %2150 = vrot.lane.b32.xlu1 %v7923_v25, %s7752_s25 }
  0x33   : > { %2156 = vrot.lane.b32.xlu0 %v2133_v31, %s7752_s25 }
  0x34   : > { %2154 = vrot.lane.b32.xlu1 %v2129_v29, %s7752_s25 }
  0x37   : > { %2160 = vrot.lane.b32.xlu0 %v2141_v35, %s7752_s25 }
  0x38   : > { %2158 = vrot.lane.b32.xlu1 %v2137_v33, %s7752_s25 }
  0x3b   : > { %2164 = vrot.lane.b32.xlu0 %v2149_v38, %s7752_s25 }
  0x3c   : > { %2162 = vrot.lane.b32.xlu1 %v2145_v37, %s7752_s25 }
  0x3f   : > { %2227 = vrot.lane.b32.xlu0 %v2200_v41, %s7753_s28 }
  0x40   : > { %2225 = vrot.lane.b32.xlu1 %v2196_v40, %s7753_s28 }
  0x43   : > { %2231 = vrot.lane.b32.xlu0 %v2208_v43, %s7753_s28 }
  0x44   : > { %2229 = vrot.lane.b32.xlu1 %v2204_v42, %s7753_s28 }
  0x47   : > { %2235 = vrot.lane.b32.xlu0 %v2216_v45, %s7753_s28 }
  0x48   : > { %2233 = vrot.lane.b32.xlu1 %v2212_v44, %s7753_s28 }
  0x4b   : > { %2239 = vrot.lane.b32.xlu0 %v7975_v47, %s7753_s28 }
  0x4c   : > { %2237 = vrot.lane.b32.xlu1 %v7971_v46, %s7753_s28 }
  0x4f   : > { %2269 = vrot.lane.b32.xlu0 %v7928_v27, %s7754_s29 }
  0x50   : > { %2267 = vrot.lane.b32.xlu1 %v7923_v25, %s7754_s29 }
  0x53   : > { %2273 = vrot.lane.b32.xlu0 %v2133_v31, %s7754_s29 }
  0x54   : > { %2271 = vrot.lane.b32.xlu1 %v2129_v29, %s7754_s29 }
  0x57   : > { %2277 = vrot.lane.b32.xlu0 %v2141_v35, %s7754_s29 }
  0x58   : > { %2275 = vrot.lane.b32.xlu1 %v2137_v33, %s7754_s29 }
  0x5b   : > { %2281 = vrot.lane.b32.xlu0 %v2149_v38, %s7754_s29 }
  0x5c   : > { %2279 = vrot.lane.b32.xlu1 %v2145_v37, %s7754_s29 }
  0x5f   : > { %2312 = vrot.lane.b32.xlu0 %v2200_v41, %s7755_s30 }
  0x60   : > { %2310 = vrot.lane.b32.xlu1 %v2196_v40, %s7755_s30 }
  0x63   : > { %2316 = vrot.lane.b32.xlu0 %v2208_v43, %s7755_s30 }
  0x64   : > { %2314 = vrot.lane.b32.xlu1 %v2204_v42, %s7755_s30 }
  0x67   : > { %2320 = vrot.lane.b32.xlu0 %v2216_v45, %s7755_s30 }
  0x68   : > { %2318 = vrot.lane.b32.xlu1 %v2212_v44, %s7755_s30 }
  0x6b   : > { %2324 = vrot.lane.b32.xlu0 %v7975_v47, %s7755_s30 }
  0x6c   : > { %2322 = vrot.lane.b32.xlu1 %v7971_v46, %s7755_s30 }
  0x6f   : > { %2354 = vrot.lane.b32.xlu0 %v7928_v27, %s7756_s14 }
  0x70   : > { %2352 = vrot.lane.b32.xlu1 %v7923_v25, %s7756_s14 }
  0x73   : > { %2358 = vrot.lane.b32.xlu0 %v2133_v31, %s7756_s14 }
  0x74   : > { %2356 = vrot.lane.b32.xlu1 %v2129_v29, %s7756_s14 }
  0x77   : > { %2362 = vrot.lane.b32.xlu0 %v2141_v35, %s7756_s14 }
  0x78   : > { %2360 = vrot.lane.b32.xlu1 %v2137_v33, %s7756_s14 }
  0x7b   : > { %2366 = vrot.lane.b32.xlu0 %v2149_v38, %s7756_s14 }
  0x7c   : > { %2364 = vrot.lane.b32.xlu1 %v2145_v37, %s7756_s14 }
  0x7f   : > { %2396 = vrot.lane.b32.xlu0 %v2200_v41, %s7757_s15 }
  0x80   : > { %2394 = vrot.lane.b32.xlu1 %v2196_v40, %s7757_s15 }
  0x83   : > { %2400 = vrot.lane.b32.xlu0 %v2208_v43, %s7757_s15 }
  0x84   : > { %2398 = vrot.lane.b32.xlu1 %v2204_v42, %s7757_s15 }
  0x85   : > { %v532_v48 = vpop.permute.xlu0 %531 }
  0x86   : > { %v696_v49 = vpop.permute.xlu1 %695  ;;  %6872 = vmatmul.mubr.msk.f32.vlgmr.msra.gmra.mrb[0].mxu1 %vm453_vm1, %v532_v48 }
  0x87   : > { %6983 = vmatpush3.bf16.msra.mxu1 %v7849_v3  ;;  %6885 = vmatprep.mubr.msk.f32.mxu1 %vm7744_vm0, %v7743_v4 }
  0x88   : > { %6987 = vmatprep.subr.bf16.mxu1 %v7742_v2  ;;  %2402 = vrot.lane.b32.xlu1 %v2212_v44, %s7757_s15 }
  0x89   : > { %v614_v50 = vpop.permute.xlu0 %613  ;;  %2404 = vrot.lane.b32.xlu0 %v2216_v45, %s7757_s15 }
  0x8a   : > { %v778_v51 = vpop.permute.xlu1 %777  ;;  %6879 = vmatmul.mubr.msk.f32.vlgmr.msra.gmra.mrb[2].mxu0 %vm453_vm1, %v614_v50  ;;  %6886 = vmatmul.mubr.msk.f32.vlgmr.msra.gmra.mrb[2].mxu1 %vm453_vm1, %v696_v49 }
  0x8b   : > { %6986 = vmatpush3.bf16.msra.mxu0 %v7849_v3  ;;  %6989 = vmatpush3.bf16.msra.mxu1 %v7849_v3 }
  0x8c   : > { %6892 = vmatprep.mubr.msk.f32.mxu0 %vm7744_vm0, %v7743_v4  ;;  %6899 = vmatprep.mubr.msk.f32.mxu1 %vm7744_vm0, %v7743_v4 }
  0x8d   : > { %v855_v52 = vpop.permute.xlu0 %854  ;;  %6990 = vmatprep.subr.bf16.mxu0 %v7742_v2  ;;  %6993 = vmatprep.subr.bf16.mxu1 %v7742_v2 }
  0x8e   : > { %v936_v53 = vpop.permute.xlu1 %935  ;;  %6893 = vmatmul.mubr.msk.f32.vlgmr.msra.gmra.mrb[4].mxu0 %vm453_vm1, %v778_v51  ;;  %6900 = vmatmul.mubr.msk.f32.vlgmr.msra.gmra.mrb[4].mxu1 %vm453_vm1, %v855_v52 }
  0x8f   : > { %6992 = vmatpush3.bf16.msra.mxu0 %v7849_v3  ;;  %6995 = vmatpush3.bf16.msra.mxu1 %v7849_v3 }
  0x90   : > { %6906 = vmatprep.mubr.msk.f32.mxu0 %vm7744_vm0, %v7743_v4  ;;  %6913 = vmatprep.mubr.msk.f32.mxu1 %vm7744_vm0, %v7743_v4 }
  0x91   : > { %v1017_v54 = vpop.permute.xlu0 %1016  ;;  %6996 = vmatprep.subr.bf16.mxu0 %v7742_v2  ;;  %6999 = vmatprep.subr.bf16.mxu1 %v7742_v2 }
  0x92   : > { %v1173_v55 = vpop.permute.xlu1 %1172  ;;  %6907 = vmatmul.mubr.msk.f32.vlgmr.msra.gmra.mrb[6].mxu0 %vm453_vm1, %v936_v53  ;;  %6914 = vmatmul.mubr.msk.f32.vlgmr.msra.gmra.mrb[6].mxu1 %vm453_vm1, %v1017_v54 }
  0x93   : > { %6998 = vmatpush3.bf16.msra.mxu0 %v7849_v3  ;;  %7001 = vmatpush3.bf16.msra.mxu1 %v7849_v3 }
  0x94   : > { %6920 = vmatprep.mubr.msk.f32.mxu0 %vm7744_vm0, %v7743_v4  ;;  %6927 = vmatprep.mubr.msk.f32.mxu1 %vm7744_vm0, %v7743_v4 }
  0x95   : > { %7002 = vmatprep.subr.bf16.mxu0 %v7742_v2  ;;  %7005 = vmatprep.subr.bf16.mxu1 %v7742_v2  ;;  %v1254_v57 = vpop.permute.xlu0 %1253 }
  0x96   : > { %v1335_v58 = vpop.permute.xlu1 %1334  ;;  %6921 = vmatmul.mubr.msk.f32.vlgmr.msra.gmra.mrb[8].mxu0 %vm453_vm1, %v1095_v56  ;;  %6928 = vmatmul.mubr.msk.f32.vlgmr.msra.gmra.mrb[8].mxu1 %vm453_vm1, %v1173_v55 }
  0x97   : > { %7004 = vmatpush3.bf16.msra.mxu0 %v7849_v3  ;;  %7007 = vmatpush3.bf16.msra.mxu1 %v7849_v3 }
  0x98   : > { %6934 = vmatprep.mubr.msk.f32.mxu0 %vm7744_vm0, %v7743_v4  ;;  %6941 = vmatprep.mubr.msk.f32.mxu1 %vm7744_vm0, %v7743_v4 }
  0x99   : > { %7008 = vmatprep.subr.bf16.mxu0 %v7742_v2  ;;  %7011 = vmatprep.subr.bf16.mxu1 %v7742_v2  ;;  %v1416_v59 = vpop.permute.xlu0 %1415 }
  0x9a   : > { %v1493_v60 = vpop.permute.xlu1 %1492  ;;  %6935 = vmatmul.mubr.msk.f32.vlgmr.msra.gmra.mrb[10].mxu0 %vm453_vm1, %v1254_v57  ;;  %6942 = vmatmul.mubr.msk.f32.vlgmr.msra.gmra.mrb[10].mxu1 %vm453_vm1, %v1335_v58 }
  0x9b   : > { %7010 = vmatpush3.bf16.msra.mxu0 %v7849_v3  ;;  %7013 = vmatpush3.bf16.msra.mxu1 %v7849_v3 }
  0x9c   : > { %6948 = vmatprep.mubr.msk.f32.mxu0 %vm7744_vm0, %v7743_v4  ;;  %6955 = vmatprep.mubr.msk.f32.mxu1 %vm7744_vm0, %v7743_v4 }
  0x9d   : > { %7014 = vmatprep.subr.bf16.mxu0 %v7742_v2  ;;  %7017 = vmatprep.subr.bf16.mxu1 %v7742_v2  ;;  %v1574_v61 = vpop.permute.xlu0 %1573 }
  0x9e   : > { %6949 = vmatmul.mubr.msk.f32.vlgmr.msra.gmra.mrb[12].mxu0 %vm453_vm1, %v1416_v59  ;;  %6956 = vmatmul.mubr.msk.f32.vlgmr.msra.gmra.mrb[12].mxu1 %vm453_vm1, %v1493_v60  ;;  %v1655_v62 = vpop.permute.xlu1 %1654 }
  0x9f   : > { %7016 = vmatpush3.bf16.msra.mxu0 %v7849_v3  ;;  %7019 = vmatpush3.bf16.msra.mxu1 %v7849_v3 }
  0xa0   : > { %6962 = vmatprep.mubr.msk.f32.mxu0 %vm7744_vm0, %v7743_v4  ;;  %6969 = vmatprep.mubr.msk.f32.mxu1 %vm7744_vm0, %v7743_v4  ;;  %vm2673_vm0 = vcmask 523264  }
  0xa1   : > { %2406 = vrot.lane.b32.xlu1 %v7971_v46, %s7757_s15  ;;  %2408 = vrot.lane.b32.xlu0 %v7975_v47, %s7757_s15  ;;  %v8093_v63 = vpop.permute.xlu0 %2152 }
  0xa2   : > { %12826 = vst [vmem:[#allocation15_spill] sm:$0xff] %v8093_v63  ;;  %6963 = vmatmul.mubr.msk.f32.vlgmr.msra.gmra.mrb[14].mxu0 %vm453_vm1, %v1574_v61  ;;  %6970 = vmatmul.mubr.msk.f32.vlgmr.msra.gmra.mrb[14].mxu1 %vm453_vm1, %v1655_v62  ;;  %v8151_v37 = vpop.permute.xlu1 %2150  ;;  %vm2755_vm1 = vcmask 506880  }
  0xa3   : > { %12836 = vst [vmem:[#allocation25_spill] sm:$0xff] %v8151_v37 }
  0xa5   : > { %v8097_v0 = vpop.permute.xlu0 %2156 }
  0xa6   : > { %12827 = vst [vmem:[#allocation16_spill] sm:$0xff] %v8097_v0  ;;  %v8153_v38 = vpop.permute.xlu1 %2154 }
  0xa7   : > { %12837 = vst [vmem:[#allocation26_spill] sm:$0xff] %v8153_v38 }
  0xa9   : > { %v8099_v1 = vpop.permute.xlu0 %2160 }
  0xaa   : > { %12828 = vst [vmem:[#allocation17_spill] sm:$0xff] %v8099_v1  ;;  %v8155_v39 = vpop.permute.xlu1 %2158 }
  0xab   : > { %12838 = vst [vmem:[#allocation27_spill] sm:$0xff] %v8155_v39 }
  0xad   : > { %v8101_v2 = vpop.permute.xlu0 %2164 }
  0xae   : > { %12829 = vst [vmem:[#allocation18_spill] sm:$0xff] %v8101_v2  ;;  %v8157_v40 = vpop.permute.xlu1 %2162 }
  0xaf   : > { %12839 = vst [vmem:[#allocation28_spill] sm:$0xff] %v8157_v40 }
  0xb1   : > { %v8103_v3 = vpop.permute.xlu0 %2227 }
  0xb2   : > { %v8159_v41 = vpop.permute.xlu1 %2225 }
  0xb5   : > { %v8105_v4 = vpop.permute.xlu0 %2231 }
  0xb6   : > { %v8161_v42 = vpop.permute.xlu1 %2229 }
  0xb9   : > { %v8107_v5 = vpop.permute.xlu0 %2235 }
  0xba   : > { %v8163_v43 = vpop.permute.xlu1 %2233 }
  0xbb   : > { %12840 = vst [vmem:[#allocation29_spill] sm:$0xff] %v8163_v43 }
  0xbd   : > { %v8109_v6 = vpop.permute.xlu0 %2239 }
  0xbe   : > { %12830 = vst [vmem:[#allocation19_spill] sm:$0xff] %v8109_v6  ;;  %v8165_v44 = vpop.permute.xlu1 %2237 }
  0xbf   : > { %12841 = vst [vmem:[#allocation30_spill] sm:$0xff] %v8165_v44 }
  0xc1   : > { %v8111_v7 = vpop.permute.xlu0 %2269 }
  0xc2   : > { %v8168_v47 = vpop.permute.xlu1 %2267 }
  0xc5   : > { %v8113_v8 = vpop.permute.xlu0 %2273 }
  0xc6   : > { %v8174_v56 = vpop.permute.xlu1 %2271 }
  0xc9   : > { %v8115_v9 = vpop.permute.xlu0 %2277 }
  0xcd   : > { %v8117_v10 = vpop.permute.xlu0 %2281 }
  0xce   : > { %12831 = vst [vmem:[#allocation20_spill] sm:$0xff] %v8117_v10 }
  0xd1   : > { %v8119_v11 = vpop.permute.xlu0 %2312 }
  0xd5   : > { %v8121_v12 = vpop.permute.xlu0 %2316 }
  0xd9   : > { %v8123_v13 = vpop.permute.xlu0 %2320 }
  0xda   : > { %12832 = vst [vmem:[#allocation21_spill] sm:$0xff] %v8123_v13 }
  0xdd   : > { %v8125_v15 = vpop.permute.xlu0 %2324 }
  0xde   : > { %12833 = vst [vmem:[#allocation22_spill] sm:$0xff] %v8125_v15  ;;  %v2351_v16 = vmul.f32 %v8125_v15, %v2309_v14 }
  0xe0   : > { %2626 = vrot.lane.b32.xlu0 %v2351_v16, %s7758_s13 }
  0xe1   : > { %v8129_v17 = vpop.permute.xlu0 %2354 }
  0xe5   : > { %v8131_v18 = vpop.permute.xlu0 %2358 }
  0xe9   : > { %v8133_v19 = vpop.permute.xlu0 %2362 }
  0xea   : > { %v523_v22 = vpop.f32.mrb[0].mxu0 }
  0xeb   : > { %528 = vst.msk [vmem:[#allocation2] sm:$0xf] %vm527_vm3, %v523_v22  ;;  %v6866_v23 = vpop.f32.mrb[1].mxu0  ;;  %v8180_v22 = vpop.permute.xlu1 %2275 }
  0xed   : > { %v8136_v24 = vpop.permute.xlu0 %2366 }
  0xee   : > { %12834 = vst [vmem:[#allocation23_spill] sm:$0xff] %v8136_v24  ;;  %v2393_v25 = vmul.f32 %v8136_v24, %v2309_v14 }
  0xf0   : > { %2671 = vrot.lane.b32.xlu1 %v2393_v25, %s7748_s17 }
  0xf1   : > { %v8141_v27 = vpop.permute.xlu0 %2396 }
  0xf4   : > { %2708 = vrot.lane.b32.xlu1 %v2309_v14, %s7759_s18 }
  0xf5   : > { %v8143_v29 = vpop.permute.xlu0 %2400 }
  0xfb   : > { %v8145_v31 = vpop.permute.xlu0 %2404 }
 0x113   : > { %v8147_v33 = vpop.permute.xlu0 %2408 }
 0x114   : > { %12835 = vst [vmem:[#allocation24_spill] sm:$0xff] %v8147_v33  ;;  %v2434_v35 = vmul.f32 %v8147_v33, %v2309_v14 }
 0x116   : > { %2753 = vrot.lane.b32.xlu1 %v2434_v35, %s7760_s20 }
 0x159   : > { %v601_v45 = vpop.f32.mrb[0].mxu1 }
 0x15a   : > { %v6873_v46 = vpop.f32.mrb[1].mxu1  ;;  %606 = vrot.lane.b32.xlu0 %v601_v45, %s7750_s19 }
 0x15d   : > { %v683_v48 = vpop.f32.mrb[2].mxu0  ;;  %v765_v49 = vpop.f32.mrb[2].mxu1 }
 0x15e   : > { %v6887_v50 = vpop.f32.mrb[3].mxu1  ;;  %688 = vrot.lane.b32.xlu1 %v683_v48, %s7748_s17  ;;  %v6880_v51 = vpop.f32.mrb[3].mxu0  ;;  %770 = vrot.lane.b32.xlu0 %v765_v49, %s7747_s16 }
 0x15f   : > { %v8186_v51 = vpop.permute.xlu1 %2279 }
 0x160   : > { %12842 = vst [vmem:[#allocation31_spill] sm:$0xff] %v8186_v51 }
 0x161   : > { %v924_v52 = vpop.f32.mrb[4].mxu1  ;;  %v847_v53 = vpop.f32.mrb[4].mxu0 }
 0x162   : > { %929 = vrot.lane.b32.xlu1 %v924_v52, %s7750_s19  ;;  %851 = vst.msk [vmem:[#allocation2 + $0x4] sm:$0xf] %vm527_vm3, %v847_v53  ;;  %v6894_v54 = vpop.f32.mrb[5].mxu0  ;;  %v6901_v55 = vpop.f32.mrb[5].mxu1 }
 0x165   : > { %v1005_v57 = vpop.f32.mrb[6].mxu0  ;;  %v1086_v58 = vpop.f32.mrb[6].mxu1 }
 0x166   : > { %1010 = vrot.lane.b32.xlu0 %v1005_v57, %s7748_s17  ;;  %1091 = vrot.lane.b32.xlu1 %v1086_v58, %s7747_s16  ;;  %v6915_v59 = vpop.f32.mrb[7].mxu1  ;;  %v6908_v60 = vpop.f32.mrb[7].mxu0 }
 0x167   : > { %v8190_v57 = vpop.permute.xlu1 %2310 }
 0x169   : > { %v1242_v61 = vpop.f32.mrb[8].mxu1  ;;  %v1165_v62 = vpop.f32.mrb[8].mxu0 }
 0x16a   : > { %1247 = vrot.lane.b32.xlu0 %v1242_v61, %s7750_s19  ;;  %1169 = vst.msk [vmem:[#allocation2 + $0x8] sm:$0xf] %vm527_vm3, %v1165_v62  ;;  %v6922_v14 = vpop.f32.mrb[9].mxu0  ;;  %v6929_v16 = vpop.f32.mrb[9].mxu1 }
 0x16b   : > { %v8192_v58 = vpop.permute.xlu1 %2314 }
 0x16d   : > { %v1323_v23 = vpop.f32.mrb[10].mxu0  ;;  %v1404_v25 = vpop.f32.mrb[10].mxu1 }
 0x16e   : > { %1328 = vrot.lane.b32.xlu1 %v1323_v23, %s7748_s17  ;;  %1409 = vrot.lane.b32.xlu0 %v1404_v25, %s7747_s16  ;;  %v6943_v35 = vpop.f32.mrb[11].mxu1  ;;  %v6936_v45 = vpop.f32.mrb[11].mxu0 }
 0x16f   : > { %v8194_v59 = vpop.permute.xlu1 %2318 }
 0x170   : > { %12843 = vst [vmem:[#allocation32_spill] sm:$0xff] %v8194_v59 }
 0x171   : > { %v1562_v46 = vpop.f32.mrb[12].mxu1  ;;  %v1485_v48 = vpop.f32.mrb[12].mxu0 }
 0x172   : > { %1567 = vrot.lane.b32.xlu1 %v1562_v46, %s7750_s19  ;;  %1489 = vst.msk [vmem:[#allocation2 + $0xc] sm:$0xf] %vm527_vm3, %v1485_v48  ;;  %v6950_v49 = vpop.f32.mrb[13].mxu0  ;;  %v6957_v50 = vpop.f32.mrb[13].mxu1  ;;  %v12519_v48 = vmov 0  }
 0x173   : > { %v8196_v60 = vpop.permute.xlu1 %2322  ;;  %7049 = vset.pattern.permute.xlu0 %v12519_v48  ;;  %3094 = vmatprep.mubr.bf16.mxu0 %v12519_v48  ;;  %v8222_v50 = vpop.permute.xlu0 %2626 }
 0x174   : > { %12844 = vst [vmem:[#allocation33_spill] sm:$0xff] %v8196_v60  ;;  %3135 = vmatprep.mubr.bf16.mxu1 %v12519_v48  ;;  %7215 = vset.pattern.permute.xlu1 %v12519_v48  ;;  %12849 = vst [vmem:[#allocation38_spill] sm:$0xff] %v8222_v50 }
 0x175   : > { %v1643_v52 = vpop.f32.mrb[14].mxu0  ;;  %v1724_v53 = vpop.f32.mrb[14].mxu1 }
 0x176   : > { %1648 = vrot.lane.b32.xlu0 %v1643_v52, %s7748_s17  ;;  %1729 = vrot.lane.b32.xlu1 %v1724_v53, %s7747_s16  ;;  %v6964_v54 = vpop.f32.mrb[15].mxu0  ;;  %v6971_v55 = vpop.f32.mrb[15].mxu1 }
 0x177   : > { %v8198_v61 = vpop.permute.xlu1 %2352 }
 0x17b   : > { %v8200_v62 = vpop.permute.xlu1 %2356 }
 0x17f   : > { %v8202_v14 = vpop.permute.xlu1 %2360 }
 0x183   : > { %v8204_v16 = vpop.permute.xlu1 %2364 }
 0x184   : > { %12845 = vst [vmem:[#allocation34_spill] sm:$0xff] %v8204_v16 }
 0x187   : > { %v8206_v23 = vpop.permute.xlu1 %2394 }
 0x18b   : > { %v8208_v25 = vpop.permute.xlu1 %2398 }
 0x18f   : > { %v8210_v35 = vpop.permute.xlu1 %2402 }
 0x193   : > { %v8212_v45 = vpop.permute.xlu1 %2406 }
 0x194   : > { %12846 = vst [vmem:[#allocation35_spill] sm:$0xff] %v8212_v45 }
 0x197   : > { %v8214_v46 = vpop.permute.xlu1 %2671 }
 0x198   : > { %12847 = vst [vmem:[#allocation36_spill] sm:$0xff] %v8214_v46 }
 0x19b   : > { %v8220_v49 = vpop.permute.xlu1 %2708 }
 0x19c   : > { %12848 = vst [vmem:[#allocation37_spill] sm:$0xff] %v8220_v49 }
 0x19f   : > { %v8224_v52 = vpop.permute.xlu1 %2753 }
 0x1a0   : > { %12850 = vst [vmem:[#allocation39_spill] sm:$0xff] %v8224_v52 }
 0x1cc   : > { %v607_v53 = vpop.permute.xlu0 %606 }
 0x1cd   : > { %610 = vst.msk [vmem:[#allocation2] sm:$0xf] %vm609_vm4, %v607_v53 }
 0x1d0   : > { %v689_v54 = vpop.permute.xlu1 %688  ;;  %v771_v55 = vpop.permute.xlu0 %770 }
 0x1d1   : > { %692 = vst.msk [vmem:[#allocation2] sm:$0xf] %vm691_vm5, %v689_v54 }
 0x1d2   : > { %774 = vst.msk [vmem:[#allocation2] sm:$0xf] %vm773_vm6, %v771_v55 }
 0x1d4   : > { %v930_v46 = vpop.permute.xlu1 %929 }
 0x1d5   : > { %932 = vst.msk [vmem:[#allocation2 + $0x4] sm:$0xf] %vm609_vm4, %v930_v46 }
 0x1d8   : > { %v1011_v48 = vpop.permute.xlu0 %1010  ;;  %v1092_v49 = vpop.permute.xlu1 %1091 }
 0x1d9   : > { %1013 = vst.msk [vmem:[#allocation2 + $0x4] sm:$0xf] %vm691_vm5, %v1011_v48  ;;  %v8231_v52 = vld [vmem:[#allocation2] sm:$0xf] }
 0x1da   : > { %1094 = vst.msk [vmem:[#allocation2 + $0x4] sm:$0xf] %vm773_vm6, %v1092_v49  ;;  %v1737_v53 = vmul.f32 0.48387095, %v8231_v52  ;;  %v8235_v50 = vld [vmem:[#allocation2] sm:$0xf] }
 0x1db   : > { %v1750_v55 = vmul.f32 0.9677419, %v8235_v50  ;;  %v8240_v46 = vld [vmem:[#allocation2] sm:$0xf]  ;;  %v1749_v13 = vmul.f32 0.032258093, %v8235_v50 }
 0x1dc   : > { %1739 = vrot.lane.b32.xlu0 %v1737_v53, %s7747_s16  ;;  %v1248_v54 = vpop.permute.xlu0 %1247  ;;  %v1733_v2 = vld [vmem:[#allocation2] sm:$0xf]  ;;  %v1763_v1 = vmul.f32 0.45161295, %v8240_v46 }
 0x1dd   : > { %1250 = vst.msk [vmem:[#allocation2 + $0x8] sm:$0xf] %vm609_vm4, %v1248_v54  ;;  %v8247_v54 = vld [vmem:[#allocation2] sm:$0xf] }
 0x1de   : > { %1734 = vst.msk [vmem:[#allocation3 + $0x8] sm:$0xf] %vm527_vm3, %v1733_v2 }
 0x1e0   : > { %v1329_v40 = vpop.permute.xlu1 %1328  ;;  %1752 = vrot.lane.b32.xlu0 %v1750_v55, %s7747_s16  ;;  %v1410_v48 = vpop.permute.xlu0 %1409  ;;  %v1776_v55 = vmul.f32 0.9354838, %v8247_v54 }
 0x1e1   : > { %1331 = vst.msk [vmem:[#allocation2 + $0x8] sm:$0xf] %vm691_vm5, %v1329_v40  ;;  %v1810_v49 = vld [vmem:[#allocation2 + $0x4] sm:$0xf]  ;;  %v8253_v40 = vld [vmem:[#allocation2] sm:$0xf] }
 0x1e2   : > { %1412 = vst.msk [vmem:[#allocation2 + $0x8] sm:$0xf] %vm773_vm6, %v1410_v48  ;;  %v1812_v53 = vmul.f32 0.38709688, %v1810_v49  ;;  %v8314_v45 = vld [vmem:[#allocation2 + $0x4] sm:$0xf] }
 0x1e3   : > { %v8324_v33 = vld [vmem:[#allocation2 + $0x4] sm:$0xf] }
 0x1e4   : > { %1814 = vrot.lane.b32.xlu1 %v1812_v53, %s7747_s16  ;;  %1765 = vrot.lane.b32.xlu0 %v1763_v1, %s7747_s16  ;;  %v1568_v39 = vpop.permute.xlu1 %1567  ;;  %v1789_v53 = vmul.f32 0.41935492, %v8253_v40  ;;  %v8259_v1 = vld [vmem:[#allocation2] sm:$0xf] }
 0x1e5   : > { %1570 = vst.msk [vmem:[#allocation2 + $0xc] sm:$0xf] %vm609_vm4, %v1568_v39  ;;  %v1820_v39 = vld [vmem:[#allocation2 + $0x4] sm:$0xf]  ;;  %v1802_v0 = vmul.f32 0.9032259, %v8259_v1 }
 0x1e8   : > { %1778 = vrot.lane.b32.xlu0 %v1776_v55, %s7747_s16  ;;  %v1649_v2 = vpop.permute.xlu0 %1648  ;;  %v1730_v48 = vpop.permute.xlu1 %1729  ;;  %v1822_v55 = vmul.f32 0.8709676, %v1820_v39 }
 0x1e9   : > { %1651 = vst.msk [vmem:[#allocation2 + $0xc] sm:$0xf] %vm691_vm5, %v1649_v2  ;;  %v1908_v49 = vld [vmem:[#allocation2 + $0x8] sm:$0xf] }
 0x1ea   : > { %1732 = vst.msk [vmem:[#allocation2 + $0xc] sm:$0xf] %vm773_vm6, %v1730_v48  ;;  %v1910_v38 = vmul.f32 0.25806475, %v1908_v49  ;;  %v8268_v2 = vld [vmem:[%s12509_s3] ss:$2 sm:$0xff] }
 0x1eb   : > { %v8270_v49 = vld [vmem:[#allocation2 + $0x4] sm:$0xf]  ;;  %v8306_v37 = vrot.slane %v8268_v2, %v7945_v34  ;;  %v8400_v6 = vrot.slane %v8268_v2, %v7914_v21 }
 0x1ec   : > { %1912 = vrot.lane.b32.xlu1 %v1910_v38, %s7747_s16  ;;  %1791 = vrot.lane.b32.xlu0 %v1789_v53, %s7747_s16  ;;  %v8276_v38 = vrot.slane %v8268_v2, %v7912_v20  ;;  %v8279_v53 = vld [vmem:[#allocation2 + $0x4] sm:$0xf] }
 0x1ed   : > { %v1848_v39 = vmul.f32 0.83870983, %v8279_v53  ;;  %12854 = vst [vmem:[#allocation43_spill] sm:$0xff] %v8306_v37  ;;  %12859 = vst [vmem:[#allocation48_spill] sm:$0xff] %v8400_v6 }
 0x1ee   : > { %12851 = vst [vmem:[#allocation40_spill] sm:$0xff] %v8276_v38 }
 0x1f0   : > { %1804 = vrot.lane.b32.xlu0 %v1802_v0, %s7747_s16  ;;  %v1835_v0 = vmul.f32 0.35483885, %v8270_v49 }
 0x1f1   : > { %v2006_v63 = vld [vmem:[#allocation2 + $0xc] sm:$0xf] }
 0x1f2   : > { %v2008_v48 = vmul.f32 0.12903214, %v2006_v63  ;;  %v8286_v63 = vrot.slane %v8268_v2, %v7925_v26  ;;  %v2016_v16 = vld [vmem:[#allocation2 + $0xc] sm:$0xf] }
 0x1f3   : > { %v2018_v24 = vmul.f32 0.6129036, %v2016_v16  ;;  %v8374_v51 = vld [vmem:[#allocation2 + $0xc] sm:$0xf] }
 0x1f4   : > { %1824 = vrot.lane.b32.xlu0 %v1822_v55, %s7747_s16  ;;  %2010 = vrot.lane.b32.xlu1 %v2008_v48, %s7747_s16  ;;  %12852 = vst [vmem:[#allocation41_spill] sm:$0xff] %v8286_v63  ;;  %v8289_v55 = vld [vmem:[#allocation2 + $0x4] sm:$0xf]  ;;  %v8296_v48 = vrot.slane %v8268_v2, %v7937_v30  ;;  %v8378_v10 = vld [vmem:[#allocation2 + $0xc] sm:$0xf] }
 0x1f5   : > { %v8382_v44 = vld [vmem:[#allocation2 + $0xc] sm:$0xf] }
 0x1f6   : > { %12853 = vst [vmem:[#allocation42_spill] sm:$0xff] %v8296_v48  ;;  %v8390_v16 = vld [vmem:[#allocation2 + $0xc] sm:$0xf] }
 0x1f8   : > { %1837 = vrot.lane.b32.xlu0 %v1835_v0, %s7747_s16  ;;  %3302 = vrot.lane.b32.xlu1 %v8276_v38, %s7752_s25  ;;  %v1861_v0 = vmul.f32 0.3225808, %v8289_v55  ;;  %v8299_v38 = vld [vmem:[#allocation2 + $0x4] sm:$0xf] }
 0x1fc   : > { %1850 = vrot.lane.b32.xlu0 %v1848_v39, %s7747_s16  ;;  %3306 = vrot.lane.b32.xlu1 %v8286_v63, %s7752_s25  ;;  %v8311_v39 = vld [vmem:[%s12509_s3 + $0x1] ss:$2 sm:$0xff]  ;;  %v1874_v63 = vmul.f32 0.8064518, %v8299_v38 }
 0x1fd   : > { %v8331_v60 = vrot.slane %v8311_v39, %v7925_v26  ;;  %v8339_v15 = vrot.slane %v8311_v39, %v7937_v30  ;;  %v8348_v26 = vrot.slane %v8311_v39, %v7945_v34 }
 0x1ff   : > { %12856 = vst [vmem:[#allocation45_spill] sm:$0xff] %v8331_v60  ;;  %12857 = vst [vmem:[#allocation46_spill] sm:$0xff] %v8339_v15 }
 0x200   : > { %1863 = vrot.lane.b32.xlu0 %v1861_v0, %s7747_s16  ;;  %3310 = vrot.lane.b32.xlu1 %v8296_v48, %s7752_s25  ;;  %v8321_v0 = vrot.slane %v8311_v39, %v7912_v20  ;;  %v1887_v48 = vmul.f32 0.29032278, %v8314_v45  ;;  %12858 = vst [vmem:[#allocation47_spill] sm:$0xff] %v8348_v26 }
 0x202   : > { %12855 = vst [vmem:[#allocation44_spill] sm:$0xff] %v8321_v0 }
 0x204   : > { %1876 = vrot.lane.b32.xlu0 %v1874_v63, %s7747_s16  ;;  %3314 = vrot.lane.b32.xlu1 %v8306_v37, %s7752_s25  ;;  %v1918_v63 = vld [vmem:[#allocation2 + $0x8] sm:$0xf]  ;;  %v1900_v37 = vmul.f32 0.77419376, %v8324_v33 }
 0x205   : > { %v1920_v20 = vmul.f32 0.74193525, %v1918_v63  ;;  %v8351_v63 = vld [vmem:[#allocation2 + $0x8] sm:$0xf] }
 0x206   : > { %v1946_v30 = vmul.f32 0.7096777, %v8351_v63 }
 0x208   : > { %1889 = vrot.lane.b32.xlu0 %v1887_v48, %s7747_s16  ;;  %3376 = vrot.lane.b32.xlu1 %v8321_v0, %s7753_s28  ;;  %v8341_v48 = vld [vmem:[#allocation2 + $0x8] sm:$0xf] }
 0x209   : > { %v8365_v0 = vld [vmem:[#allocation2 + $0x8] sm:$0xf] }
 0x20c   : > { %1902 = vrot.lane.b32.xlu0 %v1900_v37, %s7747_s16  ;;  %3380 = vrot.lane.b32.xlu1 %v8331_v60, %s7753_s28  ;;  %v1933_v37 = vmul.f32 0.22580624, %v8341_v48  ;;  %v8357_v60 = vld [vmem:[#allocation2 + $0x8] sm:$0xf] }
 0x210   : > { %1922 = vrot.lane.b32.xlu0 %v1920_v20, %s7747_s16  ;;  %3384 = vrot.lane.b32.xlu1 %v8339_v15, %s7753_s28  ;;  %v1959_v20 = vmul.f32 0.1935482, %v8357_v60  ;;  %v8361_v15 = vld [vmem:[#allocation2 + $0x8] sm:$0xf] }
 0x211   : > { %v1972_v34 = vmul.f32 0.67741966, %v8361_v15 }
 0x214   : > { %1935 = vrot.lane.b32.xlu0 %v1933_v37, %s7747_s16  ;;  %3388 = vrot.lane.b32.xlu1 %v8348_v26, %s7753_s28  ;;  %v1985_v37 = vmul.f32 0.16129017, %v8365_v0  ;;  %v8369_v26 = vld [vmem:[#allocation2 + $0x8] sm:$0xf] }
 0x218   : > { %1948 = vrot.lane.b32.xlu0 %v1946_v30, %s7747_s16  ;;  %v1998_v30 = vmul.f32 0.6451616, %v8369_v26 }
 0x21c   : > { %1961 = vrot.lane.b32.xlu0 %v1959_v20, %s7747_s16  ;;  %v2031_v20 = vmul.f32 0.0967741, %v8374_v51 }
 0x220   : > { %1974 = vrot.lane.b32.xlu0 %v1972_v34, %s7747_s16  ;;  %v2044_v34 = vmul.f32 0.58064556, %v8378_v10 }
 0x224   : > { %1987 = vrot.lane.b32.xlu0 %v1985_v37, %s7747_s16  ;;  %v2057_v37 = vmul.f32 0.06451607, %v8382_v44 }
 0x228   : > { %2000 = vrot.lane.b32.xlu0 %v1998_v30, %s7747_s16  ;;  %v8386_v30 = vld [vmem:[#allocation2 + $0xc] sm:$0xf] }
 0x22c   : > { %2020 = vrot.lane.b32.xlu0 %v2018_v24, %s7747_s16  ;;  %v2070_v24 = vmul.f32 0.5483875, %v8386_v30 }
 0x230   : > { %2033 = vrot.lane.b32.xlu0 %v2031_v20, %s7747_s16  ;;  %v2083_v20 = vmul.f32 0.032258034, %v8390_v16 }
 0x234   : > { %2046 = vrot.lane.b32.xlu0 %v2044_v34, %s7747_s16  ;;  %v2819_v34 = vld [vmem:[%s12512_s6] sm:$0xff] }
 0x238   : > { %2059 = vrot.lane.b32.xlu0 %v2057_v37, %s7747_s16  ;;  %v8406_v37 = vrot.slane %v8268_v2, %v7930_v28 }
 0x23a   : > { %12860 = vst [vmem:[#allocation49_spill] sm:$0xff] %v8406_v37 }
 0x23c   : > { %2072 = vrot.lane.b32.xlu0 %v2070_v24, %s7747_s16  ;;  %v8412_v24 = vrot.slane %v8268_v2, %v7940_v32 }
 0x240   : > { %2085 = vrot.lane.b32.xlu0 %v2083_v20, %s7747_s16  ;;  %v1736_v20 = vmul.f32 0.516129, %v8231_v52  ;;  %v8427_v52 = vrot.slane %v8311_v39, %v7914_v21 }
 0x244   : > { %2822 = vperm.xlu0 %7049, %v2819_v34  }
 0x248   : > { %3304 = vrot.lane.b32.xlu0 %v8400_v6, %s7752_s25  ;;  %v8419_v6 = vrot.slane %v8268_v2, %v7948_v36 }
 0x24c   : > { %3308 = vrot.lane.b32.xlu0 %v8406_v37, %s7752_s25 }
 0x24e   : > { %v1740_v34 = vpop.permute.xlu0 %1739 }
 0x24f   : > { %v1742_v59 = vadd.f32 %v1740_v34, %v1736_v20  ;;  %v1762_v20 = vmul.f32 0.54838705, %v8240_v46  ;;  %v1788_v46 = vmul.f32 0.5806451, %v8253_v40 }
 0x250   : > { %3312 = vrot.lane.b32.xlu0 %v8412_v24, %s7752_s25 }
 0x251   : > { %1744 = vrot.lane.b32.xlu1 %v1742_v59, %s7750_s19  ;;  %v8435_v59 = vrot.slane %v8311_v39, %v7930_v28 }
 0x252   : > { %v1753_v37 = vpop.permute.xlu0 %1752 }
 0x253   : > { %v1755_v43 = vadd.f32 %v1753_v37, %v1749_v13  ;;  %v1775_v13 = vmul.f32 0.06451619, %v8247_v54  ;;  %v8451_v54 = vrot.slane %v8311_v39, %v7948_v36 }
 0x254   : > { %3316 = vrot.lane.b32.xlu0 %v8419_v6, %s7752_s25 }
 0x255   : > { %1757 = vrot.lane.b32.xlu1 %v1755_v43, %s7748_s17  ;;  %v8443_v43 = vrot.slane %v8311_v39, %v7940_v32  ;;  %12861 = vst [vmem:[#allocation50_spill] sm:$0xff] %v8451_v54  ;;  %v1834_v39 = vmul.f32 0.64516115, %v8270_v49  ;;  %v1847_v32 = vmul.f32 0.16129017, %v8279_v53 }
 0x256   : > { %v1766_v34 = vpop.permute.xlu0 %1765 }
 0x257   : > { %v1768_v2 = vadd.f32 %v1766_v34, %v1762_v20 }
 0x258   : > { %3378 = vrot.lane.b32.xlu0 %v8427_v52, %s7753_s28 }
 0x259   : > { %1770 = vrot.lane.b32.xlu1 %v1768_v2, %s7748_s17 }
 0x25a   : > { %v1779_v50 = vpop.permute.xlu0 %1778 }
 0x25b   : > { %v1781_v37 = vadd.f32 %v1779_v50, %v1775_v13  ;;  %v1819_v13 = vld [vmem:[#allocation2] sm:$0xf]  ;;  %v8456_v50 = vld [vmem:[#allocation2 + $0xc] sm:$0xf] }
 0x25c   : > { %3382 = vrot.lane.b32.xlu0 %v8435_v59, %s7753_s28  ;;  %v1821_v40 = vmul.f32 0.12903237, %v1819_v13  ;;  %v1860_v13 = vmul.f32 0.6774192, %v8289_v55 }
 0x25d   : > { %1783 = vrot.lane.b32.xlu1 %v1781_v37, %s7747_s16 }
 0x25e   : > { %v1792_v20 = vpop.permute.xlu0 %1791 }
 0x25f   : > { %v1794_v34 = vadd.f32 %v1792_v20, %v1788_v46  ;;  %v2096_v46 = vmul.f32 0.5161295, %v8456_v50 }
 0x260   : > { %3386 = vrot.lane.b32.xlu0 %v8443_v43, %s7753_s28 }
 0x261   : > { %1796 = vrot.lane.b32.xlu1 %v1794_v34, %s7747_s16 }
 0x262   : > { %v8454_v2 = vpop.permute.xlu0 %1804 }
 0x264   : > { %3390 = vrot.lane.b32.xlu0 %v8451_v54, %s7753_s28 }
 0x266   : > { %v1825_v37 = vpop.permute.xlu0 %1824 }
 0x267   : > { %v1827_v20 = vadd.f32 %v1825_v37, %v1821_v40  ;;  %v1873_v37 = vmul.f32 0.1935482, %v8299_v38  ;;  %v1932_v38 = vmul.f32 0.77419376, %v8341_v48 }
 0x268   : > { %2098 = vrot.lane.b32.xlu0 %v2096_v46, %s7747_s16 }
 0x269   : > { %1829 = vrot.lane.b32.xlu1 %v1827_v20, %s7750_s19 }
 0x26a   : > { %v1838_v34 = vpop.permute.xlu0 %1837 }
 0x26b   : > { %v1840_v36 = vadd.f32 %v1838_v34, %v1834_v39  ;;  %v8477_v34 = vpop.permute.xlu1 %1814 }
 0x26d   : > { %1842 = vrot.lane.b32.xlu1 %v1840_v36, %s7750_s19  ;;  %v1886_v36 = vmul.f32 0.7096772, %v8314_v45  ;;  %v1945_v45 = vmul.f32 0.2903223, %v8351_v63  ;;  %v1984_v63 = vmul.f32 0.83870983, %v8365_v0 }
 0x26e   : > { %v1851_v28 = vpop.permute.xlu0 %1850 }
 0x26f   : > { %v1853_v21 = vadd.f32 %v1851_v28, %v1847_v32 }
 0x271   : > { %1855 = vrot.lane.b32.xlu1 %v1853_v21, %s7748_s17  ;;  %v1917_v21 = vld [vmem:[#allocation2 + $0x4] sm:$0xf] }
 0x272   : > { %v1864_v54 = vpop.permute.xlu0 %1863  ;;  %v1919_v32 = vmul.f32 0.25806475, %v1917_v21 }
 0x273   : > { %v1866_v40 = vadd.f32 %v1864_v54, %v1860_v13 }
 0x275   : > { %1868 = vrot.lane.b32.xlu1 %v1866_v40, %s7748_s17 }
 0x276   : > { %v1877_v46 = vpop.permute.xlu0 %1876 }
 0x277   : > { %v1879_v49 = vadd.f32 %v1877_v46, %v1873_v37  ;;  %v8481_v37 = vpop.permute.xlu1 %1912 }
 0x279   : > { %1881 = vrot.lane.b32.xlu1 %v1879_v49, %s7747_s16  ;;  %v1958_v49 = vmul.f32 0.8064518, %v8357_v60 }
 0x27a   : > { %v1890_v20 = vpop.permute.xlu0 %1889 }
 0x27b   : > { %v1892_v53 = vadd.f32 %v1890_v20, %v1886_v36  ;;  %v8485_v20 = vpop.permute.xlu1 %2010 }
 0x27d   : > { %1894 = vrot.lane.b32.xlu1 %v1892_v53, %s7747_s16  ;;  %v1971_v53 = vmul.f32 0.32258034, %v8361_v15 }
 0x27e   : > { %v8473_v28 = vpop.permute.xlu0 %1902 }
 0x282   : > { %v1923_v55 = vpop.permute.xlu0 %1922 }
 0x283   : > { %v1925_v54 = vadd.f32 %v1923_v55, %v1919_v32  ;;  %v8489_v55 = vpop.permute.xlu1 %3302 }
 0x284   : > { %12862 = vst [vmem:[#allocation51_spill] sm:$0xff] %v8489_v55 }
 0x285   : > { %1927 = vrot.lane.b32.xlu1 %v1925_v54, %s7750_s19 }
 0x286   : > { %v1936_v39 = vpop.permute.xlu0 %1935 }
 0x287   : > { %v1938_v13 = vadd.f32 %v1936_v39, %v1932_v38  ;;  %v8494_v60 = vpop.permute.xlu1 %3306 }
 0x288   : > { %12863 = vst [vmem:[#allocation52_spill] sm:$0xff] %v8494_v60 }
 0x289   : > { %1940 = vrot.lane.b32.xlu1 %v1938_v13, %s7750_s19  ;;  %v2015_v13 = vld [vmem:[#allocation2 + $0x8] sm:$0xf] }
 0x28a   : > { %v1949_v40 = vpop.permute.xlu0 %1948 }
 0x28b   : > { %v1951_v46 = vadd.f32 %v1949_v40, %v1945_v45  ;;  %v2017_v45 = vmul.f32 0.3870964, %v2015_v13 }
 0x28d   : > { %1953 = vrot.lane.b32.xlu1 %v1951_v46, %s7748_s17  ;;  %v8498_v46 = vpop.permute.xlu1 %3310 }
 0x28e   : > { %v1962_v36 = vpop.permute.xlu0 %1961  ;;  %12864 = vst [vmem:[#allocation53_spill] sm:$0xff] %v8498_v46 }
 0x28f   : > { %v1964_v48 = vadd.f32 %v1962_v36, %v1958_v49  ;;  %v2030_v49 = vmul.f32 0.9032259, %v8374_v51  ;;  %v2069_v51 = vmul.f32 0.45161247, %v8386_v30 }
 0x291   : > { %1966 = vrot.lane.b32.xlu1 %v1964_v48, %s7748_s17  ;;  %v2043_v48 = vmul.f32 0.41935444, %v8378_v10  ;;  %v2082_v10 = vmul.f32 0.96774197, %v8390_v16  ;;  %v1809_v16 = vld [vmem:[#allocation2] sm:$0xf] }
 0x292   : > { %v1975_v21 = vpop.permute.xlu0 %1974 }
 0x293   : > { %v1977_v32 = vadd.f32 %v1975_v21, %v1971_v53  ;;  %v8504_v53 = vpop.permute.xlu1 %3314 }
 0x294   : > { %12865 = vst [vmem:[#allocation54_spill] sm:$0xff] %v8504_v53 }
 0x295   : > { %1979 = vrot.lane.b32.xlu1 %v1977_v32, %s7747_s16 }
 0x296   : > { %v1988_v54 = vpop.permute.xlu0 %1987 }
 0x297   : > { %v1990_v38 = vadd.f32 %v1988_v54, %v1984_v63  ;;  %v2056_v63 = vmul.f32 0.93548393, %v8382_v44  ;;  %v8508_v13 = vpop.permute.xlu1 %3376 }
 0x299   : > { %1992 = vrot.lane.b32.xlu1 %v1990_v38, %s7747_s16 }
 0x29a   : > { %v8496_v39 = vpop.permute.xlu0 %2000 }
 0x29e   : > { %v2021_v40 = vpop.permute.xlu0 %2020 }
 0x29f   : > { %v2023_v15 = vadd.f32 %v2021_v40, %v2017_v45 }
 0x2a1   : > { %2025 = vrot.lane.b32.xlu1 %v2023_v15, %s7750_s19  ;;  %v8514_v15 = vpop.permute.xlu1 %3380 }
 0x2a2   : > { %v2034_v36 = vpop.permute.xlu0 %2033 }
 0x2a3   : > { %v2036_v0 = vadd.f32 %v2034_v36, %v2030_v49 }
 0x2a5   : > { %2038 = vrot.lane.b32.xlu1 %v2036_v0, %s7750_s19  ;;  %v8517_v44 = vpop.permute.xlu1 %3384  ;;  %s7762_s19 = smov 126  }
 0x2a6   : > { %v2047_v21 = vpop.permute.xlu0 %2046 }
 0x2a7   : > { %v2049_v32 = vadd.f32 %v2047_v21, %v2043_v48 }
 0x2a9   : > { %2051 = vrot.lane.b32.xlu1 %v2049_v32, %s7748_s17  ;;  %v8519_v0 = vpop.permute.xlu1 %3388 }
 0x2aa   : > { %v2060_v54 = vpop.permute.xlu0 %2059 }
 0x2ab   : > { %v2062_v38 = vadd.f32 %v2060_v54, %v2056_v63  ;;  %v1801_v63 = vmul.f32 0.0967741, %v8259_v1  ;;  %v1811_v54 = vmul.f32 0.6129031, %v1809_v16 }
 0x2ad   : > { %2064 = vrot.lane.b32.xlu1 %v2062_v38, %s7748_s17  ;;  %v2284_v38 = vsel %vm2283_vm7, %v8168_v47, %v8111_v7 }
 0x2ae   : > { %v2073_v45 = vpop.permute.xlu0 %2072 }
 0x2af   : > { %v2075_v40 = vadd.f32 %v2073_v45, %v2069_v51  ;;  %v1807_v51 = vadd.f32 %v8454_v2, %v1801_v63  ;;  %v2410_v63 = vsel %vm436_vm2, %v8206_v23, %v8141_v27 }
 0x2b1   : > { %2077 = vrot.lane.b32.xlu1 %v2075_v40, %s7747_s16 }
 0x2b2   : > { %v2086_v49 = vpop.permute.xlu0 %2085 }
 0x2b3   : > { %v2088_v36 = vadd.f32 %v2086_v49, %v2082_v10  ;;  %v1817_v10 = vadd.f32 %v8477_v34, %v1811_v54  ;;  %v8534_v49 = vld [vmem:[#allocation3] sm:$0xff] }
 0x2b5   : > { %2090 = vrot.lane.b32.xlu1 %v2088_v36, %s7747_s16 }
 0x2c3   : > { %v1745_v48 = vpop.permute.xlu1 %1744 }
 0x2c4   : > { %1747 = vst.msk [vmem:[#allocation3 + $0x8] sm:$0xf] %vm609_vm4, %v1745_v48  ;;  %v2300_v48 = vmul.f32 %v8534_v49, %v8168_v47 }
 0x2c7   : > { %v1758_v30 = vpop.permute.xlu1 %1757 }
 0x2c8   : > { %1760 = vst.msk [vmem:[#allocation3 + $0x8] sm:$0xf] %vm691_vm5, %v1758_v30  ;;  %v2369_v30 = vsel %vm2368_vm8, %v8198_v61, %v8129_v17 }
 0x2cb   : > { %v1771_v21 = vpop.permute.xlu1 %1770 }
 0x2cc   : > { %1773 = vst.msk [vmem:[#allocation3 + $0x8] sm:$0xf] %vm773_vm6, %v1771_v21 }
 0x2cf   : > { %v1784_v32 = vpop.permute.xlu1 %1783 }
 0x2d0   : > { %1786 = vst.msk [vmem:[#allocation3 + $0x10] sm:$0xf] %vm527_vm3, %v1784_v32 }
 0x2d3   : > { %v1797_v45 = vpop.permute.xlu1 %1796  ;;  %v8530_v40 = vld [vmem:[#allocation3 + $0x8] sm:$0xff] }
 0x2d4   : > { %1799 = vst.msk [vmem:[#allocation3 + $0x10] sm:$0xf] %vm609_vm4, %v1797_v45  ;;  %v7050_v36 = vpack.i.bf16 %v8530_v40, %v8534_v49  ;;  %v2301_v1 = vmul.f32 %v2284_v38, %v8530_v40  ;;  %v2385_v16 = vmul.f32 %v8198_v61, %v8530_v40  ;;  %v2242_v45 = vsel %vm2241_vm9, %v8159_v41, %v8103_v3 }
 0x2d5   : > { %1808 = vst.msk [vmem:[#allocation3 + $0x10] sm:$0xf] %vm691_vm5, %v1807_v51  ;;  %v2426_v61 = vmul.f32 %v8206_v23, %v8530_v40 }
 0x2d6   : > { %1818 = vst.msk [vmem:[#allocation3 + $0x10] sm:$0xf] %vm773_vm6, %v1817_v10  ;;  %7051 = vrot.lane.b32.xlu1 %v7050_v36, %s7754_s29  ;;  %v7070_v2 = vpack.i.bf16 %v2301_v1, %v2300_v48  ;;  %v2259_v10 = vmul.f32 %v2242_v45, %v8530_v40  ;;  %v2258_v1 = vmul.f32 %v8534_v49, %v8159_v41 }
 0x2d7   : > { %v2343_v41 = vmul.f32 %v8190_v57, %v8530_v40 }
 0x2da   : > { %7071 = vrot.lane.b32.xlu1 %v7070_v2, %s7747_s16  ;;  %v2327_v2 = vsel %vm2326_vm10, %v8190_v57, %v8119_v11 }
 0x2db   : > { %v1830_v34 = vpop.permute.xlu1 %1829 }
 0x2dc   : > { %1832 = vst.msk [vmem:[#allocation3 + $0x18] sm:$0xf] %vm527_vm3, %v1830_v34  ;;  %v7065_v34 = vpack.i.bf16 %v2259_v10, %v2258_v1  ;;  %v2285_v1 = vsel %vm2283_vm7, %v8111_v7, %v8174_v56  ;;  %v2370_v7 = vsel %vm2368_vm8, %v8129_v17, %v8200_v62 }
 0x2dd   : > { %v8549_v21 = vld [vmem:[#allocation3 + $0x10] sm:$0xff] }
 0x2de   : > { %v7055_v47 = vpack.i.bf16 %v8549_v21, %v8530_v40  ;;  %v2386_v32 = vmul.f32 %v2369_v30, %v8549_v21  ;;  %v2427_v51 = vmul.f32 %v2410_v63, %v8549_v21  ;;  %v2344_v23 = vmul.f32 %v2327_v2, %v8549_v21 }
 0x2df   : > { %v1843_v54 = vpop.permute.xlu1 %1842  ;;  %v1899_v63 = vmul.f32 0.22580624, %v8324_v33 }
 0x2e0   : > { %1845 = vst.msk [vmem:[#allocation3 + $0x18] sm:$0xf] %vm609_vm4, %v1843_v54  ;;  %7056 = vrot.lane.b32.xlu0 %v7055_v47, %s7752_s25  ;;  %v7080_v38 = vpack.i.bf16 %v2386_v32, %v2385_v16  ;;  %v7085_v48 = vpack.i.bf16 %v2427_v51, %v2426_v61  ;;  %v1907_v16 = vld [vmem:[#allocation2 + $0x4] sm:$0xf]  ;;  %v2286_v51 = vsel %vm2283_vm7, %v8174_v56, %v8113_v8 }
 0x2e1   : > { %v1909_v54 = vmul.f32 0.74193525, %v1907_v16  ;;  %v1905_v45 = vadd.f32 %v8473_v28, %v1899_v63  ;;  %v2302_v28 = vmul.f32 %v2285_v1, %v8549_v21  ;;  %v2371_v56 = vsel %vm2368_vm8, %v8200_v62, %v8131_v18 }
 0x2e2   : > { %7081 = vrot.lane.b32.xlu1 %v7080_v38, %s7748_s17  ;;  %v8585_v38 = vpop.permute.xlu0 %2822  ;;  %v2412_v16 = vsel %vm436_vm2, %v8208_v25, %v8143_v29  ;;  %v2244_v63 = vsel %vm2241_vm9, %v8161_v42, %v8105_v4 }
 0x2e3   : > { %v1856_v36 = vpop.permute.xlu1 %1855  ;;  %v1915_v10 = vadd.f32 %v8481_v37, %v1909_v54  ;;  %v2411_v54 = vsel %vm436_vm2, %v8141_v27, %v8208_v25  ;;  %v2329_v25 = vsel %vm2326_vm10, %v8192_v58, %v8121_v12 }
 0x2e4   : > { %1858 = vst.msk [vmem:[#allocation3 + $0x18] sm:$0xf] %vm691_vm5, %v1856_v36  ;;  %7061 = vrot.lane.b32.xlu0 %v7055_v47, %s7759_s18  ;;  %v7075_v47 = vpack.i.bf16 %v2344_v23, %v2343_v41 }
 0x2e6   : > { %7086 = vrot.lane.b32.xlu1 %v7085_v48, %s7760_s20  ;;  %v8605_v37 = vpop.permute.xlu0 %3304 }
 0x2e7   : > { %v1869_v30 = vpop.permute.xlu1 %1868  ;;  %12866 = vst [vmem:[#allocation55_spill] sm:$0xff] %v8605_v37 }
 0x2e8   : > { %1871 = vst.msk [vmem:[#allocation3 + $0x18] sm:$0xf] %vm773_vm6, %v1869_v30  ;;  %7066 = vrot.lane.b32.xlu0 %v7065_v34, %s7762_s19 }
 0x2ea   : > { %v8617_v23 = vpop.permute.xlu0 %3308 }
 0x2eb   : > { %v1882_v32 = vpop.permute.xlu1 %1881  ;;  %12867 = vst [vmem:[#allocation56_spill] sm:$0xff] %v8617_v23 }
 0x2ec   : > { %1884 = vst.msk [vmem:[#allocation3 + $0x20] sm:$0xf] %vm527_vm3, %v1882_v32  ;;  %7076 = vrot.lane.b32.xlu0 %v7075_v47, %s7758_s13 }
 0x2ef   : > { %v1895_v61 = vpop.permute.xlu1 %1894  ;;  %v8591_v57 = vld [vmem:[#allocation3 + $0x18] sm:$0xff] }
 0x2f0   : > { %1897 = vst.msk [vmem:[#allocation3 + $0x20] sm:$0xf] %vm609_vm4, %v1895_v61  ;;  %v7090_v36 = vpack.i.bf16 %v8591_v57, %v8549_v21  ;;  %v2303_v33 = vmul.f32 %v2286_v51, %v8591_v57  ;;  %v2387_v41 = vmul.f32 %v2370_v7, %v8591_v57  ;;  %v2428_v51 = vmul.f32 %v2411_v54, %v8591_v57 }
 0x2f1   : > { %1906 = vst.msk [vmem:[#allocation3 + $0x20] sm:$0xf] %vm691_vm5, %v1905_v45  ;;  %v2261_v45 = vmul.f32 %v2244_v63, %v8591_v57  ;;  %v2243_v61 = vsel %vm2241_vm9, %v8103_v3, %v8161_v42  ;;  %v2328_v3 = vsel %vm2326_vm10, %v8119_v11, %v8192_v58  ;;  %v2288_v11 = vsel %vm2283_vm7, %v8180_v22, %v8115_v9 }
 0x2f2   : > { %1916 = vst.msk [vmem:[#allocation3 + $0x20] sm:$0xf] %vm773_vm6, %v1915_v10  ;;  %7091 = vrot.lane.b32.xlu0 %v7090_v36, %s7754_s29  ;;  %v7110_v48 = vpack.i.bf16 %v2303_v33, %v2302_v28  ;;  %v8641_v36 = vpop.permute.xlu0 %3312  ;;  %v2260_v27 = vmul.f32 %v2243_v61, %v8549_v21  ;;  %v2287_v54 = vsel %vm2283_vm7, %v8113_v8, %v8180_v22 }
 0x2f3   : > { %12868 = vst [vmem:[#allocation57_spill] sm:$0xff] %v8641_v36  ;;  %v2372_v8 = vsel %vm2368_vm8, %v8131_v18, %v8202_v14  ;;  %v2373_v22 = vsel %vm2368_vm8, %v8202_v14, %v8133_v19 }
 0x2f4   : > { %v7105_v1 = vpack.i.bf16 %v2261_v45, %v2260_v27 }
 0x2f6   : > { %7111 = vrot.lane.b32.xlu0 %v7110_v48, %s7747_s16  ;;  %v2345_v48 = vmul.f32 %v2328_v3, %v8591_v57  ;;  %v12870_v3 = vld [vmem:[#allocation29_spill] sm:$0xff] }
 0x2f7   : > { %v1928_v2 = vpop.permute.xlu1 %1927 }
 0x2f8   : > { %1930 = vst.msk [vmem:[#allocation3 + $0x28] sm:$0xf] %vm527_vm3, %v1928_v2  ;;  %v8657_v2 = vpop.permute.xlu0 %3316 }
 0x2f9   : > { %v8615_v34 = vld [vmem:[#allocation3 + $0x20] sm:$0xff]  ;;  %12869 = vst [vmem:[#allocation58_spill] sm:$0xff] %v8657_v2 }
 0x2fa   : > { %v7095_v30 = vpack.i.bf16 %v8615_v34, %v8591_v57  ;;  %v2388_v47 = vmul.f32 %v2371_v56, %v8615_v34  ;;  %v2429_v32 = vmul.f32 %v2412_v16, %v8615_v34  ;;  %v2346_v28 = vmul.f32 %v2329_v25, %v8615_v34  ;;  %v2005_v56 = vld [vmem:[#allocation2 + $0x8] sm:$0xf] }
 0x2fb   : > { %v1941_v17 = vpop.permute.xlu1 %1940  ;;  %v2414_v25 = vsel %vm436_vm2, %v8210_v35, %v8145_v31 }
 0x2fc   : > { %1943 = vst.msk [vmem:[#allocation3 + $0x28] sm:$0xf] %vm609_vm4, %v1941_v17  ;;  %7096 = vrot.lane.b32.xlu1 %v7095_v30, %s7752_s25  ;;  %v7120_v62 = vpack.i.bf16 %v2388_v47, %v2387_v41  ;;  %v7125_v33 = vpack.i.bf16 %v2429_v32, %v2428_v51  ;;  %v7115_v7 = vpack.i.bf16 %v2346_v28, %v2345_v48  ;;  %v1997_v41 = vmul.f32 0.35483837, %v8369_v26  ;;  %v8669_v32 = vpop.permute.xlu0 %3378 }
 0x2fd   : > { %v2007_v47 = vmul.f32 0.87096786, %v2005_v56  ;;  %v2413_v48 = vsel %vm436_vm2, %v8143_v29, %v8210_v35  ;;  %v12872_v29 = vld [vmem:[#allocation32_spill] sm:$0xff] }
 0x2fe   : > { %7121 = vrot.lane.b32.xlu0 %v7120_v62, %s7748_s17  ;;  %v2003_v58 = vadd.f32 %v8496_v39, %v1997_v41 }
 0x2ff   : > { %v1954_v10 = vpop.permute.xlu1 %1953  ;;  %v2013_v62 = vadd.f32 %v8485_v20, %v2007_v47  ;;  %v2304_v20 = vmul.f32 %v2287_v54, %v8615_v34 }
 0x300   : > { %1956 = vst.msk [vmem:[#allocation3 + $0x28] sm:$0xf] %vm691_vm5, %v1954_v10  ;;  %7101 = vrot.lane.b32.xlu1 %v7095_v30, %s7759_s18  ;;  %v8682_v51 = vpop.permute.xlu0 %3382 }
 0x302   : > { %7126 = vrot.lane.b32.xlu0 %v7125_v33, %s7760_s20 }
 0x303   : > { %v1967_v42 = vpop.permute.xlu1 %1966 }
 0x304   : > { %1969 = vst.msk [vmem:[#allocation3 + $0x28] sm:$0xf] %vm773_vm6, %v1967_v42  ;;  %7106 = vrot.lane.b32.xlu1 %v7105_v1, %s7762_s19  ;;  %v8701_v28 = vpop.permute.xlu0 %3386  ;;  %v2246_v42 = vsel %vm2241_vm9, %v12870_v3, %v8107_v5 }
 0x307   : > { %v1980_v30 = vpop.permute.xlu1 %1979 }
 0x308   : > { %1982 = vst.msk [vmem:[#allocation3 + $0x30] sm:$0xf] %vm527_vm3, %v1980_v30  ;;  %7116 = vrot.lane.b32.xlu1 %v7115_v7, %s7758_s13  ;;  %v2245_v30 = vsel %vm2241_vm9, %v8105_v4, %v12870_v3  ;;  %v2330_v4 = vsel %vm2326_vm10, %v8121_v12, %v12872_v29 }
 0x30b   : > { %v1993_v16 = vpop.permute.xlu1 %1992  ;;  %v8666_v17 = vld [vmem:[#allocation3 + $0x28] sm:$0xff] }
 0x30c   : > { %1995 = vst.msk [vmem:[#allocation3 + $0x30] sm:$0xf] %vm609_vm4, %v1993_v16  ;;  %v7130_v63 = vpack.i.bf16 %v8666_v17, %v8615_v34  ;;  %v2305_v26 = vmul.f32 %v2288_v11, %v8666_v17  ;;  %v2389_v33 = vmul.f32 %v2372_v8, %v8666_v17  ;;  %v2430_v7 = vmul.f32 %v2413_v48, %v8666_v17  ;;  %v8724_v16 = vpop.permute.xlu0 %3390  ;;  %v12876_v48 = vld [vmem:[#allocation31_spill] sm:$0xff] }
 0x30d   : > { %2004 = vst.msk [vmem:[#allocation3 + $0x30] sm:$0xf] %vm691_vm5, %v2003_v58  ;;  %v2263_v56 = vmul.f32 %v2246_v42, %v8666_v17  ;;  %v2262_v11 = vmul.f32 %v2245_v30, %v8615_v34  ;;  %v12871_v58 = vld [vmem:[#allocation21_spill] sm:$0xff]  ;;  %v2347_v54 = vmul.f32 %v2330_v4, %v8666_v17  ;;  %v2095_v8 = vmul.f32 0.4838705, %v8456_v50  ;;  %v12875_v42 = vld [vmem:[#allocation20_spill] sm:$0xff] }
 0x30e   : > { %2014 = vst.msk [vmem:[#allocation3 + $0x30] sm:$0xf] %vm773_vm6, %v2013_v62  ;;  %7131 = vrot.lane.b32.xlu1 %v7130_v63, %s7754_s29  ;;  %v7150_v39 = vpack.i.bf16 %v2305_v26, %v2304_v20  ;;  %v2331_v35 = vsel %vm2326_vm10, %v12872_v29, %v12871_v58 }
 0x30f   : > { %v7145_v62 = vpack.i.bf16 %v2263_v56, %v2262_v11  ;;  %v2289_v11 = vsel %vm2283_vm7, %v8115_v9, %v12876_v48 }
 0x312   : > { %7151 = vrot.lane.b32.xlu1 %v7150_v39, %s7747_s16 }
 0x313   : > { %v2026_v45 = vpop.permute.xlu1 %2025 }
 0x314   : > { %2028 = vst.msk [vmem:[#allocation3 + $0x38] sm:$0xf] %vm527_vm3, %v2026_v45  ;;  %v2099_v45 = vpop.permute.xlu0 %2098 }
 0x315   : > { %v8692_v61 = vld [vmem:[#allocation3 + $0x30] sm:$0xff] }
 0x316   : > { %v7135_v10 = vpack.i.bf16 %v8692_v61, %v8666_v17  ;;  %v2390_v27 = vmul.f32 %v2373_v22, %v8692_v61  ;;  %v2431_v14 = vmul.f32 %v2414_v25, %v8692_v61  ;;  %v2348_v63 = vmul.f32 %v2331_v35, %v8692_v61 }
 0x317   : > { %v2039_v1 = vpop.permute.xlu1 %2038  ;;  %v2101_v22 = vadd.f32 %v2099_v45, %v2095_v8  ;;  %v2306_v35 = vmul.f32 %v2289_v11, %v8692_v61  ;;  %v12880_v45 = vld [vmem:[#allocation33_spill] sm:$0xff] }
 0x318   : > { %2041 = vst.msk [vmem:[#allocation3 + $0x38] sm:$0xf] %vm609_vm4, %v2039_v1  ;;  %7136 = vrot.lane.b32.xlu0 %v7135_v10, %s7752_s25  ;;  %v7160_v18 = vpack.i.bf16 %v2390_v27, %v2389_v33  ;;  %v7165_v47 = vpack.i.bf16 %v2431_v14, %v2430_v7  ;;  %v7155_v20 = vpack.i.bf16 %v2348_v63, %v2347_v54  ;;  %v2103_v27 = vld [vmem:[#allocation2 + $0xc] sm:$0xf] }
 0x319   : > { %v12874_v14 = vld [vmem:[#allocation30_spill] sm:$0xff]  ;;  %v2290_v7 = vsel %vm2283_vm7, %v12876_v48, %v12875_v42 }
 0x31a   : > { %7161 = vrot.lane.b32.xlu1 %v7160_v18, %s7748_s17  ;;  %v12873_v18 = vld [vmem:[#allocation19_spill] sm:$0xff]  ;;  %v12878_v63 = vld [vmem:[#allocation34_spill] sm:$0xff] }
 0x31b   : > { %v2052_v41 = vpop.permute.xlu1 %2051  ;;  %v2248_v3 = vsel %vm2241_vm9, %v12874_v14, %v12873_v18  ;;  %v2374_v9 = vsel %vm2368_vm8, %v8133_v19, %v12878_v63 }
 0x31c   : > { %2054 = vst.msk [vmem:[#allocation3 + $0x38] sm:$0xf] %vm691_vm5, %v2052_v41  ;;  %7141 = vrot.lane.b32.xlu0 %v7135_v10, %s7759_s18 }
 0x31e   : > { %7166 = vrot.lane.b32.xlu1 %v7165_v47, %s7760_s20  ;;  %v2247_v47 = vsel %vm2241_vm9, %v8107_v5, %v12874_v14 }
 0x31f   : > { %v2065_v26 = vpop.permute.xlu1 %2064  ;;  %v2264_v29 = vmul.f32 %v2247_v47, %v8692_v61 }
 0x320   : > { %2067 = vst.msk [vmem:[#allocation3 + $0x38] sm:$0xf] %vm773_vm6, %v2065_v26  ;;  %7146 = vrot.lane.b32.xlu0 %v7145_v62, %s7762_s19  ;;  %v12877_v62 = vld [vmem:[#allocation23_spill] sm:$0xff] }
 0x321   : > { %v2375_v4 = vsel %vm2368_vm8, %v12878_v63, %v12877_v62 }
 0x323   : > { %v2078_v39 = vpop.permute.xlu1 %2077 }
 0x324   : > { %2080 = vst.msk [vmem:[#allocation3 + $0x40] sm:$0xf] %vm527_vm3, %v2078_v39  ;;  %7156 = vrot.lane.b32.xlu0 %v7155_v20, %s7758_s13  ;;  %v12879_v39 = vld [vmem:[#allocation22_spill] sm:$0xff]  ;;  %vm3037_vm3 = vcmask 1043456  }
 0x325   : > { %v2333_v8 = vsel %vm2326_vm10, %v12880_v45, %v12879_v39 }
 0x327   : > { %v2091_v10 = vpop.permute.xlu1 %2090  ;;  %v8737_v33 = vld [vmem:[#allocation3 + $0x38] sm:$0xff] }
 0x328   : > { %2093 = vst.msk [vmem:[#allocation3 + $0x40] sm:$0xf] %vm609_vm4, %v2091_v10  ;;  %v7170_v12 = vpack.i.bf16 %v8737_v33, %v8692_v61  ;;  %v2265_v30 = vmul.f32 %v2248_v3, %v8737_v33  ;;  %v2307_v41 = vmul.f32 %v2290_v7, %v8737_v33  ;;  %v2391_v20 = vmul.f32 %v2374_v9, %v8737_v33  ;;  %v12882_v10 = vld [vmem:[#allocation35_spill] sm:$0xff] }
 0x329   : > { %2102 = vst.msk [vmem:[#allocation3 + $0x40] sm:$0xf] %vm691_vm5, %v2101_v22  ;;  %v12881_v22 = vld [vmem:[#allocation24_spill] sm:$0xff]  ;;  %v2415_v14 = vsel %vm436_vm2, %v8145_v31, %v12882_v10  ;;  %vm3033_vm4 = vcmask 588800  }
 0x32a   : > { %2104 = vst.msk [vmem:[#allocation3 + $0x40] sm:$0xf] %vm773_vm6, %v2103_v27  ;;  %7171 = vrot.lane.b32.xlu0 %v7170_v12, %s7754_s29  ;;  %v7190_v26 = vpack.i.bf16 %v2265_v30, %v2264_v29  ;;  %v7195_v54 = vpack.i.bf16 %v2307_v41, %v2306_v35  ;;  %v2416_v12 = vsel %vm436_vm2, %v12882_v10, %v12881_v22  ;;  %v12883_v41 = vld [vmem:[#allocation25_spill] sm:$0xff] }
 0x32b   : > { %v2183_v31 = vmul.f32 %v8534_v49, %v12883_v41 }
 0x331   : > { %v8745_v25 = vld [vmem:[#allocation3 + $0x40] sm:$0xff] }
 0x332   : > { %v7185_v50 = vpack.i.bf16 %v8745_v25, %v8737_v33  ;;  %v7175_v1 = vpack.i.bf16 %v8534_v49, %v8745_v25  ;;  %v2266_v56 = vmul.f32 %v12873_v18, %v8745_v25  ;;  %v2392_v5 = vmul.f32 %v2375_v4, %v8745_v25 }
 0x333   : > { %v2308_v27 = vmul.f32 %v12875_v42, %v8745_v25  ;;  %v2350_v19 = vmul.f32 %v2333_v8, %v8745_v25  ;;  %v2332_v18 = vsel %vm2326_vm10, %v12871_v58, %v12880_v45  ;;  %v2432_v42 = vmul.f32 %v2415_v14, %v8737_v33 }
 0x334   : > { %7186 = vrot.lane.b32.xlu0 %v7185_v50, %s7759_s18  ;;  %7176 = vrot.lane.b32.xlu1 %v7175_v1, %s7754_s29  ;;  %v2433_v1 = vmul.f32 %v2416_v12, %v8745_v25  ;;  %v2349_v3 = vmul.f32 %v2332_v18, %v8737_v33 }
 0x336   : > { %v7200_v48 = vpack.i.bf16 %v2350_v19, %v2349_v3  ;;  %v7210_v7 = vpack.i.bf16 %v2433_v1, %v2432_v42 }
 0x338   : > { %7181 = vrot.lane.b32.xlu1 %v7185_v50, %s7752_s25  ;;  %2504 = vrot.lane.b32.xlu0 %v2266_v56, %s7762_s19  ;;  %v7205_v50 = vpack.i.bf16 %v2392_v5, %v2391_v20 }
 0x33c   : > { %7191 = vrot.lane.b32.xlu1 %v7190_v26, %s7762_s19  ;;  %7196 = vrot.lane.b32.xlu0 %v7195_v54, %s7747_s16 }
 0x340   : > { %2549 = vrot.lane.b32.xlu1 %v2308_v27, %s7747_s16  ;;  %7206 = vrot.lane.b32.xlu0 %v7205_v50, %s7748_s17  ;;  %v12884_v27 = vld [vmem:[#allocation15_spill] sm:$0xff] }
 0x341   : > { %v2167_v50 = vsel %vm2166_vm13, %v12883_v41, %v12884_v27 }
 0x342   : > { %v2184_v1 = vmul.f32 %v2167_v50, %v8530_v40 }
 0x344   : > { %7201 = vrot.lane.b32.xlu1 %v7200_v48, %s7758_s13  ;;  %7211 = vrot.lane.b32.xlu0 %v7210_v7, %s7760_s20 }
 0x348   : > { %v7052_v56 = vpop.permute.xlu1 %7051 }
 0x349   : > { %v7054_v58 = vunpack.i.h.bf16 %v7052_v56  ;;  %v7053_v30 = vunpack.i.l.bf16 %v7052_v56 }
 0x34b   : > { %v2462_v47 = vsel %vm2283_vm7, %v7053_v30, %v7054_v58 }
 0x34c   : > { %v2773_v11 = vpack.c.bf16 %v2462_v47, %v2183_v31  ;;  %v7072_v29 = vpop.permute.xlu1 %7071 }
 0x34d   : > { %v7074_v54 = vunpack.i.h.bf16 %v7072_v29  ;;  %v7073_v5 = vunpack.i.l.bf16 %v7072_v29 }
 0x34e   : > { %2870 = vrot.lane.b32.xlu1 %v2773_v11, %s7757_s15 }
 0x34f   : > { %v2552_v45 = vsel %vm2551_vm11, %v7073_v5, %v7074_v54 }
 0x352   : > { %v8809_v35 = vpop.permute.xlu0 %7056 }
 0x353   : > { %v7058_v48 = vunpack.i.l.bf16 %v8809_v35  ;;  %v7059_v40 = vunpack.i.h.bf16 %v8809_v35 }
 0x354   : > { %v8811_v62 = vpop.permute.xlu1 %7081 }
 0x355   : > { %v7083_v4 = vunpack.i.l.bf16 %v8811_v62  ;;  %v2585_v29 = vsel %vm2166_vm13, %v7058_v48, %v7059_v40 }
 0x356   : > { %v8813_v63 = vpop.permute.xlu0 %7061 }
 0x357   : > { %v7063_v26 = vunpack.i.l.bf16 %v8813_v63  ;;  %v7064_v35 = vunpack.i.h.bf16 %v8813_v63 }
 0x358   : > { %v8829_v42 = vpop.permute.xlu1 %7086 }
 0x359   : > { %v2800_v9 = vpack.c.bf16 %v7063_v26, %v7083_v4  ;;  %v7088_v7 = vunpack.i.l.bf16 %v8829_v42  ;;  %v2711_v50 = vsel %vm2710_vm15, %v7063_v26, %v7064_v35 }
 0x35a   : > { %v7067_v49 = vpop.permute.xlu0 %7066 }
 0x35b   : > { %v7069_v20 = vunpack.i.h.bf16 %v7067_v49  ;;  %v7068_v39 = vunpack.i.l.bf16 %v7067_v49  ;;  %2924 = vrot.lane.b32.xlu0 %v2800_v9, %s7757_s15 }
 0x35d   : > { %v2507_v8 = vsel %vm2506_vm12, %v7068_v39, %v7069_v20 }
 0x35e   : > { %v2782_v22 = vpack.c.bf16 %v2552_v45, %v2507_v8  ;;  %v8820_v10 = vpop.permute.xlu0 %7076  ;;  %v7084_v45 = vunpack.i.h.bf16 %v8811_v62 }
 0x35f   : > { %v7078_v14 = vunpack.i.l.bf16 %v8820_v10  ;;  %v7079_v30 = vunpack.i.h.bf16 %v8820_v10 }
 0x360   : > { %2888 = vrot.lane.b32.xlu0 %v2782_v22, %s7757_s15 }
 0x361   : > { %v2791_v56 = vpack.c.bf16 %v7078_v14, %v7058_v48  ;;  %v2629_v31 = vsel %vm2628_vm14, %v7078_v14, %v7079_v30  ;;  %v2674_v14 = vsel %vm2673_vm0, %v7083_v4, %v7084_v45 }
 0x362   : > { %v2792_v5 = vpack.c.bf16 %v2629_v31, %v2585_v29 }
 0x364   : > { %v7092_v12 = vpop.permute.xlu0 %7091 }
 0x365   : > { %v7093_v19 = vunpack.i.l.bf16 %v7092_v12 }
 0x367   : > { %v2463_v18 = vsel %vm2283_vm7, %v7054_v58, %v7093_v19  ;;  %v2809_v58 = vpack.c.bf16 %v7088_v7, %v7088_v7 }
 0x368   : > { %v2774_v3 = vpack.c.bf16 %v2463_v18, %v2184_v1  ;;  %v8840_v47 = vpop.permute.xlu0 %7111  ;;  %v7089_v1 = vunpack.i.h.bf16 %v8829_v42 }
 0x369   : > { %v7113_v9 = vunpack.i.l.bf16 %v8840_v47 }
 0x36a   : > { %2872 = vrot.lane.b32.xlu1 %v2774_v3, %s7757_s15  ;;  %v7094_v3 = vunpack.i.h.bf16 %v7092_v12 }
 0x36b   : > { %v2553_v8 = vsel %vm2551_vm11, %v7074_v54, %v7113_v9  ;;  %v2801_v54 = vpack.c.bf16 %v2711_v50, %v2674_v14 }
 0x36e   : > { %v8835_v41 = vpop.permute.xlu1 %7096  ;;  %2906 = vrot.lane.b32.xlu1 %v2791_v56, %s7757_s15  ;;  %v12885_v56 = vld [vmem:[#allocation16_spill] sm:$0xff] }
 0x370   : > { %v8868_v48 = vpop.permute.xlu0 %7121 }
 0x372   : > { %v8842_v11 = vpop.permute.xlu1 %7101  ;;  %2942 = vrot.lane.b32.xlu1 %v2809_v58, %s7757_s15  ;;  %v12886_v58 = vld [vmem:[#allocation26_spill] sm:$0xff] }
 0x373   : > { %v2169_v31 = vsel %vm2166_vm13, %v12886_v58, %v12885_v56  ;;  %v2168_v12 = vsel %vm2166_vm13, %v12884_v27, %v12886_v58 }
 0x374   : > { %v2185_v14 = vmul.f32 %v2168_v12, %v8549_v21  ;;  %v12581_v21 = vunpack.i.h.bf16 %v8835_v41 }
 0x376   : > { %v8847_v49 = vpop.permute.xlu1 %7106  ;;  %2908 = vrot.lane.b32.xlu1 %v2792_v5, %s7757_s15 }
 0x377   : > { %v7108_v39 = vunpack.i.l.bf16 %v8847_v49  ;;  %v7109_v29 = vunpack.i.h.bf16 %v8847_v49 }
 0x379   : > { %v2508_v22 = vsel %vm2506_vm12, %v7069_v20, %v7108_v39  ;;  %v2756_v20 = vsel %vm2755_vm1, %v7088_v7, %v7089_v1  ;;  %v2186_v7 = vmul.f32 %v2169_v31, %v8591_v57  ;;  %v2509_v27 = vsel %vm2506_vm12, %v7108_v39, %v7109_v29 }
 0x37a   : > { %v2783_v10 = vpack.c.bf16 %v2553_v8, %v2508_v22  ;;  %v8859_v18 = vpop.permute.xlu1 %7116  ;;  %v2810_v5 = vpack.c.bf16 %v2756_v20, %v2756_v20  ;;  %v2464_v8 = vsel %vm2283_vm7, %v7093_v19, %v7094_v3  ;;  %v7114_v22 = vunpack.i.h.bf16 %v8840_v47  ;;  %v8890_v20 = vpop.permute.xlu0 %7126 }
 0x37b   : > { %v2775_v57 = vpack.c.bf16 %v2464_v8, %v2185_v14  ;;  %v12582_v47 = vunpack.i.h.bf16 %v8859_v18 }
 0x37c   : > { %2890 = vrot.lane.b32.xlu0 %v2783_v10, %s7757_s15  ;;  %v7118_v10 = vunpack.i.l.bf16 %v8859_v18  ;;  %v2554_v19 = vsel %vm2551_vm11, %v7113_v9, %v7114_v22  ;;  %v7128_v9 = vunpack.i.l.bf16 %v8890_v20 }
 0x37d   : > { %v2784_v58 = vpack.c.bf16 %v2554_v19, %v2509_v27  ;;  %v12887_v27 = vld [vmem:[#allocation27_spill] sm:$0xff] }
 0x380   : > { %v8870_v26 = vpop.permute.xlu1 %7131  ;;  %2926 = vrot.lane.b32.xlu0 %v2801_v54, %s7757_s15  ;;  %v7098_v54 = vunpack.i.l.bf16 %v8835_v41 }
 0x381   : > { %v7133_v4 = vunpack.i.l.bf16 %v8870_v26 }
 0x382   : > { %v2586_v31 = vsel %vm2166_vm13, %v7059_v40, %v7098_v54 }
 0x383   : > { %v2465_v50 = vsel %vm2283_vm7, %v7094_v3, %v7133_v4  ;;  %v2630_v3 = vsel %vm2628_vm14, %v7079_v30, %v7118_v10  ;;  %v2631_v30 = vsel %vm2628_vm14, %v7118_v10, %v12582_v47 }
 0x384   : > { %2944 = vrot.lane.b32.xlu0 %v2810_v5, %s7757_s15  ;;  %v2776_v49 = vpack.c.bf16 %v2465_v50, %v2186_v7  ;;  %v2793_v39 = vpack.c.bf16 %v2630_v3, %v2586_v31  ;;  %v12580_v5 = vunpack.i.h.bf16 %v8890_v20  ;;  %v2587_v7 = vsel %vm2166_vm13, %v7098_v54, %v12581_v21  ;;  %v8911_v40 = vpop.permute.xlu1 %7151 }
 0x385   : > { %v2794_v50 = vpack.c.bf16 %v2631_v30, %v2587_v7  ;;  %v7153_v10 = vunpack.i.l.bf16 %v8911_v40  ;;  %v7103_v3 = vunpack.i.l.bf16 %v8842_v11  ;;  %v7123_v30 = vunpack.i.l.bf16 %v8868_v48 }
 0x386   : > { %2876 = vrot.lane.b32.xlu1 %v2776_v49, %s7757_s15  ;;  %v7134_v49 = vunpack.i.h.bf16 %v8870_v26  ;;  %v2758_v14 = vsel %vm2755_vm1, %v7128_v9, %v12580_v5  ;;  %v7154_v7 = vunpack.i.h.bf16 %v8911_v40  ;;  %v7104_v21 = vunpack.i.h.bf16 %v8842_v11 }
 0x387   : > { %v2812_v19 = vpack.c.bf16 %v2758_v14, %v2758_v14  ;;  %v2675_v63 = vsel %vm2673_vm0, %v7084_v45, %v7123_v30 }
 0x388   : > { %2874 = vrot.lane.b32.xlu0 %v2775_v57, %s7757_s15  ;;  %v2170_v57 = vsel %vm2166_vm13, %v12885_v56, %v12887_v27  ;;  %v2555_v56 = vsel %vm2551_vm11, %v7114_v22, %v7153_v10  ;;  %v2556_v11 = vsel %vm2551_vm11, %v7153_v10, %v7154_v7 }
 0x38a   : > { %v8899_v12 = vpop.permute.xlu0 %7136  ;;  %2892 = vrot.lane.b32.xlu1 %v2784_v58, %s7757_s15  ;;  %v2466_v58 = vsel %vm2283_vm7, %v7133_v4, %v7134_v49 }
 0x38c   : > { %2910 = vrot.lane.b32.xlu0 %v2793_v39, %s7757_s15  ;;  %v2187_v39 = vmul.f32 %v2170_v57, %v8615_v34  ;;  %v8936_v14 = vpop.permute.xlu1 %7161 }
 0x38d   : > { %v7164_v40 = vunpack.i.h.bf16 %v8936_v14 }
 0x38e   : > { %v8913_v8 = vpop.permute.xlu0 %7141  ;;  %v2777_v5 = vpack.c.bf16 %v2466_v58, %v2187_v39 }
 0x38f   : > { %v7143_v34 = vunpack.i.l.bf16 %v8913_v8 }
 0x390   : > { %2912 = vrot.lane.b32.xlu0 %v2794_v50, %s7757_s15 }
 0x392   : > { %v8924_v54 = vpop.permute.xlu0 %7146 }
 0x393   : > { %v7149_v26 = vunpack.i.h.bf16 %v8924_v54  ;;  %v7148_v31 = vunpack.i.l.bf16 %v8924_v54 }
 0x394   : > { %2948 = vrot.lane.b32.xlu0 %v2812_v19, %s7757_s15  ;;  %v2712_v19 = vsel %vm2710_vm15, %v7064_v35, %v7103_v3  ;;  %v7163_v35 = vunpack.i.l.bf16 %v8936_v14 }
 0x395   : > { %v2510_v50 = vsel %vm2506_vm12, %v7109_v29, %v7148_v31  ;;  %v2511_v57 = vsel %vm2506_vm12, %v7148_v31, %v7149_v26  ;;  %v7124_v29 = vunpack.i.h.bf16 %v8868_v48  ;;  %v2802_v58 = vpack.c.bf16 %v2712_v19, %v2675_v63 }
 0x396   : > { %v2785_v4 = vpack.c.bf16 %v2555_v56, %v2510_v50  ;;  %v8946_v47 = vpop.permute.xlu0 %7156  ;;  %v2786_v22 = vpack.c.bf16 %v2556_v11, %v2511_v57  ;;  %v2713_v31 = vsel %vm2710_vm15, %v7103_v3, %v7104_v21  ;;  %v8976_v56 = vpop.permute.xlu1 %7166 }
 0x397   : > { %v2676_v62 = vsel %vm2673_vm0, %v7123_v30, %v7124_v29  ;;  %v2677_v45 = vsel %vm2673_vm0, %v7124_v29, %v7163_v35  ;;  %v12888_v30 = vld [vmem:[#allocation17_spill] sm:$0xff]  ;;  %v7158_v19 = vunpack.i.l.bf16 %v8946_v47 }
 0x398   : > { %2878 = vrot.lane.b32.xlu0 %v2777_v5, %s7757_s15  ;;  %2894 = vrot.lane.b32.xlu1 %v2785_v4, %s7757_s15  ;;  %v2714_v5 = vsel %vm2710_vm15, %v7104_v21, %v7143_v34  ;;  %v2803_v10 = vpack.c.bf16 %v2713_v31, %v2676_v62  ;;  %v2757_v21 = vsel %vm2755_vm1, %v7089_v1, %v7128_v9  ;;  %v7138_v1 = vunpack.i.l.bf16 %v8899_v12  ;;  %v12891_v31 = vld [vmem:[#allocation18_spill] sm:$0xff] }
 0x399   : > { %v2804_v48 = vpack.c.bf16 %v2714_v5, %v2677_v45  ;;  %v2811_v50 = vpack.c.bf16 %v2757_v21, %v2757_v21  ;;  %v2171_v4 = vsel %vm2166_vm13, %v12887_v27, %v12888_v30  ;;  %v12890_v27 = vunpack.i.h.bf16 %v8859_v18 }
 0x39a   : > { %v2188_v42 = vmul.f32 %v2171_v4, %v8666_v17  ;;  %v2191_v17 = vmul.f32 %v12891_v31, %v8745_v25  ;;  %v12892_v5 = vunpack.i.h.bf16 %v8835_v41  ;;  %v12894_v4 = vunpack.i.h.bf16 %v8890_v20 }
 0x39b   : > { %v7139_v20 = vunpack.i.h.bf16 %v8899_v12 }
 0x39c   : > { %v8962_v39 = vpop.permute.xlu0 %7171  ;;  %2896 = vrot.lane.b32.xlu0 %v2786_v22, %s7757_s15  ;;  %2928 = vrot.lane.b32.xlu1 %v2802_v58, %s7757_s15  ;;  %v7168_v22 = vunpack.i.l.bf16 %v8976_v56  ;;  %v2632_v58 = vsel %vm2628_vm14, %v12890_v27, %v7158_v19  ;;  %v2588_v62 = vsel %vm2166_vm13, %v12892_v5, %v7138_v1  ;;  %v7159_v27 = vunpack.i.h.bf16 %v8946_v47 }
 0x39d   : > { %v7173_v3 = vunpack.i.l.bf16 %v8962_v39  ;;  %v7174_v9 = vunpack.i.h.bf16 %v8962_v39  ;;  %v2589_v54 = vsel %vm2166_vm13, %v7138_v1, %v7139_v20  ;;  %v2678_v1 = vsel %vm2673_vm0, %v7163_v35, %v7164_v40 }
 0x39f   : > { %v2467_v57 = vsel %vm2283_vm7, %v7134_v49, %v7173_v3 }
 0x3a0   : > { %2932 = vrot.lane.b32.xlu0 %v2804_v48, %s7757_s15  ;;  %2930 = vrot.lane.b32.xlu1 %v2803_v10, %s7757_s15  ;;  %v2778_v11 = vpack.c.bf16 %v2467_v57, %v2188_v42  ;;  %v12893_v48 = vld [vmem:[#allocation28_spill] sm:$0xff]  ;;  %v2468_v10 = vsel %vm2283_vm7, %v7173_v3, %v7174_v9  ;;  %v2759_v57 = vsel %vm2755_vm1, %v12894_v4, %v7168_v22 }
 0x3a1   : > { %v2172_v18 = vsel %vm2166_vm13, %v12888_v30, %v12893_v48  ;;  %v2813_v3 = vpack.c.bf16 %v2759_v57, %v2759_v57 }
 0x3a2   : > { %v2189_v41 = vmul.f32 %v2172_v18, %v8692_v61 }
 0x3a4   : > { %2946 = vrot.lane.b32.xlu1 %v2811_v50, %s7757_s15  ;;  %v2795_v50 = vpack.c.bf16 %v2632_v58, %v2588_v62  ;;  %v2779_v30 = vpack.c.bf16 %v2468_v10, %v2189_v41  ;;  %v7144_v10 = vunpack.i.h.bf16 %v8913_v8 }
 0x3a6   : > { %v8987_v29 = vpop.permute.xlu1 %7176  ;;  %v8989_v63 = vpop.permute.xlu0 %7186 }
 0x3a7   : > { %12889 = vst [vmem:[#allocation29_spill] sm:$0xff] %v8987_v29  ;;  %v7178_v49 = vunpack.i.l.bf16 %v8987_v29  ;;  %v7188_v35 = vunpack.i.l.bf16 %v8989_v63 }
 0x3a8   : > { %2880 = vrot.lane.b32.xlu1 %v2778_v11, %s7757_s15 }
 0x3a9   : > { %v2781_v45 = vpack.c.bf16 %v7178_v49, %v2191_v17 }
 0x3aa   : > { %v9010_v21 = vpop.permute.xlu1 %7181  ;;  %v9012_v25 = vpop.permute.xlu0 %2504 }
 0x3ab   : > { %2886 = vrot.lane.b32.xlu0 %v2781_v45, %s7757_s15  ;;  %v7184_v14 = vunpack.i.h.bf16 %v9010_v21 }
 0x3ac   : > { %2914 = vrot.lane.b32.xlu1 %v2795_v50, %s7757_s15  ;;  %v2633_v50 = vsel %vm2628_vm14, %v7158_v19, %v7159_v27  ;;  %v2715_v19 = vsel %vm2710_vm15, %v7143_v34, %v7144_v10 }
 0x3ad   : > { %v2796_v57 = vpack.c.bf16 %v2633_v50, %v2589_v54  ;;  %v2805_v8 = vpack.c.bf16 %v2715_v19, %v2678_v1 }
 0x3ae   : > { %v9020_v42 = vpop.permute.xlu1 %7191  ;;  %v7197_v11 = vpop.permute.xlu0 %7196 }
 0x3af   : > { %v7193_v17 = vunpack.i.l.bf16 %v9020_v42  ;;  %v7198_v58 = vunpack.i.l.bf16 %v7197_v11  ;;  %2882 = vrot.lane.b32.xlu0 %v2779_v30, %s7757_s15  ;;  %v7194_v61 = vunpack.i.h.bf16 %v9020_v42  ;;  %v7199_v5 = vunpack.i.h.bf16 %v7197_v11 }
 0x3b0   : > { %2950 = vrot.lane.b32.xlu1 %v2813_v3, %s7757_s15  ;;  %v7169_v30 = vunpack.i.h.bf16 %v8976_v56 }
 0x3b1   : > { %v2512_v62 = vsel %vm2506_vm12, %v7149_v26, %v7193_v17  ;;  %v2557_v47 = vsel %vm2551_vm11, %v7154_v7, %v7198_v58  ;;  %v2513_v4 = vsel %vm2506_vm12, %v7193_v17, %v7194_v61  ;;  %v2558_v12 = vsel %vm2551_vm11, %v7198_v58, %v7199_v5 }
 0x3b2   : > { %v2550_v45 = vpop.permute.xlu1 %2549  ;;  %v2787_v18 = vpack.c.bf16 %v2557_v47, %v2512_v62  ;;  %v7183_v26 = vunpack.i.l.bf16 %v9010_v21  ;;  %v2788_v11 = vpack.c.bf16 %v2558_v12, %v2513_v4  ;;  %v7207_v58 = vpop.permute.xlu0 %7206  ;;  %v2760_v56 = vsel %vm2755_vm1, %v7168_v22, %v7169_v30 }
 0x3b3   : > { %v2790_v41 = vpack.c.bf16 %v2550_v45, %v9012_v25  ;;  %v7208_v47 = vunpack.i.l.bf16 %v7207_v58  ;;  %v2469_v22 = vsel %vm2283_vm7, %v7174_v9, %v7178_v49  ;;  %v7209_v4 = vunpack.i.h.bf16 %v7207_v58  ;;  %v12896_v9 = vld [vmem:[#allocation36_spill] sm:$0xff] }
 0x3b4   : > { %2898 = vrot.lane.b32.xlu1 %v2787_v18, %s7757_s15  ;;  %v2590_v17 = vsel %vm2166_vm13, %v7139_v20, %v7183_v26  ;;  %v12895_v18 = vld [vmem:[#allocation38_spill] sm:$0xff]  ;;  %v2814_v20 = vpack.c.bf16 %v2760_v56, %v2760_v56  ;;  %v2559_v39 = vsel %vm2551_vm11, %v7199_v5, %v2550_v45  ;;  %v12899_v56 = vld [vmem:[#allocation48_spill] sm:$0xff] }
 0x3b5   : > { %2904 = vrot.lane.b32.xlu0 %v2790_v41, %s7757_s15  ;;  %v2679_v12 = vsel %vm2673_vm0, %v7164_v40, %v7208_v47  ;;  %v2681_v49 = vsel %vm2673_vm0, %v7209_v4, %v12896_v9  ;;  %v12897_v40 = vld [vmem:[#allocation37_spill] sm:$0xff]  ;;  %v12909_v9 = vld [vmem:[#allocation47_spill] sm:$0xff] }
 0x3b6   : > { %v7202_v7 = vpop.permute.xlu1 %7201  ;;  %v7212_v54 = vpop.permute.xlu0 %7211 }
 0x3b7   : > { %v7203_v42 = vunpack.i.l.bf16 %v7202_v7  ;;  %v7204_v3 = vunpack.i.h.bf16 %v7202_v7  ;;  %v7189_v7 = vunpack.i.h.bf16 %v8989_v63  ;;  %v7213_v19 = vunpack.i.l.bf16 %v7212_v54 }
 0x3b8   : > { %2916 = vrot.lane.b32.xlu1 %v2796_v57, %s7757_s15  ;;  %v7214_v5 = vunpack.i.h.bf16 %v7212_v54 }
 0x3b9   : > { %v2634_v62 = vsel %vm2628_vm14, %v7159_v27, %v7203_v42  ;;  %2900 = vrot.lane.b32.xlu0 %v2788_v11, %s7757_s15  ;;  %v2636_v50 = vsel %vm2628_vm14, %v7204_v3, %v12895_v18  ;;  %v2173_v27 = vsel %vm2166_vm13, %v12893_v48, %v12891_v31  ;;  %v2716_v31 = vsel %vm2710_vm15, %v7144_v10, %v7188_v35  ;;  %v12901_v18 = vld [vmem:[#allocation49_spill] sm:$0xff] }
 0x3ba   : > { %v2797_v34 = vpack.c.bf16 %v2634_v62, %v2590_v17  ;;  %v2799_v41 = vpack.c.bf16 %v2636_v50, %v7184_v14  ;;  %v2190_v21 = vmul.f32 %v2173_v27, %v8737_v33  ;;  %v2806_v57 = vpack.c.bf16 %v2716_v31, %v2679_v12  ;;  %v12898_v62 = vld [vmem:[#allocation39_spill] sm:$0xff]  ;;  %v12902_v50 = vld [vmem:[#allocation41_spill] sm:$0xff]  ;;  %v12907_v31 = vld [vmem:[#allocation46_spill] sm:$0xff] }
 0x3bb   : > { %v2514_v33 = vsel %vm2506_vm12, %v7194_v61, %v9012_v25  ;;  %v2718_v63 = vsel %vm2710_vm15, %v7189_v7, %v12897_v40  ;;  %v2635_v10 = vsel %vm2628_vm14, %v7203_v42, %v7204_v3  ;;  %v2761_v45 = vsel %vm2755_vm1, %v7169_v30, %v7213_v19 }
 0x3bc   : > { %2934 = vrot.lane.b32.xlu1 %v2805_v8, %s7757_s15  ;;  %v2780_v48 = vpack.c.bf16 %v2469_v22, %v2190_v21  ;;  %v2789_v11 = vpack.c.bf16 %v2559_v39, %v2514_v33  ;;  %v2808_v1 = vpack.c.bf16 %v2718_v63, %v2681_v49  ;;  %v2591_v17 = vsel %vm2166_vm13, %v7183_v26, %v7184_v14  ;;  %v12904_v22 = vld [vmem:[#allocation43_spill] sm:$0xff]  ;;  %v12906_v21 = vld [vmem:[#allocation45_spill] sm:$0xff] }
 0x3bd   : > { %2918 = vrot.lane.b32.xlu0 %v2797_v34, %s7757_s15  ;;  %v2798_v58 = vpack.c.bf16 %v2635_v10, %v2591_v17  ;;  %v2680_v25 = vsel %vm2673_vm0, %v7208_v47, %v7209_v4  ;;  %v2815_v61 = vpack.c.bf16 %v2761_v45, %v2761_v45  ;;  %v2763_v8 = vsel %vm2755_vm1, %v7214_v5, %v12898_v62  ;;  %v12900_v47 = vld [vmem:[#allocation40_spill] sm:$0xff] }
 0x3be   : > { %v2717_v42 = vsel %vm2710_vm15, %v7188_v35, %v7189_v7  ;;  %v2817_v34 = vpack.c.bf16 %v2763_v8, %v2763_v8  ;;  %v2762_v30 = vsel %vm2755_vm1, %v7213_v19, %v7214_v5  ;;  %v12903_v35 = vld [vmem:[#allocation42_spill] sm:$0xff]  ;;  %v12905_v4 = vld [vmem:[#allocation44_spill] sm:$0xff] }
 0x3bf   : > { %v2807_v3 = vpack.c.bf16 %v2717_v42, %v2680_v25  ;;  %v2816_v26 = vpack.c.bf16 %v2762_v30, %v2762_v30 }
 0x3c0   : > { %2952 = vrot.lane.b32.xlu1 %v2814_v20, %s7757_s15  ;;  %v2871_v14 = vpop.permute.xlu1 %2870 }
 0x3c1   : > { %2922 = vrot.lane.b32.xlu0 %v2799_v41, %s7757_s15 }
 0x3c4   : > { %2884 = vrot.lane.b32.xlu1 %v2780_v48, %s7757_s15  ;;  %v12908_v48 = vld [vmem:[#allocation50_spill] sm:$0xff] }
 0x3c5   : > { %2936 = vrot.lane.b32.xlu0 %v2806_v57, %s7757_s15 }
 0x3c8   : > { %2902 = vrot.lane.b32.xlu1 %v2789_v11, %s7757_s15 }
 0x3c9   : > { %2940 = vrot.lane.b32.xlu0 %v2808_v1, %s7757_s15 }
 0x3cc   : > { %2920 = vrot.lane.b32.xlu1 %v2798_v58, %s7757_s15 }
 0x3cd   : > { %2954 = vrot.lane.b32.xlu0 %v2815_v61, %s7757_s15  ;;  %v9114_v27 = vpop.permute.xlu0 %2924 }
 0x3d0   : > { %2938 = vrot.lane.b32.xlu1 %v2807_v3, %s7757_s15 }
 0x3d1   : > { %2958 = vrot.lane.b32.xlu0 %v2817_v34, %s7757_s15 }
 0x3d2   : > { %v2889_v12 = vpop.permute.xlu0 %2888 }
 0x3d4   : > { %2956 = vrot.lane.b32.xlu1 %v2816_v26, %s7757_s15 }
 0x3d5   : > { %3419 = vrot.lane.b32.xlu0 %v12899_v56, %s7754_s29 }
 0x3d8   : > { %3417 = vrot.lane.b32.xlu1 %v12900_v47, %s7754_s29 }
 0x3d9   : > { %3423 = vrot.lane.b32.xlu0 %v12901_v18, %s7754_s29 }
 0x3dc   : > { %3421 = vrot.lane.b32.xlu1 %v12902_v50, %s7754_s29  ;;  %v2873_v20 = vpop.permute.xlu1 %2872 }
 0x3dd   : > { %3427 = vrot.lane.b32.xlu0 %v8412_v24, %s7754_s29  ;;  %v2961_v11 = vsel %vm436_vm2, %v2871_v14, %v2873_v20 }
 0x3e0   : > { %3425 = vrot.lane.b32.xlu1 %v12903_v35, %s7754_s29  ;;  %v2907_v41 = vpop.permute.xlu1 %2906 }
 0x3e1   : > { %3431 = vrot.lane.b32.xlu0 %v8419_v6, %s7754_s29 }
 0x3e4   : > { %3429 = vrot.lane.b32.xlu1 %v12904_v22, %s7754_s29  ;;  %v2943_v54 = vpop.permute.xlu1 %2942 }
 0x3e5   : > { %3461 = vrot.lane.b32.xlu0 %v8427_v52, %s7755_s30 }
 0x3e8   : > { %3459 = vrot.lane.b32.xlu1 %v12905_v4, %s7755_s30  ;;  %v2909_v57 = vpop.permute.xlu1 %2908 }
 0x3e9   : > { %3465 = vrot.lane.b32.xlu0 %v8435_v59, %s7755_s30 }
 0x3ec   : > { %3463 = vrot.lane.b32.xlu1 %v12906_v21, %s7755_s30 }
 0x3ed   : > { %3469 = vrot.lane.b32.xlu0 %v8443_v43, %s7755_s30 }
 0x3ee   : > { %v2891_v7 = vpop.permute.xlu0 %2890 }
 0x3ef   : > { %v2969_v5 = vsel %vm436_vm2, %v2889_v12, %v2891_v7 }
 0x3f0   : > { %3467 = vrot.lane.b32.xlu1 %v12907_v31, %s7755_s30 }
 0x3f1   : > { %3473 = vrot.lane.b32.xlu0 %v12908_v48, %s7755_s30 }
 0x3f2   : > { %v2927_v39 = vpop.permute.xlu0 %2926 }
 0x3f3   : > { %v2985_v3 = vsel %vm436_vm2, %v9114_v27, %v2927_v39 }
 0x3f4   : > { %3471 = vrot.lane.b32.xlu1 %v12909_v9, %s7755_s30 }
 0x3f5   : > { %3502 = vrot.lane.b32.xlu0 %v12899_v56, %s7756_s14 }
 0x3f6   : > { %v2945_v49 = vpop.permute.xlu0 %2944 }
 0x3f7   : > { %v2993_v30 = vsel %vm436_vm2, %v2943_v54, %v2945_v49 }
 0x3f8   : > { %3500 = vrot.lane.b32.xlu1 %v12900_v47, %s7756_s14  ;;  %v2877_v19 = vpop.permute.xlu1 %2876  ;;  %v3039_v47 = vsel %vm3037_vm3, %v2993_v30, 0 }
 0x3f9   : > { %3506 = vrot.lane.b32.xlu0 %v12901_v18, %s7756_s14 }
 0x3fa   : > { %v2875_v33 = vpop.permute.xlu0 %2874 }
 0x3fb   : > { %v2962_v40 = vsel %vm436_vm2, %v2873_v20, %v2875_v33  ;;  %v2963_v62 = vsel %vm436_vm2, %v2875_v33, %v2877_v19  ;;  %v12910_v20 = vmov 0  }
 0x3fc   : > { %3062 = vmatprep.subr.bf16.mxu0 %v2962_v40  ;;  %3504 = vrot.lane.b32.xlu1 %v12902_v50, %s7756_s14  ;;  %v2893_v63 = vpop.permute.xlu1 %2892  ;;  %v9186_v50 = vld [vmem:[%s12511_s5] sm:$0xf] }
 0x3fd   : > { %3063 = vmatpush1.bf16.msra.mxu0 %v2961_v11  ;;  %3510 = vrot.lane.b32.xlu0 %v8412_v24, %s7756_s14  ;;  %v2970_v10 = vsel %vm436_vm2, %v2891_v7, %v2893_v63  ;;  %v2977_v24 = vsel %vm436_vm2, %v2907_v41, %v2909_v57 }
 0x3fe   : > { %v2911_v1 = vpop.permute.xlu0 %2910  ;;  %3064 = vmatprep.subr.bf16.mxu0 %v2970_v10 }
 0x3ff   : > { %v2978_v45 = vsel %vm436_vm2, %v2909_v57, %v2911_v1 }
 0x400   : > { %3508 = vrot.lane.b32.xlu1 %v12903_v35, %s7756_s14 }
 0x401   : > { %3514 = vrot.lane.b32.xlu0 %v8419_v6, %s7756_s14  ;;  %3065 = vmatpush1.bf16.msra.mxu0 %v2969_v5 }
 0x402   : > { %v2913_v17 = vpop.permute.xlu0 %2912  ;;  %3066 = vmatprep.subr.bf16.mxu0 %v2978_v45 }
 0x403   : > { %v2979_v41 = vsel %vm436_vm2, %v2911_v1, %v2913_v17 }
 0x404   : > { %3512 = vrot.lane.b32.xlu1 %v12904_v22, %s7756_s14 }
 0x405   : > { %3543 = vrot.lane.b32.xlu0 %v8427_v52, %s7757_s15  ;;  %3067 = vmatpush1.bf16.msra.mxu0 %v2977_v24 }
 0x406   : > { %v2949_v58 = vpop.permute.xlu0 %2948 }
 0x408   : > { %3541 = vrot.lane.b32.xlu1 %v12905_v4, %s7757_s15 }
 0x409   : > { %3547 = vrot.lane.b32.xlu0 %v8435_v59, %s7757_s15 }
 0x40a   : > { %v2879_v6 = vpop.permute.xlu0 %2878  ;;  %v2895_v25 = vpop.permute.xlu1 %2894 }
 0x40b   : > { %v2964_v61 = vsel %vm436_vm2, %v2877_v19, %v2879_v6 }
 0x40c   : > { %3545 = vrot.lane.b32.xlu1 %v12906_v21, %s7757_s15  ;;  %3103 = vmatprep.subr.bf16.mxu1 %v2964_v61 }
 0x40d   : > { %3551 = vrot.lane.b32.xlu0 %v8443_v43, %s7757_s15  ;;  %3104 = vmatpush1.bf16.msra.mxu1 %v2963_v62  ;;  %v2971_v43 = vsel %vm436_vm2, %v2893_v63, %v2895_v25 }
 0x40e   : > { %v2897_v52 = vpop.permute.xlu0 %2896  ;;  %v2929_v8 = vpop.permute.xlu1 %2928 }
 0x40f   : > { %v2986_v42 = vsel %vm436_vm2, %v2927_v39, %v2929_v8  ;;  %v2972_v59 = vsel %vm436_vm2, %v2895_v25, %v2897_v52 }
 0x410   : > { %3549 = vrot.lane.b32.xlu1 %v12907_v31, %s7757_s15  ;;  %3068 = vmatprep.subr.bf16.mxu0 %v2986_v42 }
 0x411   : > { %3105 = vmatprep.subr.bf16.mxu1 %v2972_v59  ;;  %3555 = vrot.lane.b32.xlu0 %v12908_v48, %s7757_s15 }
 0x412   : > { %3069 = vmatpush1.bf16.msra.mxu0 %v2985_v3  ;;  %3106 = vmatpush1.bf16.msra.mxu1 %v2971_v43  ;;  %v2931_v34 = vpop.permute.xlu1 %2930  ;;  %v2933_v18 = vpop.permute.xlu0 %2932 }
 0x413   : > { %v2988_v12 = vsel %vm436_vm2, %v2931_v34, %v2933_v18  ;;  %v2987_v31 = vsel %vm436_vm2, %v2929_v8, %v2931_v34 }
 0x414   : > { %3553 = vrot.lane.b32.xlu1 %v12909_v9, %s7757_s15 }
 0x416   : > { %v2947_v26 = vpop.permute.xlu1 %2946 }
 0x417   : > { %v2994_v56 = vsel %vm436_vm2, %v2945_v49, %v2947_v26  ;;  %v2995_v48 = vsel %vm436_vm2, %v2947_v26, %v2949_v58 }
 0x418   : > { %6772 = vmatprep.subr.msk.bf16.mxu0 %vm3037_vm3, %v2994_v56  ;;  %v3045_v49 = vsel %vm3037_vm3, %v2995_v48, 0 }
 0x419   : > { %3071 = vmatpush1.bf16.msra.mxu0 %v3039_v47 }
 0x41a   : > { %v2881_v14 = vpop.permute.xlu1 %2880 }
 0x41b   : > { %v2965_v7 = vsel %vm436_vm2, %v2879_v6, %v2881_v14 }
 0x41c   : > { %6773 = vmatmul.mubr.msk.bf16.vlgmr.msra.gmra.mrb[16].mxu0 %vm3033_vm4, %v9186_v50 }
 0x41d   : > { %v2887_v35 = vpop.permute.xlu0 %2886  ;;  %3176 = vmatprep.mubr.bf16.mxu0 %v12910_v20 }
 0x41e   : > { %v2915_v27 = vpop.permute.xlu1 %2914 }
 0x41f   : > { %v2980_v22 = vsel %vm436_vm2, %v2913_v17, %v2915_v27 }
 0x420   : > { %3107 = vmatprep.subr.bf16.mxu1 %v2980_v22 }
 0x421   : > { %v2883_v4 = vpop.permute.xlu0 %2882  ;;  %3108 = vmatpush1.bf16.msra.mxu1 %v2979_v41 }
 0x422   : > { %3109 = vmatprep.subr.bf16.mxu1 %v2988_v12  ;;  %v2951_v21 = vpop.permute.xlu1 %2950  ;;  %v2966_v54 = vsel %vm436_vm2, %v2881_v14, %v2883_v4 }
 0x423   : > { %3144 = vmatprep.subr.bf16.mxu0 %v2966_v54  ;;  %v2996_v39 = vsel %vm436_vm2, %v2949_v58, %v2951_v21 }
 0x424   : > { %3145 = vmatpush1.bf16.msra.mxu0 %v2965_v7 }
 0x425   : > { %3110 = vmatpush1.bf16.msra.mxu1 %v2987_v31 }
 0x426   : > { %6774 = vmatprep.subr.msk.bf16.mxu1 %vm3037_vm3, %v2996_v39  ;;  %v2899_v57 = vpop.permute.xlu1 %2898 }
 0x427   : > { %v2905_v9 = vpop.permute.xlu0 %2904  ;;  %v2973_v63 = vsel %vm436_vm2, %v2897_v52, %v2899_v57 }
 0x429   : > { %3112 = vmatpush1.bf16.msra.mxu1 %v3045_v49 }
 0x42a   : > { %v2917_v19 = vpop.permute.xlu1 %2916 }
 0x42b   : > { %v2901_v33 = vpop.permute.xlu0 %2900  ;;  %v2981_v5 = vsel %vm436_vm2, %v2915_v27, %v2917_v19 }
 0x42c   : > { %6775 = vmatmul.mubr.msk.bf16.vlgmr.msra.gmra.mrb[16].mxu1 %vm3033_vm4, %v9186_v50  ;;  %v2974_v40 = vsel %vm436_vm2, %v2899_v57, %v2901_v33 }
 0x42d   : > { %3146 = vmatprep.subr.bf16.mxu0 %v2974_v40  ;;  %3217 = vmatprep.mubr.bf16.mxu1 %v12910_v20  ;;  %v3960_v40 = vld [vmem:[%s12514_s8] sm:$0xff] }
 0x42e   : > { %3147 = vmatpush1.bf16.msra.mxu0 %v2973_v63  ;;  %v2935_v11 = vpop.permute.xlu1 %2934  ;;  %v4396_v63 = vld [vmem:[%s12510_s4] ss:$2 sm:$0xff] }
 0x42f   : > { %v2919_v10 = vpop.permute.xlu0 %2918  ;;  %v2989_v62 = vsel %vm436_vm2, %v2933_v18, %v2935_v11 }
 0x430   : > { %v2982_v1 = vsel %vm436_vm2, %v2917_v19, %v2919_v10 }
 0x431   : > { %3148 = vmatprep.subr.bf16.mxu0 %v2982_v1 }
 0x432   : > { %3149 = vmatpush1.bf16.msra.mxu0 %v2981_v5  ;;  %v2953_v45 = vpop.permute.xlu1 %2952  ;;  %v12912_v5 = vld [vmem:[#allocation9_spill] sm:$0xff] }
 0x433   : > { %v2923_v17 = vpop.permute.xlu0 %2922  ;;  %v2997_v3 = vsel %vm436_vm2, %v2951_v21, %v2953_v45 }
 0x434   : > { %v3051_v47 = vsel %vm3037_vm3, %v2997_v3, 0 }
 0x436   : > { %v2885_v24 = vpop.permute.xlu1 %2884 }
 0x437   : > { %v2937_v58 = vpop.permute.xlu0 %2936  ;;  %v2968_v6 = vsel %vm436_vm2, %v2885_v24, %v2887_v35  ;;  %v2967_v25 = vsel %vm436_vm2, %v2883_v4, %v2885_v24 }
 0x438   : > { %3185 = vmatprep.subr.bf16.mxu1 %v2968_v6  ;;  %v2990_v61 = vsel %vm436_vm2, %v2935_v11, %v2937_v58  ;;  %v12911_v11 = vld [vmem:[#allocation7_spill] sm:$0xff] }
 0x439   : > { %3150 = vmatprep.subr.bf16.mxu0 %v2990_v61  ;;  %3186 = vmatpush1.bf16.msra.mxu1 %v2967_v25  ;;  %v12914_v61 = vld [vmem:[#allocation13_spill] sm:$0xff] }
 0x43a   : > { %3151 = vmatpush1.bf16.msra.mxu0 %v2989_v62  ;;  %v2903_v52 = vpop.permute.xlu1 %2902  ;;  %v4436_v62 = vrot.slane %v4396_v63, %v12914_v61 }
 0x43b   : > { %v2941_v8 = vpop.permute.xlu0 %2940  ;;  %v2976_v42 = vsel %vm436_vm2, %v2903_v52, %v2905_v9  ;;  %v2975_v59 = vsel %vm436_vm2, %v2901_v33, %v2903_v52  ;;  %v3458_v9 = vld [vmem:[#allocation4 + $0x48] sm:$0xff] }
 0x43c   : > { %3187 = vmatprep.subr.bf16.mxu1 %v2976_v42 }
 0x43d   : > { %3188 = vmatpush1.bf16.msra.mxu1 %v2975_v59 }
 0x43e   : > { %v2921_v43 = vpop.permute.xlu1 %2920 }
 0x43f   : > { %v2955_v34 = vpop.permute.xlu0 %2954  ;;  %v2984_v30 = vsel %vm436_vm2, %v2921_v43, %v2923_v17  ;;  %v2983_v26 = vsel %vm436_vm2, %v2919_v10, %v2921_v43  ;;  %v4412_v10 = vrot.slane %v4396_v63, %v12911_v11 }
 0x440   : > { %3189 = vmatprep.subr.bf16.mxu1 %v2984_v30  ;;  %v2998_v56 = vsel %vm436_vm2, %v2953_v45, %v2955_v34  ;;  %v4420_v45 = vrot.slane %v4396_v63, %v12912_v5 }
 0x441   : > { %6776 = vmatprep.subr.msk.bf16.mxu0 %vm3037_vm3, %v2998_v56  ;;  %3190 = vmatpush1.bf16.msra.mxu1 %v2983_v26  ;;  %v12915_v26 = vld [vmem:[#allocation8_spill] sm:$0xff] }
 0x442   : > { %3153 = vmatpush1.bf16.msra.mxu0 %v3051_v47  ;;  %v2939_v18 = vpop.permute.xlu1 %2938  ;;  %v4416_v56 = vrot.slane %v4396_v63, %v12915_v26 }
 0x443   : > { %v2959_v14 = vpop.permute.xlu0 %2958  ;;  %v2992_v35 = vsel %vm436_vm2, %v2939_v18, %v2941_v8  ;;  %v2991_v27 = vsel %vm436_vm2, %v2937_v58, %v2939_v18  ;;  %v12913_v58 = vld [vmem:[#allocation11_spill] sm:$0xff]  ;;  %v6789_v8 = vld [vmem:[%s12510_s4 + $0x1] ss:$2 sm:$0xff] }
 0x444   : > { %3191 = vmatprep.subr.bf16.mxu1 %v2992_v35  ;;  %v4428_v6 = vrot.slane %v4396_v63, %v12913_v58  ;;  %v4486_v42 = vrot.slane %v6789_v8, %v12911_v11  ;;  %v4494_v3 = vrot.slane %v6789_v8, %v12912_v5  ;;  %v4502_v47 = vrot.slane %v6789_v8, %v12913_v58  ;;  %v12916_v18 = vld [vmem:[#allocation10_spill] sm:$0xff] }
 0x445   : > { %6777 = vmatmul.mubr.msk.bf16.vlgmr.msra.gmra.mrb[20].mxu0 %vm3033_vm4, %v9186_v50  ;;  %3192 = vmatpush1.bf16.msra.mxu1 %v2991_v27  ;;  %v4510_v35 = vrot.slane %v6789_v8, %v12914_v61 }
 0x446   : > { %v2957_v22 = vpop.permute.xlu1 %2956  ;;  %4232 = vmatprep.mubr.bf16.mxu0 %v12910_v20 }
 0x447   : > { %v2999_v41 = vsel %vm436_vm2, %v2955_v34, %v2957_v22  ;;  %v9226_v4 = vpop.permute.xlu0 %3419  ;;  %v3000_v12 = vsel %vm436_vm2, %v2957_v22, %v2959_v14  ;;  %v4424_v14 = vrot.slane %v4396_v63, %v12916_v18  ;;  %v12917_v22 = vld [vmem:[#allocation12_spill] sm:$0xff] }
 0x448   : > { %6778 = vmatprep.subr.msk.bf16.mxu1 %vm3037_vm3, %v3000_v12  ;;  %v3057_v21 = vsel %vm3037_vm3, %v2999_v41, 0  ;;  %v4432_v41 = vrot.slane %v4396_v63, %v12917_v22 }
 0x449   : > { %3194 = vmatpush1.bf16.msra.mxu1 %v3057_v21  ;;  %v12918_v21 = vld [vmem:[#allocation14_spill] sm:$0xff] }
 0x44a   : > { %v9290_v30 = vpop.permute.xlu1 %3417 }
 0x44b   : > { %v9231_v54 = vpop.permute.xlu0 %3423 }
 0x44c   : > { %6779 = vmatmul.mubr.msk.bf16.vlgmr.msra.gmra.mrb[20].mxu1 %vm3033_vm4, %v9186_v50 }
 0x44d   : > { %4273 = vmatprep.mubr.bf16.mxu1 %v12910_v20  ;;  %v4514_v20 = vrot.slane %v6789_v8, %v12918_v21 }
 0x44e   : > { %v9300_v27 = vpop.permute.xlu1 %3421 }
 0x44f   : > { %v9236_v7 = vpop.permute.xlu0 %3427 }
 0x452   : > { %v9305_v12 = vpop.permute.xlu1 %3425 }
 0x453   : > { %v9238_v31 = vpop.permute.xlu0 %3431 }
 0x457   : > { %v9240_v48 = vpop.permute.xlu0 %3461 }
 0x45b   : > { %v9242_v39 = vpop.permute.xlu0 %3465 }
 0x45f   : > { %v9244_v57 = vpop.permute.xlu0 %3469 }
 0x463   : > { %v9246_v49 = vpop.permute.xlu0 %3473 }
 0x464   : > { %v3499_v19 = vmul.f32 %v9246_v49, %v3458_v9 }
 0x466   : > { %3771 = vrot.lane.b32.xlu1 %v3499_v19, %s7758_s13  ;;  %v4490_v19 = vrot.slane %v6789_v8, %v12915_v26 }
 0x467   : > { %v9250_v50 = vpop.permute.xlu0 %3502 }
 0x46a   : > { %3851 = vrot.lane.b32.xlu1 %v3458_v9, %s7759_s18 }
 0x46b   : > { %v9253_v33 = vpop.permute.xlu0 %3506 }
 0x46e   : > { %3963 = vperm.xlu1 %7215, %v3960_v40   ;;  %v9313_v40 = vpop.permute.xlu1 %3429 }
 0x46f   : > { %v9262_v1 = vpop.permute.xlu0 %3510 }
 0x472   : > { %4441 = vrot.lane.b32.xlu1 %v4412_v10, %s7752_s25 }
 0x473   : > { %v9266_v17 = vpop.permute.xlu0 %3514 }
 0x474   : > { %v3540_v24 = vmul.f32 %v9266_v17, %v3458_v9 }
 0x476   : > { %3815 = vrot.lane.b32.xlu0 %v3540_v24, %s7748_s17  ;;  %4445 = vrot.lane.b32.xlu1 %v4420_v45, %s7752_s25  ;;  %v4498_v24 = vrot.slane %v6789_v8, %v12916_v18 }
 0x477   : > { %v9272_v25 = vpop.permute.xlu0 %3543 }
 0x47a   : > { %4449 = vrot.lane.b32.xlu1 %v4428_v6, %s7752_s25 }
 0x47b   : > { %v9276_v52 = vpop.permute.xlu0 %3547 }
 0x47e   : > { %4453 = vrot.lane.b32.xlu1 %v4436_v62, %s7752_s25 }
 0x47f   : > { %v9283_v59 = vpop.permute.xlu0 %3551 }
 0x482   : > { %4515 = vrot.lane.b32.xlu1 %v4486_v42, %s7753_s28 }
 0x483   : > { %v9287_v43 = vpop.permute.xlu0 %3555 }
 0x484   : > { %v3581_v34 = vmul.f32 %v9287_v43, %v3458_v9  ;;  %v4440_v9 = vrot.slane %v4396_v63, %v12918_v21  ;;  %v4506_v63 = vrot.slane %v6789_v8, %v12917_v22 }
 0x486   : > { %3895 = vrot.lane.b32.xlu0 %v3581_v34, %s7760_s20  ;;  %4519 = vrot.lane.b32.xlu1 %v4494_v3, %s7753_s28  ;;  %v9318_v34 = vpop.permute.xlu1 %3459 }
 0x48a   : > { %4443 = vrot.lane.b32.xlu0 %v4416_v56, %s7752_s25  ;;  %4523 = vrot.lane.b32.xlu1 %v4502_v47, %s7753_s28  ;;  %v9326_v61 = vpop.permute.xlu1 %3463 }
 0x48e   : > { %4447 = vrot.lane.b32.xlu0 %v4424_v14, %s7752_s25  ;;  %4527 = vrot.lane.b32.xlu1 %v4510_v35, %s7753_s28  ;;  %v9330_v53 = vpop.permute.xlu1 %3467 }
 0x492   : > { %4451 = vrot.lane.b32.xlu0 %v4432_v41, %s7752_s25  ;;  %4556 = vrot.lane.b32.xlu1 %v4412_v10, %s7754_s29  ;;  %v9336_v2 = vpop.permute.xlu1 %3471 }
 0x496   : > { %4455 = vrot.lane.b32.xlu0 %v4440_v9, %s7752_s25  ;;  %4560 = vrot.lane.b32.xlu1 %v4420_v45, %s7754_s29  ;;  %v9340_v8 = vpop.permute.xlu1 %3500 }
 0x49a   : > { %4517 = vrot.lane.b32.xlu0 %v4490_v19, %s7753_s28  ;;  %4564 = vrot.lane.b32.xlu1 %v4428_v6, %s7754_s29  ;;  %v9346_v21 = vpop.permute.xlu1 %3504 }
 0x49e   : > { %4521 = vrot.lane.b32.xlu0 %v4498_v24, %s7753_s28  ;;  %4568 = vrot.lane.b32.xlu1 %v4436_v62, %s7754_s29  ;;  %v9350_v46 = vpop.permute.xlu1 %3508 }
 0x4a2   : > { %4525 = vrot.lane.b32.xlu0 %v4506_v63, %s7753_s28  ;;  %4598 = vrot.lane.b32.xlu1 %v4486_v42, %s7755_s30 }
 0x4a6   : > { %4529 = vrot.lane.b32.xlu0 %v4514_v20, %s7753_s28  ;;  %4602 = vrot.lane.b32.xlu1 %v4494_v3, %s7755_s30 }
 0x4aa   : > { %4558 = vrot.lane.b32.xlu0 %v4416_v56, %s7754_s29  ;;  %4606 = vrot.lane.b32.xlu1 %v4502_v47, %s7755_s30 }
 0x4ae   : > { %4562 = vrot.lane.b32.xlu0 %v4424_v14, %s7754_s29  ;;  %4610 = vrot.lane.b32.xlu1 %v4510_v35, %s7755_s30 }
 0x4b2   : > { %4566 = vrot.lane.b32.xlu0 %v4432_v41, %s7754_s29  ;;  %4639 = vrot.lane.b32.xlu1 %v4412_v10, %s7756_s14  ;;  %v9356_v10 = vpop.permute.xlu1 %3512 }
 0x4b6   : > { %4570 = vrot.lane.b32.xlu0 %v4440_v9, %s7754_s29  ;;  %4643 = vrot.lane.b32.xlu1 %v4420_v45, %s7756_s14  ;;  %v9363_v45 = vld [vmem:[%s12510_s4 + $0x1] ss:$2 sm:$0xff] }
 0x4ba   : > { %4600 = vrot.lane.b32.xlu0 %v4490_v19, %s7755_s30  ;;  %4647 = vrot.lane.b32.xlu1 %v4428_v6, %s7756_s14  ;;  %v3542_v6 = vpop.permute.xlu1 %3541 }
 0x4be   : > { %4604 = vrot.lane.b32.xlu0 %v4498_v24, %s7755_s30  ;;  %4651 = vrot.lane.b32.xlu1 %v4436_v62, %s7756_s14  ;;  %v9368_v62 = vrot.slane %v9363_v45, %v12911_v11 }
 0x4c0   : > { %12919 = vst [vmem:[#allocation21_spill] sm:$0xff] %v9368_v62 }
 0x4c2   : > { %4608 = vrot.lane.b32.xlu0 %v4506_v63, %s7755_s30  ;;  %4680 = vrot.lane.b32.xlu1 %v4486_v42, %s7757_s15  ;;  %v9375_v42 = vrot.slane %v9363_v45, %v12912_v5 }
 0x4c4   : > { %12920 = vst [vmem:[#allocation32_spill] sm:$0xff] %v9375_v42 }
 0x4c6   : > { %4612 = vrot.lane.b32.xlu0 %v4514_v20, %s7755_s30  ;;  %4684 = vrot.lane.b32.xlu1 %v4494_v3, %s7757_s15  ;;  %v9378_v3 = vpop.permute.xlu1 %3545 }
 0x4ca   : > { %4688 = vrot.lane.b32.xlu1 %v4502_v47, %s7757_s15  ;;  %4641 = vrot.lane.b32.xlu0 %v4416_v56, %s7756_s14  ;;  %v9384_v56 = vrot.slane %v9363_v45, %v12913_v58  ;;  %v9390_v47 = vld [vmem:[%s12510_s4] ss:$2 sm:$0xff] }
 0x4cc   : > { %12921 = vst [vmem:[#allocation19_spill] sm:$0xff] %v9384_v56 }
 0x4ce   : > { %4692 = vrot.lane.b32.xlu1 %v4510_v35, %s7757_s15  ;;  %4645 = vrot.lane.b32.xlu0 %v4424_v14, %s7756_s14  ;;  %v9392_v14 = vpop.permute.xlu1 %3549  ;;  %v9398_v35 = vrot.slane %v9390_v47, %v12911_v11  ;;  %v9414_v11 = vrot.slane %v9390_v47, %v12913_v58  ;;  %v9431_v58 = vld [vmem:[%s9428_s24] sm:$0xff] }
 0x4cf   : > { %5125 = vst [vmem:[#allocation6 + $0x8] sm:$0xf] %v9431_v58 }
 0x4d0   : > { %12923 = vst [vmem:[#allocation20_spill] sm:$0xff] %v9414_v11 }
 0x4d2   : > { %5251 = vrot.lane.b32.xlu1 %v9368_v62, %s7753_s28  ;;  %4649 = vrot.lane.b32.xlu0 %v4432_v41, %s7756_s14  ;;  %v9405_v41 = vrot.slane %v9390_v47, %v12912_v5 }
 0x4d4   : > { %12922 = vst [vmem:[#allocation30_spill] sm:$0xff] %v9405_v41 }
 0x4d6   : > { %5255 = vrot.lane.b32.xlu1 %v9375_v42, %s7753_s28  ;;  %4653 = vrot.lane.b32.xlu0 %v4440_v9, %s7756_s14  ;;  %v9408_v9 = vpop.permute.xlu1 %3553 }
 0x4da   : > { %5259 = vrot.lane.b32.xlu1 %v9384_v56, %s7753_s28  ;;  %4682 = vrot.lane.b32.xlu0 %v4490_v19, %s7757_s15  ;;  %v9417_v19 = vpop.permute.xlu1 %3771 }
 0x4db   : > { %12924 = vst [vmem:[#allocation31_spill] sm:$0xff] %v9417_v19 }
 0x4de   : > { %5292 = vrot.lane.b32.xlu1 %v9398_v35, %s7754_s29  ;;  %4686 = vrot.lane.b32.xlu0 %v4498_v24, %s7757_s15  ;;  %v9422_v5 = vpop.permute.xlu1 %3851 }
 0x4df   : > { %12925 = vst [vmem:[#allocation23_spill] sm:$0xff] %v9422_v5 }
 0x4e2   : > { %5296 = vrot.lane.b32.xlu1 %v9405_v41, %s7754_s29  ;;  %4690 = vrot.lane.b32.xlu0 %v4506_v63, %s7757_s15 }
 0x4e6   : > { %5300 = vrot.lane.b32.xlu1 %v9414_v11, %s7754_s29  ;;  %4694 = vrot.lane.b32.xlu0 %v4514_v20, %s7757_s15 }
 0x4e8   : > { %v9450_v23 = vpop.permute.xlu0 %3815 }
 0x4e9   : > { %12928 = vst [vmem:[#allocation33_spill] sm:$0xff] %v9450_v23 }
 0x4ea   : > { %5334 = vrot.lane.b32.xlu1 %v9368_v62, %s7755_s30 }
 0x4ed   : > { %v9436_v24 = vpop.permute.xlu1 %3963 }
 0x4ee   : > { %12926 = vst [vmem:[#allocation34_spill] sm:$0xff] %v9436_v24  ;;  %5338 = vrot.lane.b32.xlu1 %v9375_v42, %s7755_s30  ;;  %v9448_v24 = vrot.slane %v9390_v47, %v12915_v26 }
 0x4ef   : > { %v3096_v20 = vpop.f32.mrb[16].mxu0 }
 0x4f0   : > { %v3097_v63 = vadd.f32 %v3096_v20, %v8585_v38  ;;  %v3098_v5 = vpop.f32.mrb[17].mxu0 }
 0x4f1   : > { %v3099_v19 = vadd.f32 %v3098_v5, %v8585_v38  ;;  %v9442_v11 = vpop.permute.xlu1 %4441  ;;  %v3100_v36 = vpop.f32.mrb[18].mxu0 }
 0x4f2   : > { %12927 = vst [vmem:[#allocation22_spill] sm:$0xff] %v9442_v11  ;;  %vm3226_vm5 = vcmp.gt.f32.partialorder %v3097_v63, 0.0  ;;  %v3234_v60 = vmul.f32 0.01, %v3097_v63  ;;  %5342 = vrot.lane.b32.xlu1 %v9384_v56, %s7755_s30  ;;  %v3101_v62 = vpop.f32.mrb[19].mxu0  ;;  %v3475_v36 = vsel %vm2326_vm10, %v9318_v34, %v9240_v48 }
 0x4f3   : > { %vm3227_vm6 = vcmp.gt.f32.partialorder %v3099_v19, 0.0  ;;  %v3235_v42 = vmul.f32 0.01, %v3099_v19  ;;  %v3516_v62 = vsel %vm2368_vm8, %v9340_v8, %v9250_v50 }
 0x4f4   : > { %v9452_v20 = vsel %vm3226_vm5, %v3097_v63, %v3234_v60 }
 0x4f5   : > { %12929 = vst [vmem:[#allocation24_spill] sm:$0xff] %v9452_v20  ;;  %v9457_v5 = vsel %vm3227_vm6, %v3099_v19, %v3235_v42  ;;  %v9459_v11 = vpop.permute.xlu1 %4445  ;;  %v9463_v56 = vmul.f32 %v9318_v34, %v9452_v20  ;;  %v9477_v42 = vmul.f32 %v9340_v8, %v9452_v20  ;;  %v3557_v34 = vsel %vm436_vm2, %v3542_v6, %v9272_v25 }
 0x4f6   : > { %12930 = vst [vmem:[#allocation35_spill] sm:$0xff] %v9459_v11  ;;  %5377 = vrot.lane.b32.xlu1 %v9448_v24, %s7756_s14  ;;  %v7216_v60 = vpack.i.bf16 %v9457_v5, %v9452_v20  ;;  %v9473_v63 = vmul.f32 %v3475_v36, %v9457_v5  ;;  %v9482_v19 = vmul.f32 %v3516_v62, %v9457_v5 }
 0x4f7   : > { %12931 = vst [vmem:[#allocation25_spill] sm:$0xff] %v9477_v42  ;;  %v9485_v11 = vmul.f32 %v3542_v6, %v9452_v20  ;;  %v9492_v36 = vmul.f32 %v3557_v34, %v9457_v5  ;;  %v9509_v34 = vld [vmem:[#allocation3] sm:$0xff] }
 0x4f8   : > { %12932 = vst [vmem:[#allocation15_spill] sm:$0xff] %v9482_v19  ;;  %v9487_v23 = vpop.permute.xlu0 %3895  ;;  %v7241_v29 = vpack.i.bf16 %v9473_v63, %v9463_v56  ;;  %v3392_v56 = vsel %vm2241_vm9, %v8508_v13, %v8669_v32  ;;  %v3408_v8 = vmul.f32 %v9509_v34, %v8508_v13 }
 0x4f9   : > { %12933 = vst [vmem:[#allocation16_spill] sm:$0xff] %v9485_v11  ;;  %12934 = vst [vmem:[#allocation26_spill] sm:$0xff] %v9487_v23  ;;  %v9494_v55 = vpop.permute.xlu1 %4449  ;;  %v3394_v11 = vsel %vm2241_vm9, %v8514_v15, %v8682_v51 }
 0x4fa   : > { %12935 = vst [vmem:[#allocation27_spill] sm:$0xff] %v9492_v36  ;;  %12936 = vst [vmem:[#allocation17_spill] sm:$0xff] %v9494_v55  ;;  %7217 = vrot.lane.b32.xlu1 %v7216_v60, %s7754_s29  ;;  %v3434_v36 = vsel %vm2283_vm7, %v9226_v4, %v9300_v27 }
 0x4fc   : > { %v9501_v6 = vpop.permute.xlu0 %4443 }
 0x4fd   : > { %12937 = vst [vmem:[#allocation18_spill] sm:$0xff] %v9501_v6  ;;  %v9503_v37 = vpop.permute.xlu1 %4453  ;;  %v3409_v6 = vmul.f32 %v3392_v56, %v9452_v20  ;;  %v3435_v56 = vsel %vm2283_vm7, %v9300_v27, %v9231_v54  ;;  %v3518_v27 = vsel %vm2368_vm8, %v9346_v21, %v9253_v33  ;;  %v3451_v20 = vmul.f32 %v3434_v36, %v9457_v5 }
 0x4fe   : > { %12938 = vst [vmem:[#allocation28_spill] sm:$0xff] %v9503_v37  ;;  %7222 = vrot.lane.b32.xlu1 %v7216_v60, %s7752_s25  ;;  %v3393_v37 = vsel %vm2241_vm9, %v8669_v32, %v8514_v15  ;;  %v3476_v32 = vsel %vm2326_vm10, %v9240_v48, %v9326_v61  ;;  %v3558_v48 = vsel %vm436_vm2, %v9272_v25, %v9378_v3 }
 0x4ff   : > { %v3137_v63 = vpop.f32.mrb[16].mxu1  ;;  %v7231_v19 = vpack.i.bf16 %v3409_v6, %v3408_v8 }
 0x500   : > { %v3138_v55 = vadd.f32 %v3137_v63, %v8585_v38  ;;  %v9514_v23 = vpop.permute.xlu0 %4447  ;;  %v3139_v62 = vpop.f32.mrb[17].mxu1 }
 0x501   : > { %12939 = vst [vmem:[#allocation38_spill] sm:$0xff] %v9514_v23  ;;  %v3140_v13 = vadd.f32 %v3139_v62, %v8585_v38  ;;  %v9527_v63 = vpop.permute.xlu1 %4515  ;;  %v3141_v23 = vpop.f32.mrb[18].mxu1  ;;  %v3477_v62 = vsel %vm2326_vm10, %v9326_v61, %v9242_v39  ;;  %v3559_v61 = vsel %vm436_vm2, %v9378_v3, %v9276_v52 }
 0x502   : > { %12940 = vst [vmem:[#allocation36_spill] sm:$0xff] %v9527_v63  ;;  %vm3228_vm5 = vcmp.gt.f32.partialorder %v3138_v55, 0.0  ;;  %v3236_v42 = vmul.f32 0.01, %v3138_v55  ;;  %7227 = vrot.lane.b32.xlu1 %v7216_v60, %s7759_s18  ;;  %v3142_v15 = vpop.f32.mrb[19].mxu1  ;;  %v3517_v23 = vsel %vm2368_vm8, %v9250_v50, %v9346_v21 }
 0x503   : > { %vm3229_vm6 = vcmp.gt.f32.partialorder %v3140_v13, 0.0  ;;  %v3237_v63 = vmul.f32 0.01, %v3140_v13 }
 0x504   : > { %v9548_v60 = vsel %vm3228_vm5, %v3138_v55, %v3236_v42  ;;  %v9550_v15 = vpop.permute.xlu0 %4451 }
 0x505   : > { %12941 = vst [vmem:[#allocation37_spill] sm:$0xff] %v9550_v15  ;;  %v9555_v50 = vsel %vm3229_vm6, %v3140_v13, %v3237_v63  ;;  %v9557_v41 = vpop.permute.xlu1 %4519  ;;  %v3452_v21 = vmul.f32 %v3435_v56, %v9548_v60  ;;  %v3534_v55 = vmul.f32 %v3517_v23, %v9548_v60  ;;  %v3575_v42 = vmul.f32 %v3558_v48, %v9548_v60 }
 0x506   : > { %12942 = vst [vmem:[#allocation39_spill] sm:$0xff] %v9557_v41  ;;  %7232 = vrot.lane.b32.xlu1 %v7231_v19, %s7762_s19  ;;  %v3535_v25 = vmul.f32 %v3518_v27, %v9555_v50  ;;  %v3576_v8 = vmul.f32 %v3559_v61, %v9555_v50  ;;  %v9568_v3 = vpack.i.bf16 %v9555_v50, %v9548_v60 }
 0x507   : > { %v7276_v6 = vpack.i.bf16 %v3452_v21, %v3451_v20  ;;  %v9571_v13 = vmul.f32 %v3393_v37, %v9457_v5  ;;  %v9574_v36 = vmul.f32 %v3394_v11, %v9548_v60  ;;  %v9579_v23 = vmul.f32 %v3476_v32, %v9548_v60 }
 0x508   : > { %v9576_v19 = vpop.permute.xlu0 %4455  ;;  %v7286_v63 = vpack.i.bf16 %v3535_v25, %v3534_v55  ;;  %v7291_v56 = vpack.i.bf16 %v3576_v8, %v3575_v42  ;;  %v9582_v27 = vmul.f32 %v3477_v62, %v9555_v50  ;;  %v3395_v42 = vsel %vm2241_vm9, %v8682_v51, %v8517_v44 }
 0x509   : > { %12943 = vst [vmem:[#allocation48_spill] sm:$0xff] %v9576_v19  ;;  %v9584_v20 = vpop.permute.xlu1 %4523  ;;  %v3396_v8 = vsel %vm2241_vm9, %v8517_v44, %v8701_v28  ;;  %v9625_v48 = vsel %vm2241_vm9, %v8519_v0, %v8724_v16  ;;  %v3436_v51 = vsel %vm2283_vm7, %v9231_v54, %v9305_v12  ;;  %v3437_v44 = vsel %vm2283_vm7, %v9305_v12, %v9236_v7 }
 0x50a   : > { %12944 = vst [vmem:[#allocation40_spill] sm:$0xff] %v9584_v20  ;;  %7242 = vrot.lane.b32.xlu1 %v7241_v29, %s7758_s13  ;;  %v3478_v54 = vsel %vm2326_vm10, %v9242_v39, %v9330_v53  ;;  %v3479_v12 = vsel %vm2326_vm10, %v9330_v53, %v9244_v57  ;;  %v9659_v39 = vmul.f32 %v3436_v51, %v9555_v50 }
 0x50c   : > { %v9591_v11 = vpop.permute.xlu0 %4517 }
 0x50d   : > { %12945 = vst [vmem:[#allocation49_spill] sm:$0xff] %v9591_v11  ;;  %v9593_v61 = vpop.permute.xlu1 %4527 }
 0x50e   : > { %12946 = vst [vmem:[#allocation41_spill] sm:$0xff] %v9593_v61  ;;  %7277 = vrot.lane.b32.xlu1 %v7276_v6, %s7747_s16  ;;  %v9617_v6 = vsel %vm2241_vm9, %v8701_v28, %v8519_v0  ;;  %v3439_v0 = vsel %vm2283_vm7, %v9313_v40, %v9238_v31 }
 0x510   : > { %v9596_v32 = vpop.permute.xlu0 %4521 }
 0x511   : > { %12947 = vst [vmem:[#allocation42_spill] sm:$0xff] %v9596_v32  ;;  %v9598_v62 = vpop.permute.xlu1 %4556 }
 0x512   : > { %12948 = vst [vmem:[#allocation43_spill] sm:$0xff] %v9598_v62  ;;  %7287 = vrot.lane.b32.xlu1 %v7286_v63, %s7748_s17 }
 0x514   : > { %v9601_v21 = vpop.permute.xlu0 %4525 }
 0x515   : > { %12949 = vst [vmem:[#allocation44_spill] sm:$0xff] %v9601_v21  ;;  %v9603_v55 = vpop.permute.xlu1 %4560 }
 0x516   : > { %12950 = vst [vmem:[#allocation45_spill] sm:$0xff] %v9603_v55  ;;  %7292 = vrot.lane.b32.xlu1 %v7291_v56, %s7760_s20 }
 0x518   : > { %v9606_v29 = vpop.permute.xlu0 %4529  ;;  %v3178_v25 = vpop.f32.mrb[20].mxu0 }
 0x519   : > { %12951 = vst [vmem:[#allocation46_spill] sm:$0xff] %v9606_v29  ;;  %v3179_v63 = vadd.f32 %v3178_v25, %v8585_v38  ;;  %v9620_v37 = vpop.permute.xlu1 %4564  ;;  %v3180_v56 = vpop.f32.mrb[21].mxu0  ;;  %v3438_v25 = vsel %vm2283_vm7, %v9236_v7, %v9313_v40  ;;  %v3519_v7 = vsel %vm2368_vm8, %v9253_v33, %v9350_v46  ;;  %v3520_v33 = vsel %vm2368_vm8, %v9350_v46, %v9262_v1 }
 0x51a   : > { %12952 = vst [vmem:[#allocation50_spill] sm:$0xff] %v9620_v37  ;;  %v3181_v28 = vadd.f32 %v3180_v56, %v8585_v38  ;;  %v3182_v19 = vpop.f32.mrb[22].mxu0 }
 0x51b   : > { %vm3230_vm5 = vcmp.gt.f32.partialorder %v3179_v63, 0.0  ;;  %v3238_v15 = vmul.f32 0.01, %v3179_v63  ;;  %v3183_v29 = vpop.f32.mrb[23].mxu0 }
 0x51c   : > { %vm3231_vm6 = vcmp.gt.f32.partialorder %v3181_v28, 0.0  ;;  %v3239_v19 = vmul.f32 0.01, %v3181_v28  ;;  %v9646_v56 = vpop.permute.xlu0 %4558  ;;  %v9656_v29 = vmul.f32 %v3395_v42, %v9555_v50 }
 0x51d   : > { %12953 = vst [vmem:[#allocation47_spill] sm:$0xff] %v9646_v56  ;;  %v9651_v40 = vsel %vm3230_vm5, %v3179_v63, %v3238_v15  ;;  %v9653_v61 = vpop.permute.xlu1 %4568 }
 0x51e   : > { %12954 = vst [vmem:[#allocation7_spill] sm:$0xff] %v9653_v61  ;;  %v9661_v37 = vsel %vm3231_vm6, %v3181_v28, %v3239_v19  ;;  %v3413_v53 = vmul.f32 %v3396_v8, %v9651_v40  ;;  %v9665_v21 = vmul.f32 %v3478_v54, %v9651_v40  ;;  %v9668_v20 = vmul.f32 %v3437_v44, %v9651_v40 }
 0x51f   : > { %v3219_v15 = vpop.f32.mrb[20].mxu1  ;;  %v7296_v42 = vpack.i.bf16 %v9661_v37, %v9651_v40  ;;  %v3496_v63 = vmul.f32 %v3479_v12, %v9661_v37  ;;  %v9677_v51 = vmul.f32 %v3519_v7, %v9651_v40  ;;  %v9686_v46 = vmul.f32 %v3520_v33, %v9661_v37 }
 0x520   : > { %v3220_v8 = vadd.f32 %v3219_v15, %v8585_v38  ;;  %v9680_v28 = vpop.permute.xlu0 %4562  ;;  %v3221_v54 = vpop.f32.mrb[21].mxu1  ;;  %v7311_v44 = vpack.i.bf16 %v3413_v53, %v9656_v29  ;;  %v3480_v12 = vsel %vm2326_vm10, %v9244_v57, %v9336_v2  ;;  %v3560_v7 = vsel %vm436_vm2, %v9276_v52, %v9392_v14 }
 0x521   : > { %12955 = vst [vmem:[#allocation9_spill] sm:$0xff] %v9680_v28  ;;  %v3222_v15 = vadd.f32 %v3221_v54, %v8585_v38  ;;  %v9695_v61 = vpop.permute.xlu1 %4598  ;;  %7297 = vrot.lane.b32.xlu1 %v7296_v42, %s7754_s29  ;;  %v7321_v29 = vpack.i.bf16 %v3496_v63, %v9665_v21  ;;  %v3223_v53 = vpop.f32.mrb[22].mxu1  ;;  %v3561_v33 = vsel %vm436_vm2, %v9392_v14, %v9283_v59 }
 0x522   : > { %12956 = vst [vmem:[#allocation11_spill] sm:$0xff] %v9695_v61  ;;  %vm3232_vm5 = vcmp.gt.f32.partialorder %v3220_v8, 0.0  ;;  %v3240_v19 = vmul.f32 0.01, %v3220_v8  ;;  %v3224_v28 = vpop.f32.mrb[23].mxu1  ;;  %v9705_v38 = vmul.f32 %v3560_v7, %v9651_v40  ;;  %v9708_v54 = vmul.f32 %v3561_v33, %v9661_v37 }
 0x523   : > { %vm3233_vm6 = vcmp.gt.f32.partialorder %v3222_v15, 0.0  ;;  %v3241_v52 = vmul.f32 0.01, %v3222_v15  ;;  %v3481_v21 = vsel %vm2326_vm10, %v9336_v2, %v9246_v49  ;;  %v3521_v14 = vsel %vm2368_vm8, %v9262_v1, %v9356_v10 }
 0x524   : > { %v3522_v63 = vsel %vm2368_vm8, %v9356_v10, %v9266_v17  ;;  %v9719_v28 = vsel %vm3232_vm5, %v3220_v8, %v3240_v19  ;;  %v9721_v53 = vpop.permute.xlu0 %4566  ;;  %v3562_v7 = vsel %vm436_vm2, %v9283_v59, %v9408_v9  ;;  %v3455_v2 = vmul.f32 %v3438_v25, %v9661_v37 }
 0x525   : > { %12957 = vst [vmem:[#allocation8_spill] sm:$0xff] %v9721_v53  ;;  %v9726_v33 = vsel %vm3233_vm6, %v3222_v15, %v3241_v52  ;;  %v9728_v57 = vpop.permute.xlu1 %4602  ;;  %7302 = vrot.lane.b32.xlu1 %v7296_v42, %s7752_s25  ;;  %v3456_v49 = vmul.f32 %v3439_v0, %v9719_v28  ;;  %v3563_v1 = vsel %vm436_vm2, %v9408_v9, %v9287_v43  ;;  %v12981_v53 = vld [vmem:[#allocation27_spill] sm:$0xff] }
 0x526   : > { %12958 = vst [vmem:[#allocation10_spill] sm:$0xff] %v9728_v57  ;;  %v3538_v17 = vmul.f32 %v3521_v14, %v9719_v28  ;;  %v3539_v10 = vmul.f32 %v3522_v63, %v9726_v33  ;;  %v3579_v59 = vmul.f32 %v3562_v7, %v9719_v28  ;;  %v3580_v19 = vmul.f32 %v3563_v1, %v9726_v33 }
 0x527   : > { %v7356_v8 = vpack.i.bf16 %v3456_v49, %v3455_v2  ;;  %v9744_v25 = vpack.i.bf16 %v9726_v33, %v9719_v28  ;;  %v9750_v43 = vmul.f32 %v9617_v6, %v9661_v37  ;;  %v9754_v9 = vmul.f32 %v9625_v48, %v9719_v28 }
 0x528   : > { %v9746_v0 = vpop.permute.xlu0 %4570  ;;  %v7366_v52 = vpack.i.bf16 %v3539_v10, %v3538_v17  ;;  %v9757_v14 = vmul.f32 %v3480_v12, %v9719_v28  ;;  %v7371_v7 = vpack.i.bf16 %v3580_v19, %v3579_v59  ;;  %v9763_v2 = vmul.f32 %v3481_v21, %v9726_v33  ;;  %v5110_v21 = vld [vmem:[%s9428_s24 + $0x8] sm:$0xff] }
 0x529   : > { %12959 = vst [vmem:[#allocation12_spill] sm:$0xff] %v9746_v0  ;;  %v9759_v63 = vpop.permute.xlu1 %4606  ;;  %7307 = vrot.lane.b32.xlu1 %v7296_v42, %s7759_s18  ;;  %v5117_v42 = vcombine.high %v9431_v58, %v9431_v58  ;;  %v5118_v59 = vcombine.high %v5110_v21, %v5110_v21  ;;  %5127 = vst [vmem:[#allocation6 + $0x18] sm:$0xf] %v5110_v21  ;;  %v3416_v58 = vmul.f32 %v8724_v16, %v9726_v33 }
 0x52a   : > { %12960 = vst [vmem:[#allocation59_spill] sm:$0xff] %v9759_v63  ;;  %v9808_v16 = vrot.slane %v9363_v45, %v12916_v18 }
 0x52b   : > { %5126 = vst [vmem:[#allocation6 + $0x10] sm:$0xf] %v5117_v42  ;;  %5128 = vst [vmem:[#allocation6 + $0x20] sm:$0xf] %v5118_v59  ;;  %v5111_v42 = vld [vmem:[%s9428_s24 + $0x10] sm:$0xff] }
 0x52c   : > { %v9769_v48 = vpop.permute.xlu0 %4600  ;;  %v5119_v15 = vcombine.high %v5111_v42, %v5111_v42  ;;  %5129 = vst [vmem:[#allocation6 + $0x28] sm:$0xf] %v5111_v42 }
 0x52d   : > { %12961 = vst [vmem:[#allocation60_spill] sm:$0xff] %v9769_v48  ;;  %v9771_v1 = vpop.permute.xlu1 %4610  ;;  %7312 = vrot.lane.b32.xlu1 %v7311_v44, %s7762_s19  ;;  %v4597_v44 = vld [vmem:[#allocation5 + $0x48] sm:$0xff] }
 0x52e   : > { %12962 = vst [vmem:[#allocation61_spill] sm:$0xff] %v9771_v1  ;;  %5130 = vst [vmem:[#allocation6 + $0x30] sm:$0xf] %v5119_v15  ;;  %v12976_v1 = vld [vmem:[#allocation30_spill] sm:$0xff] }
 0x530   : > { %v9774_v12 = vpop.permute.xlu0 %4604 }
 0x531   : > { %12963 = vst [vmem:[#allocation62_spill] sm:$0xff] %v9774_v12  ;;  %v9778_v17 = vpop.permute.xlu1 %4639  ;;  %7322 = vrot.lane.b32.xlu1 %v7321_v29, %s7758_s13  ;;  %v12989_v12 = vpack.i.bf16 %v9574_v36, %v9571_v13  ;;  %v12994_v13 = vpack.i.bf16 %v9686_v46, %v9677_v51  ;;  %v12995_v36 = vpack.i.bf16 %v9708_v54, %v9705_v38 }
 0x532   : > { %12964 = vst [vmem:[#allocation63_spill] sm:$0xff] %v9778_v17  ;;  %v12999_v46 = vpack.i.bf16 %v9754_v9, %v9750_v43  ;;  %v3457_v54 = vmul.f32 %v9238_v31, %v9726_v33  ;;  %v13002_v43 = vpack.i.bf16 %v9763_v2, %v9757_v14 }
 0x534   : > { %v9782_v10 = vpop.permute.xlu0 %4608 }
 0x535   : > { %12965 = vst [vmem:[#allocation64_spill] sm:$0xff] %v9782_v10  ;;  %v9784_v19 = vpop.permute.xlu1 %4643  ;;  %7357 = vrot.lane.b32.xlu1 %v7356_v8, %s7747_s16  ;;  %v9799_v8 = vrot.slane %v9363_v45, %v12915_v26  ;;  %v9817_v26 = vrot.slane %v9363_v45, %v12917_v22  ;;  %v9837_v45 = vrot.slane %v9390_v47, %v12917_v22  ;;  %v12978_v10 = vld [vmem:[#allocation15_spill] sm:$0xff] }
 0x536   : > { %12966 = vst [vmem:[#allocation65_spill] sm:$0xff] %v9784_v19  ;;  %v3433_v22 = vsel %vm2283_vm7, %v9290_v30, %v9226_v4  ;;  %v12979_v4 = vld [vmem:[#allocation25_spill] sm:$0xff] }
 0x537   : > { %v12980_v63 = vpack.i.bf16 %v12978_v10, %v12979_v4  ;;  %v12987_v10 = vld [vmem:[#allocation51_spill] sm:$0xff] }
 0x538   : > { %v9789_v49 = vpop.permute.xlu0 %4612 }
 0x539   : > { %12967 = vst [vmem:[#allocation66_spill] sm:$0xff] %v9789_v49  ;;  %v4638_v6 = vmul.f32 %v9789_v49, %v4597_v44  ;;  %v9792_v29 = vpop.permute.xlu1 %4647  ;;  %3651 = vrot.lane.b32.xlu1 %v3416_v58, %s7762_s19 }
 0x53a   : > { %12968 = vst [vmem:[#allocation67_spill] sm:$0xff] %v9792_v29 }
 0x53b   : > { %4910 = vrot.lane.b32.xlu0 %v4638_v6, %s7758_s13 }
 0x53c   : > { %v9901_v17 = vpop.permute.xlu0 %4641 }
 0x53d   : > { %v9801_v21 = vpop.permute.xlu1 %4651  ;;  %7367 = vrot.lane.b32.xlu1 %v7366_v52, %s7748_s17  ;;  %12988 = vst [vmem:[#allocation25_spill] sm:$0xff] %v9901_v17 }
 0x53e   : > { %12969 = vst [vmem:[#allocation68_spill] sm:$0xff] %v9801_v21  ;;  %v12975_v21 = vld [vmem:[#allocation24_spill] sm:$0xff] }
 0x53f   : > { %5253 = vrot.lane.b32.xlu0 %v9799_v8, %s7753_s28  ;;  %v3450_v49 = vmul.f32 %v3433_v22, %v12975_v21  ;;  %v12982_v22 = vld [vmem:[#allocation16_spill] sm:$0xff] }
 0x541   : > { %v9810_v59 = vpop.permute.xlu1 %4680  ;;  %7372 = vrot.lane.b32.xlu1 %v7371_v7, %s7760_s20  ;;  %v9829_v7 = vrot.slane %v9390_v47, %v12916_v18  ;;  %v3449_v47 = vmul.f32 %v9509_v34, %v9290_v30 }
 0x542   : > { %12970 = vst [vmem:[#allocation69_spill] sm:$0xff] %v9810_v59 }
 0x543   : > { %5257 = vrot.lane.b32.xlu0 %v9808_v16, %s7753_s28 }
 0x545   : > { %v9819_v15 = vpop.permute.xlu1 %4684 }
 0x546   : > { %12971 = vst [vmem:[#allocation70_spill] sm:$0xff] %v9819_v15  ;;  %v12983_v15 = vpack.i.bf16 %v12981_v53, %v12982_v22 }
 0x547   : > { %5261 = vrot.lane.b32.xlu0 %v9817_v26, %s7753_s28 }
 0x549   : > { %v9823_v52 = vpop.permute.xlu1 %4688 }
 0x54a   : > { %12972 = vst [vmem:[#allocation71_spill] sm:$0xff] %v9823_v52  ;;  %v7236_v52 = vpack.i.bf16 %v3450_v49, %v3449_v47 }
 0x54b   : > { %5294 = vrot.lane.b32.xlu0 %v9448_v24, %s7754_s29 }
 0x54d   : > { %v9831_v6 = vpop.permute.xlu1 %4692 }
 0x54e   : > { %12973 = vst [vmem:[#allocation72_spill] sm:$0xff] %v9831_v6 }
 0x54f   : > { %5298 = vrot.lane.b32.xlu0 %v9829_v7, %s7754_s29 }
 0x551   : > { %v9839_v44 = vpop.permute.xlu1 %5251 }
 0x553   : > { %5302 = vrot.lane.b32.xlu0 %v9837_v45, %s7754_s29 }
 0x555   : > { %v9843_v58 = vpop.permute.xlu1 %5255 }
 0x557   : > { %5336 = vrot.lane.b32.xlu0 %v9799_v8, %s7755_s30 }
 0x559   : > { %v9847_v18 = vpop.permute.xlu1 %5259 }
 0x55b   : > { %5340 = vrot.lane.b32.xlu0 %v9808_v16, %s7755_s30 }
 0x55d   : > { %v9851_v42 = vpop.permute.xlu1 %5292 }
 0x55e   : > { %12974 = vst [vmem:[#allocation73_spill] sm:$0xff] %v9851_v42 }
 0x55f   : > { %5375 = vrot.lane.b32.xlu0 %v9398_v35, %s7756_s14 }
 0x561   : > { %v9860_v6 = vpop.permute.xlu1 %5296 }
 0x563   : > { %5379 = vrot.lane.b32.xlu0 %v12976_v1, %s7756_s14 }
 0x565   : > { %v9865_v0 = vpop.permute.xlu1 %5300 }
 0x567   : > { %7237 = vrot.lane.b32.xlu0 %v7236_v52, %s7747_s16 }
 0x569   : > { %v9868_v29 = vpop.permute.xlu1 %5334 }
 0x56a   : > { %12977 = vst [vmem:[#allocation24_spill] sm:$0xff] %v9868_v29 }
 0x56b   : > { %7247 = vrot.lane.b32.xlu0 %v12980_v63, %s7748_s17  ;;  %v12986_v63 = vld [vmem:[#allocation55_spill] sm:$0xff] }
 0x56c   : > { %v3318_v47 = vsel %vm2166_vm13, %v12987_v10, %v12986_v63 }
 0x56d   : > { %v9874_v30 = vpop.permute.xlu1 %5338 }
 0x56f   : > { %7252 = vrot.lane.b32.xlu0 %v12983_v15, %s7760_s20  ;;  %v3335_v15 = vmul.f32 %v3318_v47, %v12975_v21  ;;  %v9912_v21 = vpop.permute.xlu0 %4645  ;;  %v12992_v47 = vpack.i.bf16 %v9668_v20, %v9659_v39 }
 0x570   : > { %12991 = vst [vmem:[#allocation27_spill] sm:$0xff] %v9912_v21 }
 0x571   : > { %v9880_v19 = vpop.permute.xlu1 %5342 }
 0x572   : > { %12984 = vst [vmem:[#allocation30_spill] sm:$0xff] %v9880_v19 }
 0x573   : > { %7257 = vrot.lane.b32.xlu0 %v9568_v3, %s7754_s29 }
 0x575   : > { %v9884_v49 = vpop.permute.xlu1 %5377 }
 0x576   : > { %12985 = vst [vmem:[#allocation15_spill] sm:$0xff] %v9884_v49 }
 0x577   : > { %7262 = vrot.lane.b32.xlu0 %v9568_v3, %s7752_s25 }
 0x579   : > { %v9888_v52 = vpop.permute.xlu1 %7217 }
 0x57a   : > { %v12640_v4 = vunpack.i.h.bf16 %v9888_v52  ;;  %v7219_v53 = vunpack.i.l.bf16 %v9888_v52 }
 0x57b   : > { %7267 = vrot.lane.b32.xlu0 %v9568_v3, %s7759_s18  ;;  %v12990_v3 = vpack.i.bf16 %v9582_v27, %v9579_v23 }
 0x57c   : > { %v3610_v22 = vsel %vm2283_vm7, %v7219_v53, %v12640_v4 }
 0x57d   : > { %v3915_v59 = vpack.c.bf16 %v3610_v22, %v3335_v15  ;;  %v9918_v15 = vpop.permute.xlu0 %4649  ;;  %v9932_v27 = vpop.permute.xlu1 %7222 }
 0x57e   : > { %12993 = vst [vmem:[#allocation16_spill] sm:$0xff] %v9918_v15 }
 0x57f   : > { %7272 = vrot.lane.b32.xlu0 %v12989_v12, %s7762_s19  ;;  %4013 = vrot.lane.b32.xlu1 %v3915_v59, %s7757_s15  ;;  %v13001_v59 = vld [vmem:[#allocation29_spill] sm:$0xff] }
 0x580   : > { %v7179_v22 = vunpack.i.h.bf16 %v13001_v59 }
 0x581   : > { %v9928_v23 = vpop.permute.xlu0 %4653  ;;  %v9938_v39 = vpop.permute.xlu1 %7227 }
 0x582   : > { %12996 = vst [vmem:[#allocation55_spill] sm:$0xff] %v9928_v23 }
 0x583   : > { %7282 = vrot.lane.b32.xlu0 %v12990_v3, %s7758_s13 }
 0x585   : > { %v9934_v20 = vpop.permute.xlu0 %4682  ;;  %v9948_v38 = vpop.permute.xlu1 %7232 }
 0x586   : > { %12997 = vst [vmem:[#allocation51_spill] sm:$0xff] %v9934_v20  ;;  %v7235_v20 = vunpack.i.h.bf16 %v9948_v38  ;;  %v7234_v17 = vunpack.i.l.bf16 %v9948_v38 }
 0x587   : > { %7317 = vrot.lane.b32.xlu0 %v12992_v47, %s7747_s16  ;;  %v3334_v47 = vmul.f32 %v9509_v34, %v12987_v10 }
 0x588   : > { %v3653_v41 = vsel %vm2506_vm12, %v7234_v17, %v7235_v20 }
 0x589   : > { %v9942_v51 = vpop.permute.xlu0 %4686  ;;  %v9957_v3 = vpop.permute.xlu1 %7242 }
 0x58a   : > { %12998 = vst [vmem:[#allocation74_spill] sm:$0xff] %v9942_v51  ;;  %v7244_v31 = vunpack.i.l.bf16 %v9957_v3  ;;  %v12659_v48 = vunpack.i.h.bf16 %v9957_v3 }
 0x58b   : > { %7327 = vrot.lane.b32.xlu0 %v12994_v13, %s7748_s17 }
 0x58c   : > { %v3773_v38 = vsel %vm2628_vm14, %v7244_v31, %v12659_v48 }
 0x58d   : > { %v9952_v12 = vpop.permute.xlu0 %4690 }
 0x58e   : > { %13000 = vst [vmem:[#allocation75_spill] sm:$0xff] %v9952_v12 }
 0x58f   : > { %7332 = vrot.lane.b32.xlu0 %v12995_v36, %s7760_s20  ;;  %v7224_v36 = vunpack.i.l.bf16 %v9932_v27 }
 0x591   : > { %v9965_v9 = vpop.permute.xlu0 %4694 }
 0x592   : > { %13003 = vst [vmem:[#allocation29_spill] sm:$0xff] %v9965_v9 }
 0x593   : > { %7337 = vrot.lane.b32.xlu0 %v9744_v25, %s7754_s29 }
 0x597   : > { %7342 = vrot.lane.b32.xlu0 %v9744_v25, %s7752_s25 }
 0x59b   : > { %7347 = vrot.lane.b32.xlu0 %v9744_v25, %s7759_s18  ;;  %v3609_v25 = vsel %vm2283_vm7, %v7179_v22, %v7219_v53  ;;  %v3932_v53 = vpack.c.bf16 %v7244_v31, %v7224_v36 }
 0x59c   : > { %v3914_v13 = vpack.c.bf16 %v3609_v25, %v3334_v47 }
 0x59f   : > { %7352 = vrot.lane.b32.xlu0 %v12999_v46, %s7762_s19 }
 0x5a3   : > { %3695 = vrot.lane.b32.xlu0 %v3457_v54, %s7747_s16 }
 0x5a7   : > { %7362 = vrot.lane.b32.xlu0 %v13002_v43, %s7758_s13 }
 0x5ab   : > { %4011 = vrot.lane.b32.xlu0 %v3914_v13, %s7757_s15 }
 0x5ad   : > { %v9970_v46 = vpop.permute.xlu0 %4910 }
 0x5ae   : > { %13004 = vst [vmem:[#allocation76_spill] sm:$0xff] %v9970_v46  ;;  %v7229_v46 = vunpack.i.l.bf16 %v9938_v39 }
 0x5af   : > { %4047 = vrot.lane.b32.xlu0 %v3932_v53, %s7757_s15  ;;  %v9993_v53 = vpop.permute.xlu1 %7277 }
 0x5b0   : > { %v12668_v29 = vunpack.i.h.bf16 %v9993_v53 }
 0x5b1   : > { %v9973_v34 = vpop.permute.xlu0 %5253 }
 0x5b3   : > { %v10002_v57 = vpop.permute.xlu1 %7287 }
 0x5b5   : > { %v9975_v10 = vpop.permute.xlu0 %5257 }
 0x5b7   : > { %v10014_v62 = vpop.permute.xlu1 %7292 }
 0x5b9   : > { %v9977_v14 = vpop.permute.xlu0 %5261 }
 0x5bd   : > { %v9979_v2 = vpop.permute.xlu0 %5294 }
 0x5c1   : > { %v9981_v54 = vpop.permute.xlu0 %5298 }
 0x5c5   : > { %v9983_v59 = vpop.permute.xlu0 %5302 }
 0x5c6   : > { %13005 = vst [vmem:[#allocation77_spill] sm:$0xff] %v9983_v59 }
 0x5c9   : > { %v9985_v22 = vpop.permute.xlu0 %5336 }
 0x5cd   : > { %v9987_v25 = vpop.permute.xlu0 %5340 }
 0x5d1   : > { %v9989_v47 = vpop.permute.xlu0 %5375 }
 0x5d2   : > { %13006 = vst [vmem:[#allocation78_spill] sm:$0xff] %v9989_v47 }
 0x5d5   : > { %v9991_v43 = vpop.permute.xlu0 %5379 }
 0x5d6   : > { %13007 = vst [vmem:[#allocation79_spill] sm:$0xff] %v9991_v43 }
 0x5d9   : > { %v7238_v13 = vpop.permute.xlu0 %7237 }
 0x5da   : > { %v7240_v12 = vunpack.i.h.bf16 %v7238_v13  ;;  %v7239_v15 = vunpack.i.l.bf16 %v7238_v13  ;;  %v12662_v13 = vunpack.i.h.bf16 %v9932_v27 }
 0x5dc   : > { %v3697_v55 = vsel %vm2551_vm11, %v7239_v15, %v7240_v12 }
 0x5dd   : > { %v7248_v4 = vpop.permute.xlu0 %7247 }
 0x5de   : > { %v7249_v23 = vunpack.i.l.bf16 %v7248_v4 }
 0x5e0   : > { %v3941_v9 = vpack.c.bf16 %v7229_v46, %v7249_v23 }
 0x5e1   : > { %v9996_v51 = vpop.permute.xlu0 %7252 }
 0x5e2   : > { %v7254_v21 = vunpack.i.l.bf16 %v9996_v51  ;;  %4065 = vrot.lane.b32.xlu1 %v3941_v9, %s7757_s15  ;;  %v3923_v9 = vpack.c.bf16 %v3697_v55, %v3653_v41  ;;  %v13008_v41 = vld [vmem:[#allocation56_spill] sm:$0xff] }
 0x5e3   : > { %v13009_v55 = vld [vmem:[#allocation52_spill] sm:$0xff] }
 0x5e4   : > { %v3950_v61 = vpack.c.bf16 %v7254_v21, %v7254_v21  ;;  %v3320_v43 = vsel %vm2166_vm13, %v13009_v55, %v13008_v41 }
 0x5e5   : > { %v10006_v32 = vpop.permute.xlu0 %7257  ;;  %v3337_v19 = vmul.f32 %v3320_v43, %v9548_v60  ;;  %v7230_v60 = vunpack.i.h.bf16 %v9938_v39  ;;  %v12673_v39 = vunpack.i.l.bf16 %v10002_v57 }
 0x5e6   : > { %4083 = vrot.lane.b32.xlu1 %v3950_v61, %s7757_s15  ;;  %v12664_v56 = vunpack.i.h.bf16 %v10006_v32  ;;  %v7259_v11 = vunpack.i.l.bf16 %v10006_v32  ;;  %v3730_v61 = vsel %vm2166_vm13, %v7224_v36, %v12662_v13  ;;  %v7279_v36 = vunpack.i.l.bf16 %v9993_v53 }
 0x5e7   : > { %v3933_v17 = vpack.c.bf16 %v3773_v38, %v3730_v61  ;;  %v7250_v13 = vunpack.i.h.bf16 %v7248_v4 }
 0x5e8   : > { %v3612_v31 = vsel %vm2283_vm7, %v7259_v11, %v12664_v56  ;;  %v3699_v43 = vsel %vm2551_vm11, %v7279_v36, %v12668_v29  ;;  %v7255_v29 = vunpack.i.h.bf16 %v9996_v51 }
 0x5e9   : > { %v10018_v15 = vpop.permute.xlu0 %7262  ;;  %v3917_v38 = vpack.c.bf16 %v3612_v31, %v3337_v19  ;;  %v3817_v42 = vsel %vm2673_vm0, %v7249_v23, %v7250_v13 }
 0x5ea   : > { %4029 = vrot.lane.b32.xlu1 %v3923_v9, %s7757_s15  ;;  %v10034_v9 = vpop.permute.xlu1 %7297 }
 0x5ed   : > { %v10030_v48 = vpop.permute.xlu0 %7267 }
 0x5ee   : > { %4049 = vrot.lane.b32.xlu1 %v3933_v17, %s7757_s15  ;;  %v3698_v17 = vsel %vm2551_vm11, %v7240_v12, %v7279_v36  ;;  %v10053_v31 = vpop.permute.xlu1 %7302  ;;  %v13010_v12 = vunpack.i.l.bf16 %v10030_v48  ;;  %v7294_v36 = vunpack.i.l.bf16 %v10014_v62 }
 0x5f1   : > { %v10038_v61 = vpop.permute.xlu0 %7272 }
 0x5f2   : > { %v7275_v56 = vunpack.i.h.bf16 %v10038_v61  ;;  %v7274_v47 = vunpack.i.l.bf16 %v10038_v61  ;;  %4017 = vrot.lane.b32.xlu1 %v3917_v38, %s7757_s15 }
 0x5f4   : > { %v3654_v19 = vsel %vm2506_vm12, %v7235_v20, %v7274_v47  ;;  %v3655_v4 = vsel %vm2506_vm12, %v7274_v47, %v7275_v56  ;;  %v3854_v20 = vsel %vm2710_vm15, %v7230_v60, %v13010_v12  ;;  %v3853_v47 = vsel %vm2710_vm15, %v7229_v46, %v7230_v60  ;;  %v10076_v12 = vpop.permute.xlu1 %7307 }
 0x5f5   : > { %v10055_v59 = vpop.permute.xlu0 %7282  ;;  %v3924_v49 = vpack.c.bf16 %v3698_v17, %v3654_v19  ;;  %v3925_v38 = vpack.c.bf16 %v3699_v43, %v3655_v4  ;;  %v3818_v43 = vsel %vm2673_vm0, %v7250_v13, %v12673_v39  ;;  %v3942_v23 = vpack.c.bf16 %v3853_v47, %v3817_v42 }
 0x5f6   : > { %v3943_v51 = vpack.c.bf16 %v3854_v20, %v3818_v43  ;;  %v12670_v19 = vunpack.i.h.bf16 %v10055_v59  ;;  %v7284_v4 = vunpack.i.l.bf16 %v10055_v59  ;;  %v12669_v46 = vunpack.i.h.bf16 %v10018_v15 }
 0x5f7   : > { %4031 = vrot.lane.b32.xlu0 %v3924_v49, %s7757_s15  ;;  %4033 = vrot.lane.b32.xlu1 %v3925_v38, %s7757_s15  ;;  %v3897_v49 = vsel %vm2755_vm1, %v7254_v21, %v7255_v29  ;;  %v3898_v38 = vsel %vm2755_vm1, %v7255_v29, %v7294_v36  ;;  %v7264_v13 = vunpack.i.l.bf16 %v10018_v15  ;;  %v3319_v21 = vsel %vm2166_vm13, %v12986_v63, %v13009_v55 }
 0x5f8   : > { %v3951_v60 = vpack.c.bf16 %v3897_v49, %v3897_v49  ;;  %v3952_v20 = vpack.c.bf16 %v3898_v38, %v3898_v38  ;;  %v12672_v29 = vunpack.i.h.bf16 %v10014_v62  ;;  %v13011_v47 = vunpack.i.h.bf16 %v9888_v52  ;;  %v10102_v49 = vpop.permute.xlu1 %7312 }
 0x5f9   : > { %v10070_v17 = vpop.permute.xlu0 %7317  ;;  %v3732_v63 = vsel %vm2166_vm13, %v7264_v13, %v12669_v46  ;;  %v12671_v55 = vunpack.i.h.bf16 %v10034_v9  ;;  %v7299_v52 = vunpack.i.l.bf16 %v10034_v9  ;;  %v13013_v46 = vunpack.i.h.bf16 %v9932_v27 }
 0x5fa   : > { %v3611_v43 = vsel %vm2283_vm7, %v13011_v47, %v7259_v11  ;;  %v7320_v27 = vunpack.i.h.bf16 %v10070_v17 }
 0x5fb   : > { %4067 = vrot.lane.b32.xlu0 %v3942_v23, %s7757_s15  ;;  %4069 = vrot.lane.b32.xlu1 %v3943_v51, %s7757_s15  ;;  %v3775_v23 = vsel %vm2628_vm14, %v7284_v4, %v12670_v19  ;;  %v3336_v51 = vmul.f32 %v3319_v21, %v9457_v5  ;;  %v7319_v5 = vunpack.i.l.bf16 %v10070_v17  ;;  %v3899_v21 = vsel %vm2755_vm1, %v7294_v36, %v12672_v29 }
 0x5fc   : > { %v3935_v47 = vpack.c.bf16 %v3775_v23, %v3732_v63  ;;  %v3731_v19 = vsel %vm2166_vm13, %v13013_v46, %v7264_v13  ;;  %v13015_v23 = vld [vmem:[#allocation53_spill] sm:$0xff]  ;;  %v3953_v36 = vpack.c.bf16 %v3899_v21, %v3899_v21  ;;  %v13016_v46 = vunpack.i.h.bf16 %v9993_v53 }
 0x5fd   : > { %v10082_v42 = vpop.permute.xlu0 %7327  ;;  %v3916_v38 = vpack.c.bf16 %v3611_v43, %v3336_v51  ;;  %v13014_v43 = vld [vmem:[#allocation57_spill] sm:$0xff] }
 0x5fe   : > { %v3700_v13 = vsel %vm2551_vm11, %v13016_v46, %v7319_v5 }
 0x5ff   : > { %4085 = vrot.lane.b32.xlu0 %v3951_v60, %s7757_s15  ;;  %4087 = vrot.lane.b32.xlu1 %v3952_v20, %s7757_s15  ;;  %v13012_v60 = vunpack.i.h.bf16 %v9957_v3  ;;  %v3322_v3 = vsel %vm2166_vm13, %v13015_v23, %v13014_v43 }
 0x601   : > { %v10104_v11 = vpop.permute.xlu0 %7332  ;;  %v3774_v20 = vsel %vm2628_vm14, %v13012_v60, %v7284_v4  ;;  %v3614_v4 = vsel %vm2283_vm7, %v7299_v52, %v12671_v55  ;;  %v10132_v60 = vpop.permute.xlu1 %7322  ;;  %v3339_v55 = vmul.f32 %v3322_v3, %v9651_v40  ;;  %v3701_v40 = vsel %vm2551_vm11, %v7319_v5, %v7320_v27 }
 0x602   : > { %v3934_v63 = vpack.c.bf16 %v3774_v20, %v3731_v19  ;;  %v7290_v19 = vunpack.i.h.bf16 %v10002_v57  ;;  %v7315_v20 = vunpack.i.h.bf16 %v10102_v49  ;;  %v7325_v46 = vunpack.i.h.bf16 %v10132_v60 }
 0x603   : > { %4015 = vrot.lane.b32.xlu0 %v3916_v38, %s7757_s15  ;;  %4053 = vrot.lane.b32.xlu1 %v3935_v47, %s7757_s15  ;;  %v7314_v38 = vunpack.i.l.bf16 %v10102_v49  ;;  %v7270_v47 = vunpack.i.h.bf16 %v10030_v48  ;;  %v3919_v53 = vpack.c.bf16 %v3614_v4, %v3339_v55  ;;  %v7324_v39 = vunpack.i.l.bf16 %v10132_v60 }
 0x604   : > { %v7305_v55 = vunpack.i.h.bf16 %v10053_v31  ;;  %v3321_v5 = vsel %vm2166_vm13, %v13008_v41, %v13015_v23 }
 0x605   : > { %v10124_v51 = vpop.permute.xlu0 %7337  ;;  %v3656_v21 = vsel %vm2506_vm12, %v7275_v56, %v7314_v38  ;;  %v13018_v56 = vunpack.i.l.bf16 %v10002_v57  ;;  %v3657_v4 = vsel %vm2506_vm12, %v7314_v38, %v7315_v20  ;;  %v3777_v57 = vsel %vm2628_vm14, %v7324_v39, %v7325_v46 }
 0x606   : > { %v3926_v29 = vpack.c.bf16 %v3700_v13, %v3656_v21  ;;  %v13019_v21 = vunpack.i.h.bf16 %v10006_v32  ;;  %v3338_v41 = vmul.f32 %v3321_v5, %v9555_v50  ;;  %v7310_v38 = vunpack.i.h.bf16 %v10076_v12 }
 0x607   : > { %4051 = vrot.lane.b32.xlu0 %v3934_v63, %s7757_s15  ;;  %4089 = vrot.lane.b32.xlu1 %v3953_v36, %s7757_s15  ;;  %v13017_v63 = vunpack.i.l.bf16 %v10030_v48  ;;  %v3819_v61 = vsel %vm2673_vm0, %v13018_v56, %v7290_v19  ;;  %v7304_v48 = vunpack.i.l.bf16 %v10053_v31  ;;  %v7329_v56 = vunpack.i.l.bf16 %v10082_v42 }
 0x608   : > { %v7309_v32 = vunpack.i.l.bf16 %v10076_v12  ;;  %v7335_v5 = vunpack.i.h.bf16 %v10104_v11  ;;  %v5112_v12 = vld [vmem:[%s9428_s24 + $0x18] sm:$0xff] }
 0x609   : > { %v3855_v36 = vsel %vm2710_vm15, %v13017_v63, %v7270_v47  ;;  %v10150_v3 = vpop.permute.xlu0 %7342  ;;  %v7330_v63 = vunpack.i.h.bf16 %v10082_v42  ;;  %v3734_v23 = vsel %vm2166_vm13, %v7304_v48, %v7305_v55  ;;  %5131 = vst [vmem:[#allocation6 + $0x38] sm:$0xf] %v5112_v12 }
 0x60a   : > { %v3944_v13 = vpack.c.bf16 %v3855_v36, %v3819_v61  ;;  %v13020_v61 = vunpack.i.h.bf16 %v10055_v59  ;;  %v13021_v59 = vunpack.i.h.bf16 %v10018_v15  ;;  %v3856_v15 = vsel %vm2710_vm15, %v7270_v47, %v7309_v32 }
 0x60b   : > { %4035 = vrot.lane.b32.xlu0 %v3926_v29, %s7757_s15  ;;  %4021 = vrot.lane.b32.xlu1 %v3919_v53, %s7757_s15  ;;  %v3927_v29 = vpack.c.bf16 %v3701_v40, %v3657_v4  ;;  %v3613_v53 = vsel %vm2283_vm7, %v13019_v21, %v7299_v52  ;;  %v3937_v40 = vpack.c.bf16 %v3777_v57, %v3734_v23  ;;  %v7339_v23 = vunpack.i.l.bf16 %v10124_v51 }
 0x60c   : > { %v3918_v52 = vpack.c.bf16 %v3613_v53, %v3338_v41  ;;  %v3776_v4 = vsel %vm2628_vm14, %v13020_v61, %v7324_v39  ;;  %v3821_v50 = vsel %vm2673_vm0, %v7329_v56, %v7330_v63  ;;  %v3733_v39 = vsel %vm2166_vm13, %v13021_v59, %v7304_v48  ;;  %v13022_v48 = vld [vmem:[#allocation58_spill] sm:$0xff] }
 0x60d   : > { %v10181_v36 = vpop.permute.xlu0 %7347  ;;  %v3936_v57 = vpack.c.bf16 %v3776_v4, %v3733_v39  ;;  %v3820_v53 = vsel %vm2673_vm0, %v7290_v19, %v7329_v56  ;;  %v7340_v41 = vunpack.i.h.bf16 %v10124_v51  ;;  %v13023_v61 = vld [vmem:[#allocation54_spill] sm:$0xff]  ;;  %v10213_v56 = vpop.permute.xlu1 %7357  ;;  %v13024_v39 = vunpack.i.h.bf16 %v10014_v62 }
 0x60e   : > { %v3324_v19 = vsel %vm2166_vm13, %v13023_v61, %v13022_v48  ;;  %v3945_v4 = vpack.c.bf16 %v3856_v15, %v3820_v53 }
 0x60f   : > { %4071 = vrot.lane.b32.xlu0 %v3944_v13, %s7757_s15  ;;  %4037 = vrot.lane.b32.xlu1 %v3927_v29, %s7757_s15  ;;  %v7334_v13 = vunpack.i.l.bf16 %v10104_v11  ;;  %v3857_v29 = vsel %vm2710_vm15, %v7309_v32, %v7310_v38  ;;  %v3341_v47 = vmul.f32 %v3324_v19, %v9719_v28  ;;  %v7360_v32 = vunpack.i.h.bf16 %v10213_v56 }
 0x610   : > { %v3946_v21 = vpack.c.bf16 %v3857_v29, %v3821_v50  ;;  %v3616_v50 = vsel %vm2283_vm7, %v7339_v23, %v7340_v41 }
 0x613   : > { %4019 = vrot.lane.b32.xlu0 %v3918_v52, %s7757_s15  ;;  %4057 = vrot.lane.b32.xlu1 %v3937_v40, %s7757_s15  ;;  %v3901_v52 = vsel %vm2755_vm1, %v7334_v13, %v7335_v5  ;;  %v10205_v40 = vpop.permute.xlu0 %7352 }
 0x614   : > { %v3955_v51 = vpack.c.bf16 %v3901_v52, %v3901_v52  ;;  %v7355_v29 = vunpack.i.h.bf16 %v10205_v40  ;;  %v7354_v59 = vunpack.i.l.bf16 %v10205_v40  ;;  %v3921_v52 = vpack.c.bf16 %v3616_v50, %v3341_v47 }
 0x616   : > { %v3658_v15 = vsel %vm2506_vm12, %v7315_v20, %v7354_v59  ;;  %v3659_v62 = vsel %vm2506_vm12, %v7354_v59, %v7355_v29  ;;  %v3323_v20 = vsel %vm2166_vm13, %v13014_v43, %v13023_v61  ;;  %v3652_v43 = vpop.permute.xlu1 %3651 }
 0x617   : > { %4055 = vrot.lane.b32.xlu0 %v3936_v57, %s7757_s15  ;;  %4075 = vrot.lane.b32.xlu1 %v3946_v21, %s7757_s15  ;;  %v3900_v57 = vsel %vm2755_vm1, %v13024_v39, %v7334_v13  ;;  %v7359_v21 = vunpack.i.l.bf16 %v10213_v56  ;;  %v3340_v50 = vmul.f32 %v3323_v20, %v9661_v37  ;;  %v3696_v59 = vpop.permute.xlu0 %3695 }
 0x618   : > { %v3954_v53 = vpack.c.bf16 %v3900_v57, %v3900_v57  ;;  %v13027_v57 = vld [vmem:[#allocation20_spill] sm:$0xff]  ;;  %v3931_v47 = vpack.c.bf16 %v3696_v59, %v3652_v43 }
 0x619   : > { %v3703_v28 = vsel %vm2551_vm11, %v7359_v21, %v7360_v32  ;;  %v3702_v13 = vsel %vm2551_vm11, %v7320_v27, %v7359_v21  ;;  %v3342_v27 = vmul.f32 %v13022_v48, %v9726_v33  ;;  %v13028_v33 = vld [vmem:[#allocation32_spill] sm:$0xff]  ;;  %v7344_v48 = vunpack.i.l.bf16 %v10150_v3 }
 0x61a   : > { %v3928_v19 = vpack.c.bf16 %v3702_v13, %v3658_v15  ;;  %v3929_v49 = vpack.c.bf16 %v3703_v28, %v3659_v62  ;;  %v7368_v37 = vpop.permute.xlu1 %7367  ;;  %v7349_v21 = vunpack.i.l.bf16 %v10181_v36 }
 0x61b   : > { %4073 = vrot.lane.b32.xlu0 %v3945_v4, %s7757_s15  ;;  %4093 = vrot.lane.b32.xlu1 %v3955_v51, %s7757_s15  ;;  %v13025_v4 = vunpack.i.h.bf16 %v10034_v9  ;;  %v3922_v9 = vpack.c.bf16 %v7340_v41, %v3342_v27  ;;  %v7363_v61 = vpop.permute.xlu0 %7362  ;;  %v3735_v15 = vsel %vm2166_vm13, %v7305_v55, %v7344_v48  ;;  %v7369_v13 = vunpack.i.l.bf16 %v7368_v37 }
 0x61c   : > { %v7364_v39 = vunpack.i.l.bf16 %v7363_v61  ;;  %v7365_v41 = vunpack.i.h.bf16 %v7363_v61  ;;  %v3858_v60 = vsel %vm2710_vm15, %v7310_v38, %v7349_v21  ;;  %v7370_v31 = vunpack.i.h.bf16 %v7368_v37  ;;  %v13030_v61 = vld [vmem:[#allocation14_spill] sm:$0xff] }
 0x61d   : > { %v3615_v51 = vsel %vm2283_vm7, %v13025_v4, %v7339_v23  ;;  %v13026_v23 = vld [vmem:[#allocation21_spill] sm:$0xff]  ;;  %v3822_v55 = vsel %vm2673_vm0, %v7330_v63, %v7369_v13 }
 0x61e   : > { %v3920_v17 = vpack.c.bf16 %v3615_v51, %v3340_v50  ;;  %v7373_v62 = vpop.permute.xlu1 %7372  ;;  %v5120_v50 = vcombine.high %v5112_v12, %v5112_v12  ;;  %v3823_v42 = vsel %vm2673_vm0, %v7369_v13, %v7370_v31  ;;  %v10376_v12 = vld [vmem:[#allocation6 + $0x28] sm:$0xff] }
 0x61f   : > { %4091 = vrot.lane.b32.xlu0 %v3954_v53, %s7757_s15  ;;  %4025 = vrot.lane.b32.xlu1 %v3921_v52, %s7757_s15  ;;  %v3778_v53 = vsel %vm2628_vm14, %v7325_v46, %v7364_v39  ;;  %v7345_v52 = vunpack.i.h.bf16 %v10150_v3  ;;  %v13029_v46 = vld [vmem:[#allocation19_spill] sm:$0xff]  ;;  %v7374_v3 = vunpack.i.l.bf16 %v7373_v62  ;;  %v7375_v4 = vunpack.i.h.bf16 %v7373_v62 }
 0x620   : > { %v3938_v28 = vpack.c.bf16 %v3778_v53, %v3735_v15  ;;  %5132 = vst [vmem:[#allocation6 + $0x40] sm:$0xf] %v5120_v50  ;;  %v13035_v53 = vld [vmem:[#allocation26_spill] sm:$0xff] }
 0x621   : > { %v3902_v51 = vsel %vm2755_vm1, %v7335_v5, %v7374_v3  ;;  %v3903_v27 = vsel %vm2755_vm1, %v7374_v3, %v7375_v4  ;;  %v3704_v5 = vsel %vm2551_vm11, %v7360_v32, %v3696_v59  ;;  %v3904_v15 = vsel %vm2755_vm1, %v7375_v4, %v13035_v53  ;;  %v10362_v3 = vld [vmem:[#allocation6 + $0x8] sm:$0xff] }
 0x622   : > { %v3956_v63 = vpack.c.bf16 %v3902_v51, %v3902_v51  ;;  %v3957_v11 = vpack.c.bf16 %v3903_v27, %v3903_v27  ;;  %v3958_v62 = vpack.c.bf16 %v3904_v15, %v3904_v15  ;;  %v5310_v27 = vsel %vm2283_vm7, %v9860_v6, %v9981_v54 }
 0x623   : > { %4039 = vrot.lane.b32.xlu0 %v3928_v19, %s7757_s15  ;;  %4041 = vrot.lane.b32.xlu1 %v3929_v49, %s7757_s15  ;;  %v7350_v19 = vunpack.i.h.bf16 %v10181_v36  ;;  %v3736_v49 = vsel %vm2166_vm13, %v7344_v48, %v7345_v52  ;;  %v3947_v36 = vpack.c.bf16 %v3858_v60, %v3822_v55  ;;  %v13032_v48 = vld [vmem:[#allocation23_spill] sm:$0xff]  ;;  %v5351_v15 = vsel %vm2326_vm10, %v9985_v22, %v9874_v30 }
 0x625   : > { %v3859_v38 = vsel %vm2710_vm15, %v7349_v21, %v7350_v19  ;;  %v3860_v40 = vsel %vm2710_vm15, %v7350_v19, %v13032_v48 }
 0x627   : > { %4023 = vrot.lane.b32.xlu0 %v3920_v17, %s7757_s15  ;;  %5381 = vrot.lane.b32.xlu1 %v9829_v7, %s7756_s14  ;;  %v3948_v17 = vpack.c.bf16 %v3859_v38, %v3823_v42 }
 0x62b   : > { %4027 = vrot.lane.b32.xlu0 %v3922_v9, %s7757_s15  ;;  %5416 = vrot.lane.b32.xlu1 %v13026_v23, %s7757_s15  ;;  %v7722_v9 = vld [vmem:[%s12510_s4 + $0x1] ss:$2 sm:$0xff] }
 0x62c   : > { %v5250_v23 = vrot.slane %v7722_v9, %v13030_v61 }
 0x62f   : > { %5383 = vrot.lane.b32.xlu0 %v13027_v57, %s7756_s14  ;;  %5420 = vrot.lane.b32.xlu1 %v13028_v33, %s7757_s15  ;;  %v13031_v33 = vld [vmem:[#allocation31_spill] sm:$0xff] }
 0x630   : > { %v3780_v56 = vsel %vm2628_vm14, %v7365_v41, %v13031_v33 }
 0x631   : > { %v3940_v59 = vpack.c.bf16 %v3780_v56, %v7345_v52  ;;  %v10331_v52 = vpop.permute.xlu1 %4013 }
 0x633   : > { %5418 = vrot.lane.b32.xlu0 %v9799_v8, %s7757_s15  ;;  %4045 = vrot.lane.b32.xlu1 %v3931_v47, %s7757_s15  ;;  %v3779_v8 = vsel %vm2628_vm14, %v7364_v39, %v7365_v41  ;;  %v3660_v39 = vsel %vm2506_vm12, %v7355_v29, %v3652_v43  ;;  %v13033_v29 = vld [vmem:[#allocation13_spill] sm:$0xff] }
 0x634   : > { %v3939_v20 = vpack.c.bf16 %v3779_v8, %v3736_v49  ;;  %v3930_v37 = vpack.c.bf16 %v3704_v5, %v3660_v39  ;;  %v5246_v43 = vrot.slane %v7722_v9, %v13033_v29  ;;  %v13034_v47 = vld [vmem:[#allocation33_spill] sm:$0xff]  ;;  %v4012_v8 = vpop.permute.xlu0 %4011  ;;  %v10366_v49 = vld [vmem:[#allocation6 + $0x10] sm:$0xff]  ;;  %v10411_v9 = vld [vmem:[#allocation6 + $0x18] sm:$0xff] }
 0x635   : > { %v3824_v21 = vsel %vm2673_vm0, %v7370_v31, %v13034_v47  ;;  %v10405_v5 = vld [vmem:[#allocation3] sm:$0xff]  ;;  %v5327_v39 = vmul.f32 %v5310_v27, %v10411_v9  ;;  %v4101_v48 = vsel %vm436_vm2, %v4012_v8, %v10331_v52 }
 0x636   : > { %v3949_v41 = vpack.c.bf16 %v3860_v40, %v3824_v21  ;;  %v10440_v40 = vld [vmem:[#allocation6 + $0x30] sm:$0xff] }
 0x637   : > { %4059 = vrot.lane.b32.xlu0 %v3938_v28, %s7757_s15  ;;  %5424 = vrot.lane.b32.xlu1 %v13029_v46, %s7757_s15 }
 0x638   : > { %v10364_v55 = vpop.permute.xlu0 %4047 }
 0x63b   : > { %4077 = vrot.lane.b32.xlu0 %v3947_v36, %s7757_s15  ;;  %4061 = vrot.lane.b32.xlu1 %v3939_v20, %s7757_s15  ;;  %v5267_v36 = vsel %vm2241_vm9, %v9839_v44, %v9973_v34  ;;  %v10374_v20 = vld [vmem:[#allocation6 + $0x20] sm:$0xff] }
 0x63c   : > { %v5284_v4 = vmul.f32 %v5267_v36, %v10362_v3  ;;  %v5309_v36 = vsel %vm2283_vm7, %v9979_v2, %v9860_v6 }
 0x63f   : > { %4095 = vrot.lane.b32.xlu0 %v3956_v63, %s7757_s15  ;;  %4079 = vrot.lane.b32.xlu1 %v3948_v17, %s7757_s15 }
 0x643   : > { %5422 = vrot.lane.b32.xlu0 %v9808_v16, %s7757_s15  ;;  %4097 = vrot.lane.b32.xlu1 %v3957_v11, %s7757_s15  ;;  %v7723_v16 = vld [vmem:[%s12510_s4] ss:$2 sm:$0xff]  ;;  %v5311_v11 = vsel %vm2283_vm7, %v9981_v54, %v9865_v0 }
 0x644   : > { %v10317_v32 = vrot.slane %v7723_v16, %v13030_v61  ;;  %v10342_v13 = vrot.slane %v7723_v16, %v13033_v29  ;;  %v5269_v29 = vsel %vm2241_vm9, %v9843_v58, %v9975_v10 }
 0x647   : > { %4043 = vrot.lane.b32.xlu0 %v3930_v37, %s7757_s15  ;;  %5265 = vrot.lane.b32.xlu1 %v5250_v23, %s7753_s28  ;;  %v5328_v37 = vmul.f32 %v5311_v11, %v10374_v20 }
 0x64b   : > { %4063 = vrot.lane.b32.xlu0 %v3940_v59, %s7757_s15  ;;  %5306 = vrot.lane.b32.xlu1 %v10317_v32, %s7754_s29  ;;  %v7376_v59 = vpack.i.bf16 %v10411_v9, %v10366_v49 }
 0x64f   : > { %4081 = vrot.lane.b32.xlu0 %v3949_v41, %s7757_s15  ;;  %5346 = vrot.lane.b32.xlu1 %v5246_v43, %s7755_s30  ;;  %v5352_v41 = vsel %vm2326_vm10, %v9874_v30, %v9987_v25 }
 0x653   : > { %4099 = vrot.lane.b32.xlu0 %v3958_v62, %s7757_s15  ;;  %5385 = vrot.lane.b32.xlu1 %v9837_v45, %s7756_s14  ;;  %v13036_v62 = vld [vmem:[#allocation73_spill] sm:$0xff] }
 0x654   : > { %v10336_v28 = vpop.permute.xlu1 %4065  ;;  %v5308_v8 = vsel %vm2283_vm7, %v13036_v62, %v9979_v2 }
 0x655   : > { %v5325_v2 = vmul.f32 %v5308_v8, %v10362_v3 }
 0x657   : > { %5263 = vrot.lane.b32.xlu0 %v5246_v43, %s7753_s28  ;;  %5389 = vrot.lane.b32.xlu1 %v10317_v32, %s7756_s14 }
 0x658   : > { %v10344_v19 = vpop.permute.xlu1 %4083 }
 0x65b   : > { %5304 = vrot.lane.b32.xlu0 %v10342_v13, %s7754_s29  ;;  %5428 = vrot.lane.b32.xlu1 %v5246_v43, %s7757_s15 }
 0x65c   : > { %v10349_v60 = vpop.permute.xlu1 %4029 }
 0x65f   : > { %5344 = vrot.lane.b32.xlu0 %v9817_v26, %s7755_s30  ;;  %5177 = vrot.lane.b32.xlu1 %v9398_v35, %s7752_s25  ;;  %v5268_v35 = vsel %vm2241_vm9, %v9973_v34, %v9843_v58  ;;  %v5271_v34 = vsel %vm2241_vm9, %v9847_v18, %v9977_v14  ;;  %v7386_v58 = vpack.i.bf16 %v10440_v40, %v10405_v5 }
 0x660   : > { %v10355_v46 = vpop.permute.xlu1 %4049  ;;  %v5285_v38 = vmul.f32 %v5268_v35, %v10366_v49  ;;  %v5288_v42 = vmul.f32 %v5271_v34, %v10376_v12  ;;  %v5369_v35 = vmul.f32 %v5352_v41, %v10374_v20  ;;  %v5368_v34 = vmul.f32 %v5351_v15, %v10411_v9  ;;  %v10542_v15 = vld [vmem:[%s12513_s7] sm:$0xf] }
 0x662   : > { %v7441_v27 = vpack.i.bf16 %v5369_v35, %v5368_v34 }
 0x663   : > { %5348 = vrot.lane.b32.xlu0 %v5250_v23, %s7755_s30  ;;  %5181 = vrot.lane.b32.xlu1 %v12976_v1, %s7752_s25  ;;  %v7381_v1 = vpack.i.bf16 %v10376_v12, %v10374_v20 }
 0x664   : > { %v10360_v31 = vpop.permute.xlu1 %4017 }
 0x667   : > { %5387 = vrot.lane.b32.xlu0 %v10342_v13, %s7756_s14  ;;  %5185 = vrot.lane.b32.xlu1 %v13027_v57, %s7752_s25  ;;  %v7391_v57 = vpack.i.bf16 %v5285_v38, %v5284_v4  ;;  %v13037_v38 = vld [vmem:[#allocation15_spill] sm:$0xff] }
 0x669   : > { %v4032_v51 = vpop.permute.xlu0 %4031  ;;  %v10386_v50 = vpop.permute.xlu1 %4033 }
 0x66a   : > { %v4110_v47 = vsel %vm436_vm2, %v4032_v51, %v10386_v50 }
 0x66b   : > { %5426 = vrot.lane.b32.xlu0 %v9817_v26, %s7757_s15  ;;  %7382 = vrot.lane.b32.xlu1 %v7381_v1, %s7754_s29  ;;  %v5283_v26 = vmul.f32 %v10405_v5, %v9839_v44  ;;  %v7411_v44 = vpack.i.bf16 %v5328_v37, %v5327_v39 }
 0x66d   : > { %v10395_v63 = vpop.permute.xlu0 %4067  ;;  %v10397_v17 = vpop.permute.xlu1 %4069  ;;  %v7401_v61 = vpack.i.bf16 %v5283_v26, %v5288_v42  ;;  %v4117_v42 = vsel %vm436_vm2, %v10364_v55, %v10355_v46 }
 0x66e   : > { %v4126_v39 = vsel %vm436_vm2, %v10395_v63, %v10397_v17  ;;  %v4125_v55 = vsel %vm436_vm2, %v10336_v28, %v10395_v63  ;;  %v5324_v63 = vmul.f32 %v10405_v5, %v13036_v62 }
 0x66f   : > { %5430 = vrot.lane.b32.xlu0 %v5250_v23, %s7757_s15  ;;  %7392 = vrot.lane.b32.xlu1 %v7391_v57, %s7762_s19  ;;  %v5326_v57 = vmul.f32 %v5309_v36, %v10366_v49 }
 0x671   : > { %v10415_v33 = vpop.permute.xlu0 %4085  ;;  %v10417_v56 = vpop.permute.xlu1 %4087 }
 0x673   : > { %5179 = vrot.lane.b32.xlu0 %v9448_v24, %s7752_s25  ;;  %7402 = vrot.lane.b32.xlu1 %v7401_v61, %s7762_s19  ;;  %v10436_v24 = vpack.i.bf16 %v10366_v49, %v10362_v3 }
 0x675   : > { %v10422_v54 = vpop.permute.xlu0 %4015  ;;  %v10424_v23 = vpop.permute.xlu1 %4053 }
 0x676   : > { %v4102_v16 = vsel %vm436_vm2, %v10331_v52, %v10422_v54  ;;  %v4109_v52 = vsel %vm436_vm2, %v10349_v60, %v4032_v51  ;;  %v13038_v60 = vld [vmem:[#allocation78_spill] sm:$0xff] }
 0x677   : > { %5183 = vrot.lane.b32.xlu0 %v9829_v7, %s7752_s25  ;;  %7412 = vrot.lane.b32.xlu1 %v7411_v44, %s7747_s16  ;;  %v5270_v7 = vsel %vm2241_vm9, %v9975_v10, %v9847_v18  ;;  %v10464_v18 = vpack.i.bf16 %v10440_v40, %v10376_v12  ;;  %v5286_v10 = vmul.f32 %v5269_v29, %v10411_v9  ;;  %v13039_v44 = vld [vmem:[#allocation77_spill] sm:$0xff] }
 0x678   : > { %4200 = vmatprep.subr.bf16.mxu0 %v4102_v16  ;;  %v5287_v53 = vmul.f32 %v5270_v7, %v10374_v20  ;;  %v5391_v51 = vsel %vm2368_vm8, %v13038_v60, %v13037_v38  ;;  %v5407_v11 = vmul.f32 %v13038_v60, %v10362_v3  ;;  %v5312_v16 = vsel %vm2283_vm7, %v9865_v0, %v13039_v44 }
 0x679   : > { %4201 = vmatpush1.bf16.msra.mxu0 %v4101_v48  ;;  %v10448_v43 = vpop.permute.xlu0 %4051  ;;  %v10452_v21 = vpop.permute.xlu1 %4089  ;;  %v5408_v26 = vmul.f32 %v5391_v51, %v10366_v49  ;;  %v4133_v29 = vsel %vm436_vm2, %v10344_v19, %v10415_v33  ;;  %v4134_v0 = vsel %vm436_vm2, %v10415_v33, %v10417_v56  ;;  %v4103_v33 = vsel %vm436_vm2, %v10422_v54, %v10360_v31 }
 0x67a   : > { %4202 = vmatprep.subr.bf16.mxu0 %v4110_v47  ;;  %v4118_v4 = vsel %vm436_vm2, %v10355_v46, %v10448_v43  ;;  %v7396_v6 = vpack.i.bf16 %v5287_v53, %v5286_v10  ;;  %v7406_v46 = vpack.i.bf16 %v5326_v57, %v5325_v2  ;;  %v4177_v19 = vsel %vm3037_vm3, %v4133_v29, 0 }
 0x67b   : > { %7377 = vrot.lane.b32.xlu0 %v7376_v59, %s7754_s29  ;;  %7422 = vrot.lane.b32.xlu1 %v10436_v24, %s7752_s25  ;;  %v5329_v59 = vmul.f32 %v5312_v16, %v10376_v12  ;;  %v7451_v48 = vpack.i.bf16 %v5408_v26, %v5407_v11  ;;  %v13041_v60 = vmov 0   ;;  %v4135_v57 = vsel %vm436_vm2, %v10417_v56, %v10452_v21 }
 0x67d   : > { %4203 = vmatpush1.bf16.msra.mxu0 %v4109_v52  ;;  %v4036_v1 = vpop.permute.xlu0 %4035  ;;  %v10483_v30 = vpop.permute.xlu1 %4021  ;;  %v7416_v41 = vpack.i.bf16 %v5324_v63, %v5329_v59  ;;  %v13040_v52 = vld [vmem:[#allocation24_spill] sm:$0xff] }
 0x67e   : > { %4204 = vmatprep.subr.bf16.mxu0 %v4118_v4  ;;  %v5350_v62 = vsel %vm2326_vm10, %v13040_v52, %v9985_v22  ;;  %v4111_v54 = vsel %vm436_vm2, %v10386_v50, %v4036_v1  ;;  %v5366_v8 = vmul.f32 %v13040_v52, %v10362_v3  ;;  %v4119_v50 = vsel %vm436_vm2, %v10448_v43, %v10424_v23 }
 0x67f   : > { %7387 = vrot.lane.b32.xlu0 %v7386_v58, %s7754_s29  ;;  %7432 = vrot.lane.b32.xlu1 %v10464_v18, %s7752_s25  ;;  %v5367_v36 = vmul.f32 %v5350_v62, %v10366_v49 }
 0x681   : > { %4205 = vmatpush1.bf16.msra.mxu0 %v4117_v42  ;;  %v4072_v61 = vpop.permute.xlu0 %4071  ;;  %v10503_v37 = vpop.permute.xlu1 %4037 }
 0x682   : > { %4206 = vmatprep.subr.bf16.mxu0 %v4126_v39  ;;  %v4112_v10 = vsel %vm436_vm2, %v4036_v1, %v10503_v37  ;;  %v7436_v1 = vpack.i.bf16 %v5367_v36, %v5366_v8  ;;  %v4127_v2 = vsel %vm436_vm2, %v10397_v17, %v4072_v61 }
 0x683   : > { %7397 = vrot.lane.b32.xlu0 %v7396_v6, %s7762_s19  ;;  %7442 = vrot.lane.b32.xlu1 %v7441_v27, %s7758_s13  ;;  %v4183_v27 = vsel %vm3037_vm3, %v4135_v57, 0 }
 0x685   : > { %4207 = vmatpush1.bf16.msra.mxu0 %v4125_v55  ;;  %v4020_v7 = vpop.permute.xlu0 %4019  ;;  %v10520_v47 = vpop.permute.xlu1 %4057 }
 0x686   : > { %6781 = vmatprep.subr.msk.bf16.mxu0 %vm3037_vm3, %v4134_v0  ;;  %v4104_v28 = vsel %vm436_vm2, %v10360_v31, %v4020_v7  ;;  %v10550_v31 = vpack.i.bf16 %v10374_v20, %v10411_v9  ;;  %v4105_v56 = vsel %vm436_vm2, %v4020_v7, %v10483_v30 }
 0x687   : > { %7407 = vrot.lane.b32.xlu0 %v7406_v46, %s7747_s16  ;;  %7452 = vrot.lane.b32.xlu1 %v7451_v48, %s7748_s17 }
 0x688   : > { %4241 = vmatprep.subr.bf16.mxu1 %v4104_v28 }
 0x689   : > { %4209 = vmatpush1.bf16.msra.mxu0 %v4177_v19  ;;  %4242 = vmatpush1.bf16.msra.mxu1 %v4103_v33  ;;  %v10533_v58 = vpop.permute.xlu0 %4055  ;;  %v10537_v53 = vpop.permute.xlu1 %4075 }
 0x68a   : > { %4243 = vmatprep.subr.bf16.mxu1 %v4112_v10  ;;  %v4120_v35 = vsel %vm436_vm2, %v10424_v23, %v10533_v58 }
 0x68b   : > { %7417 = vrot.lane.b32.xlu0 %v7416_v41, %s7747_s16 }
 0x68c   : > { %6782 = vmatmul.mubr.msk.bf16.vlgmr.msra.gmra.mrb[24].mxu0 %vm3033_vm4, %v10542_v15 }
 0x68d   : > { %4244 = vmatpush1.bf16.msra.mxu1 %v4111_v54  ;;  %v4074_v22 = vpop.permute.xlu0 %4073  ;;  %v4094_v4 = vpop.permute.xlu1 %4093  ;;  %4314 = vmatprep.mubr.bf16.mxu0 %v13041_v60 }
 0x68e   : > { %4245 = vmatprep.subr.bf16.mxu1 %v4120_v35  ;;  %v4128_v34 = vsel %vm436_vm2, %v4072_v61, %v4074_v22  ;;  %v4129_v41 = vsel %vm436_vm2, %v4074_v22, %v10537_v53 }
 0x68f   : > { %7427 = vrot.lane.b32.xlu0 %v10550_v31, %s7752_s25 }
 0x691   : > { %4246 = vmatpush1.bf16.msra.mxu1 %v4119_v50  ;;  %v4092_v51 = vpop.permute.xlu0 %4091  ;;  %v4026_v6 = vpop.permute.xlu1 %4025 }
 0x692   : > { %4247 = vmatprep.subr.bf16.mxu1 %v4128_v34  ;;  %v4136_v23 = vsel %vm436_vm2, %v10452_v21, %v4092_v51  ;;  %v4137_v10 = vsel %vm436_vm2, %v4092_v51, %v4094_v4 }
 0x693   : > { %7437 = vrot.lane.b32.xlu0 %v7436_v1, %s7758_s13 }
 0x695   : > { %4248 = vmatpush1.bf16.msra.mxu1 %v4127_v2  ;;  %v4040_v42 = vpop.permute.xlu0 %4039  ;;  %v4042_v43 = vpop.permute.xlu1 %4041 }
 0x696   : > { %6783 = vmatprep.subr.msk.bf16.mxu1 %vm3037_vm3, %v4136_v23  ;;  %v4114_v21 = vsel %vm436_vm2, %v4040_v42, %v4042_v43  ;;  %v4113_v46 = vsel %vm436_vm2, %v10503_v37, %v4040_v42  ;;  %v4121_v37 = vsel %vm436_vm2, %v10533_v58, %v10520_v47 }
 0x699   : > { %4250 = vmatpush1.bf16.msra.mxu1 %v4183_v27  ;;  %v4024_v11 = vpop.permute.xlu0 %4023  ;;  %v10579_v26 = vpop.permute.xlu1 %5381 }
 0x69a   : > { %v4106_v17 = vsel %vm436_vm2, %v10483_v30, %v4024_v11  ;;  %v4107_v30 = vsel %vm436_vm2, %v4024_v11, %v4026_v6 }
 0x69b   : > { %4282 = vmatprep.subr.bf16.mxu0 %v4106_v17 }
 0x69c   : > { %6784 = vmatmul.mubr.msk.bf16.vlgmr.msra.gmra.mrb[24].mxu1 %vm3033_vm4, %v10542_v15  ;;  %4283 = vmatpush1.bf16.msra.mxu0 %v4105_v56 }
 0x69d   : > { %v4028_v61 = vpop.permute.xlu0 %4027  ;;  %4284 = vmatprep.subr.bf16.mxu0 %v4114_v21  ;;  %v10588_v39 = vpop.permute.xlu1 %5416  ;;  %4355 = vmatprep.mubr.bf16.mxu1 %v13041_v60 }
 0x69e   : > { %v4108_v16 = vsel %vm436_vm2, %v4026_v6, %v4028_v61 }
 0x69f   : > { %4323 = vmatprep.subr.bf16.mxu1 %v4108_v16 }
 0x6a0   : > { %4285 = vmatpush1.bf16.msra.mxu0 %v4113_v46  ;;  %4324 = vmatpush1.bf16.msra.mxu1 %v4107_v30 }
 0x6a1   : > { %v5384_v55 = vpop.permute.xlu0 %5383  ;;  %v10595_v59 = vpop.permute.xlu1 %5420 }
 0x6a2   : > { %v5394_v42 = vsel %vm2368_vm8, %v10579_v26, %v5384_v55 }
 0x6a3   : > { %v5411_v56 = vmul.f32 %v5394_v42, %v10376_v12 }
 0x6a5   : > { %v10597_v48 = vpop.permute.xlu0 %5418  ;;  %v4046_v29 = vpop.permute.xlu1 %4045 }
 0x6a9   : > { %v4060_v7 = vpop.permute.xlu0 %4059  ;;  %v10599_v0 = vpop.permute.xlu1 %5424 }
 0x6aa   : > { %v4122_v28 = vsel %vm436_vm2, %v10520_v47, %v4060_v7  ;;  %v4189_v47 = vsel %vm3037_vm3, %v4137_v10, 0  ;;  %v13044_v10 = vld [vmem:[#allocation79_spill] sm:$0xff] }
 0x6ab   : > { %4286 = vmatprep.subr.bf16.mxu0 %v4122_v28 }
 0x6ac   : > { %4287 = vmatpush1.bf16.msra.mxu0 %v4121_v37 }
 0x6ad   : > { %v4078_v63 = vpop.permute.xlu0 %4077  ;;  %v4062_v19 = vpop.permute.xlu1 %4061 }
 0x6ae   : > { %v4130_v33 = vsel %vm436_vm2, %v10537_v53, %v4078_v63  ;;  %v4123_v51 = vsel %vm436_vm2, %v4060_v7, %v4062_v19 }
 0x6af   : > { %4288 = vmatprep.subr.bf16.mxu0 %v4130_v33 }
 0x6b0   : > { %4289 = vmatpush1.bf16.msra.mxu0 %v4129_v41 }
 0x6b1   : > { %v4096_v52 = vpop.permute.xlu0 %4095  ;;  %v4080_v62 = vpop.permute.xlu1 %4079 }
 0x6b2   : > { %v4138_v54 = vsel %vm436_vm2, %v4094_v4, %v4096_v52  ;;  %v4131_v57 = vsel %vm436_vm2, %v4078_v63, %v4080_v62  ;;  %v13042_v63 = vld [vmem:[#allocation30_spill] sm:$0xff] }
 0x6b3   : > { %6785 = vmatprep.subr.msk.bf16.mxu0 %vm3037_vm3, %v4138_v54 }
 0x6b4   : > { %4291 = vmatpush1.bf16.msra.mxu0 %v4189_v47 }
 0x6b5   : > { %v10614_v58 = vpop.permute.xlu0 %5422  ;;  %v4098_v8 = vpop.permute.xlu1 %4097 }
 0x6b6   : > { %v4139_v23 = vsel %vm436_vm2, %v4096_v52, %v4098_v8 }
 0x6b7   : > { %6786 = vmatmul.mubr.msk.bf16.vlgmr.msra.gmra.mrb[28].mxu0 %vm3033_vm4, %v10542_v15  ;;  %v4195_v61 = vsel %vm3037_vm3, %v4139_v23, 0 }
 0x6b8   : > { %6101 = vmatprep.mubr.bf16.mxu0 %v13041_v60 }
 0x6b9   : > { %v4044_v53 = vpop.permute.xlu0 %4043  ;;  %v10619_v36 = vpop.permute.xlu1 %5265 }
 0x6ba   : > { %v4116_v22 = vsel %vm436_vm2, %v4044_v53, %v4046_v29  ;;  %v4115_v35 = vsel %vm436_vm2, %v4042_v43, %v4044_v53  ;;  %v5432_v29 = vsel %vm436_vm2, %v10588_v39, %v10597_v48 }
 0x6bb   : > { %4325 = vmatprep.subr.bf16.mxu1 %v4116_v22  ;;  %v5449_v7 = vmul.f32 %v5432_v29, %v10366_v49 }
 0x6bc   : > { %4326 = vmatpush1.bf16.msra.mxu1 %v4115_v35 }
 0x6bd   : > { %v4064_v4 = vpop.permute.xlu0 %4063  ;;  %v10623_v50 = vpop.permute.xlu1 %5306 }
 0x6be   : > { %v4124_v1 = vsel %vm436_vm2, %v4062_v19, %v4064_v4  ;;  %v5353_v19 = vsel %vm2326_vm10, %v9987_v25, %v13042_v63  ;;  %v5392_v25 = vsel %vm2368_vm8, %v13037_v38, %v13044_v10  ;;  %v5435_v38 = vsel %vm436_vm2, %v10614_v58, %v10599_v0 }
 0x6bf   : > { %4327 = vmatprep.subr.bf16.mxu1 %v4124_v1  ;;  %v5434_v1 = vsel %vm436_vm2, %v10595_v59, %v10614_v58 }
 0x6c0   : > { %4328 = vmatpush1.bf16.msra.mxu1 %v4123_v51  ;;  %v5451_v42 = vmul.f32 %v5434_v1, %v10374_v20 }
 0x6c1   : > { %v4082_v34 = vpop.permute.xlu0 %4081  ;;  %v10627_v6 = vpop.permute.xlu1 %5346 }
 0x6c2   : > { %v4132_v2 = vsel %vm436_vm2, %v4080_v62, %v4082_v34  ;;  %v5452_v34 = vmul.f32 %v5435_v38, %v10376_v12 }
 0x6c3   : > { %4329 = vmatprep.subr.bf16.mxu1 %v4132_v2 }
 0x6c4   : > { %4330 = vmatpush1.bf16.msra.mxu1 %v4131_v57  ;;  %v5433_v57 = vsel %vm436_vm2, %v10597_v48, %v10595_v59  ;;  %v10718_v59 = vld [vmem:[#allocation6 + $0x38] sm:$0xff] }
 0x6c5   : > { %v4100_v43 = vpop.permute.xlu0 %4099  ;;  %v10634_v27 = vpop.permute.xlu1 %5385  ;;  %13045 = vst [vmem:[#allocation52_spill] sm:$0xff] %v10718_v59 }
 0x6c6   : > { %v4140_v11 = vsel %vm436_vm2, %v4098_v8, %v4100_v43  ;;  %v5395_v17 = vsel %vm2368_vm8, %v5384_v55, %v10634_v27  ;;  %v5448_v55 = vmul.f32 %v10588_v39, %v10362_v3  ;;  %v5393_v3 = vsel %vm2368_vm8, %v13044_v10, %v10579_v26 }
 0x6c7   : > { %v5412_v21 = vmul.f32 %v5395_v17, %v10440_v40  ;;  %6787 = vmatprep.subr.msk.bf16.mxu1 %vm3037_vm3, %v4140_v11  ;;  %v5370_v39 = vmul.f32 %v5353_v19, %v10376_v12  ;;  %v5409_v26 = vmul.f32 %v5392_v25, %v10411_v9  ;;  %v5143_v12 = vld [vmem:[#allocation6 + $0x40] sm:$0xff] }
 0x6c8   : > { %4332 = vmatpush1.bf16.msra.mxu1 %v4195_v61 }
 0x6c9   : > { %v7461_v16 = vpack.i.bf16 %v5412_v21, %v5411_v56  ;;  %v5264_v46 = vpop.permute.xlu0 %5263  ;;  %v10643_v30 = vpop.permute.xlu1 %5389  ;;  %v5291_v56 = vmul.f32 %v10619_v36, %v5143_v12 }
 0x6ca   : > { %v5273_v48 = vsel %vm2241_vm9, %v5264_v46, %v10619_v36 }
 0x6cb   : > { %6788 = vmatmul.mubr.msk.bf16.vlgmr.msra.gmra.mrb[28].mxu1 %vm3033_vm4, %v10542_v15  ;;  %7462 = vrot.lane.b32.xlu1 %v7461_v16, %s7748_s17  ;;  %v7481_v15 = vpack.i.bf16 %v5449_v7, %v5448_v55  ;;  %v5290_v36 = vmul.f32 %v5273_v48, %v10718_v59  ;;  %v5332_v7 = vmul.f32 %v10623_v50, %v5143_v12 }
 0x6cc   : > { %6142 = vmatprep.mubr.bf16.mxu1 %v13041_v60  ;;  %v13074_v60 = vld [vmem:[#allocation36_spill] sm:$0xff] }
 0x6cd   : > { %v5305_v28 = vpop.permute.xlu0 %5304  ;;  %v10655_v37 = vpop.permute.xlu1 %5428 }
 0x6ce   : > { %v5314_v29 = vsel %vm2283_vm7, %v5305_v28, %v10623_v50 }
 0x6cf   : > { %7472 = vrot.lane.b32.xlu1 %v10550_v31, %s7759_s18  ;;  %v5410_v31 = vmul.f32 %v5393_v3, %v10374_v20  ;;  %v10724_v20 = vpack.i.bf16 %v5143_v12, %v10718_v59 }
 0x6d1   : > { %v5345_v33 = vpop.permute.xlu0 %5344  ;;  %v10662_v41 = vpop.permute.xlu1 %5177  ;;  %v7456_v8 = vpack.i.bf16 %v5410_v31, %v5409_v26  ;;  %v10787_v26 = vld [vmem:[#allocation6 + $0x48] sm:$0xff] }
 0x6d2   : > { %13043 = vst [vmem:[#allocation56_spill] sm:$0xff] %v10662_v41  ;;  %v5354_v49 = vsel %vm2326_vm10, %v13042_v63, %v5345_v33 }
 0x6d3   : > { %v5371_v52 = vmul.f32 %v5354_v49, %v10440_v40  ;;  %7482 = vrot.lane.b32.xlu1 %v7481_v15, %s7760_s20 }
 0x6d5   : > { %v7446_v62 = vpack.i.bf16 %v5371_v52, %v5370_v39  ;;  %v10676_v54 = vpop.permute.xlu0 %5348  ;;  %v10678_v47 = vpop.permute.xlu1 %5181 }
 0x6d7   : > { %7447 = vrot.lane.b32.xlu0 %v7446_v62, %s7758_s13 }
 0x6d9   : > { %v5388_v53 = vpop.permute.xlu0 %5387  ;;  %v10682_v22 = vpop.permute.xlu1 %5185 }
 0x6da   : > { %v5396_v19 = vsel %vm2368_vm8, %v10634_v27, %v5388_v53 }
 0x6db   : > { %7457 = vrot.lane.b32.xlu0 %v7456_v8, %s7748_s17  ;;  %v5413_v3 = vmul.f32 %v5396_v19, %v10718_v59 }
 0x6dd   : > { %v10688_v35 = vpop.permute.xlu0 %5426  ;;  %v10690_v4 = vpop.permute.xlu1 %7382 }
 0x6de   : > { %v5436_v51 = vsel %vm436_vm2, %v10599_v0, %v10688_v35  ;;  %v5450_v0 = vmul.f32 %v5433_v57, %v10411_v9  ;;  %v12698_v61 = vunpack.i.l.bf16 %v10690_v4  ;;  %v5437_v8 = vsel %vm436_vm2, %v10688_v35, %v10655_v37 }
 0x6df   : > { %v5453_v2 = vmul.f32 %v5436_v51, %v10440_v40  ;;  %7467 = vrot.lane.b32.xlu0 %v10436_v24, %s7759_s18  ;;  %v5374_v35 = vmul.f32 %v10676_v54, %v10787_v26 }
 0x6e0   : > { %v7486_v24 = vpack.i.bf16 %v5451_v42, %v5450_v0 }
 0x6e1   : > { %v7491_v23 = vpack.i.bf16 %v5453_v2, %v5452_v34  ;;  %v10706_v43 = vpop.permute.xlu0 %5430  ;;  %v10708_v58 = vpop.permute.xlu1 %7392  ;;  %v5454_v2 = vmul.f32 %v5437_v8, %v10718_v59 }
 0x6e2   : > { %v12696_v25 = vunpack.i.h.bf16 %v10708_v58 }
 0x6e3   : > { %7477 = vrot.lane.b32.xlu0 %v10464_v18, %s7759_s18  ;;  %7492 = vrot.lane.b32.xlu1 %v7491_v23, %s7760_s20  ;;  %v5272_v18 = vsel %vm2241_vm9, %v9977_v14, %v5264_v46  ;;  %v5356_v14 = vsel %vm2326_vm10, %v10627_v6, %v10676_v54 }
 0x6e4   : > { %v5289_v16 = vmul.f32 %v5272_v18, %v10440_v40  ;;  %v5373_v63 = vmul.f32 %v5356_v14, %v5143_v12 }
 0x6e5   : > { %v10714_v11 = vpop.permute.xlu0 %5179  ;;  %v10716_v17 = vpop.permute.xlu1 %7402 }
 0x6e7   : > { %7487 = vrot.lane.b32.xlu0 %v7486_v24, %s7760_s20  ;;  %5189 = vrot.lane.b32.xlu1 %v10342_v13, %s7752_s25  ;;  %v5355_v13 = vsel %vm2326_vm10, %v5345_v33, %v10627_v6 }
 0x6e8   : > { %v5372_v6 = vmul.f32 %v5355_v13, %v10718_v59 }
 0x6e9   : > { %v10726_v9 = vpop.permute.xlu0 %5183  ;;  %v10733_v21 = vpop.permute.xlu1 %7412 }
 0x6ea   : > { %v7516_v27 = vpack.i.bf16 %v5373_v63, %v5372_v6  ;;  %v12692_v51 = vunpack.i.l.bf16 %v10733_v21  ;;  %v12693_v24 = vunpack.i.h.bf16 %v10733_v21 }
 0x6eb   : > { %5187 = vrot.lane.b32.xlu0 %v9837_v45, %s7752_s25  ;;  %7497 = vrot.lane.b32.xlu1 %v10724_v20, %s7754_s29  ;;  %v5313_v45 = vsel %vm2283_vm7, %v13039_v44, %v5305_v28  ;;  %v5397_v44 = vsel %vm2368_vm8, %v5388_v53, %v10643_v30  ;;  %v7501_v28 = vpack.i.bf16 %v5290_v36, %v5289_v16 }
 0x6ec   : > { %v5330_v15 = vmul.f32 %v5313_v45, %v10440_v40  ;;  %v5414_v49 = vmul.f32 %v5397_v44, %v5143_v12  ;;  %v5438_v53 = vsel %vm436_vm2, %v10655_v37, %v10706_v43 }
 0x6ed   : > { %v10747_v46 = vpop.permute.xlu0 %7377  ;;  %v10772_v33 = vpop.permute.xlu1 %7422  ;;  %v5455_v57 = vmul.f32 %v5438_v53, %v5143_v12  ;;  %v12676_v12 = vunpack.i.l.bf16 %v10716_v17 }
 0x6ee   : > { %v12701_v55 = vunpack.i.h.bf16 %v10747_v46  ;;  %v7521_v31 = vpack.i.bf16 %v5414_v49, %v5413_v3  ;;  %v12688_v45 = vunpack.i.h.bf16 %v10772_v33 }
 0x6ef   : > { %5191 = vrot.lane.b32.xlu0 %v10317_v32, %s7752_s25  ;;  %5526 = vrot.lane.b32.xlu1 %v5291_v56, %s7762_s19  ;;  %v5331_v32 = vmul.f32 %v5314_v29, %v10718_v59  ;;  %v7531_v48 = vpack.i.bf16 %v5455_v57, %v5454_v2  ;;  %v12675_v29 = vunpack.i.l.bf16 %v10772_v33 }
 0x6f0   : > { %v10768_v50 = vsel %vm2283_vm7, %v12701_v55, %v12698_v61 }
 0x6f1   : > { %13046 = vst [vmem:[#allocation57_spill] sm:$0xff] %v10768_v50  ;;  %v10774_v10 = vpop.permute.xlu0 %7387  ;;  %v7506_v39 = vpack.i.bf16 %v5331_v32, %v5330_v15  ;;  %v10783_v62 = vpop.permute.xlu1 %7432  ;;  %v10880_v15 = vsel %vm2166_vm13, %v12675_v29, %v12688_v45 }
 0x6f2   : > { %13047 = vst [vmem:[#allocation53_spill] sm:$0xff] %v10774_v10  ;;  %13054 = vst [vmem:[#allocation14_spill] sm:$0xff] %v10880_v15 }
 0x6f3   : > { %7502 = vrot.lane.b32.xlu0 %v7501_v28, %s7762_s19  ;;  %5570 = vrot.lane.b32.xlu1 %v5332_v7, %s7747_s16 }
 0x6f5   : > { %v10779_v52 = vpop.permute.xlu0 %7397  ;;  %v10820_v23 = vpop.permute.xlu1 %7442 }
 0x6f6   : > { %v12694_v40 = vunpack.i.l.bf16 %v10779_v52  ;;  %v12695_v37 = vunpack.i.h.bf16 %v10779_v52  ;;  %v12680_v13 = vunpack.i.h.bf16 %v10820_v23  ;;  %v12687_v14 = vunpack.i.l.bf16 %v10820_v23 }
 0x6f7   : > { %7507 = vrot.lane.b32.xlu0 %v7506_v39, %s7747_s16  ;;  %7517 = vrot.lane.b32.xlu1 %v7516_v27, %s7758_s13 }
 0x6f8   : > { %v10800_v38 = vsel %vm2506_vm12, %v12696_v25, %v12694_v40  ;;  %v10837_v56 = vsel %vm2506_vm12, %v12695_v37, %v12676_v12  ;;  %v10862_v63 = vsel %vm2628_vm14, %v12687_v14, %v12680_v13  ;;  %v13071_v40 = vld [vmem:[#allocation34_spill] sm:$0xff] }
 0x6f9   : > { %13048 = vst [vmem:[#allocation58_spill] sm:$0xff] %v10800_v38  ;;  %v10802_v1 = vpop.permute.xlu0 %7407  ;;  %13050 = vst [vmem:[#allocation21_spill] sm:$0xff] %v10837_v56  ;;  %v10893_v39 = vpop.permute.xlu1 %7452  ;;  %v13083_v56 = vld [vmem:[#allocation45_spill] sm:$0xff] }
 0x6fa   : > { %v12697_v34 = vunpack.i.h.bf16 %v10802_v1  ;;  %13052 = vst [vmem:[#allocation32_spill] sm:$0xff] %v10862_v63  ;;  %13056 = vst [vmem:[#allocation23_spill] sm:$0xff] %v10893_v39  ;;  %v12685_v49 = vunpack.i.h.bf16 %v10893_v39 }
 0x6fb   : > { %7512 = vrot.lane.b32.xlu0 %v10724_v20, %s7752_s25  ;;  %7522 = vrot.lane.b32.xlu1 %v7521_v31, %s7748_s17 }
 0x6fc   : > { %v10818_v42 = vsel %vm2551_vm11, %v12697_v34, %v12692_v51 }
 0x6fd   : > { %13049 = vst [vmem:[#allocation54_spill] sm:$0xff] %v10818_v42  ;;  %v10822_v54 = vpop.permute.xlu0 %7417 }
 0x6fe   : > { %v12678_v18 = vunpack.i.l.bf16 %v10822_v54 }
 0x6ff   : > { %7527 = vrot.lane.b32.xlu1 %v10724_v20, %s7759_s18  ;;  %5646 = vrot.lane.b32.xlu0 %v5374_v35, %s7758_s13 }
 0x700   : > { %v10846_v16 = vsel %vm2551_vm11, %v12693_v24, %v12678_v18 }
 0x701   : > { %13051 = vst [vmem:[#allocation20_spill] sm:$0xff] %v10846_v16  ;;  %v10848_v20 = vpop.permute.xlu0 %7427 }
 0x702   : > { %v12681_v7 = vunpack.i.h.bf16 %v10848_v20  ;;  %v12689_v6 = vunpack.i.l.bf16 %v10848_v20 }
 0x703   : > { %7532 = vrot.lane.b32.xlu1 %v7531_v48, %s7760_s20 }
 0x704   : > { %v10869_v19 = vsel %vm2166_vm13, %v12689_v6, %v12681_v7 }
 0x705   : > { %13053 = vst [vmem:[#allocation19_spill] sm:$0xff] %v10869_v19  ;;  %v10871_v44 = vpop.permute.xlu0 %7437  ;;  %v13080_v19 = vld [vmem:[#allocation43_spill] sm:$0xff] }
 0x706   : > { %v12682_v32 = vunpack.i.h.bf16 %v10871_v44  ;;  %v12674_v27 = vunpack.i.l.bf16 %v10871_v44  ;;  %v4588_v15 = vmul.f32 %v10405_v5, %v13080_v19 }
 0x708   : > { %v10889_v3 = vsel %vm2628_vm14, %v12674_v27, %v12682_v32 }
 0x709   : > { %13055 = vst [vmem:[#allocation31_spill] sm:$0xff] %v10889_v3 }
 0x73d   : > { %v10895_v31 = vpop.permute.xlu1 %7462 }
 0x73e   : > { %13057 = vst [vmem:[#allocation13_spill] sm:$0xff] %v10895_v31  ;;  %v12677_v2 = vunpack.i.l.bf16 %v10895_v31 }
 0x741   : > { %v10899_v53 = vpop.permute.xlu1 %7472 }
 0x742   : > { %13058 = vst [vmem:[#allocation33_spill] sm:$0xff] %v10899_v53  ;;  %v12684_v36 = vunpack.i.l.bf16 %v10899_v53  ;;  %v12691_v7 = vunpack.i.h.bf16 %v10899_v53 }
 0x745   : > { %v10913_v29 = vpop.permute.xlu1 %7482 }
 0x746   : > { %13061 = vst [vmem:[#allocation15_spill] sm:$0xff] %v10913_v29  ;;  %v12700_v13 = vunpack.i.h.bf16 %v10913_v29 }
 0x749   : > { %v10897_v8 = vpop.permute.xlu0 %7447 }
 0x74d   : > { %v10901_v35 = vpop.permute.xlu0 %7457 }
 0x74e   : > { %13059 = vst [vmem:[#allocation26_spill] sm:$0xff] %v10901_v35  ;;  %v12679_v57 = vunpack.i.h.bf16 %v10901_v35  ;;  %v12683_v48 = vunpack.i.l.bf16 %v10901_v35 }
 0x750   : > { %v10911_v27 = vsel %vm2673_vm0, %v12679_v57, %v12677_v2  ;;  %v10925_v12 = vsel %vm2673_vm0, %v12685_v49, %v12683_v48 }
 0x751   : > { %13060 = vst [vmem:[#allocation73_spill] sm:$0xff] %v10911_v27  ;;  %v10915_v28 = vpop.permute.xlu0 %7467  ;;  %13062 = vst [vmem:[#allocation78_spill] sm:$0xff] %v10925_v12  ;;  %v13076_v27 = vld [vmem:[#allocation49_spill] sm:$0xff] }
 0x752   : > { %v12686_v0 = vunpack.i.h.bf16 %v10915_v28 }
 0x754   : > { %v10932_v2 = vsel %vm2710_vm15, %v12686_v0, %v12684_v36 }
 0x755   : > { %13063 = vst [vmem:[#allocation77_spill] sm:$0xff] %v10932_v2  ;;  %v10934_v18 = vpop.permute.xlu0 %7477  ;;  %v10936_v57 = vpop.permute.xlu1 %7492  ;;  %v13079_v2 = vld [vmem:[#allocation47_spill] sm:$0xff] }
 0x756   : > { %v12690_v32 = vunpack.i.l.bf16 %v10934_v18  ;;  %v12702_v14 = vunpack.i.l.bf16 %v10936_v57  ;;  %v4573_v16 = vsel %vm2283_vm7, %v13079_v2, %v13083_v56 }
 0x758   : > { %v10947_v48 = vsel %vm2710_vm15, %v12691_v7, %v12690_v32 }
 0x759   : > { %13064 = vst [vmem:[#allocation24_spill] sm:$0xff] %v10947_v48  ;;  %v10949_v36 = vpop.permute.xlu0 %7487  ;;  %v10951_v49 = vpop.permute.xlu1 %5189 }
 0x75a   : > { %13065 = vst [vmem:[#allocation30_spill] sm:$0xff] %v10949_v36  ;;  %13066 = vst [vmem:[#allocation79_spill] sm:$0xff] %v10951_v49  ;;  %v12703_v45 = vunpack.i.h.bf16 %v10949_v36  ;;  %v12699_v6 = vunpack.i.l.bf16 %v10949_v36 }
 0x75c   : > { %v10964_v32 = vsel %vm2755_vm1, %v12700_v13, %v12699_v6  ;;  %v10971_v0 = vsel %vm2755_vm1, %v12703_v45, %v12702_v14 }
 0x75d   : > { %13067 = vst [vmem:[#allocation80_spill] sm:$0xff] %v10964_v32  ;;  %13068 = vst [vmem:[#allocation81_spill] sm:$0xff] %v10971_v0  ;;  %v10973_v7 = vpop.permute.xlu0 %5187  ;;  %v10975_v51 = vpop.permute.xlu1 %7497  ;;  %v4547_v0 = vmul.f32 %v10405_v5, %v13074_v60 }
 0x75e   : > { %13069 = vst [vmem:[#allocation82_spill] sm:$0xff] %v10973_v7  ;;  %13070 = vst [vmem:[#allocation83_spill] sm:$0xff] %v10975_v51  ;;  %v13095_v51 = vld [vmem:[#allocation69_spill] sm:$0xff] }
 0x75f   : > { %v4234_v24 = vpop.f32.mrb[24].mxu0 }
 0x760   : > { %v4235_v37 = vadd.f32 %v4234_v24, %v13071_v40  ;;  %v4236_v25 = vpop.f32.mrb[25].mxu0  ;;  %v4531_v24 = vsel %vm2241_vm9, %v13074_v60, %v13076_v27 }
 0x761   : > { %v4237_v34 = vadd.f32 %v4236_v25, %v13071_v40  ;;  %v10979_v61 = vpop.permute.xlu0 %5191  ;;  %v10981_v6 = vpop.permute.xlu1 %5526 }
 0x762   : > { %13072 = vst [vmem:[#allocation34_spill] sm:$0xff] %v10979_v61  ;;  %13073 = vst [vmem:[#allocation84_spill] sm:$0xff] %v10981_v6  ;;  %vm4364_vm5 = vcmp.gt.f32.partialorder %v4235_v37, 0.0  ;;  %v4372_v13 = vmul.f32 0.01, %v4235_v37  ;;  %v4238_v55 = vpop.f32.mrb[26].mxu0  ;;  %v12730_v6 = vunpack.i.h.bf16 %v10897_v8 }
 0x763   : > { %vm4365_vm6 = vcmp.gt.f32.partialorder %v4237_v34, 0.0  ;;  %v4373_v14 = vmul.f32 0.01, %v4237_v34  ;;  %v4239_v45 = vpop.f32.mrb[27].mxu0 }
 0x764   : > { %v10985_v32 = vsel %vm4364_vm5, %v4235_v37, %v4372_v13  ;;  %v4572_v37 = vsel %vm2283_vm7, %v13080_v19, %v13079_v2  ;;  %v13082_v13 = vld [vmem:[#allocation42_spill] sm:$0xff] }
 0x765   : > { %13075 = vst [vmem:[#allocation36_spill] sm:$0xff] %v10985_v32  ;;  %v10990_v25 = vsel %vm4365_vm6, %v4237_v34, %v4373_v14  ;;  %v10992_v48 = vpop.permute.xlu0 %7502  ;;  %v10994_v12 = vpop.permute.xlu1 %5570  ;;  %v7541_v55 = vpack.i.bf16 %v10985_v32, %v10787_v26  ;;  %v7536_v45 = vpack.i.bf16 %v10985_v32, %v10405_v5  ;;  %v13081_v14 = vld [vmem:[#allocation39_spill] sm:$0xff]  ;;  %v4589_v3 = vmul.f32 %v4572_v37, %v10985_v32 }
 0x766   : > { %13077 = vst [vmem:[#allocation49_spill] sm:$0xff] %v10992_v48  ;;  %13078 = vst [vmem:[#allocation85_spill] sm:$0xff] %v10994_v12  ;;  %v7546_v34 = vpack.i.bf16 %v10990_v25, %v10985_v32  ;;  %v11010_v63 = vsel %vm2241_vm9, %v13076_v27, %v13081_v14  ;;  %v11020_v60 = vsel %vm2241_vm9, %v13081_v14, %v13082_v13  ;;  %v13084_v27 = vld [vmem:[#allocation9_spill] sm:$0xff]  ;;  %v13085_v5 = vunpack.i.h.bf16 %v10992_v48  ;;  %v13088_v37 = vld [vmem:[#allocation11_spill] sm:$0xff] }
 0x767   : > { %7542 = vrot.lane.b32.xlu0 %v7541_v55, %s7759_s18  ;;  %7537 = vrot.lane.b32.xlu1 %v7536_v45, %s7754_s29  ;;  %v11028_v38 = vsel %vm2283_vm7, %v13083_v56, %v13084_v27  ;;  %v13086_v19 = vunpack.i.l.bf16 %v10992_v48  ;;  %v13087_v45 = vld [vmem:[#allocation60_spill] sm:$0xff]  ;;  %v7556_v2 = vpack.i.bf16 %v4589_v3, %v4588_v15  ;;  %v4548_v41 = vmul.f32 %v4531_v24, %v10985_v32  ;;  %v13090_v48 = vld [vmem:[#allocation10_spill] sm:$0xff] }
 0x768   : > { %v4614_v14 = vsel %vm2326_vm10, %v13088_v37, %v13087_v45  ;;  %v11047_v56 = vmul.f32 %v13088_v37, %v10985_v32  ;;  %v11056_v59 = vsel %vm2326_vm10, %v13087_v45, %v13090_v48  ;;  %v13091_v15 = vld [vmem:[#allocation62_spill] sm:$0xff]  ;;  %v5415_v37 = vmul.f32 %v10643_v30, %v10787_v26 }
 0x769   : > { %v11035_v55 = vsel %vm2506_vm12, %v13086_v19, %v13085_v5  ;;  %v11040_v42 = vpop.permute.xlu0 %7507  ;;  %v11042_v50 = vpop.permute.xlu1 %7517  ;;  %v11061_v3 = vsel %vm2326_vm10, %v13090_v48, %v13091_v15  ;;  %v11066_v24 = vmul.f32 %v4614_v14, %v10990_v25  ;;  %v5456_v30 = vmul.f32 %v10706_v43, %v10787_v26  ;;  %v13096_v43 = vld [vmem:[#allocation25_spill] sm:$0xff] }
 0x76a   : > { %13089 = vst [vmem:[#allocation47_spill] sm:$0xff] %v11040_v42  ;;  %v12726_v5 = vunpack.i.h.bf16 %v11040_v42  ;;  %v12727_v19 = vunpack.i.l.bf16 %v11040_v42  ;;  %v12729_v12 = vunpack.i.l.bf16 %v11042_v50  ;;  %v4712_v36 = vmul.f32 %v13095_v51, %v10985_v32 }
 0x76b   : > { %7547 = vrot.lane.b32.xlu0 %v7546_v34, %s7752_s25  ;;  %7557 = vrot.lane.b32.xlu1 %v7556_v2, %s7747_s16  ;;  %v13093_v34 = vld [vmem:[#allocation63_spill] sm:$0xff]  ;;  %v13097_v2 = vld [vmem:[#allocation65_spill] sm:$0xff] }
 0x76c   : > { %v11075_v45 = vsel %vm2551_vm11, %v12727_v19, %v12726_v5  ;;  %v11082_v48 = vsel %vm2628_vm14, %v12730_v6, %v12729_v12  ;;  %v4671_v14 = vmul.f32 %v13093_v34, %v10985_v32  ;;  %v7551_v5 = vpack.i.bf16 %v4548_v41, %v4547_v0  ;;  %v13098_v0 = vld [vmem:[#allocation51_spill] sm:$0xff] }
 0x76d   : > { %13092 = vst [vmem:[#allocation43_spill] sm:$0xff] %v11082_v48  ;;  %v11089_v49 = vpop.permute.xlu0 %7512  ;;  %v11091_v42 = vpop.permute.xlu1 %7522  ;;  %v7571_v19 = vpack.i.bf16 %v11066_v24, %v11047_v56  ;;  %v4655_v26 = vsel %vm2368_vm8, %v13093_v34, %v13096_v43  ;;  %v4656_v41 = vsel %vm2368_vm8, %v13096_v43, %v13097_v2  ;;  %v4696_v56 = vsel %vm436_vm2, %v13095_v51, %v13098_v0  ;;  %v13099_v24 = vld [vmem:[#allocation70_spill] sm:$0xff] }
 0x76e   : > { %13094 = vst [vmem:[#allocation39_spill] sm:$0xff] %v11091_v42  ;;  %v4697_v61 = vsel %vm436_vm2, %v13098_v0, %v13099_v24  ;;  %v13100_v32 = vunpack.i.l.bf16 %v11089_v49  ;;  %v13101_v34 = vunpack.i.h.bf16 %v10783_v62  ;;  %v13103_v43 = vunpack.i.l.bf16 %v11091_v42 }
 0x76f   : > { %v4275_v6 = vpop.f32.mrb[24].mxu1  ;;  %7552 = vrot.lane.b32.xlu0 %v7551_v5, %s7762_s19  ;;  %v13104_v51 = vunpack.i.h.bf16 %v10895_v31  ;;  %v7561_v29 = vpack.i.bf16 %v4671_v14, %v5415_v37  ;;  %v4672_v5 = vmul.f32 %v4655_v26, %v10990_v25 }
 0x770   : > { %v11119_v7 = vsel %vm2166_vm13, %v13101_v34, %v13100_v32  ;;  %v4277_v0 = vpop.f32.mrb[25].mxu1  ;;  %v4276_v12 = vadd.f32 %v4275_v6, %v13071_v40  ;;  %v12750_v34 = vunpack.i.h.bf16 %v10934_v18 }
 0x771   : > { %13102 = vst [vmem:[#allocation42_spill] sm:$0xff] %v11119_v7  ;;  %v11126_v10 = vsel %vm2673_vm0, %v13104_v51, %v13103_v43  ;;  %v4278_v35 = vadd.f32 %v4277_v0, %v13071_v40  ;;  %v11131_v53 = vpop.permute.xlu1 %7527  ;;  %v4279_v39 = vpop.f32.mrb[26].mxu1  ;;  %v7566_v43 = vpack.i.bf16 %v4712_v36, %v5456_v30  ;;  %v4549_v36 = vmul.f32 %v11010_v63, %v10990_v25 }
 0x772   : > { %13105 = vst [vmem:[#allocation45_spill] sm:$0xff] %v11126_v10  ;;  %13106 = vst [vmem:[#allocation9_spill] sm:$0xff] %v11131_v53  ;;  %v12749_v31 = vunpack.i.l.bf16 %v11131_v53  ;;  %v4280_v51 = vpop.f32.mrb[27].mxu1  ;;  %v5647_v42 = vpop.permute.xlu0 %5646  ;;  %vm4366_vm5 = vcmp.gt.f32.partialorder %v4276_v12, 0.0  ;;  %v4374_v6 = vmul.f32 0.01, %v4276_v12  ;;  %v4590_v30 = vmul.f32 %v4573_v16, %v10990_v25 }
 0x773   : > { %vm4367_vm6 = vcmp.gt.f32.partialorder %v4278_v35, 0.0  ;;  %v4375_v14 = vmul.f32 0.01, %v4278_v35  ;;  %7562 = vrot.lane.b32.xlu0 %v7561_v29, %s7748_s17  ;;  %v13108_v0 = vunpack.i.h.bf16 %v11042_v50  ;;  %v13143_v10 = vunpack.i.l.bf16 %v10690_v4 }
 0x774   : > { %v11145_v39 = vsel %vm2710_vm15, %v12750_v34, %v12749_v31  ;;  %v11153_v37 = vsel %vm4366_vm5, %v4276_v12, %v4374_v6  ;;  %v13110_v31 = vunpack.i.h.bf16 %v11089_v49  ;;  %v4713_v12 = vmul.f32 %v4696_v56, %v10990_v25 }
 0x775   : > { %13107 = vst [vmem:[#allocation60_spill] sm:$0xff] %v11145_v39  ;;  %v5655_v51 = vsel %vm2628_vm14, %v13108_v0, %v5647_v42  ;;  %v11155_v32 = vsel %vm4367_vm6, %v4278_v35, %v4375_v14  ;;  %v11157_v29 = vpop.permute.xlu1 %7532  ;;  %v7581_v16 = vpack.i.bf16 %v11153_v37, %v10990_v25  ;;  %v4550_v35 = vmul.f32 %v11020_v60, %v11153_v37 }
 0x776   : > { %13109 = vst [vmem:[#allocation11_spill] sm:$0xff] %v11157_v29  ;;  %v11162_v34 = vpack.c.bf16 %v5655_v51, %v13110_v31  ;;  %v7586_v42 = vpack.i.bf16 %v11155_v32, %v11153_v37  ;;  %v4591_v26 = vmul.f32 %v11028_v38, %v11153_v37  ;;  %v4673_v31 = vmul.f32 %v4656_v41, %v11153_v37 }
 0x777   : > { %7567 = vrot.lane.b32.xlu0 %v7566_v43, %s7760_s20  ;;  %v4714_v6 = vmul.f32 %v4697_v61, %v11153_v37  ;;  %v12751_v14 = vunpack.i.h.bf16 %v10936_v57  ;;  %7582 = vrot.lane.b32.xlu1 %v7581_v16, %s7759_s18  ;;  %v4632_v0 = vmul.f32 %v11056_v59, %v11153_v37  ;;  %v4633_v56 = vmul.f32 %v11061_v3, %v11155_v32  ;;  %v13114_v59 = vld [vmem:[#allocation40_spill] sm:$0xff] }
 0x778   : > { %13111 = vst [vmem:[#allocation10_spill] sm:$0xff] %v11162_v34  ;;  %v7591_v43 = vpack.i.bf16 %v4550_v35, %v4549_v36  ;;  %v7596_v51 = vpack.i.bf16 %v4591_v26, %v4590_v30  ;;  %v7601_v60 = vpack.i.bf16 %v4673_v31, %v4672_v5  ;;  %v13112_v38 = vunpack.i.l.bf16 %v11157_v29  ;;  %v13115_v5 = vld [vmem:[#allocation44_spill] sm:$0xff]  ;;  %v13116_v30 = vld [vmem:[#allocation50_spill] sm:$0xff]  ;;  %v13118_v26 = vld [vmem:[#allocation59_spill] sm:$0xff] }
 0x779   : > { %v7606_v63 = vpack.i.bf16 %v4714_v6, %v4713_v12  ;;  %v7611_v34 = vpack.i.bf16 %v4633_v56, %v4632_v0  ;;  %v4535_v36 = vsel %vm2241_vm9, %v13114_v59, %v13115_v5  ;;  %v13119_v31 = vld [vmem:[#allocation64_spill] sm:$0xff]  ;;  %v13120_v0 = vld [vmem:[#allocation27_spill] sm:$0xff]  ;;  %v13204_v39 = vunpack.i.h.bf16 %v10934_v18 }
 0x77a   : > { %v11191_v41 = vsel %vm2755_vm1, %v12751_v14, %v13112_v38  ;;  %v4618_v6 = vsel %vm2326_vm10, %v13118_v26, %v13119_v31  ;;  %v4657_v56 = vsel %vm2368_vm8, %v13097_v2, %v13120_v0  ;;  %v13122_v38 = vld [vmem:[#allocation74_spill] sm:$0xff]  ;;  %v13205_v7 = vunpack.i.l.bf16 %v10934_v18  ;;  %v13206_v18 = vld [vmem:[#allocation13_spill] sm:$0xff] }
 0x77b   : > { %7572 = vrot.lane.b32.xlu0 %v7571_v19, %s7758_s13  ;;  %13113 = vst [vmem:[#allocation62_spill] sm:$0xff] %v11191_v41  ;;  %7587 = vrot.lane.b32.xlu1 %v7586_v42, %s7752_s25  ;;  %v4534_v19 = vsel %vm2241_vm9, %v13082_v13, %v13114_v59  ;;  %v13117_v42 = vld [vmem:[#allocation8_spill] sm:$0xff]  ;;  %v4617_v13 = vsel %vm2326_vm10, %v13091_v15, %v13118_v26  ;;  %v13142_v41 = vunpack.i.h.bf16 %v10690_v4 }
 0x77c   : > { %v4576_v12 = vsel %vm2283_vm7, %v13116_v30, %v13117_v42  ;;  %v4698_v15 = vsel %vm436_vm2, %v13099_v24, %v13122_v38 }
 0x77d   : > { %v4715_v61 = vmul.f32 %v4698_v15, %v11155_v32 }
 0x77f   : > { %7577 = vrot.lane.b32.xlu0 %v7581_v16, %s7754_s29  ;;  %7592 = vrot.lane.b32.xlu1 %v7591_v43, %s7762_s19  ;;  %v4575_v16 = vsel %vm2283_vm7, %v13084_v27, %v13116_v30  ;;  %v13123_v30 = vld [vmem:[#allocation71_spill] sm:$0xff] }
 0x780   : > { %v4699_v2 = vsel %vm436_vm2, %v13122_v38, %v13123_v30 }
 0x783   : > { %7597 = vrot.lane.b32.xlu0 %v7596_v51, %s7747_s16  ;;  %7602 = vrot.lane.b32.xlu1 %v7601_v60, %s7748_s17  ;;  %v13121_v51 = vld [vmem:[#allocation67_spill] sm:$0xff] }
 0x784   : > { %v4658_v60 = vsel %vm2368_vm8, %v13120_v0, %v13121_v51  ;;  %v4674_v0 = vmul.f32 %v4657_v56, %v11155_v32 }
 0x787   : > { %7607 = vrot.lane.b32.xlu1 %v7606_v63, %s7760_s20 }
 0x78a   : > { %v4316_v3 = vpop.f32.mrb[28].mxu0 }
 0x78b   : > { %v4317_v35 = vadd.f32 %v4316_v3, %v13071_v40  ;;  %v4318_v63 = vpop.f32.mrb[29].mxu0  ;;  %7612 = vrot.lane.b32.xlu1 %v7611_v34, %s7758_s13  ;;  %v4592_v34 = vmul.f32 %v4575_v16, %v11155_v32 }
 0x78c   : > { %v4319_v27 = vadd.f32 %v4318_v63, %v13071_v40  ;;  %v4320_v43 = vpop.f32.mrb[30].mxu0 }
 0x78d   : > { %vm4368_vm5 = vcmp.gt.f32.partialorder %v4317_v35, 0.0  ;;  %v4376_v59 = vmul.f32 0.01, %v4317_v35  ;;  %v4321_v3 = vpop.f32.mrb[31].mxu0  ;;  %v4551_v43 = vmul.f32 %v4534_v19, %v11155_v32 }
 0x78e   : > { %vm4369_vm6 = vcmp.gt.f32.partialorder %v4319_v27, 0.0  ;;  %v4377_v63 = vmul.f32 0.01, %v4319_v27 }
 0x78f   : > { %v11233_v26 = vsel %vm4368_vm5, %v4317_v35, %v4376_v59 }
 0x790   : > { %v11238_v24 = vsel %vm4369_vm6, %v4319_v27, %v4377_v63  ;;  %v7621_v3 = vpack.i.bf16 %v11233_v26, %v11155_v32  ;;  %v4593_v14 = vmul.f32 %v4576_v12, %v11233_v26  ;;  %v4552_v38 = vmul.f32 %v4535_v36, %v11233_v26 }
 0x791   : > { %v7626_v16 = vpack.i.bf16 %v11238_v24, %v11233_v26  ;;  %v4675_v35 = vmul.f32 %v4658_v60, %v11233_v26  ;;  %v4716_v19 = vmul.f32 %v4699_v2, %v11233_v26  ;;  %v4634_v56 = vmul.f32 %v4617_v13, %v11233_v26 }
 0x792   : > { %7622 = vrot.lane.b32.xlu0 %v7621_v3, %s7759_s18  ;;  %7617 = vrot.lane.b32.xlu1 %v7621_v3, %s7754_s29  ;;  %v7636_v27 = vpack.i.bf16 %v4593_v14, %v4592_v34  ;;  %v7631_v15 = vpack.i.bf16 %v4552_v38, %v4551_v43  ;;  %v4635_v59 = vmul.f32 %v4618_v6, %v11238_v24  ;;  %v13124_v3 = vld [vmem:[#allocation41_spill] sm:$0xff]  ;;  %v13125_v6 = vld [vmem:[#allocation46_spill] sm:$0xff]  ;;  %v13126_v34 = vld [vmem:[#allocation7_spill] sm:$0xff] }
 0x793   : > { %v7641_v12 = vpack.i.bf16 %v4675_v35, %v4674_v0  ;;  %v7646_v63 = vpack.i.bf16 %v4716_v19, %v4715_v61  ;;  %v4536_v14 = vsel %vm2241_vm9, %v13115_v5, %v13124_v3  ;;  %v4537_v61 = vsel %vm2241_vm9, %v13124_v3, %v13125_v6  ;;  %v13128_v19 = vld [vmem:[#allocation61_spill] sm:$0xff] }
 0x794   : > { %v7651_v36 = vpack.i.bf16 %v4635_v59, %v4634_v56  ;;  %v4577_v43 = vsel %vm2283_vm7, %v13117_v42, %v13126_v34  ;;  %v4619_v56 = vsel %vm2326_vm10, %v13119_v31, %v13128_v19 }
 0x795   : > { %v11286_v3 = vmul.f32 %v4577_v43, %v11238_v24 }
 0x796   : > { %7627 = vrot.lane.b32.xlu0 %v7626_v16, %s7752_s25  ;;  %7637 = vrot.lane.b32.xlu1 %v7636_v27, %s7747_s16  ;;  %v13127_v16 = vld [vmem:[#allocation12_spill] sm:$0xff] }
 0x797   : > { %v4578_v35 = vsel %vm2283_vm7, %v13126_v34, %v13127_v16 }
 0x79a   : > { %7632 = vrot.lane.b32.xlu0 %v7631_v15, %s7762_s19  ;;  %v13129_v15 = vld [vmem:[#allocation66_spill] sm:$0xff] }
 0x79b   : > { %v4620_v59 = vsel %vm2326_vm10, %v13128_v19, %v13129_v15 }
 0x79e   : > { %v4357_v60 = vpop.f32.mrb[28].mxu1  ;;  %7642 = vrot.lane.b32.xlu0 %v7641_v12, %s7748_s17  ;;  %v13130_v12 = vld [vmem:[#allocation16_spill] sm:$0xff] }
 0x79f   : > { %v4358_v13 = vadd.f32 %v4357_v60, %v13071_v40  ;;  %v4359_v2 = vpop.f32.mrb[29].mxu1  ;;  %v13131_v60 = vld [vmem:[#allocation68_spill] sm:$0xff] }
 0x7a0   : > { %v4360_v0 = vadd.f32 %v4359_v2, %v13071_v40  ;;  %v4361_v38 = vpop.f32.mrb[30].mxu1  ;;  %v4659_v40 = vsel %vm2368_vm8, %v13121_v51, %v13130_v12  ;;  %v4660_v2 = vsel %vm2368_vm8, %v13130_v12, %v13131_v60 }
 0x7a1   : > { %vm4370_vm5 = vcmp.gt.f32.partialorder %v4358_v13, 0.0  ;;  %v4378_v5 = vmul.f32 0.01, %v4358_v13  ;;  %v4362_v27 = vpop.f32.mrb[31].mxu1  ;;  %v11289_v34 = vmul.f32 %v4659_v40, %v11238_v24  ;;  %v7726_v40 = vld [vmem:[#allocation6 + $0x10] sm:$0xff] }
 0x7a2   : > { %vm4371_vm9 = vcmp.gt.f32.partialorder %v4360_v0, 0.0  ;;  %v4379_v42 = vmul.f32 0.01, %v4360_v0  ;;  %7647 = vrot.lane.b32.xlu0 %v7646_v63, %s7760_s20  ;;  %v11310_v27 = vld [vmem:[#allocation6 + $0x8] sm:$0xff] }
 0x7a3   : > { %v11283_v31 = vsel %vm4370_vm5, %v4358_v13, %v4378_v5  ;;  %v13132_v13 = vld [vmem:[#allocation75_spill] sm:$0xff]  ;;  %v5194_v5 = vsel %vm2166_vm13, %v10714_v11, %v10678_v47 }
 0x7a4   : > { %v11291_v38 = vsel %vm4371_vm9, %v4360_v0, %v4379_v42  ;;  %v11295_v51 = vpack.i.bf16 %v11283_v31, %v11238_v24  ;;  %v11298_v63 = vmul.f32 %v4578_v35, %v11283_v31  ;;  %v11301_v19 = vmul.f32 %v4660_v2, %v11283_v31  ;;  %v13133_v35 = vld [vmem:[#allocation72_spill] sm:$0xff] }
 0x7a5   : > { %v4700_v43 = vsel %vm436_vm2, %v13123_v30, %v13132_v13  ;;  %v7661_v15 = vpack.i.bf16 %v11310_v27, %v11291_v38  ;;  %v4701_v12 = vsel %vm436_vm2, %v13132_v13, %v13133_v35  ;;  %v11326_v2 = vmul.f32 %v4536_v14, %v11238_v24 }
 0x7a6   : > { %7652 = vrot.lane.b32.xlu0 %v7651_v36, %s7758_s13  ;;  %v11329_v0 = vmul.f32 %v4537_v61, %v11283_v31  ;;  %v11332_v13 = vmul.f32 %v4700_v43, %v11238_v24  ;;  %v11335_v36 = vmul.f32 %v4701_v12, %v11283_v31  ;;  %v5211_v60 = vmul.f32 %v7726_v40, %v5194_v5  ;;  %v7727_v5 = vld [vmem:[#allocation6 + $0x20] sm:$0xff] }
 0x7a7   : > { %7662 = vrot.lane.b32.xlu1 %v7661_v15, %s7754_s29  ;;  %13134 = vst [vmem:[#allocation63_spill] sm:$0xff] %v11326_v2  ;;  %v11339_v42 = vmul.f32 %v4619_v56, %v11283_v31  ;;  %v11342_v15 = vmul.f32 %v4620_v59, %v11291_v38  ;;  %v5196_v14 = vsel %vm2166_vm13, %v10726_v9, %v10682_v22  ;;  %v13140_v61 = vunpack.i.h.bf16 %v10747_v46 }
 0x7a8   : > { %13135 = vst [vmem:[#allocation69_spill] sm:$0xff] %v11329_v0  ;;  %13136 = vst [vmem:[#allocation25_spill] sm:$0xff] %v11332_v13  ;;  %v13141_v43 = vunpack.i.l.bf16 %v10747_v46  ;;  %v5213_v40 = vmul.f32 %v7727_v5, %v5196_v14  ;;  %v7394_v56 = vunpack.i.l.bf16 %v10708_v58  ;;  %v13144_v13 = vunpack.i.h.bf16 %v10802_v1 }
 0x7a9   : > { %13137 = vst [vmem:[#allocation65_spill] sm:$0xff] %v11335_v36  ;;  %13138 = vst [vmem:[#allocation51_spill] sm:$0xff] %v11339_v42  ;;  %v7420_v5 = vunpack.i.h.bf16 %v10822_v54 }
 0x7aa   : > { %13139 = vst [vmem:[#allocation70_spill] sm:$0xff] %v11342_v15  ;;  %v5486_v12 = vsel %vm2283_vm7, %v13141_v43, %v13140_v61  ;;  %7657 = vrot.lane.b32.xlu0 %v11295_v51, %s7754_s29  ;;  %v5488_v61 = vsel %vm2283_vm7, %v13143_v10, %v13142_v41  ;;  %v7409_v43 = vunpack.i.l.bf16 %v10802_v1  ;;  %v13146_v10 = vunpack.i.h.bf16 %v10779_v52 }
 0x7ab   : > { %v5791_v16 = vpack.c.bf16 %v5486_v12, %v5211_v60  ;;  %v5793_v30 = vpack.c.bf16 %v5488_v61, %v5213_v40  ;;  %v13145_v60 = vunpack.i.h.bf16 %v10708_v58  ;;  %v13147_v41 = vunpack.i.l.bf16 %v10779_v52 }
 0x7ac   : > { %v5573_v59 = vsel %vm2551_vm11, %v7409_v43, %v13144_v13  ;;  %v7405_v1 = vunpack.i.h.bf16 %v10716_v17  ;;  %v13148_v13 = vunpack.i.h.bf16 %v10733_v21 }
 0x7ad   : > { %v5529_v14 = vsel %vm2506_vm12, %v7394_v56, %v13145_v60  ;;  %v7434_v60 = vunpack.i.l.bf16 %v10783_v62 }
 0x7ae   : > { %5884 = vrot.lane.b32.xlu0 %v5791_v16, %s7757_s15  ;;  %v5799_v12 = vpack.c.bf16 %v5573_v59, %v5529_v14  ;;  %v5531_v16 = vsel %vm2506_vm12, %v13147_v41, %v13146_v10  ;;  %v5572_v59 = vsel %vm2551_vm11, %v7420_v5, %v7409_v43  ;;  %v5528_v52 = vsel %vm2506_vm12, %v7405_v1, %v7394_v56 }
 0x7af   : > { %v5798_v61 = vpack.c.bf16 %v5572_v59, %v5528_v52  ;;  %v13150_v14 = vunpack.i.l.bf16 %v10848_v20  ;;  %v13153_v41 = vunpack.i.h.bf16 %v10871_v44  ;;  %v7449_v43 = vunpack.i.l.bf16 %v10897_v8  ;;  %v13156_v59 = vld [vmem:[#allocation23_spill] sm:$0xff] }
 0x7b0   : > { %v13154_v5 = vunpack.i.h.bf16 %v10848_v20  ;;  %v7454_v52 = vunpack.i.l.bf16 %v13156_v59 }
 0x7b2   : > { %5888 = vrot.lane.b32.xlu0 %v5793_v30, %s7757_s15  ;;  %v13149_v30 = vunpack.i.l.bf16 %v10733_v21  ;;  %v13152_v21 = vunpack.i.l.bf16 %v10820_v23  ;;  %v5608_v1 = vsel %vm2166_vm13, %v13154_v5, %v7434_v60 }
 0x7b4   : > { %v5575_v58 = vsel %vm2551_vm11, %v13149_v30, %v13148_v13  ;;  %v13155_v13 = vunpack.i.h.bf16 %v10820_v23  ;;  %v13158_v23 = vunpack.i.h.bf16 %v13156_v59 }
 0x7b5   : > { %v5801_v40 = vpack.c.bf16 %v5575_v58, %v5531_v16  ;;  %v5649_v16 = vsel %vm2628_vm14, %v13153_v41, %v13152_v21 }
 0x7b6   : > { %5900 = vrot.lane.b32.xlu0 %v5799_v12, %s7757_s15  ;;  %v13151_v12 = vunpack.i.h.bf16 %v10772_v33  ;;  %v5651_v30 = vsel %vm2628_vm14, %v13155_v13, %v7449_v43  ;;  %v5692_v20 = vsel %vm2673_vm0, %v7454_v52, %v13158_v23  ;;  %v13165_v13 = vld [vmem:[#allocation15_spill] sm:$0xff]  ;;  %v13167_v23 = vld [vmem:[#allocation53_spill] sm:$0xff] }
 0x7b7   : > { %v5811_v58 = vpack.c.bf16 %v5651_v30, %v5608_v1  ;;  %v11434_v30 = vunpack.i.l.bf16 %v13165_v13  ;;  %v13166_v59 = vunpack.i.h.bf16 %v13165_v13 }
 0x7b8   : > { %v5606_v10 = vsel %vm2166_vm13, %v13151_v12, %v13150_v14 }
 0x7b9   : > { %v5809_v56 = vpack.c.bf16 %v5649_v16, %v5606_v10  ;;  %v13159_v10 = vld [vmem:[#allocation33_spill] sm:$0xff] }
 0x7ba   : > { %5904 = vrot.lane.b32.xlu0 %v5801_v40, %s7757_s15  ;;  %v7469_v40 = vunpack.i.l.bf16 %v10915_v28  ;;  %v13160_v21 = vunpack.i.h.bf16 %v13159_v10  ;;  %v13161_v41 = vunpack.i.l.bf16 %v13159_v10  ;;  %v13168_v10 = vld [vmem:[#allocation82_spill] sm:$0xff] }
 0x7bc   : > { %v5730_v16 = vsel %vm2710_vm15, %v13161_v41, %v13160_v21  ;;  %v13170_v41 = vld [vmem:[#allocation30_spill] sm:$0xff] }
 0x7be   : > { %5898 = vrot.lane.b32.xlu0 %v5798_v61, %s7757_s15  ;;  %v13157_v61 = vunpack.i.h.bf16 %v10915_v28 }
 0x7c0   : > { %v5728_v14 = vsel %vm2710_vm15, %v7469_v40, %v13157_v61  ;;  %v5772_v61 = vsel %vm2755_vm1, %v11434_v30, %v13166_v59  ;;  %v13175_v59 = vld [vmem:[#allocation34_spill] sm:$0xff] }
 0x7c1   : > { %v5817_v12 = vpack.c.bf16 %v5728_v14, %v5692_v20  ;;  %v5826_v14 = vpack.c.bf16 %v5772_v61, %v5772_v61  ;;  %v12754_v20 = vunpack.i.h.bf16 %v13167_v23  ;;  %v13176_v61 = vld [vmem:[#allocation79_spill] sm:$0xff] }
 0x7c2   : > { %5920 = vrot.lane.b32.xlu0 %v5809_v56, %s7757_s15  ;;  %v13162_v56 = vld [vmem:[#allocation26_spill] sm:$0xff] }
 0x7c3   : > { %v13163_v5 = vunpack.i.h.bf16 %v13162_v56  ;;  %v13164_v28 = vunpack.i.l.bf16 %v13162_v56  ;;  %v7728_v56 = vld [vmem:[#allocation6 + $0x28] sm:$0xff] }
 0x7c5   : > { %v5694_v1 = vsel %vm2673_vm0, %v13164_v28, %v13163_v5 }
 0x7c6   : > { %5924 = vrot.lane.b32.xlu0 %v5811_v58, %s7757_s15  ;;  %v5816_v58 = vpack.c.bf16 %v7469_v40, %v7454_v52  ;;  %v13172_v40 = vunpack.i.l.bf16 %v13170_v41 }
 0x7ca   : > { %7667 = vrot.lane.b32.xlu0 %v11295_v51, %s7759_s18  ;;  %v5819_v51 = vpack.c.bf16 %v5730_v16, %v5694_v1  ;;  %v13171_v16 = vunpack.i.h.bf16 %v13170_v41  ;;  %v13173_v1 = vunpack.i.h.bf16 %v10690_v4  ;;  %v5199_v41 = vsel %vm2166_vm13, %v13176_v61, %v13175_v59 }
 0x7cc   : > { %v5774_v52 = vsel %vm2755_vm1, %v13172_v40, %v13171_v16 }
 0x7cd   : > { %v5828_v28 = vpack.c.bf16 %v5774_v52, %v5774_v52 }
 0x7ce   : > { %5936 = vrot.lane.b32.xlu0 %v5817_v12, %s7757_s15  ;;  %v5197_v12 = vsel %vm2166_vm13, %v10682_v22, %v13168_v10  ;;  %v13174_v22 = vld [vmem:[#allocation83_spill] sm:$0xff] }
 0x7cf   : > { %v5214_v5 = vmul.f32 %v7728_v56, %v5197_v12  ;;  %v12757_v13 = vunpack.i.h.bf16 %v13174_v22  ;;  %v13177_v12 = vld [vmem:[#allocation52_spill] sm:$0xff] }
 0x7d0   : > { %v5216_v40 = vmul.f32 %v5199_v41, %v13177_v12  ;;  %v13184_v12 = vld [vmem:[#allocation49_spill] sm:$0xff] }
 0x7d1   : > { %v13185_v15 = vunpack.i.l.bf16 %v13184_v12 }
 0x7d2   : > { %5940 = vrot.lane.b32.xlu0 %v5819_v51, %s7757_s15  ;;  %v5489_v51 = vsel %vm2283_vm7, %v13173_v1, %v12754_v20  ;;  %v13179_v20 = vld [vmem:[#allocation47_spill] sm:$0xff] }
 0x7d3   : > { %v13180_v42 = vunpack.i.l.bf16 %v13179_v20 }
 0x7d6   : > { %5934 = vrot.lane.b32.xlu0 %v5816_v58, %s7757_s15  ;;  %v12758_v58 = vunpack.i.l.bf16 %v13174_v22 }
 0x7d8   : > { %v5491_v4 = vsel %vm2283_vm7, %v12758_v58, %v12757_v13  ;;  %v13186_v13 = vunpack.i.l.bf16 %v10716_v17 }
 0x7d9   : > { %v11446_v21 = vpop.permute.xlu0 %7542  ;;  %v11468_v52 = vpop.permute.xlu1 %7537  ;;  %v5796_v1 = vpack.c.bf16 %v5491_v4, %v5216_v40  ;;  %v13187_v40 = vld [vmem:[#allocation85_spill] sm:$0xff]  ;;  %v13188_v4 = vunpack.i.h.bf16 %v13179_v20  ;;  %v13193_v20 = vunpack.i.h.bf16 %v10897_v8  ;;  %v13196_v8 = vunpack.i.h.bf16 %v11089_v49 }
 0x7da   : > { %13169 = vst [vmem:[#allocation40_spill] sm:$0xff] %v11446_v21  ;;  %5954 = vrot.lane.b32.xlu0 %v5826_v14, %s7757_s15  ;;  %v5794_v14 = vpack.c.bf16 %v5489_v51, %v5214_v5  ;;  %v5533_v58 = vsel %vm2506_vm12, %v13186_v13, %v13185_v15  ;;  %v13192_v15 = vunpack.i.h.bf16 %v10783_v62  ;;  %v13195_v62 = vunpack.i.l.bf16 %v11042_v50 }
 0x7dc   : > { %v5609_v13 = vsel %vm2166_vm13, %v7434_v60, %v13192_v15 }
 0x7dd   : > { %v11464_v16 = vpop.permute.xlu0 %7547  ;;  %v11485_v41 = vpop.permute.xlu1 %7557 }
 0x7de   : > { %5958 = vrot.lane.b32.xlu0 %v5828_v28, %s7757_s15  ;;  %v13181_v28 = vunpack.i.l.bf16 %v10822_v54  ;;  %13183 = vst [vmem:[#allocation8_spill] sm:$0xff] %v11485_v41  ;;  %v5579_v54 = vsel %vm2551_vm11, %v13188_v4, %v13187_v40 }
 0x7e0   : > { %v5577_v5 = vsel %vm2551_vm11, %v13181_v28, %v13180_v42  ;;  %v13190_v28 = vld [vmem:[#allocation84_spill] sm:$0xff] }
 0x7e1   : > { %v11475_v56 = vpop.permute.xlu0 %7552 }
 0x7e2   : > { %13178 = vst [vmem:[#allocation44_spill] sm:$0xff] %v11475_v56  ;;  %5890 = vrot.lane.b32.xlu0 %v5794_v14, %s7757_s15  ;;  %v5803_v14 = vpack.c.bf16 %v5577_v5, %v5533_v58  ;;  %v5652_v58 = vsel %vm2628_vm14, %v7449_v43, %v13193_v20  ;;  %v13197_v43 = vunpack.i.l.bf16 %v11089_v49  ;;  %v13200_v20 = vld [vmem:[#allocation18_spill] sm:$0xff] }
 0x7e5   : > { %v11483_v51 = vpop.permute.xlu0 %7562 }
 0x7e6   : > { %13182 = vst [vmem:[#allocation50_spill] sm:$0xff] %v11483_v51  ;;  %5894 = vrot.lane.b32.xlu0 %v5796_v1, %s7757_s15  ;;  %v13191_v1 = vunpack.i.h.bf16 %v13184_v12 }
 0x7e8   : > { %v5535_v2 = vsel %vm2506_vm12, %v13191_v1, %v13190_v28  ;;  %v5812_v1 = vpack.c.bf16 %v5652_v58, %v5609_v13  ;;  %v13199_v13 = vld [vmem:[#allocation35_spill] sm:$0xff] }
 0x7e9   : > { %v11497_v36 = vpop.permute.xlu0 %7567  ;;  %v11499_v42 = vpop.permute.xlu1 %7582  ;;  %v5805_v17 = vpack.c.bf16 %v5579_v54, %v5535_v2  ;;  %v13194_v2 = vunpack.i.h.bf16 %v11042_v50  ;;  %v5611_v54 = vsel %vm2166_vm13, %v13197_v43, %v13196_v8  ;;  %v4458_v50 = vsel %vm2166_vm13, %v13200_v20, %v13199_v13  ;;  %v13202_v8 = vld [vmem:[#allocation39_spill] sm:$0xff] }
 0x7ea   : > { %13189 = vst [vmem:[#allocation59_spill] sm:$0xff] %v11497_v36  ;;  %5908 = vrot.lane.b32.xlu0 %v5803_v14, %s7757_s15  ;;  %v12762_v14 = vunpack.i.h.bf16 %v11464_v16 }
 0x7eb   : > { %v5654_v60 = vsel %vm2628_vm14, %v13195_v62, %v13194_v2  ;;  %v11547_v62 = vmul.f32 %v4458_v50, %v10990_v25  ;;  %v13217_v25 = vunpack.i.h.bf16 %v11131_v53 }
 0x7ec   : > { %v5814_v0 = vpack.c.bf16 %v5654_v60, %v5611_v54  ;;  %v13210_v60 = vunpack.i.l.bf16 %v13202_v8 }
 0x7ed   : > { %v11512_v5 = vpop.permute.xlu0 %7572  ;;  %v11514_v4 = vpop.permute.xlu1 %7587  ;;  %13201 = vst [vmem:[#allocation27_spill] sm:$0xff] %v11547_v62  ;;  %v13212_v62 = vunpack.i.h.bf16 %v11475_v56  ;;  %v13220_v56 = vunpack.i.h.bf16 %v11446_v21 }
 0x7ee   : > { %5912 = vrot.lane.b32.xlu0 %v5805_v17, %s7757_s15  ;;  %v12761_v12 = vunpack.i.l.bf16 %v11514_v4 }
 0x7f0   : > { %v11534_v17 = vsel %vm2166_vm13, %v12762_v14, %v12761_v12 }
 0x7f1   : > { %13198 = vst [vmem:[#allocation64_spill] sm:$0xff] %v11534_v17  ;;  %v11536_v15 = vpop.permute.xlu0 %7577  ;;  %v11543_v49 = vpop.permute.xlu1 %7592 }
 0x7f2   : > { %v12767_v58 = vunpack.i.h.bf16 %v11536_v15  ;;  %v12768_v2 = vunpack.i.l.bf16 %v11536_v15  ;;  %5926 = vrot.lane.b32.xlu0 %v5812_v1, %s7757_s15  ;;  %v5732_v1 = vsel %vm2710_vm15, %v13205_v7, %v13204_v39  ;;  %v13207_v7 = vunpack.i.h.bf16 %v13206_v18 }
 0x7f3   : > { %v13208_v39 = vunpack.i.l.bf16 %v13206_v18 }
 0x7f4   : > { %v11555_v12 = vsel %vm2283_vm7, %v12768_v2, %v12767_v58  ;;  %v13209_v2 = vunpack.i.h.bf16 %v13202_v8  ;;  %v13253_v8 = vunpack.i.h.bf16 %v11514_v4 }
 0x7f5   : > { %13203 = vst [vmem:[#allocation67_spill] sm:$0xff] %v11555_v12  ;;  %v11565_v43 = vpop.permute.xlu0 %7597  ;;  %v11572_v54 = vpop.permute.xlu1 %7602  ;;  %v5696_v50 = vsel %vm2673_vm0, %v13208_v39, %v13207_v7  ;;  %v13215_v39 = vunpack.i.h.bf16 %v11485_v41  ;;  %v13218_v12 = vunpack.i.l.bf16 %v11131_v53  ;;  %v13223_v41 = vunpack.i.h.bf16 %v11483_v51 }
 0x7f6   : > { %5930 = vrot.lane.b32.xlu0 %v5814_v0, %s7757_s15  ;;  %v5698_v14 = vsel %vm2673_vm0, %v13210_v60, %v13209_v2  ;;  %v13211_v0 = vunpack.i.l.bf16 %v11543_v49  ;;  %v13214_v7 = vunpack.i.l.bf16 %v11565_v43  ;;  %v5821_v58 = vpack.c.bf16 %v5732_v1, %v5696_v50 }
 0x7f7   : > { %v5734_v2 = vsel %vm2710_vm15, %v13218_v12, %v13217_v25  ;;  %v13219_v60 = vunpack.i.l.bf16 %v11499_v42 }
 0x7f8   : > { %v11593_v18 = vsel %vm2506_vm12, %v13212_v62, %v13211_v0  ;;  %v11600_v48 = vsel %vm2551_vm11, %v13215_v39, %v13214_v7  ;;  %v13222_v0 = vunpack.i.l.bf16 %v11572_v54  ;;  %v5823_v39 = vpack.c.bf16 %v5734_v2, %v5698_v14 }
 0x7f9   : > { %13213 = vst [vmem:[#allocation74_spill] sm:$0xff] %v11593_v18  ;;  %13216 = vst [vmem:[#allocation71_spill] sm:$0xff] %v11600_v48  ;;  %v11612_v62 = vsel %vm2710_vm15, %v13220_v56, %v13219_v60  ;;  %v11623_v50 = vpop.permute.xlu1 %7607  ;;  %v11629_v56 = vunpack.i.h.bf16 %v11497_v36  ;;  %v12780_v14 = vunpack.i.h.bf16 %v11512_v5 }
 0x7fa   : > { %13221 = vst [vmem:[#allocation41_spill] sm:$0xff] %v11612_v62  ;;  %v11619_v7 = vsel %vm2673_vm0, %v13223_v41, %v13222_v0  ;;  %5944 = vrot.lane.b32.xlu0 %v5821_v58, %s7757_s15  ;;  %v12775_v25 = vunpack.i.l.bf16 %v11623_v50  ;;  %v13225_v41 = vunpack.i.h.bf16 %v10936_v57  ;;  %v13226_v0 = vunpack.i.l.bf16 %v10936_v57 }
 0x7fb   : > { %13224 = vst [vmem:[#allocation46_spill] sm:$0xff] %v11619_v7 }
 0x7fc   : > { %v5776_v1 = vsel %vm2755_vm1, %v13226_v0, %v13225_v41  ;;  %v11642_v58 = vsel %vm2755_vm1, %v11629_v56, %v12775_v25  ;;  %v13229_v41 = vunpack.i.h.bf16 %v11157_v29  ;;  %v13230_v0 = vunpack.i.l.bf16 %v11157_v29 }
 0x7fd   : > { %13227 = vst [vmem:[#allocation7_spill] sm:$0xff] %v11642_v58  ;;  %v11644_v12 = vpop.permute.xlu1 %7612  ;;  %v5830_v60 = vpack.c.bf16 %v5776_v1, %v5776_v1  ;;  %v13231_v58 = vld [vmem:[#allocation17_spill] sm:$0xff]  ;;  %v13232_v1 = vld [vmem:[#allocation38_spill] sm:$0xff] }
 0x7fe   : > { %5948 = vrot.lane.b32.xlu0 %v5823_v39, %s7757_s15  ;;  %v12779_v2 = vunpack.i.l.bf16 %v11644_v12  ;;  %v5778_v25 = vsel %vm2755_vm1, %v13230_v0, %v13229_v41  ;;  %v4460_v7 = vsel %vm2166_vm13, %v13232_v1, %v13231_v58  ;;  %v13255_v51 = vunpack.i.h.bf16 %v11644_v12 }
 0x7ff   : > { %v11677_v0 = vmul.f32 %v4460_v7, %v11155_v32  ;;  %v12790_v7 = vunpack.i.h.bf16 %v11565_v43  ;;  %v12794_v32 = vunpack.i.h.bf16 %v11543_v49 }
 0x800   : > { %v11654_v57 = vsel %vm2628_vm14, %v12780_v14, %v12779_v2  ;;  %v5832_v2 = vpack.c.bf16 %v5778_v25, %v5778_v25  ;;  %v12785_v14 = vunpack.i.h.bf16 %v11499_v42 }
 0x801   : > { %13228 = vst [vmem:[#allocation61_spill] sm:$0xff] %v11654_v57  ;;  %13233 = vst [vmem:[#allocation66_spill] sm:$0xff] %v11677_v0  ;;  %v13239_v0 = vpack.i.bf16 %v11301_v19, %v11289_v34  ;;  %v7540_v19 = vunpack.i.h.bf16 %v11468_v52 }
 0x802   : > { %5962 = vrot.lane.b32.xlu0 %v5830_v60, %s7757_s15 }
 0x804   : > { %v11667_v62 = vpop.permute.xlu0 %7622  ;;  %v11669_v18 = vpop.permute.xlu1 %7617 }
 0x805   : > { %v12784_v48 = vunpack.i.l.bf16 %v11667_v62  ;;  %v12787_v41 = vunpack.i.h.bf16 %v11669_v18  ;;  %v12786_v60 = vunpack.i.l.bf16 %v11669_v18 }
 0x806   : > { %5966 = vrot.lane.b32.xlu0 %v5832_v2, %s7757_s15 }
 0x807   : > { %v11684_v39 = vsel %vm2710_vm15, %v12785_v14, %v12784_v48  ;;  %v11691_v25 = vsel %vm2283_vm7, %v12786_v60, %v12787_v41  ;;  %v13237_v48 = vpack.i.bf16 %v11298_v63, %v11286_v3  ;;  %v13240_v3 = vld [vmem:[#allocation29_spill] sm:$0xff] }
 0x808   : > { %13234 = vst [vmem:[#allocation16_spill] sm:$0xff] %v11684_v39  ;;  %13235 = vst [vmem:[#allocation75_spill] sm:$0xff] %v11691_v25  ;;  %v11693_v17 = vpop.permute.xlu0 %7627  ;;  %v11695_v2 = vpop.permute.xlu1 %7637 }
 0x809   : > { %13236 = vst [vmem:[#allocation72_spill] sm:$0xff] %v11693_v17  ;;  %v12789_v57 = vunpack.i.l.bf16 %v11695_v2  ;;  %v13252_v53 = vunpack.i.l.bf16 %v11693_v17  ;;  %v7549_v17 = vunpack.i.l.bf16 %v11464_v16 }
 0x80a   : > { %7687 = vrot.lane.b32.xlu0 %v13237_v48, %s7747_s16  ;;  %v4702_v48 = vsel %vm436_vm2, %v13133_v35, %v13240_v3  ;;  %v7539_v35 = vunpack.i.l.bf16 %v11468_v52 }
 0x80b   : > { %v11710_v14 = vsel %vm2551_vm11, %v12790_v7, %v12789_v57  ;;  %v4555_v7 = vmul.f32 %v13125_v6, %v11291_v38  ;;  %v4719_v25 = vmul.f32 %v4702_v48, %v11291_v38 }
 0x80c   : > { %13238 = vst [vmem:[#allocation23_spill] sm:$0xff] %v11710_v14  ;;  %v11712_v60 = vpop.permute.xlu0 %7632  ;;  %v12804_v14 = vunpack.i.h.bf16 %v11623_v50 }
 0x80d   : > { %v12793_v41 = vunpack.i.l.bf16 %v11712_v60 }
 0x80e   : > { %7692 = vrot.lane.b32.xlu0 %v13239_v0, %s7748_s17  ;;  %v12801_v0 = vunpack.i.h.bf16 %v11572_v54 }
 0x80f   : > { %v11728_v63 = vsel %vm2506_vm12, %v12794_v32, %v12793_v41  ;;  %v11741_v41 = vld [vmem:[#allocation5 + $0x48] sm:$0xff] }
 0x810   : > { %13241 = vst [vmem:[#allocation33_spill] sm:$0xff] %v11728_v63  ;;  %v11730_v57 = vpop.permute.xlu0 %7642  ;;  %13242 = vst [vmem:[#allocation26_spill] sm:$0xff] %v11741_v41  ;;  %v4720_v32 = vmul.f32 %v11741_v41, %v13240_v3  ;;  %v4748_v63 = vsel %vm2283_vm7, %v7539_v35, %v7540_v19  ;;  %v13244_v41 = vld [vmem:[#allocation22_spill] sm:$0xff]  ;;  %v13246_v35 = vld [vmem:[#allocation56_spill] sm:$0xff] }
 0x811   : > { %v12800_v29 = vunpack.i.l.bf16 %v11730_v57  ;;  %v5193_v34 = vsel %vm2166_vm13, %v13246_v35, %v10714_v11  ;;  %v13248_v11 = vld [vmem:[#allocation37_spill] sm:$0xff] }
 0x812   : > { %4790 = vrot.lane.b32.xlu0 %v4555_v7, %s7762_s19  ;;  %v7711_v52 = vpack.i.bf16 %v4720_v32, %v4719_v25  ;;  %v7730_v7 = vld [vmem:[#allocation3] sm:$0xff]  ;;  %v4457_v32 = vsel %vm2166_vm13, %v13244_v41, %v13200_v20  ;;  %v4461_v39 = vsel %vm2166_vm13, %v13231_v58, %v13248_v11  ;;  %v11804_v58 = vsel %vm2166_vm13, %v13253_v8, %v13252_v53 }
 0x813   : > { %v11751_v6 = vsel %vm2673_vm0, %v12801_v0, %v12800_v29  ;;  %v4473_v36 = vmul.f32 %v7730_v7, %v13244_v41 }
 0x814   : > { %13243 = vst [vmem:[#allocation15_spill] sm:$0xff] %v11751_v6  ;;  %v11753_v48 = vpop.permute.xlu0 %7647  ;;  %v13251_v6 = vld [vmem:[#allocation36_spill] sm:$0xff] }
 0x815   : > { %v12803_v3 = vunpack.i.l.bf16 %v11753_v48  ;;  %v5053_v29 = vpack.c.bf16 %v4748_v63, %v4473_v36 }
 0x816   : > { %7712 = vrot.lane.b32.xlu0 %v7711_v52, %s7760_s20  ;;  %v5195_v52 = vsel %vm2166_vm13, %v10678_v47, %v10726_v9  ;;  %v13249_v47 = vld [vmem:[#allocation48_spill] sm:$0xff] }
 0x817   : > { %v11768_v25 = vsel %vm2755_vm1, %v12804_v14, %v12803_v3  ;;  %v13247_v3 = vunpack.i.l.bf16 %v11536_v15  ;;  %v13250_v9 = vld [vmem:[#allocation28_spill] sm:$0xff] }
 0x818   : > { %13245 = vst [vmem:[#allocation53_spill] sm:$0xff] %v11768_v25  ;;  %v11779_v0 = vpop.permute.xlu0 %7652  ;;  %v4463_v36 = vsel %vm2166_vm13, %v13250_v9, %v13249_v47  ;;  %v7731_v25 = vld [vmem:[#allocation6 + $0x18] sm:$0xff] }
 0x819   : > { %v4749_v14 = vsel %vm2283_vm7, %v7540_v19, %v13247_v3  ;;  %v11787_v41 = vpop.permute.xlu1 %7662  ;;  %v4474_v19 = vmul.f32 %v4457_v32, %v13251_v6  ;;  %v5210_v3 = vmul.f32 %v11310_v27, %v5193_v34  ;;  %v5212_v20 = vmul.f32 %v7731_v25, %v5195_v52 }
 0x81a   : > { %v7665_v63 = vunpack.i.h.bf16 %v11787_v41  ;;  %6278 = vrot.lane.b32.xlu0 %v5053_v29, %s7757_s15  ;;  %v13254_v21 = vunpack.i.l.bf16 %v11779_v0  ;;  %v7574_v29 = vunpack.i.l.bf16 %v11512_v5  ;;  %v13256_v27 = vunpack.i.l.bf16 %v10747_v46 }
 0x81b   : > { %v5054_v25 = vpack.c.bf16 %v4749_v14, %v4474_v19  ;;  %v12814_v8 = vunpack.i.l.bf16 %v11787_v41  ;;  %v11828_v46 = vmul.f32 %v4461_v39, %v11233_v26  ;;  %v11831_v14 = vmul.f32 %v4463_v36, %v11283_v31 }
 0x81c   : > { %v11811_v40 = vsel %vm2628_vm14, %v13255_v51, %v13254_v21  ;;  %v5485_v34 = vsel %vm2283_vm7, %v7665_v63, %v13256_v27  ;;  %v11817_v6 = vpop.permute.xlu0 %7657  ;;  %v7389_v51 = vunpack.i.l.bf16 %v13167_v23  ;;  %v13257_v19 = vunpack.i.h.bf16 %v11669_v18 }
 0x81d   : > { %v12816_v32 = vunpack.i.h.bf16 %v11817_v6  ;;  %v12815_v52 = vunpack.i.l.bf16 %v11817_v6  ;;  %v5790_v21 = vpack.c.bf16 %v5485_v34, %v5210_v3  ;;  %v5071_v26 = vpack.c.bf16 %v7574_v29, %v7549_v17 }
 0x81e   : > { %6280 = vrot.lane.b32.xlu0 %v5054_v25, %s7757_s15  ;;  %v13258_v25 = vld [vmem:[#allocation57_spill] sm:$0xff]  ;;  %v5484_v53 = vsel %vm2283_vm7, %v7389_v51, %v7665_v63  ;;  %v13259_v36 = vunpack.i.h.bf16 %v11512_v5  ;;  %v13261_v5 = vunpack.i.l.bf16 %v11669_v18  ;;  %v13267_v18 = vunpack.i.l.bf16 %v11565_v43 }
 0x81f   : > { %v11838_v27 = vsel %vm2283_vm7, %v13257_v19, %v12815_v52  ;;  %v11845_v3 = vsel %vm2283_vm7, %v12816_v32, %v12814_v8  ;;  %5882 = vrot.lane.b32.xlu1 %v5790_v21, %s7757_s15  ;;  %v5792_v19 = vpack.c.bf16 %v13258_v25, %v5212_v20  ;;  %v5209_v8 = vmul.f32 %v7730_v7, %v13246_v35  ;;  %v13271_v25 = vld [vmem:[#allocation21_spill] sm:$0xff] }
 0x820   : > { %v11848_v39 = vpop.permute.xlu0 %5884  ;;  %v5089_v21 = vpack.c.bf16 %v11629_v56, %v11629_v56  ;;  %v4912_v32 = vsel %vm2628_vm14, %v7574_v29, %v13259_v36  ;;  %v13260_v20 = vunpack.i.h.bf16 %v11464_v16  ;;  %v4459_v56 = vsel %vm2166_vm13, %v13199_v13, %v13232_v1 }
 0x821   : > { %v5789_v34 = vpack.c.bf16 %v5484_v53, %v5209_v8  ;;  %v13262_v29 = vunpack.i.h.bf16 %v11536_v15  ;;  %v4476_v16 = vmul.f32 %v4459_v56, %v11153_v37  ;;  %v13264_v8 = vld [vmem:[#allocation58_spill] sm:$0xff]  ;;  %v13266_v13 = vunpack.i.h.bf16 %v11565_v43 }
 0x822   : > { %6314 = vrot.lane.b32.xlu0 %v5071_v26, %s7757_s15  ;;  %v4869_v63 = vsel %vm2166_vm13, %v7549_v17, %v13260_v20  ;;  %v13263_v17 = vld [vmem:[#allocation54_spill] sm:$0xff]  ;;  %v13268_v1 = vunpack.i.h.bf16 %v11543_v49  ;;  %v13269_v37 = vunpack.i.l.bf16 %v11543_v49  ;;  %v13273_v43 = vunpack.i.h.bf16 %v11572_v54 }
 0x823   : > { %5886 = vrot.lane.b32.xlu1 %v5792_v19, %s7757_s15  ;;  %v5072_v35 = vpack.c.bf16 %v4912_v32, %v4869_v63  ;;  %v4751_v53 = vsel %vm2283_vm7, %v13262_v29, %v13261_v5  ;;  %v13265_v51 = vpack.c.bf16 %v13263_v17, %v13264_v8  ;;  %v4838_v15 = vsel %vm2551_vm11, %v13267_v18, %v13266_v13  ;;  %v13277_v29 = vld [vmem:[#allocation31_spill] sm:$0xff] }
 0x824   : > { %v11861_v52 = vpop.permute.xlu0 %5888  ;;  %v5056_v26 = vpack.c.bf16 %v4751_v53, %v4476_v16  ;;  %v4794_v36 = vsel %vm2506_vm12, %v13269_v37, %v13268_v1  ;;  %v13274_v63 = vunpack.i.l.bf16 %v11572_v54  ;;  %v13275_v49 = vunpack.i.h.bf16 %v11499_v42  ;;  %v13278_v53 = vld [vmem:[#allocation14_spill] sm:$0xff]  ;;  %v13283_v13 = vld [vmem:[#allocation19_spill] sm:$0xff] }
 0x825   : > { %v5064_v20 = vpack.c.bf16 %v4838_v15, %v4794_v36  ;;  %v13276_v56 = vunpack.i.l.bf16 %v11499_v42  ;;  %v13279_v16 = vpack.c.bf16 %v13277_v29, %v13278_v53  ;;  %v13280_v54 = vunpack.i.h.bf16 %v11623_v50  ;;  %v13282_v42 = vld [vmem:[#allocation32_spill] sm:$0xff] }
 0x826   : > { %6350 = vrot.lane.b32.xlu0 %v5089_v21, %s7757_s15  ;;  %v13284_v18 = vpack.c.bf16 %v13282_v42, %v13283_v13  ;;  %v13285_v37 = vunpack.i.l.bf16 %v10772_v33  ;;  %v13286_v36 = vunpack.i.l.bf16 %v10871_v44  ;;  %v7640_v33 = vunpack.i.h.bf16 %v11695_v2 }
 0x827   : > { %5880 = vrot.lane.b32.xlu1 %v5789_v34, %s7757_s15  ;;  %v13270_v34 = vld [vmem:[#allocation20_spill] sm:$0xff]  ;;  %v4993_v5 = vsel %vm2710_vm15, %v13276_v56, %v13275_v49  ;;  %v13291_v56 = vunpack.i.l.bf16 %v11712_v60  ;;  %v7645_v29 = vunpack.i.h.bf16 %v11730_v57  ;;  %v13292_v53 = vunpack.i.l.bf16 %v11695_v2 }
 0x828   : > { %v11871_v7 = vpop.permute.xlu0 %5900  ;;  %v13272_v19 = vpack.c.bf16 %v13270_v34, %v13271_v25  ;;  %v5807_v34 = vpack.c.bf16 %v13286_v36, %v13285_v37  ;;  %v13287_v25 = vunpack.i.h.bf16 %v11644_v12  ;;  %v13296_v13 = vunpack.i.l.bf16 %v11730_v57 }
 0x829   : > { %v13297_v37 = vunpack.i.l.bf16 %v11667_v62 }
 0x82a   : > { %6316 = vrot.lane.b32.xlu0 %v5072_v35, %s7757_s15  ;;  %v4957_v35 = vsel %vm2673_vm0, %v13274_v63, %v13273_v43  ;;  %v13289_v43 = vunpack.i.h.bf16 %v11514_v4  ;;  %v13290_v63 = vunpack.i.l.bf16 %v11514_v4 }
 0x82b   : > { %5902 = vrot.lane.b32.xlu1 %v13265_v51, %s7757_s15  ;;  %v5082_v8 = vpack.c.bf16 %v4993_v5, %v4957_v35  ;;  %v13281_v51 = vunpack.i.l.bf16 %v11623_v50  ;;  %v13288_v50 = vunpack.i.l.bf16 %v11644_v12  ;;  %v7625_v12 = vunpack.i.h.bf16 %v11667_v62 }
 0x82c   : > { %v11887_v32 = vpop.permute.xlu0 %5904  ;;  %v4871_v35 = vsel %vm2166_vm13, %v13290_v63, %v13289_v43  ;;  %v5825_v43 = vpack.c.bf16 %v11434_v30, %v11434_v30  ;;  %v13301_v63 = vunpack.i.l.bf16 %v11753_v48 }
 0x82d   : > { %v4995_v36 = vsel %vm2710_vm15, %v13297_v37, %v7625_v12  ;;  %v7733_v37 = vld [vmem:[#allocation6 + $0x40] sm:$0xff] }
 0x82e   : > { %6284 = vrot.lane.b32.xlu0 %v5056_v26, %s7757_s15  ;;  %v5037_v26 = vsel %vm2755_vm1, %v13281_v51, %v13280_v54  ;;  %v13293_v54 = vld [vmem:[#allocation77_spill] sm:$0xff]  ;;  %v13294_v51 = vld [vmem:[#allocation78_spill] sm:$0xff] }
 0x82f   : > { %5906 = vrot.lane.b32.xlu1 %v13272_v19, %s7757_s15  ;;  %v5091_v1 = vpack.c.bf16 %v5037_v26, %v5037_v26  ;;  %v4914_v19 = vsel %vm2628_vm14, %v13288_v50, %v13287_v25  ;;  %v13295_v26 = vpack.c.bf16 %v13293_v54, %v13294_v51  ;;  %v13299_v25 = vld [vmem:[#allocation73_spill] sm:$0xff] }
 0x830   : > { %v11904_v21 = vpop.permute.xlu0 %5898  ;;  %v5074_v49 = vpack.c.bf16 %v4914_v19, %v4871_v35 }
 0x832   : > { %6300 = vrot.lane.b32.xlu0 %v5064_v20, %s7757_s15  ;;  %v7635_v20 = vunpack.i.h.bf16 %v11712_v60 }
 0x833   : > { %5918 = vrot.lane.b32.xlu1 %v13279_v16, %s7757_s15  ;;  %v4840_v16 = vsel %vm2551_vm11, %v13292_v53, %v7640_v33 }
 0x834   : > { %v11921_v17 = vpop.permute.xlu0 %5920  ;;  %v4796_v5 = vsel %vm2506_vm12, %v13291_v56, %v7635_v20  ;;  %v13303_v56 = vunpack.i.l.bf16 %v11817_v6 }
 0x835   : > { %v5066_v42 = vpack.c.bf16 %v4840_v16, %v4796_v5  ;;  %v13304_v5 = vld [vmem:[#allocation80_spill] sm:$0xff]  ;;  %v5198_v16 = vsel %vm2166_vm13, %v13168_v10, %v13176_v61  ;;  %v4481_v10 = vmul.f32 %v13249_v47, %v11291_v38  ;;  %v13310_v47 = vpack.c.bf16 %v11075_v45, %v11035_v55 }
 0x836   : > { %6336 = vrot.lane.b32.xlu0 %v5082_v8, %s7757_s15  ;;  %v5827_v53 = vpack.c.bf16 %v13304_v5, %v13304_v5  ;;  %v13323_v5 = vld [vmem:[#allocation9_spill] sm:$0xff] }
 0x837   : > { %5922 = vrot.lane.b32.xlu1 %v13284_v18, %s7757_s15  ;;  %v4959_v18 = vsel %vm2673_vm0, %v13296_v13, %v7645_v29  ;;  %v13307_v13 = vunpack.i.h.bf16 %v13167_v23  ;;  %v13309_v23 = vunpack.i.h.bf16 %v13174_v22 }
 0x838   : > { %v11933_v15 = vpop.permute.xlu0 %5924  ;;  %v5084_v19 = vpack.c.bf16 %v4995_v36, %v4959_v18  ;;  %v5217_v36 = vmul.f32 %v7733_v37, %v13175_v59  ;;  %v13312_v59 = vld [vmem:[#allocation43_spill] sm:$0xff]  ;;  %v13330_v37 = vld [vmem:[#allocation26_spill] sm:$0xff] }
 0x83a   : > { %6354 = vrot.lane.b32.xlu0 %v5091_v1, %s7757_s15  ;;  %v7650_v1 = vunpack.i.h.bf16 %v11753_v48 }
 0x83b   : > { %5916 = vrot.lane.b32.xlu1 %v5807_v34, %s7757_s15  ;;  %v13298_v34 = vld [vmem:[#allocation24_spill] sm:$0xff] }
 0x83c   : > { %v11953_v44 = vpop.permute.xlu0 %7667  ;;  %v13300_v50 = vpack.c.bf16 %v13298_v34, %v13299_v25  ;;  %v5039_v35 = vsel %vm2755_vm1, %v13301_v63, %v7650_v1  ;;  %v5797_v25 = vpack.c.bf16 %v13309_v23, %v5217_v36  ;;  %v13315_v63 = vld [vmem:[#allocation50_spill] sm:$0xff]  ;;  %v7676_v36 = vpack.i.bf16 %v13330_v37, %v11291_v38  ;;  %v13331_v23 = vld [vmem:[#allocation69_spill] sm:$0xff] }
 0x83d   : > { %v7669_v4 = vunpack.i.l.bf16 %v11953_v44  ;;  %v5093_v62 = vpack.c.bf16 %v5039_v35, %v5039_v35  ;;  %v13316_v35 = vld [vmem:[#allocation10_spill] sm:$0xff] }
 0x83e   : > { %6320 = vrot.lane.b32.xlu0 %v5074_v49, %s7757_s15  ;;  %v4462_v49 = vsel %vm2166_vm13, %v13248_v11, %v13250_v9  ;;  %v7732_v9 = vld [vmem:[#allocation6 + $0x30] sm:$0xff] }
 0x83f   : > { %v11972_v8 = vsel %vm2710_vm15, %v7625_v12, %v7669_v4  ;;  %5938 = vrot.lane.b32.xlu1 %v13295_v26, %s7757_s15  ;;  %v13302_v12 = vunpack.i.h.bf16 %v11817_v6  ;;  %v4479_v54 = vmul.f32 %v4462_v49, %v11238_v24  ;;  %v5215_v51 = vmul.f32 %v7732_v9, %v5198_v16  ;;  %v13305_v26 = vld [vmem:[#allocation81_spill] sm:$0xff] }
 0x840   : > { %v5829_v6 = vpack.c.bf16 %v13305_v26, %v13305_v26  ;;  %v13308_v24 = vunpack.i.l.bf16 %v11787_v41  ;;  %v13311_v41 = vld [vmem:[#allocation85_spill] sm:$0xff] }
 0x841   : > { %v4754_v30 = vsel %vm2283_vm7, %v13303_v56, %v13302_v12  ;;  %v13318_v12 = vld [vmem:[#allocation39_spill] sm:$0xff]  ;;  %v13321_v56 = vld [vmem:[#allocation45_spill] sm:$0xff] }
 0x842   : > { %6304 = vrot.lane.b32.xlu0 %v5066_v42, %s7757_s15  ;;  %v5059_v11 = vpack.c.bf16 %v4754_v30, %v4479_v54  ;;  %v13306_v42 = vunpack.i.l.bf16 %v13174_v22  ;;  %v5061_v61 = vpack.c.bf16 %v13308_v24, %v4481_v10  ;;  %v7564_v22 = vunpack.i.l.bf16 %v13315_v63 }
 0x843   : > { %5942 = vrot.lane.b32.xlu1 %v13300_v50, %s7757_s15  ;;  %v5806_v50 = vpack.c.bf16 %v13311_v41, %v13190_v28  ;;  %v13319_v55 = vunpack.i.h.bf16 %v13318_v12  ;;  %v13320_v28 = vld [vmem:[#allocation60_spill] sm:$0xff] }
 0x844   : > { %v5490_v18 = vsel %vm2283_vm7, %v13307_v13, %v13306_v42  ;;  %v13322_v30 = vpack.c.bf16 %v13320_v28, %v13321_v56  ;;  %v13340_v28 = vld [vmem:[#allocation70_spill] sm:$0xff]  ;;  %v13341_v56 = vld [vmem:[#allocation51_spill] sm:$0xff] }
 0x845   : > { %v5795_v34 = vpack.c.bf16 %v5490_v18, %v5215_v51  ;;  %v5699_v45 = vsel %vm2673_vm0, %v13319_v55, %v7564_v22  ;;  %v13326_v51 = vld [vmem:[#allocation62_spill] sm:$0xff]  ;;  %v12069_v18 = vpop.permute.xlu0 %5936  ;;  %v13338_v22 = vld [vmem:[#allocation55_spill] sm:$0xff] }
 0x846   : > { %6340 = vrot.lane.b32.xlu0 %v5084_v19, %s7757_s15  ;;  %v13313_v19 = vld [vmem:[#allocation42_spill] sm:$0xff]  ;;  %v5831_v26 = vpack.c.bf16 %v13326_v51, %v13326_v51 }
 0x847   : > { %5952 = vrot.lane.b32.xlu1 %v5825_v43, %s7757_s15  ;;  %v13314_v43 = vpack.c.bf16 %v13312_v59, %v13313_v19  ;;  %v13335_v59 = vld [vmem:[#allocation25_spill] sm:$0xff] }
 0x849   : > { %v12072_v24 = vpop.permute.xlu0 %5940 }
 0x84a   : > { %6358 = vrot.lane.b32.xlu0 %v5093_v62, %s7757_s15  ;;  %v13317_v62 = vld [vmem:[#allocation40_spill] sm:$0xff] }
 0x84b   : > { %5956 = vrot.lane.b32.xlu1 %v5827_v53, %s7757_s15  ;;  %v7544_v49 = vunpack.i.l.bf16 %v13317_v62  ;;  %v13324_v53 = vunpack.i.h.bf16 %v13323_v5 }
 0x84d   : > { %v5735_v16 = vsel %vm2710_vm15, %v13324_v53, %v7544_v49 }
 0x84e   : > { %6290 = vrot.lane.b32.xlu0 %v5059_v11, %s7757_s15  ;;  %v5824_v54 = vpack.c.bf16 %v5735_v16, %v5699_v45  ;;  %v13325_v11 = vld [vmem:[#allocation59_spill] sm:$0xff]  ;;  %v4679_v45 = vmul.f32 %v13330_v37, %v13338_v22  ;;  %v13343_v16 = vld [vmem:[#allocation44_spill] sm:$0xff] }
 0x84f   : > { %5960 = vrot.lane.b32.xlu1 %v5829_v6, %s7757_s15  ;;  %v7569_v9 = vunpack.i.l.bf16 %v13325_v11  ;;  %v13327_v6 = vld [vmem:[#allocation11_spill] sm:$0xff] }
 0x850   : > { %v13328_v42 = vunpack.i.h.bf16 %v13327_v6  ;;  %v13346_v6 = vunpack.i.h.bf16 %v13317_v62 }
 0x852   : > { %6294 = vrot.lane.b32.xlu0 %v5061_v61, %s7757_s15  ;;  %v5779_v13 = vsel %vm2755_vm1, %v13328_v42, %v7569_v9  ;;  %v13329_v61 = vpack.i.bf16 %v11291_v38, %v11283_v31  ;;  %v13337_v31 = vld [vmem:[#allocation12_spill] sm:$0xff] }
 0x853   : > { %5892 = vrot.lane.b32.xlu1 %v5795_v34, %s7757_s15  ;;  %v5833_v10 = vpack.c.bf16 %v5779_v13, %v5779_v13  ;;  %v12081_v34 = vpop.permute.xlu0 %5934 }
 0x857   : > { %5896 = vrot.lane.b32.xlu1 %v5797_v25, %s7757_s15  ;;  %v13332_v25 = vld [vmem:[#allocation63_spill] sm:$0xff]  ;;  %v12087_v41 = vpop.permute.xlu0 %5954 }
 0x85b   : > { %5910 = vrot.lane.b32.xlu1 %v13310_v47, %s7757_s15  ;;  %v13333_v47 = vpack.i.bf16 %v13331_v23, %v13332_v25  ;;  %v12099_v12 = vpop.permute.xlu0 %5958 }
 0x85f   : > { %5914 = vrot.lane.b32.xlu1 %v5806_v50, %s7757_s15  ;;  %v13334_v50 = vld [vmem:[#allocation65_spill] sm:$0xff]  ;;  %v12111_v9 = vpop.permute.xlu0 %5890 }
 0x860   : > { %v13336_v19 = vpack.i.bf16 %v13334_v50, %v13335_v59 }
 0x863   : > { %5928 = vrot.lane.b32.xlu1 %v13314_v43, %s7757_s15  ;;  %v4596_v43 = vmul.f32 %v13337_v31, %v11291_v38  ;;  %v12130_v62 = vpop.permute.xlu0 %5894 }
 0x867   : > { %5932 = vrot.lane.b32.xlu1 %v13316_v35, %s7757_s15  ;;  %v13339_v35 = vld [vmem:[#allocation68_spill] sm:$0xff]  ;;  %v12139_v31 = vpop.permute.xlu0 %5908 }
 0x868   : > { %v4661_v49 = vsel %vm2368_vm8, %v13339_v35, %v13338_v22  ;;  %v13350_v22 = vld [vmem:[#allocation74_spill] sm:$0xff] }
 0x869   : > { %v4678_v55 = vmul.f32 %v4661_v49, %v11291_v38  ;;  %v13344_v38 = vld [vmem:[#allocation8_spill] sm:$0xff] }
 0x86a   : > { %v7559_v51 = vunpack.i.l.bf16 %v13344_v38  ;;  %v13348_v23 = vunpack.i.h.bf16 %v13344_v38 }
 0x86b   : > { %5946 = vrot.lane.b32.xlu1 %v13322_v30, %s7757_s15  ;;  %v13342_v30 = vpack.i.bf16 %v13340_v28, %v13341_v56  ;;  %v7706_v53 = vpack.i.bf16 %v4679_v45, %v4678_v55  ;;  %v13352_v45 = vld [vmem:[#allocation41_spill] sm:$0xff]  ;;  %v13353_v28 = vld [vmem:[#allocation46_spill] sm:$0xff] }
 0x86c   : > { %v13354_v56 = vpack.c.bf16 %v13352_v45, %v13353_v28 }
 0x86f   : > { %5950 = vrot.lane.b32.xlu1 %v5824_v54, %s7757_s15  ;;  %v7554_v54 = vunpack.i.l.bf16 %v13343_v16 }
 0x873   : > { %5964 = vrot.lane.b32.xlu1 %v5831_v26, %s7757_s15  ;;  %v13345_v26 = vunpack.i.h.bf16 %v13315_v63  ;;  %v4836_v63 = vsel %vm2551_vm11, %v7559_v51, %v13348_v23  ;;  %v13356_v51 = vld [vmem:[#allocation67_spill] sm:$0xff] }
 0x875   : > { %v5080_v42 = vpack.c.bf16 %v13346_v6, %v13345_v26  ;;  %v13357_v26 = vld [vmem:[#allocation27_spill] sm:$0xff] }
 0x876   : > { %v13358_v6 = vpack.c.bf16 %v13356_v51, %v13357_v26 }
 0x877   : > { %5968 = vrot.lane.b32.xlu1 %v5833_v10, %s7757_s15  ;;  %v13347_v10 = vunpack.i.h.bf16 %v13343_v16 }
 0x87b   : > { %7672 = vrot.lane.b32.xlu1 %v13329_v61, %s7752_s25  ;;  %v4792_v61 = vsel %vm2506_vm12, %v7554_v54, %v13347_v10  ;;  %v13359_v10 = vld [vmem:[#allocation61_spill] sm:$0xff] }
 0x87f   : > { %7677 = vrot.lane.b32.xlu1 %v7676_v36, %s7759_s18 }
 0x883   : > { %7682 = vrot.lane.b32.xlu1 %v13333_v47, %s7762_s19  ;;  %v5062_v47 = vpack.c.bf16 %v4836_v63, %v4792_v61  ;;  %v13360_v61 = vld [vmem:[#allocation64_spill] sm:$0xff]  ;;  %v5994_v63 = vsel %vm436_vm2, %v12081_v34, %v12069_v18  ;;  %v13366_v34 = vld [vmem:[#allocation15_spill] sm:$0xff] }
 0x887   : > { %7697 = vrot.lane.b32.xlu1 %v13336_v19, %s7760_s20  ;;  %v5978_v19 = vsel %vm436_vm2, %v11904_v21, %v11871_v7  ;;  %v12156_v21 = vpop.permute.xlu0 %5912 }
 0x88b   : > { %4834 = vrot.lane.b32.xlu1 %v4596_v43, %s7747_s16  ;;  %v13349_v43 = vld [vmem:[#allocation71_spill] sm:$0xff]  ;;  %v12167_v38 = vpop.permute.xlu0 %5926 }
 0x88c   : > { %v13351_v35 = vpack.c.bf16 %v13349_v43, %v13350_v22 }
 0x88f   : > { %7702 = vrot.lane.b32.xlu1 %v13342_v30, %s7758_s13  ;;  %s6811_s13 = sshll.u32 %s13381_s22, 6 }
 0x890   : > { %s12493_s19 = scalar_lea.vmem %s12518_s12, %s6811_s13 }
 0x891   : > { %v5883_v5 = vpop.permute.xlu1 %5882 }
 0x892   : > { %v5971_v11 = vsel %vm436_vm2, %v5883_v5, %v11848_v39 }
 0x893   : > { %6069 = vmatprep.subr.bf16.mxu0 %v5971_v11  ;;  %7707 = vrot.lane.b32.xlu1 %v7706_v53, %s7748_s17 }
 0x895   : > { %v5887_v13 = vpop.permute.xlu1 %5886 }
 0x896   : > { %v5973_v37 = vsel %vm436_vm2, %v5887_v13, %v11861_v52  ;;  %v5972_v36 = vsel %vm436_vm2, %v11848_v39, %v5887_v13 }
 0x897   : > { %6332 = vrot.lane.b32.xlu1 %v5080_v42, %s7757_s15  ;;  %6110 = vmatprep.subr.bf16.mxu1 %v5973_v37  ;;  %v13361_v37 = vpack.c.bf16 %v13359_v10, %v13360_v61  ;;  %v5974_v10 = vsel %vm436_vm2, %v11861_v52, %v12111_v9 }
 0x898   : > { %6111 = vmatpush1.bf16.msra.mxu1 %v5972_v36 }
 0x899   : > { %v5881_v25 = vpop.permute.xlu1 %5880 }
 0x89a   : > { %v5970_v50 = vsel %vm436_vm2, %v5881_v25, %v5883_v5  ;;  %v13355_v5 = vld [vmem:[#allocation7_spill] sm:$0xff] }
 0x89b   : > { %6296 = vrot.lane.b32.xlu1 %v5062_v47, %s7757_s15  ;;  %6070 = vmatpush1.bf16.msra.mxu0 %v5970_v50  ;;  %v5090_v53 = vpack.c.bf16 %v13355_v5, %v13355_v5  ;;  %v13362_v25 = vld [vmem:[#allocation23_spill] sm:$0xff]  ;;  %v13363_v47 = vld [vmem:[#allocation33_spill] sm:$0xff] }
 0x89c   : > { %v13364_v50 = vpack.c.bf16 %v13362_v25, %v13363_v47  ;;  %v13369_v5 = vld [vmem:[#allocation75_spill] sm:$0xff] }
 0x89d   : > { %v5903_v59 = vpop.permute.xlu1 %5902 }
 0x89e   : > { %v5979_v39 = vsel %vm436_vm2, %v11871_v7, %v5903_v59  ;;  %v5980_v7 = vsel %vm436_vm2, %v5903_v59, %v11887_v32 }
 0x89f   : > { %6298 = vrot.lane.b32.xlu1 %v13351_v35, %s7757_s15  ;;  %6071 = vmatprep.subr.bf16.mxu0 %v5979_v39 }
 0x8a0   : > { %6072 = vmatpush1.bf16.msra.mxu0 %v5978_v19 }
 0x8a1   : > { %v12145_v49 = vpop.permute.xlu1 %5906 }
 0x8a2   : > { %v5981_v55 = vsel %vm436_vm2, %v11887_v32, %v12145_v49 }
 0x8a3   : > { %6334 = vrot.lane.b32.xlu1 %v13354_v56, %s7757_s15  ;;  %6112 = vmatprep.subr.bf16.mxu1 %v5981_v55  ;;  %v13368_v55 = vld [vmem:[#allocation53_spill] sm:$0xff] }
 0x8a4   : > { %6113 = vmatpush1.bf16.msra.mxu1 %v5980_v7  ;;  %v5092_v45 = vpack.c.bf16 %v13368_v55, %v13368_v55 }
 0x8a5   : > { %v5919_v30 = vpop.permute.xlu1 %5918 }
 0x8a6   : > { %v5987_v16 = vsel %vm436_vm2, %v5919_v30, %v11921_v17 }
 0x8a7   : > { %6352 = vrot.lane.b32.xlu1 %v5090_v53, %s7757_s15  ;;  %6073 = vmatprep.subr.bf16.mxu0 %v5987_v16  ;;  %v13370_v53 = vld [vmem:[#allocation66_spill] sm:$0xff] }
 0x8a8   : > { %v13371_v16 = vpack.c.bf16 %v13369_v5, %v13370_v53 }
 0x8a9   : > { %v5923_v54 = vpop.permute.xlu1 %5922 }
 0x8aa   : > { %v5988_v11 = vsel %vm436_vm2, %v11921_v17, %v5923_v54  ;;  %v5989_v32 = vsel %vm436_vm2, %v5923_v54, %v11933_v15  ;;  %v12178_v17 = vpop.permute.xlu0 %5930 }
 0x8ab   : > { %6282 = vrot.lane.b32.xlu1 %v13358_v6, %s7757_s15  ;;  %6114 = vmatprep.subr.bf16.mxu1 %v5989_v32  ;;  %v12222_v32 = vld [vmem:[%s12515_s9] sm:$0xf]  ;;  %v13372_v6 = vpack.c.bf16 %v11838_v27, %v11828_v46  ;;  %v13374_v46 = vpack.c.bf16 %v11811_v40, %v11804_v58 }
 0x8ac   : > { %6115 = vmatpush1.bf16.msra.mxu1 %v5988_v11 }
 0x8ad   : > { %v5917_v42 = vpop.permute.xlu1 %5916 }
 0x8ae   : > { %v5986_v13 = vsel %vm436_vm2, %v5917_v42, %v5919_v30  ;;  %v12194_v19 = vpop.permute.xlu0 %5944 }
 0x8af   : > { %6318 = vrot.lane.b32.xlu1 %v13361_v37, %s7757_s15  ;;  %6074 = vmatpush1.bf16.msra.mxu0 %v5986_v13  ;;  %v13373_v13 = vmov 0  }
 0x8b1   : > { %v5939_v36 = vpop.permute.xlu1 %5938 }
 0x8b2   : > { %v5995_v23 = vsel %vm436_vm2, %v12069_v18, %v5939_v36  ;;  %v5996_v43 = vsel %vm436_vm2, %v5939_v36, %v12072_v24  ;;  %v13365_v18 = vld [vmem:[#allocation16_spill] sm:$0xff]  ;;  %v12207_v56 = vpop.permute.xlu0 %5948  ;;  %v5982_v36 = vsel %vm436_vm2, %v12145_v49, %v12139_v31 }
 0x8b3   : > { %6302 = vrot.lane.b32.xlu1 %v13364_v50, %s7757_s15  ;;  %6075 = vmatprep.subr.bf16.mxu0 %v5995_v23  ;;  %v13367_v22 = vpack.c.bf16 %v13365_v18, %v13366_v34 }
 0x8b4   : > { %6076 = vmatpush1.bf16.msra.mxu0 %v5994_v63 }
 0x8b5   : > { %v12189_v59 = vpop.permute.xlu1 %5942 }
 0x8b6   : > { %v5997_v39 = vsel %vm436_vm2, %v12072_v24, %v12189_v59  ;;  %v5963_v51 = vpop.permute.xlu0 %5962 }
 0x8b7   : > { %6338 = vrot.lane.b32.xlu1 %v13367_v22, %s7757_s15  ;;  %6116 = vmatprep.subr.bf16.mxu1 %v5997_v39 }
 0x8b8   : > { %6117 = vmatpush1.bf16.msra.mxu1 %v5996_v43 }
 0x8b9   : > { %v5953_v35 = vpop.permute.xlu1 %5952 }
 0x8ba   : > { %v6002_v28 = vsel %vm436_vm2, %v5953_v35, %v12087_v41  ;;  %v5967_v27 = vpop.permute.xlu0 %5966 }
 0x8bb   : > { %6356 = vrot.lane.b32.xlu1 %v5092_v45, %s7757_s15  ;;  %v6046_v30 = vsel %vm3037_vm3, %v6002_v28, 0 }
 0x8bd   : > { %v5957_v7 = vpop.permute.xlu1 %5956 }
 0x8be   : > { %v6003_v24 = vsel %vm436_vm2, %v12087_v41, %v5957_v7  ;;  %v6004_v54 = vsel %vm436_vm2, %v5957_v7, %v12099_v12  ;;  %v12253_v58 = vpop.permute.xlu0 %7687 }
 0x8bf   : > { %6286 = vrot.lane.b32.xlu1 %v13371_v16, %s7757_s15  ;;  %6791 = vmatprep.subr.msk.bf16.mxu0 %vm3037_vm3, %v6003_v24  ;;  %v6052_v26 = vsel %vm3037_vm3, %v6004_v54, 0 }
 0x8c0   : > { %6078 = vmatpush1.bf16.msra.mxu0 %v6046_v30 }
 0x8c1   : > { %v5961_v11 = vpop.permute.xlu1 %5960 }
 0x8c2   : > { %v6005_v41 = vsel %vm436_vm2, %v12099_v12, %v5961_v11  ;;  %v12262_v25 = vpop.permute.xlu0 %7692  ;;  %v6006_v55 = vsel %vm436_vm2, %v5961_v11, %v5963_v51  ;;  %v7690_v11 = vunpack.i.h.bf16 %v12253_v58 }
 0x8c3   : > { %6288 = vrot.lane.b32.xlu1 %v13372_v6, %s7757_s15  ;;  %6793 = vmatprep.subr.msk.bf16.mxu1 %vm3037_vm3, %v6005_v41  ;;  %v7689_v41 = vunpack.i.l.bf16 %v12253_v58  ;;  %v13376_v58 = vunpack.i.l.bf16 %v11779_v0 }
 0x8c4   : > { %6119 = vmatpush1.bf16.msra.mxu1 %v6052_v26  ;;  %6792 = vmatmul.mubr.msk.bf16.vlgmr.msra.gmra.mrb[32].mxu0 %vm3033_vm4, %v12222_v32  ;;  %v7655_v26 = vunpack.i.h.bf16 %v11779_v0 }
 0x8c5   : > { %v5893_v42 = vpop.permute.xlu1 %5892  ;;  %6183 = vmatprep.mubr.bf16.mxu0 %v13373_v13 }
 0x8c6   : > { %v5975_v12 = vsel %vm436_vm2, %v12111_v9, %v5893_v42  ;;  %v5976_v52 = vsel %vm436_vm2, %v5893_v42, %v12130_v62  ;;  %v12271_v43 = vpop.permute.xlu0 %4790  ;;  %v4916_v2 = vsel %vm2628_vm14, %v13376_v58, %v7655_v26 }
 0x8c7   : > { %6322 = vrot.lane.b32.xlu1 %v13374_v46, %s7757_s15  ;;  %6151 = vmatprep.subr.bf16.mxu0 %v5975_v12  ;;  %v13375_v12 = vld [vmem:[#allocation72_spill] sm:$0xff]  ;;  %v4842_v46 = vsel %vm2551_vm11, %v7689_v41, %v7690_v11 }
 0x8c8   : > { %6152 = vmatpush1.bf16.msra.mxu0 %v5974_v10  ;;  %6794 = vmatmul.mubr.msk.bf16.vlgmr.msra.gmra.mrb[32].mxu1 %vm3033_vm4, %v12222_v32  ;;  %v7630_v10 = vunpack.i.h.bf16 %v13375_v12  ;;  %v13377_v60 = vunpack.i.l.bf16 %v13375_v12 }
 0x8c9   : > { %v5897_v61 = vpop.permute.xlu1 %5896  ;;  %6224 = vmatprep.mubr.bf16.mxu1 %v13373_v13 }
 0x8ca   : > { %v5977_v37 = vsel %vm436_vm2, %v12130_v62, %v5897_v61 }
 0x8cb   : > { %6192 = vmatprep.subr.bf16.mxu1 %v5977_v37 }
 0x8cc   : > { %6193 = vmatpush1.bf16.msra.mxu1 %v5976_v52 }
 0x8cd   : > { %v5911_v9 = vpop.permute.xlu1 %5910 }
 0x8ce   : > { %v5983_v40 = vsel %vm436_vm2, %v12139_v31, %v5911_v9  ;;  %v5984_v62 = vsel %vm436_vm2, %v5911_v9, %v12156_v21  ;;  %v5990_v31 = vsel %vm436_vm2, %v11933_v15, %v12167_v38  ;;  %v5998_v15 = vsel %vm436_vm2, %v12189_v59, %v12194_v19 }
 0x8cf   : > { %6153 = vmatprep.subr.bf16.mxu0 %v5983_v40  ;;  %v6058_v59 = vsel %vm3037_vm3, %v6006_v55, 0 }
 0x8d0   : > { %6154 = vmatpush1.bf16.msra.mxu0 %v5982_v36 }
 0x8d1   : > { %v5915_v23 = vpop.permute.xlu1 %5914 }
 0x8d2   : > { %v5985_v63 = vsel %vm436_vm2, %v12156_v21, %v5915_v23 }
 0x8d3   : > { %6194 = vmatprep.subr.bf16.mxu1 %v5985_v63 }
 0x8d4   : > { %6195 = vmatpush1.bf16.msra.mxu1 %v5984_v62 }
 0x8d5   : > { %v5929_v47 = vpop.permute.xlu1 %5928 }
 0x8d6   : > { %v5991_v50 = vsel %vm436_vm2, %v12167_v38, %v5929_v47  ;;  %v5992_v21 = vsel %vm436_vm2, %v5929_v47, %v12178_v17  ;;  %v12280_v38 = vpop.permute.xlu0 %7712 }
 0x8d7   : > { %6155 = vmatprep.subr.bf16.mxu0 %v5991_v50 }
 0x8d8   : > { %6156 = vmatpush1.bf16.msra.mxu0 %v5990_v31 }
 0x8d9   : > { %v5933_v49 = vpop.permute.xlu1 %5932 }
 0x8da   : > { %v5993_v39 = vsel %vm436_vm2, %v12178_v17, %v5933_v49  ;;  %v12288_v7 = vpop.permute.xlu0 %6278 }
 0x8db   : > { %6196 = vmatprep.subr.bf16.mxu1 %v5993_v39  ;;  %v7695_v39 = vunpack.i.h.bf16 %v12262_v25 }
 0x8dc   : > { %6197 = vmatpush1.bf16.msra.mxu1 %v5992_v21  ;;  %v7670_v21 = vunpack.i.h.bf16 %v11953_v44 }
 0x8dd   : > { %v5947_v18 = vpop.permute.xlu1 %5946 }
 0x8de   : > { %v5999_v34 = vsel %vm436_vm2, %v12194_v19, %v5947_v18  ;;  %v6000_v17 = vsel %vm436_vm2, %v5947_v18, %v12207_v56  ;;  %v12299_v5 = vpop.permute.xlu0 %6280 }
 0x8df   : > { %6157 = vmatprep.subr.bf16.mxu0 %v5999_v34 }
 0x8e0   : > { %6158 = vmatpush1.bf16.msra.mxu0 %v5998_v15 }
 0x8e1   : > { %v5951_v22 = vpop.permute.xlu1 %5950 }
 0x8e2   : > { %v6001_v35 = vsel %vm436_vm2, %v12207_v56, %v5951_v22  ;;  %v12308_v54 = vpop.permute.xlu0 %6314 }
 0x8e3   : > { %6198 = vmatprep.subr.bf16.mxu1 %v6001_v35 }
 0x8e4   : > { %6199 = vmatpush1.bf16.msra.mxu1 %v6000_v17 }
 0x8e5   : > { %v5965_v45 = vpop.permute.xlu1 %5964 }
 0x8e6   : > { %v6007_v28 = vsel %vm436_vm2, %v5963_v51, %v5965_v45  ;;  %v6008_v19 = vsel %vm436_vm2, %v5965_v45, %v5967_v27  ;;  %v12322_v37 = vpop.permute.xlu0 %6350 }
 0x8e7   : > { %6795 = vmatprep.subr.msk.bf16.mxu0 %vm3037_vm3, %v6007_v28  ;;  %v6064_v56 = vsel %vm3037_vm3, %v6008_v19, 0 }
 0x8e8   : > { %6160 = vmatpush1.bf16.msra.mxu0 %v6058_v59 }
 0x8e9   : > { %v5969_v24 = vpop.permute.xlu1 %5968 }
 0x8ea   : > { %v6009_v30 = vsel %vm436_vm2, %v5967_v27, %v5969_v24  ;;  %v12340_v47 = vpop.permute.xlu0 %6316  ;;  %v13378_v24 = vpack.c.bf16 %v11845_v3, %v11831_v14 }
 0x8eb   : > { %6797 = vmatprep.subr.msk.bf16.mxu1 %vm3037_vm3, %v6009_v30  ;;  %6796 = vmatmul.mubr.msk.bf16.vlgmr.msra.gmra.mrb[36].mxu0 %vm3033_vm4, %v12222_v32 }
 0x8ec   : > { %6201 = vmatpush1.bf16.msra.mxu1 %v6064_v56  ;;  %6499 = vmatprep.mubr.bf16.mxu0 %v13373_v13 }
 0x8ed   : > { %v12301_v53 = vpop.permute.xlu1 %7672 }
 0x8ee   : > { %v7674_v50 = vunpack.i.l.bf16 %v12301_v53  ;;  %v12354_v15 = vpop.permute.xlu0 %6284  ;;  %v7675_v44 = vunpack.i.h.bf16 %v12301_v53 }
 0x8ef   : > { %6798 = vmatmul.mubr.msk.bf16.vlgmr.msra.gmra.mrb[36].mxu1 %vm3033_vm4, %v12222_v32  ;;  %v4841_v32 = vsel %vm2551_vm11, %v7640_v33, %v7689_v41  ;;  %v7694_v33 = vunpack.i.l.bf16 %v12262_v25 }
 0x8f0   : > { %6540 = vmatprep.mubr.bf16.mxu1 %v13373_v13  ;;  %v4874_v18 = vsel %vm2166_vm13, %v7630_v10, %v7674_v50  ;;  %v4875_v14 = vsel %vm2166_vm13, %v7674_v50, %v7675_v44 }
 0x8f1   : > { %v12306_v16 = vpop.permute.xlu1 %7677  ;;  %v4960_v63 = vsel %vm2673_vm0, %v7645_v29, %v7694_v33  ;;  %v4961_v25 = vsel %vm2673_vm0, %v7694_v33, %v7695_v39 }
 0x8f2   : > { %v5085_v31 = vpack.c.bf16 %v11972_v8, %v4960_v63  ;;  %v12367_v19 = vpop.permute.xlu0 %6300  ;;  %v7680_v3 = vunpack.i.h.bf16 %v12306_v16  ;;  %v6631_v63 = vld [vmem:[%s12517_s11] sm:$0xff] }
 0x8f5   : > { %v7683_v51 = vpop.permute.xlu1 %7682 }
 0x8f6   : > { %v7685_v6 = vunpack.i.h.bf16 %v7683_v51  ;;  %v7684_v42 = vunpack.i.l.bf16 %v7683_v51  ;;  %v13379_v51 = vld [vmem:[#allocation76_spill] sm:$0xff]  ;;  %v12385_v53 = vpop.permute.xlu0 %6336 }
 0x8f8   : > { %v4797_v27 = vsel %vm2506_vm12, %v7635_v20, %v7684_v42  ;;  %v4798_v61 = vsel %vm2506_vm12, %v7684_v42, %v7685_v6  ;;  %v4873_v20 = vsel %vm2166_vm13, %v13377_v60, %v7630_v10 }
 0x8f9   : > { %v5067_v52 = vpack.c.bf16 %v4841_v32, %v4797_v27  ;;  %v5068_v9 = vpack.c.bf16 %v4842_v46, %v4798_v61  ;;  %v12324_v40 = vpop.permute.xlu1 %7697  ;;  %v5076_v23 = vpack.c.bf16 %v4916_v2, %v4873_v20  ;;  %v7715_v46 = vunpack.i.h.bf16 %v12280_v38 }
 0x8fa   : > { %v7699_v0 = vunpack.i.l.bf16 %v12324_v40  ;;  %v7700_v48 = vunpack.i.h.bf16 %v12324_v40  ;;  %v7714_v27 = vunpack.i.l.bf16 %v12280_v38  ;;  %v12397_v38 = vpop.permute.xlu0 %6354 }
 0x8fb   : > { %6308 = vrot.lane.b32.xlu0 %v5068_v9, %s7757_s15  ;;  %6306 = vrot.lane.b32.xlu1 %v5067_v52, %s7757_s15 }
 0x8fc   : > { %v5040_v57 = vsel %vm2755_vm1, %v7650_v1, %v7699_v0  ;;  %v4997_v1 = vsel %vm2710_vm15, %v7669_v4, %v7670_v21  ;;  %v5041_v45 = vsel %vm2755_vm1, %v7699_v0, %v7700_v48  ;;  %v4799_v4 = vsel %vm2506_vm12, %v7685_v6, %v12271_v43 }
 0x8fd   : > { %v4835_v36 = vpop.permute.xlu1 %4834  ;;  %v5094_v22 = vpack.c.bf16 %v5040_v57, %v5040_v57  ;;  %v5086_v17 = vpack.c.bf16 %v4997_v1, %v4961_v25  ;;  %v5095_v30 = vpack.c.bf16 %v5041_v45, %v5041_v45  ;;  %v5043_v33 = vsel %vm2755_vm1, %v7714_v27, %v7715_v46  ;;  %v12434_v1 = vld [vmem:[%s12516_s10] sm:$0xf] }
 0x8fe   : > { %v5070_v62 = vpack.c.bf16 %v4835_v36, %v12271_v43  ;;  %v4843_v28 = vsel %vm2551_vm11, %v7690_v11, %v4835_v36  ;;  %v7679_v43 = vunpack.i.l.bf16 %v12306_v16  ;;  %v5042_v60 = vsel %vm2755_vm1, %v7700_v48, %v7714_v27  ;;  %v6321_v0 = vpop.permute.xlu0 %6320 }
 0x8ff   : > { %6324 = vrot.lane.b32.xlu1 %v5076_v23, %s7757_s15  ;;  %v5069_v56 = vpack.c.bf16 %v4843_v28, %v4799_v4  ;;  %v5097_v20 = vpack.c.bf16 %v5043_v33, %v5043_v33  ;;  %v5096_v36 = vpack.c.bf16 %v5042_v60, %v5042_v60 }
 0x900   : > { %6312 = vrot.lane.b32.xlu0 %v5070_v62, %s7757_s15  ;;  %v4998_v9 = vsel %vm2710_vm15, %v7670_v21, %v7679_v43  ;;  %v4999_v16 = vsel %vm2710_vm15, %v7679_v43, %v7680_v3 }
 0x901   : > { %v7703_v49 = vpop.permute.xlu1 %7702 }
 0x902   : > { %v7704_v29 = vunpack.i.l.bf16 %v7703_v49  ;;  %v7705_v59 = vunpack.i.h.bf16 %v7703_v49  ;;  %v6305_v57 = vpop.permute.xlu0 %6304 }
 0x903   : > { %6342 = vrot.lane.b32.xlu1 %v5085_v31, %s7757_s15  ;;  %v6368_v31 = vsel %vm436_vm2, %v12288_v7, %v12299_v5  ;;  %v6384_v7 = vsel %vm436_vm2, %v12308_v54, %v12340_v47 }
 0x904   : > { %v4917_v34 = vsel %vm2628_vm14, %v7655_v26, %v7704_v29  ;;  %v4919_v11 = vsel %vm2628_vm14, %v7705_v59, %v13379_v51  ;;  %v4918_v26 = vsel %vm2628_vm14, %v7704_v29, %v7705_v59 }
 0x905   : > { %v5077_v8 = vpack.c.bf16 %v4917_v34, %v4874_v18  ;;  %v7708_v35 = vpop.permute.xlu1 %7707  ;;  %v5078_v6 = vpack.c.bf16 %v4918_v26, %v4875_v14  ;;  %v5079_v10 = vpack.c.bf16 %v4919_v11, %v7675_v44 }
 0x906   : > { %v7710_v42 = vunpack.i.h.bf16 %v7708_v35  ;;  %v7709_v12 = vunpack.i.l.bf16 %v7708_v35  ;;  %v12421_v34 = vpop.permute.xlu0 %6340 }
 0x907   : > { %6360 = vrot.lane.b32.xlu1 %v5094_v22, %s7757_s15  ;;  %6326 = vrot.lane.b32.xlu0 %v5077_v8, %s7757_s15 }
 0x908   : > { %v4962_v61 = vsel %vm2673_vm0, %v7695_v39, %v7709_v12  ;;  %v4963_v52 = vsel %vm2673_vm0, %v7709_v12, %v7710_v42 }
 0x909   : > { %v12363_v55 = vpop.permute.xlu1 %6332  ;;  %v5087_v40 = vpack.c.bf16 %v4998_v9, %v4962_v61  ;;  %v5088_v58 = vpack.c.bf16 %v4999_v16, %v4963_v52 }
 0x90b   : > { %6292 = vrot.lane.b32.xlu1 %v13378_v24, %s7757_s15  ;;  %6344 = vrot.lane.b32.xlu0 %v5086_v17, %s7757_s15 }
 0x90d   : > { %v6297_v41 = vpop.permute.xlu1 %6296 }
 0x90f   : > { %6310 = vrot.lane.b32.xlu1 %v5069_v56, %s7757_s15  ;;  %6362 = vrot.lane.b32.xlu0 %v5095_v30, %s7757_s15 }
 0x911   : > { %v6299_v32 = vpop.permute.xlu1 %6298 }
 0x912   : > { %v6377_v49 = vsel %vm436_vm2, %v6299_v32, %v12367_v19  ;;  %v6376_v29 = vsel %vm436_vm2, %v6297_v41, %v6299_v32 }
 0x913   : > { %6328 = vrot.lane.b32.xlu1 %v5078_v6, %s7757_s15  ;;  %6330 = vrot.lane.b32.xlu0 %v5079_v10, %s7757_s15 }
 0x915   : > { %v6335_v2 = vpop.permute.xlu1 %6334 }
 0x916   : > { %v6392_v8 = vsel %vm436_vm2, %v12363_v55, %v6335_v2 }
 0x917   : > { %6346 = vrot.lane.b32.xlu1 %v5087_v40, %s7757_s15  ;;  %6348 = vrot.lane.b32.xlu0 %v5088_v58, %s7757_s15 }
 0x919   : > { %v6353_v23 = vpop.permute.xlu1 %6352 }
 0x91a   : > { %v6400_v35 = vsel %vm436_vm2, %v12322_v37, %v6353_v23  ;;  %v6401_v25 = vsel %vm436_vm2, %v6353_v23, %v12397_v38 }
 0x91b   : > { %6364 = vrot.lane.b32.xlu1 %v5096_v36, %s7757_s15  ;;  %6366 = vrot.lane.b32.xlu0 %v5097_v20, %s7757_s15  ;;  %v6444_v48 = vsel %vm3037_vm3, %v6400_v35, 0 }
 0x91d   : > { %v6283_v62 = vpop.permute.xlu1 %6282 }
 0x91e   : > { %v6369_v50 = vsel %vm436_vm2, %v12299_v5, %v6283_v62  ;;  %v6393_v5 = vsel %vm436_vm2, %v6335_v2, %v12385_v53  ;;  %v6370_v55 = vsel %vm436_vm2, %v6283_v62, %v12354_v15 }
 0x91f   : > { %6467 = vmatprep.subr.bf16.mxu0 %v6369_v50  ;;  %6634 = vperm.xlu1 %7215, %v6631_v63  }
 0x920   : > { %6468 = vmatpush1.bf16.msra.mxu0 %v6368_v31 }
 0x921   : > { %6469 = vmatprep.subr.bf16.mxu0 %v6377_v49  ;;  %v6319_v39 = vpop.permute.xlu1 %6318 }
 0x922   : > { %v6385_v21 = vsel %vm436_vm2, %v12340_v47, %v6319_v39  ;;  %v6359_v47 = vpop.permute.xlu0 %6358  ;;  %v6386_v56 = vsel %vm436_vm2, %v6319_v39, %v6321_v0 }
 0x924   : > { %6470 = vmatpush1.bf16.msra.mxu0 %v6376_v29 }
 0x925   : > { %6471 = vmatprep.subr.bf16.mxu0 %v6385_v21  ;;  %v6303_v18 = vpop.permute.xlu1 %6302 }
 0x926   : > { %v6379_v45 = vsel %vm436_vm2, %v6303_v18, %v6305_v57  ;;  %v6291_v28 = vpop.permute.xlu0 %6290  ;;  %v6378_v4 = vsel %vm436_vm2, %v12367_v19, %v6303_v18 }
 0x928   : > { %6472 = vmatpush1.bf16.msra.mxu0 %v6384_v7 }
 0x929   : > { %6473 = vmatprep.subr.bf16.mxu0 %v6393_v5  ;;  %v6339_v22 = vpop.permute.xlu1 %6338 }
 0x92a   : > { %v6395_v41 = vsel %vm436_vm2, %v6339_v22, %v12421_v34  ;;  %v6394_v51 = vsel %vm436_vm2, %v12385_v53, %v6339_v22  ;;  %v6295_v42 = vpop.permute.xlu0 %6294 }
 0x92c   : > { %6474 = vmatpush1.bf16.msra.mxu0 %v6392_v8 }
 0x92d   : > { %6799 = vmatprep.subr.msk.bf16.mxu0 %vm3037_vm3, %v6401_v25  ;;  %v6357_v54 = vpop.permute.xlu1 %6356 }
 0x92e   : > { %v6402_v19 = vsel %vm436_vm2, %v12397_v38, %v6357_v54  ;;  %v6403_v11 = vsel %vm436_vm2, %v6357_v54, %v6359_v47 }
 0x92f   : > { %v6450_v26 = vsel %vm3037_vm3, %v6402_v19, 0 }
 0x930   : > { %6476 = vmatpush1.bf16.msra.mxu0 %v6444_v48 }
 0x931   : > { %v6287_v17 = vpop.permute.xlu1 %6286 }
 0x932   : > { %v6371_v37 = vsel %vm436_vm2, %v12354_v15, %v6287_v17 }
 0x933   : > { %6800 = vmatmul.mubr.msk.bf16.vlgmr.msra.gmra.mrb[40].mxu0 %vm3033_vm4, %v12434_v1  ;;  %6508 = vmatprep.subr.bf16.mxu1 %v6371_v37 }
 0x934   : > { %6509 = vmatpush1.bf16.msra.mxu1 %v6370_v55  ;;  %6581 = vmatprep.mubr.bf16.mxu0 %v13373_v13 }
 0x935   : > { %6510 = vmatprep.subr.bf16.mxu1 %v6379_v45  ;;  %v6289_v59 = vpop.permute.xlu1 %6288 }
 0x936   : > { %v6372_v24 = vsel %vm436_vm2, %v6287_v17, %v6289_v59  ;;  %v6373_v44 = vsel %vm436_vm2, %v6289_v59, %v6291_v28 }
 0x937   : > { %6549 = vmatprep.subr.bf16.mxu0 %v6373_v44 }
 0x938   : > { %6511 = vmatpush1.bf16.msra.mxu1 %v6378_v4  ;;  %6550 = vmatpush1.bf16.msra.mxu0 %v6372_v24 }
 0x939   : > { %v6323_v15 = vpop.permute.xlu1 %6322 }
 0x93a   : > { %v6387_v30 = vsel %vm436_vm2, %v6321_v0, %v6323_v15 }
 0x93b   : > { %6512 = vmatprep.subr.bf16.mxu1 %v6387_v30 }
 0x93c   : > { %6513 = vmatpush1.bf16.msra.mxu1 %v6386_v56 }
 0x93d   : > { %6514 = vmatprep.subr.bf16.mxu1 %v6395_v41 }
 0x940   : > { %6515 = vmatpush1.bf16.msra.mxu1 %v6394_v51 }
 0x941   : > { %6801 = vmatprep.subr.msk.bf16.mxu1 %vm3037_vm3, %v6403_v11 }
 0x944   : > { %6517 = vmatpush1.bf16.msra.mxu1 %v6450_v26 }
 0x947   : > { %6802 = vmatmul.mubr.msk.bf16.vlgmr.msra.gmra.mrb[40].mxu1 %vm3033_vm4, %v12434_v1 }
 0x948   : > { %6622 = vmatprep.mubr.bf16.mxu1 %v13373_v13 }
 0x96d   : > { %v6309_v12 = vpop.permute.xlu0 %6308  ;;  %v6307_v14 = vpop.permute.xlu1 %6306 }
 0x96e   : > { %v6380_v3 = vsel %vm436_vm2, %v6305_v57, %v6307_v14  ;;  %v6381_v43 = vsel %vm436_vm2, %v6307_v14, %v6309_v12 }
 0x96f   : > { %6551 = vmatprep.subr.bf16.mxu0 %v6381_v43 }
 0x970   : > { %6552 = vmatpush1.bf16.msra.mxu0 %v6380_v3 }
 0x971   : > { %v6325_v53 = vpop.permute.xlu1 %6324 }
 0x972   : > { %v6313_v6 = vpop.permute.xlu0 %6312  ;;  %v6388_v61 = vsel %vm436_vm2, %v6323_v15, %v6325_v53 }
 0x975   : > { %v6343_v10 = vpop.permute.xlu1 %6342 }
 0x976   : > { %v6396_v58 = vsel %vm436_vm2, %v12421_v34, %v6343_v10 }
 0x979   : > { %v6361_v32 = vpop.permute.xlu1 %6360  ;;  %v6327_v46 = vpop.permute.xlu0 %6326 }
 0x97a   : > { %v6389_v27 = vsel %vm436_vm2, %v6325_v53, %v6327_v46  ;;  %v6404_v2 = vsel %vm436_vm2, %v6359_v47, %v6361_v32 }
 0x97b   : > { %6553 = vmatprep.subr.bf16.mxu0 %v6389_v27  ;;  %v6456_v23 = vsel %vm3037_vm3, %v6404_v2, 0 }
 0x97c   : > { %6554 = vmatpush1.bf16.msra.mxu0 %v6388_v61 }
 0x97d   : > { %v6293_v13 = vpop.permute.xlu1 %6292  ;;  %v6345_v52 = vpop.permute.xlu0 %6344 }
 0x97e   : > { %v6374_v9 = vsel %vm436_vm2, %v6291_v28, %v6293_v13  ;;  %v6397_v16 = vsel %vm436_vm2, %v6343_v10, %v6345_v52  ;;  %v6375_v40 = vsel %vm436_vm2, %v6293_v13, %v6295_v42 }
 0x97f   : > { %6555 = vmatprep.subr.bf16.mxu0 %v6397_v16  ;;  %6590 = vmatprep.subr.bf16.mxu1 %v6375_v40 }
 0x980   : > { %6556 = vmatpush1.bf16.msra.mxu0 %v6396_v58  ;;  %6591 = vmatpush1.bf16.msra.mxu1 %v6374_v9 }
 0x981   : > { %v6311_v33 = vpop.permute.xlu1 %6310  ;;  %v6363_v60 = vpop.permute.xlu0 %6362 }
 0x982   : > { %v6382_v38 = vsel %vm436_vm2, %v6309_v12, %v6311_v33  ;;  %v6405_v20 = vsel %vm436_vm2, %v6361_v32, %v6363_v60  ;;  %v6383_v36 = vsel %vm436_vm2, %v6311_v33, %v6313_v6 }
 0x983   : > { %6803 = vmatprep.subr.msk.bf16.mxu0 %vm3037_vm3, %v6405_v20  ;;  %6592 = vmatprep.subr.bf16.mxu1 %v6383_v36 }
 0x984   : > { %6558 = vmatpush1.bf16.msra.mxu0 %v6456_v23  ;;  %6593 = vmatpush1.bf16.msra.mxu1 %v6382_v38 }
 0x985   : > { %v6329_v63 = vpop.permute.xlu1 %6328  ;;  %v6331_v0 = vpop.permute.xlu0 %6330 }
 0x986   : > { %v6390_v62 = vsel %vm436_vm2, %v6327_v46, %v6329_v63  ;;  %v6391_v50 = vsel %vm436_vm2, %v6329_v63, %v6331_v0 }
 0x987   : > { %6804 = vmatmul.mubr.msk.bf16.vlgmr.msra.gmra.mrb[44].mxu0 %vm3033_vm4, %v12434_v1  ;;  %6594 = vmatprep.subr.bf16.mxu1 %v6391_v50 }
 0x988   : > { %6595 = vmatpush1.bf16.msra.mxu1 %v6390_v62 }
 0x989   : > { %v6347_v31 = vpop.permute.xlu1 %6346  ;;  %v6349_v49 = vpop.permute.xlu0 %6348 }
 0x98a   : > { %v6398_v39 = vsel %vm436_vm2, %v6345_v52, %v6347_v31  ;;  %v6399_v57 = vsel %vm436_vm2, %v6347_v31, %v6349_v49 }
 0x98b   : > { %6596 = vmatprep.subr.bf16.mxu1 %v6399_v57 }
 0x98c   : > { %6597 = vmatpush1.bf16.msra.mxu1 %v6398_v39 }
 0x98d   : > { %v6365_v29 = vpop.permute.xlu1 %6364  ;;  %v6367_v21 = vpop.permute.xlu0 %6366 }
 0x98e   : > { %v6406_v18 = vsel %vm436_vm2, %v6363_v60, %v6365_v29  ;;  %v6407_v7 = vsel %vm436_vm2, %v6365_v29, %v6367_v21 }
 0x98f   : > { %v6462_v5 = vsel %vm3037_vm3, %v6406_v18, 0  ;;  %6805 = vmatprep.subr.msk.bf16.mxu1 %vm3037_vm3, %v6407_v7 }
 0x990   : > { %6599 = vmatpush1.bf16.msra.mxu1 %v6462_v5 }
 0x993   : > { %6806 = vmatmul.mubr.msk.bf16.vlgmr.msra.gmra.mrb[44].mxu1 %vm3033_vm4, %v12434_v1 }
 0x997   : > { %v6103_v34 = vpop.f32.mrb[32].mxu0 }
 0x998   : > { %v6105_v22 = vpop.f32.mrb[33].mxu0 }
 0x999   : > { %v6107_v8 = vpop.f32.mrb[34].mxu0 }
 0x99a   : > { %v6108_v35 = vpop.f32.mrb[35].mxu0 }
 0x99b   : > { %v6144_v25 = vpop.f32.mrb[32].mxu1 }
 0x99c   : > { %v6146_v54 = vpop.f32.mrb[33].mxu1 }
 0x99d   : > { %v6148_v47 = vpop.f32.mrb[34].mxu1 }
 0x99e   : > { %v6149_v48 = vpop.f32.mrb[35].mxu1  ;;  %v6635_v30 = vpop.permute.xlu1 %6634 }
 0x9be   : > { %v6185_v17 = vpop.f32.mrb[36].mxu0 }
 0x9bf   : > { %v6187_v37 = vpop.f32.mrb[37].mxu0 }
 0x9c0   : > { %v6189_v55 = vpop.f32.mrb[38].mxu0 }
 0x9c1   : > { %v6190_v45 = vpop.f32.mrb[39].mxu0 }
 0x9c2   : > { %v6226_v28 = vpop.f32.mrb[36].mxu1 }
 0x9c3   : > { %v6228_v59 = vpop.f32.mrb[37].mxu1 }
 0x9c4   : > { %v6230_v24 = vpop.f32.mrb[38].mxu1 }
 0x9c5   : > { %v6231_v44 = vpop.f32.mrb[39].mxu1 }
 0xa06   : > { %v6501_v4 = vpop.f32.mrb[40].mxu0 }
 0xa07   : > { %v6502_v15 = vadd.f32 %v6501_v4, %v6103_v34  ;;  %v6503_v1 = vpop.f32.mrb[41].mxu0 }
 0xa08   : > { %v6504_v56 = vadd.f32 %v6503_v1, %v6105_v22  ;;  %v6505_v41 = vpop.f32.mrb[42].mxu0 }
 0xa09   : > { %v6637_v51 = vadd.f32 %v6635_v30, %v6502_v15  ;;  %v6506_v19 = vpop.f32.mrb[43].mxu0 }
 0xa0a   : > { %v6638_v11 = vadd.f32 %v6635_v30, %v6504_v56 }
 0xa0b   : > { %vm6645_vm2 = vcmp.gt.f32.partialorder %v6637_v51, 0.0  ;;  %v6653_v26 = vmul.f32 0.01, %v6637_v51 }
 0xa0c   : > { %vm6646_vm7 = vcmp.gt.f32.partialorder %v6638_v11, 0.0  ;;  %v6654_v42 = vmul.f32 0.01, %v6638_v11 }
 0xa0d   : > { %v6661_v12 = vsel %vm6645_vm2, %v6637_v51, %v6653_v26 }
 0xa0e   : > { %6669 = vst [vmem:[%s12493_s19] sm:$0xff] %v6661_v12  ;;  %v6662_v14 = vsel %vm6646_vm7, %v6638_v11, %v6654_v42 }
 0xa0f   : > { %6670 = vst [vmem:[%s12493_s19 + $0x8] sm:$0xff] %v6662_v14 }
 0xa1a   : > { %v6542_v3 = vpop.f32.mrb[40].mxu1 }
 0xa1b   : > { %v6543_v43 = vadd.f32 %v6542_v3, %v6144_v25  ;;  %v6544_v53 = vpop.f32.mrb[41].mxu1 }
 0xa1c   : > { %v6545_v6 = vadd.f32 %v6544_v53, %v6146_v54  ;;  %v6546_v10 = vpop.f32.mrb[42].mxu1 }
 0xa1d   : > { %v6639_v32 = vadd.f32 %v6635_v30, %v6543_v43  ;;  %v6547_v46 = vpop.f32.mrb[43].mxu1 }
 0xa1e   : > { %v6640_v27 = vadd.f32 %v6635_v30, %v6545_v6 }
 0xa1f   : > { %vm6647_vm8 = vcmp.gt.f32.partialorder %v6639_v32, 0.0  ;;  %v6655_v61 = vmul.f32 0.01, %v6639_v32 }
 0xa20   : > { %vm6648_vm10 = vcmp.gt.f32.partialorder %v6640_v27, 0.0  ;;  %v6656_v13 = vmul.f32 0.01, %v6640_v27 }
 0xa21   : > { %v6663_v52 = vsel %vm6647_vm8, %v6639_v32, %v6655_v61 }
 0xa22   : > { %6671 = vst [vmem:[%s12493_s19 + $0x10] sm:$0xff] %v6663_v52  ;;  %v6664_v9 = vsel %vm6648_vm10, %v6640_v27, %v6656_v13 }
 0xa23   : > { %6672 = vst [vmem:[%s12493_s19 + $0x18] sm:$0xff] %v6664_v9 }
 0xa5a   : > { %v6583_v16 = vpop.f32.mrb[44].mxu0 }
 0xa5b   : > { %v6584_v40 = vadd.f32 %v6583_v16, %v6185_v17  ;;  %v6585_v58 = vpop.f32.mrb[45].mxu0 }
 0xa5c   : > { %v6586_v2 = vadd.f32 %v6585_v58, %v6187_v37  ;;  %v6587_v33 = vpop.f32.mrb[46].mxu0 }
 0xa5d   : > { %v6641_v60 = vadd.f32 %v6635_v30, %v6584_v40  ;;  %v6588_v38 = vpop.f32.mrb[47].mxu0 }
 0xa5e   : > { %v6642_v20 = vadd.f32 %v6635_v30, %v6586_v2 }
 0xa5f   : > { %vm6649_vm11 = vcmp.gt.f32.partialorder %v6641_v60, 0.0  ;;  %v6657_v36 = vmul.f32 0.01, %v6641_v60 }
 0xa60   : > { %vm6650_vm12 = vcmp.gt.f32.partialorder %v6642_v20, 0.0  ;;  %v6658_v23 = vmul.f32 0.01, %v6642_v20 }
 0xa61   : > { %v6665_v63 = vsel %vm6649_vm11, %v6641_v60, %v6657_v36 }
 0xa62   : > { %6673 = vst [vmem:[%s12493_s19 + $0x20] sm:$0xff] %v6665_v63  ;;  %v6666_v0 = vsel %vm6650_vm12, %v6642_v20, %v6658_v23 }
 0xa63   : > { %6674 = vst [vmem:[%s12493_s19 + $0x28] sm:$0xff] %v6666_v0 }
 0xa66   : > { %v6624_v62 = vpop.f32.mrb[44].mxu1 }
 0xa67   : > { %v6625_v50 = vadd.f32 %v6624_v62, %v6226_v28  ;;  %v6626_v31 = vpop.f32.mrb[45].mxu1 }
 0xa68   : > { %v6627_v49 = vadd.f32 %v6626_v31, %v6228_v59  ;;  %v6628_v39 = vpop.f32.mrb[46].mxu1 }
 0xa69   : > { %v6643_v57 = vadd.f32 %v6635_v30, %v6625_v50  ;;  %v6629_v29 = vpop.f32.mrb[47].mxu1 }
 0xa6a   : > { %v6644_v21 = vadd.f32 %v6635_v30, %v6627_v49 }
 0xa6b   : > { %vm6651_vm13 = vcmp.gt.f32.partialorder %v6643_v57, 0.0  ;;  %v6659_v18 = vmul.f32 0.01, %v6643_v57 }
 0xa6c   : > { %vm6652_vm14 = vcmp.gt.f32.partialorder %v6644_v21, 0.0  ;;  %v6660_v7 = vmul.f32 0.01, %v6644_v21 }
 0xa6d   : > { %v6667_v5 = vsel %vm6651_vm13, %v6643_v57, %v6659_v18 }
 0xa6e   : > { %6675 = vst [vmem:[%s12493_s19 + $0x30] sm:$0xff] %v6667_v5  ;;  %v6668_v34 = vsel %vm6652_vm14, %v6644_v21, %v6660_v7 }
 0xa6f   : > { %6676 = vst [vmem:[%s12493_s19 + $0x38] sm:$0xff] %v6668_v34 }
 0xa70 PF: > { %s22_s21 = sadd.s32 1, %s7740_s21  }
 0xa71   : > { %p19_p4 = scmp.ge.s32.totalorder %s22_s21, 4  }
 0xa73   :  { %21 = sbr.rel (!%p19_p4) target bundleno = 1 (0x1), region = 103 }

</bundles_post_ra>
